<compile_context>
chip_gen: v7x
topology: tpu7x:2x2x1
jax: 0.10.0
libtpu: 0.0.40
codegen_flags: <defaults>
</compile_context>

<pallas_src>
import numpy as np

import jax
import jax.numpy as jnp
from jax.experimental import pallas as pl
from jax.experimental.pallas import tpu as pltpu

# ---------------- model hyper-parameters (consistent with the module) --------
N      = 256        # demo batch (>= 2*TILE_N so the parallel grid has 2 steps)
X_DIM  = 16         # observed dimension
U_DIM  = 3          # number of discrete labels
Z_DIM  = 4          # latent dimension
ENC_H  = 128        # encoder hidden dim (default)
SLICE  = X_DIM // 2                 # affine coupling slice dim (default None -> x_dim//2)
ACL_H  = X_DIM // 4                 # affine hidden dim (default None -> x_dim//4)
NF_H   = X_DIM // 4                 # nflow hidden dim  (default None -> x_dim//4)
NF_OUT = X_DIM - Z_DIM              # nflow MLP output dim
ACL_OUT = X_DIM - SLICE             # transformed half dim
N_COUPLING = 2 * 2                  # n_gin_blocks * gin_block_depth
FR_MIN = 1e-7
FR_MAX = 1e7

TILE_N   = 128                      # batch rows per grid step (sweep 128/256/512)
IN_LANES = 128                      # lane-dense packed-input width
OUT_LANES = 128                     # lane-dense packed-output width

assert Z_DIM <= SLICE, "fold-in of NFlow output assumes z_dim <= slice_dim"
assert SLICE == X_DIM - SLICE, "binding-swap mixing assumes slice_dim == x_dim/2"

F32 = jnp.float32
BF16 = jnp.bfloat16

# packed input layout (lane offsets)
_IN_OFF_X = 0
_IN_OFF_U = _IN_OFF_X + X_DIM
_IN_OFF_EE = _IN_OFF_U + U_DIM
_IN_OFF_EP = _IN_OFF_EE + Z_DIM
_IN_WIDTH = _IN_OFF_EP + Z_DIM                     # 27
assert _IN_WIDTH <= IN_LANES

# packed output layout (lane offsets, in this order)
_OUT_FIELDS = (
    ("encoder_firing_rate", X_DIM),
    ("posterior_firing_rate", X_DIM),
    ("encoder_z_sample", Z_DIM),
    ("encoder_mean", Z_DIM),
    ("encoder_log_variance", Z_DIM),
    ("label_mean", Z_DIM),
    ("label_log_variance", Z_DIM),
    ("posterior_z_sample", Z_DIM),
    ("posterior_mean", Z_DIM),
    ("posterior_log_variance", Z_DIM),
)
_OUT_WIDTH = sum(w for _, w in _OUT_FIELDS)        # 64
_OUT_PAD = OUT_LANES - _OUT_WIDTH                  # 64 zero lanes of padding


# --------------------------------- kernel ------------------------------------
def pivae_kernel(
    # inputs
    slab_ref,
    enc_w0_ref, enc_b0_ref, enc_w1_ref, enc_b1_ref, enc_w2_ref, enc_b2_ref,
    lp_tbl_ref,
    nf_w0_ref, nf_b0_ref, nf_w1_ref, nf_b1_ref, nf_w2_ref, nf_b2_ref,
    acl_w0_ref, acl_b0_ref, acl_w1_ref, acl_b1_ref, acl_w2_ref, acl_b2_ref,
    # single packed lane-dense output
    out_ref,
):
    slab = slab_ref[...]                                       # [TILE_N, 128]
    x = slab[:, _IN_OFF_X:_IN_OFF_X + X_DIM]
    u = slab[:, _IN_OFF_U:_IN_OFF_U + U_DIM]
    eps_e = slab[:, _IN_OFF_EE:_IN_OFF_EE + Z_DIM]
    eps_p = slab[:, _IN_OFF_EP:_IN_OFF_EP + Z_DIM]

    def mm16(a, b):  # bf16 operands, f32 accumulation (wide encoder matmuls)
        return jnp.dot(a.astype(BF16), b.astype(BF16),
                       preferred_element_type=F32)

    def mm32(a, b):  # f32 matmuls (stats head / decoder / label prior)
        return jnp.dot(a, b, preferred_element_type=F32)

    def relu(v):
        return jnp.maximum(v, 0.0)

    def softplus(v):  # numerically stable
        return jnp.maximum(v, 0.0) + jnp.log(1.0 + jnp.exp(-jnp.abs(v)))

    # ---------------- encoder MLP (Tanh hidden layers) -----------------------
    # hidden layers: bf16 operands on the MXU (the only 128-wide matmuls);
    # stats head kept in f32 because it feeds exp(0.5*log_var).
    h = jnp.tanh(mm16(x, enc_w0_ref[...]) + enc_b0_ref[...])
    h = jnp.tanh(mm16(h, enc_w1_ref[...]) + enc_b1_ref[...])
    stats = mm32(h, enc_w2_ref[...]) + enc_b2_ref[...]          # [N, 2*Z]
    enc_mu = stats[:, :Z_DIM]
    enc_lv = stats[:, Z_DIM:]

    # ---------------- discrete label prior (one table, one matmul) -----------
    lab_stats = mm32(u, lp_tbl_ref[...])                        # [N, 2*Z]
    lab_mu = lab_stats[:, :Z_DIM]
    lab_lv = lab_stats[:, Z_DIM:]

    # ---------------- posterior: product of Gaussians (f32) ------------------
    dv = enc_lv - lab_lv
    w_enc = 1.0 / (1.0 + jnp.exp(dv))                           # sigmoid(-dv)
    post_mu = enc_mu * w_enc + lab_mu * (1.0 - w_enc)
    # enc_lv + lab_lv - logaddexp(enc_lv, lab_lv), overflow-safe form
    mx = jnp.maximum(enc_lv, lab_lv)
    post_lv = enc_lv + lab_lv - (mx + jnp.log(1.0 + jnp.exp(-jnp.abs(dv))))

    # ---------------- reparameterized samples ---------------------------------
    enc_z = enc_mu + jnp.exp(0.5 * enc_lv) * eps_e
    post_z = post_mu + jnp.exp(0.5 * post_lv) * eps_p

    # ---------------- GIN flow decoder (single fused pass on 2N rows) --------
    def decode(z):
        # NFlow first layer: conceptually x = concat([z, MLP(z)]); fold straight
        # into the (x1, x2) coupling halves instead of concat + reslice.
        t = relu(mm32(z, nf_w0_ref[...]) + nf_b0_ref[...])
        t = relu(mm32(t, nf_w1_ref[...]) + nf_b1_ref[...])
        t = mm32(t, nf_w2_ref[...]) + nf_b2_ref[...]            # [2N, X-Z]
        x1 = jnp.concatenate([z, t[:, :SLICE - Z_DIM]], axis=-1)   # [2N, SLICE]
        x2 = t[:, SLICE - Z_DIM:]                                  # [2N, X-SLICE]

        # GIN affine coupling layers (volume-preserving: sum of log-scales = 0)
        for li in range(N_COUPLING):
            m = relu(mm32(x1, acl_w0_ref[li]) + acl_b0_ref[li])
            m = relu(mm32(m, acl_w1_ref[li]) + acl_b1_ref[li])
            st = mm32(m, acl_w2_ref[li]) + acl_b2_ref[li]       # [2N, 2*ACL_OUT-1]
            s = 0.1 * jnp.tanh(st[:, :ACL_OUT - 1])
            t_off = st[:, ACL_OUT - 1:]
            s_full = jnp.concatenate(
                [s, -jnp.sum(s, axis=-1, keepdims=True)], axis=-1)
            x2n = x2 * jnp.exp(s_full) + t_off
            # half-swap mixing: next layer sees concat([x2n, x1]); with
            # SLICE == X_DIM - SLICE this is just a binding swap (0 instructions).
            x1, x2 = x2n, x1
        return softplus(jnp.concatenate([x1, x2], axis=-1))     # poisson rates

    z_both = jnp.concatenate([enc_z, post_z], axis=0)           # [2N, Z]
    fr_both = jnp.clip(decode(z_both), FR_MIN, FR_MAX)          # [2N, X]
    enc_fr = fr_both[:TILE_N]
    post_fr = fr_both[TILE_N:]

    # ---------------- single lane-dense packed output ------------------------
    pad = jnp.zeros((TILE_N, _OUT_PAD), F32)
    out_ref[...] = jnp.concatenate(
        [enc_fr, post_fr, enc_z, enc_mu, enc_lv, lab_mu, lab_lv,
         post_z, post_mu, post_lv, pad], axis=-1)


# --------------------------------- wrapper -----------------------------------
def _weight_spec(shape):
    nd = len(shape)
    return pl.BlockSpec(shape, lambda i, _nd=nd: (0,) * _nd)


@jax.jit
def pivae_forward(x, u_onehot, eps_enc, eps_post, params):
    p = params
    n = x.shape[0]

    # pack the 4 narrow inputs into one lane-dense [N, 128] slab (single dense
    # DMA + unmasked load per grid step), pad the batch to a multiple of TILE_N
    # so no tail rows are silently dropped.
    slab = jnp.concatenate([x, u_onehot, eps_enc, eps_post], axis=-1).astype(F32)
    slab = jnp.pad(slab, ((0, 0), (0, IN_LANES - slab.shape[-1])))
    n_tail = (-n) % TILE_N
    if n_tail:
        slab = jnp.pad(slab, ((0, n_tail), (0, 0)))
    n_rows = slab.shape[0]

    inputs = (
        slab,
        p["enc_w0"], p["enc_b0"], p["enc_w1"], p["enc_b1"], p["enc_w2"], p["enc_b2"],
        p["lp_tbl"],
        p["nf_w0"], p["nf_b0"], p["nf_w1"], p["nf_b1"], p["nf_w2"], p["nf_b2"],
        p["acl_w0"], p["acl_b0"], p["acl_w1"], p["acl_b1"], p["acl_w2"], p["acl_b2"],
    )
    in_specs = [pl.BlockSpec((TILE_N, IN_LANES), lambda i: (i, 0))]
    in_specs += [_weight_spec(a.shape) for a in inputs[1:]]

    packed = pl.pallas_call(
        pivae_kernel,
        out_shape=jax.ShapeDtypeStruct((n_rows, OUT_LANES), F32),
        grid=(n_rows // TILE_N,),
        in_specs=in_specs,
        out_specs=pl.BlockSpec((TILE_N, OUT_LANES), lambda i: (i, 0)),
        compiler_params=pltpu.CompilerParams(
            dimension_semantics=("parallel",)),   # shards batch across TCs (v7x)
    )(*inputs)

    packed = packed[:n]
    out = {}
    off = 0
    for name, w in _OUT_FIELDS:
        out[name] = packed[:, off:off + w]
        off += w
    return out


# ----------------------------- parameter init --------------------------------
def _linear(key, fan_in, fan_out, w_dtype=F32):
    # mirrors torch.nn.Linear default init (uniform +/- 1/sqrt(fan_in))
    bound = 1.0 / np.sqrt(fan_in)
    kw, kb = jax.random.split(key)
    w = jax.random.uniform(kw, (fan_in, fan_out), F32, -bound, bound).astype(w_dtype)
    b = jax.random.uniform(kb, (1, fan_out), F32, -bound, bound)
    return w, b


def init_params(key):
    keys = jax.random.split(key, 32)
    ki = iter(keys)
    p = {}
    # encoder MLP: x_dim -> 128 -> 128 -> 2*z_dim
    # hidden weights bf16 (MXU throughput), stats head f32 (log-var precision).
    p["enc_w0"], p["enc_b0"] = _linear(next(ki), X_DIM, ENC_H, BF16)
    p["enc_w1"], p["enc_b1"] = _linear(next(ki), ENC_H, ENC_H, BF16)
    p["enc_w2"], p["enc_b2"] = _linear(next(ki), ENC_H, 2 * Z_DIM, F32)
    # discrete label prior: merged embedding table (mean | log_var), torch ~ N(0,1)
    p["lp_tbl"] = jax.random.normal(next(ki), (U_DIM, 2 * Z_DIM), F32)
    # NFlow first layer MLP: z_dim -> NF_H -> NF_H -> (x_dim - z_dim)
    p["nf_w0"], p["nf_b0"] = _linear(next(ki), Z_DIM, NF_H)
    p["nf_w1"], p["nf_b1"] = _linear(next(ki), NF_H, NF_H)
    p["nf_w2"], p["nf_b2"] = _linear(next(ki), NF_H, NF_OUT)
    # affine coupling layers (stacked along a leading layer axis; biases kept
    # as [L, 1, out] so ref[li] yields a broadcastable 2-D row)
    w0s, b0s, w1s, b1s, w2s, b2s = [], [], [], [], [], []
    for _ in range(N_COUPLING):
        w, b = _linear(next(ki), SLICE, ACL_H); w0s.append(w); b0s.append(b)
        w, b = _linear(next(ki), ACL_H, ACL_H); w1s.append(w); b1s.append(b)
        w, b = _linear(next(ki), ACL_H, 2 * ACL_OUT - 1); w2s.append(w); b2s.append(b)
    p["acl_w0"] = jnp.stack(w0s); p["acl_b0"] = jnp.stack(b0s)
    p["acl_w1"] = jnp.stack(w1s); p["acl_b1"] = jnp.stack(b1s)
    p["acl_w2"] = jnp.stack(w2s); p["acl_b2"] = jnp.stack(b2s)
    return p


# ------------------------------------ main ------------------------------------
if __name__ == "__main__":
    root = jax.random.PRNGKey(0)
    k_x, k_u, k_p, k_e1, k_e2 = jax.random.split(root, 5)

    x = jax.random.normal(k_x, (N, X_DIM), F32)
    u_int = jax.random.randint(k_u, (N,), 0, U_DIM)             # discrete labels
    u_onehot = jax.nn.one_hot(u_int, U_DIM, dtype=F32)          # embedding lookup as matmul
    eps_enc = jax.random.normal(k_e1, (N, Z_DIM), F32)          # torch.randn_like
    eps_post = jax.random.normal(k_e2, (N, Z_DIM), F32)

    params = init_params(k_p)

    out = pivae_forward(x, u_onehot, eps_enc, eps_post, params)
    jax.block_until_ready(out)

    # sanity checks on shapes / finiteness / clamp range
    assert out["encoder_firing_rate"].shape == (N, X_DIM)
    assert out["posterior_firing_rate"].shape == (N, X_DIM)
    assert out["posterior_mean"].shape == (N, Z_DIM)
    assert out["encoder_z_sample"].shape == (N, Z_DIM)
    assert bool(jnp.all(jnp.isfinite(out["posterior_firing_rate"])))
    assert bool(jnp.all(out["encoder_firing_rate"] >= FR_MIN))
    assert bool(jnp.all(out["posterior_firing_rate"] <= FR_MAX))

    # batch-tail path: a batch much smaller than TILE_N is padded internally
    # and must reproduce the same rows as the large-batch run.
    out_small = pivae_forward(x[:8], u_onehot[:8], eps_enc[:8], eps_post[:8], params)
    jax.block_until_ready(out_small)
    assert out_small["posterior_mean"].shape == (8, Z_DIM)
    np.testing.assert_allclose(
        np.asarray(out_small["encoder_mean"]),
        np.asarray(out["encoder_mean"][:8]), rtol=1e-2, atol=1e-2)
    np.testing.assert_allclose(
        np.asarray(out_small["posterior_firing_rate"]),
        np.asarray(out["posterior_firing_rate"][:8]), rtol=1e-2, atol=1e-2)

    print("KERNEL_OK")
</pallas_src>

<mosaic_0001>
module attributes {stable_mosaic.version = 11 : i64} {
  func.func @pivae_kernel(%arg0: i32, %arg1: memref<128x128xf32, #tpu.memory_space<vmem>>, %arg2: memref<16x128xbf16, #tpu.memory_space<vmem>>, %arg3: memref<1x128xf32, #tpu.memory_space<vmem>>, %arg4: memref<128x128xbf16, #tpu.memory_space<vmem>>, %arg5: memref<1x128xf32, #tpu.memory_space<vmem>>, %arg6: memref<128x8xf32, #tpu.memory_space<vmem>>, %arg7: memref<1x8xf32, #tpu.memory_space<vmem>>, %arg8: memref<3x8xf32, #tpu.memory_space<vmem>>, %arg9: memref<4x4xf32, #tpu.memory_space<vmem>>, %arg10: memref<1x4xf32, #tpu.memory_space<vmem>>, %arg11: memref<4x4xf32, #tpu.memory_space<vmem>>, %arg12: memref<1x4xf32, #tpu.memory_space<vmem>>, %arg13: memref<4x12xf32, #tpu.memory_space<vmem>>, %arg14: memref<1x12xf32, #tpu.memory_space<vmem>>, %arg15: memref<4x8x4xf32, #tpu.memory_space<vmem>>, %arg16: memref<4x1x4xf32, #tpu.memory_space<vmem>>, %arg17: memref<4x4x4xf32, #tpu.memory_space<vmem>>, %arg18: memref<4x1x4xf32, #tpu.memory_space<vmem>>, %arg19: memref<4x4x15xf32, #tpu.memory_space<vmem>>, %arg20: memref<4x1x15xf32, #tpu.memory_space<vmem>>, %arg21: memref<128x128xf32, #tpu.memory_space<vmem>>) attributes {dimension_semantics = [#tpu.dimension_semantics<parallel>], iteration_bounds = array<i64: 2>, scalar_prefetch = 0 : i64, scratch_operands = 0 : i64, tpu.core_type = #tpu.core_type<tc>, window_params = [{transform_indices = @transform_0, window_bounds = array<i64: 128, 128>}, {pipeline_mode = #tpu.pipeline_mode<synchronous>, transform_indices = @transform_1, window_bounds = array<i64: 16, 128>}, {pipeline_mode = #tpu.pipeline_mode<synchronous>, transform_indices = @transform_2, window_bounds = array<i64: 1, 128>}, {pipeline_mode = #tpu.pipeline_mode<synchronous>, transform_indices = @transform_3, window_bounds = array<i64: 128, 128>}, {pipeline_mode = #tpu.pipeline_mode<synchronous>, transform_indices = @transform_4, window_bounds = array<i64: 1, 128>}, {pipeline_mode = #tpu.pipeline_mode<synchronous>, transform_indices = @transform_5, window_bounds = array<i64: 128, 8>}, {pipeline_mode = #tpu.pipeline_mode<synchronous>, transform_indices = @transform_6, window_bounds = array<i64: 1, 8>}, {pipeline_mode = #tpu.pipeline_mode<synchronous>, transform_indices = @transform_7, window_bounds = array<i64: 3, 8>}, {pipeline_mode = #tpu.pipeline_mode<synchronous>, transform_indices = @transform_8, window_bounds = array<i64: 4, 4>}, {pipeline_mode = #tpu.pipeline_mode<synchronous>, transform_indices = @transform_9, window_bounds = array<i64: 1, 4>}, {pipeline_mode = #tpu.pipeline_mode<synchronous>, transform_indices = @transform_10, window_bounds = array<i64: 4, 4>}, {pipeline_mode = #tpu.pipeline_mode<synchronous>, transform_indices = @transform_11, window_bounds = array<i64: 1, 4>}, {pipeline_mode = #tpu.pipeline_mode<synchronous>, transform_indices = @transform_12, window_bounds = array<i64: 4, 12>}, {pipeline_mode = #tpu.pipeline_mode<synchronous>, transform_indices = @transform_13, window_bounds = array<i64: 1, 12>}, {pipeline_mode = #tpu.pipeline_mode<synchronous>, transform_indices = @transform_14, window_bounds = array<i64: 4, 8, 4>}, {pipeline_mode = #tpu.pipeline_mode<synchronous>, transform_indices = @transform_15, window_bounds = array<i64: 4, 1, 4>}, {pipeline_mode = #tpu.pipeline_mode<synchronous>, transform_indices = @transform_16, window_bounds = array<i64: 4, 4, 4>}, {pipeline_mode = #tpu.pipeline_mode<synchronous>, transform_indices = @transform_17, window_bounds = array<i64: 4, 1, 4>}, {pipeline_mode = #tpu.pipeline_mode<synchronous>, transform_indices = @transform_18, window_bounds = array<i64: 4, 4, 15>}, {pipeline_mode = #tpu.pipeline_mode<synchronous>, transform_indices = @transform_19, window_bounds = array<i64: 4, 1, 15>}, {transform_indices = @transform_20, window_bounds = array<i64: 128, 128>}]} {
    %c0 = arith.constant 0 : index
    %c0_0 = arith.constant 0 : index
    %0 = vector.load %arg1[%c0, %c0_0] : memref<128x128xf32, #tpu.memory_space<vmem>>, vector<128x128xf32>
    %1 = vector.extract_strided_slice %0 {offsets = [0, 0], sizes = [128, 16], strides = [1, 1]} : vector<128x128xf32> to vector<128x16xf32>
    %2 = vector.extract_strided_slice %0 {offsets = [0, 16], sizes = [128, 3], strides = [1, 1]} : vector<128x128xf32> to vector<128x3xf32>
    %3 = vector.extract_strided_slice %0 {offsets = [0, 19], sizes = [128, 4], strides = [1, 1]} : vector<128x128xf32> to vector<128x4xf32>
    %4 = vector.extract_strided_slice %0 {offsets = [0, 23], sizes = [128, 4], strides = [1, 1]} : vector<128x128xf32> to vector<128x4xf32>
    %c0_1 = arith.constant 0 : index
    %c0_2 = arith.constant 0 : index
    %5 = vector.load %arg2[%c0_1, %c0_2] : memref<16x128xbf16, #tpu.memory_space<vmem>>, vector<16x128xbf16>
    %6 = arith.truncf %1 : vector<128x16xf32> to vector<128x16xbf16>
    %cst = arith.constant dense<0.000000e+00> : vector<128x128xf32>
    %7 = tpu.matmul %6, %5, %cst {dimension_numbers = #tpu.dot_dimension_numbers<[1], [0], [0], [1], [0, 0, 1, 1], [], []>} : vector<128x16xbf16>, vector<16x128xbf16>, vector<128x128xf32> -> vector<128x128xf32>
    %c0_3 = arith.constant 0 : index
    %c0_4 = arith.constant 0 : index
    %8 = vector.load %arg3[%c0_3, %c0_4] : memref<1x128xf32, #tpu.memory_space<vmem>>, vector<1x128xf32>
    %9 = vector.broadcast %8 : vector<1x128xf32> to vector<128x128xf32>
    %10 = arith.addf %7, %9 : vector<128x128xf32>
    %11 = math.tanh %10 : vector<128x128xf32>
    %c0_5 = arith.constant 0 : index
    %c0_6 = arith.constant 0 : index
    %12 = vector.load %arg4[%c0_5, %c0_6] : memref<128x128xbf16, #tpu.memory_space<vmem>>, vector<128x128xbf16>
    %13 = arith.truncf %11 : vector<128x128xf32> to vector<128x128xbf16>
    %cst_7 = arith.constant dense<0.000000e+00> : vector<128x128xf32>
    %14 = tpu.matmul %13, %12, %cst_7 {dimension_numbers = #tpu.dot_dimension_numbers<[1], [0], [0], [1], [0, 0, 1, 1], [], []>} : vector<128x128xbf16>, vector<128x128xbf16>, vector<128x128xf32> -> vector<128x128xf32>
    %c0_8 = arith.constant 0 : index
    %c0_9 = arith.constant 0 : index
    %15 = vector.load %arg5[%c0_8, %c0_9] : memref<1x128xf32, #tpu.memory_space<vmem>>, vector<1x128xf32>
    %16 = vector.broadcast %15 : vector<1x128xf32> to vector<128x128xf32>
    %17 = arith.addf %14, %16 : vector<128x128xf32>
    %18 = math.tanh %17 : vector<128x128xf32>
    %c0_10 = arith.constant 0 : index
    %c0_11 = arith.constant 0 : index
    %19 = vector.load %arg6[%c0_10, %c0_11] : memref<128x8xf32, #tpu.memory_space<vmem>>, vector<128x8xf32>
    %cst_12 = arith.constant dense<0.000000e+00> : vector<128x8xf32>
    %20 = tpu.matmul %18, %19, %cst_12 {dimension_numbers = #tpu.dot_dimension_numbers<[1], [0], [0], [1], [0, 0, 1, 1], [], []>} : vector<128x128xf32>, vector<128x8xf32>, vector<128x8xf32> -> vector<128x8xf32>
    %c0_13 = arith.constant 0 : index
    %c0_14 = arith.constant 0 : index
    %21 = vector.load %arg7[%c0_13, %c0_14] : memref<1x8xf32, #tpu.memory_space<vmem>>, vector<1x8xf32>
    %22 = vector.broadcast %21 : vector<1x8xf32> to vector<128x8xf32>
    %23 = arith.addf %20, %22 : vector<128x8xf32>
    %24 = vector.extract_strided_slice %23 {offsets = [0, 0], sizes = [128, 4], strides = [1, 1]} : vector<128x8xf32> to vector<128x4xf32>
    %25 = vector.extract_strided_slice %23 {offsets = [0, 4], sizes = [128, 4], strides = [1, 1]} : vector<128x8xf32> to vector<128x4xf32>
    %c0_15 = arith.constant 0 : index
    %c0_16 = arith.constant 0 : index
    %26 = vector.load %arg8[%c0_15, %c0_16] : memref<3x8xf32, #tpu.memory_space<vmem>>, vector<3x8xf32>
    %cst_17 = arith.constant dense<0.000000e+00> : vector<128x8xf32>
    %27 = tpu.matmul %2, %26, %cst_17 {dimension_numbers = #tpu.dot_dimension_numbers<[1], [0], [0], [1], [0, 0, 1, 1], [], []>} : vector<128x3xf32>, vector<3x8xf32>, vector<128x8xf32> -> vector<128x8xf32>
    %28 = vector.extract_strided_slice %27 {offsets = [0, 0], sizes = [128, 4], strides = [1, 1]} : vector<128x8xf32> to vector<128x4xf32>
    %29 = vector.extract_strided_slice %27 {offsets = [0, 4], sizes = [128, 4], strides = [1, 1]} : vector<128x8xf32> to vector<128x4xf32>
    %30 = arith.subf %25, %29 : vector<128x4xf32>
    %31 = math.exp %30 : vector<128x4xf32>
    %cst_18 = arith.constant 1.000000e+00 : f32
    %32 = vector.broadcast %cst_18 : f32 to vector<128x4xf32>
    %33 = arith.addf %32, %31 : vector<128x4xf32>
    %cst_19 = arith.constant 1.000000e+00 : f32
    %34 = vector.broadcast %cst_19 : f32 to vector<128x4xf32>
    %35 = arith.divf %34, %33 : vector<128x4xf32>
    %36 = arith.mulf %24, %35 : vector<128x4xf32>
    %cst_20 = arith.constant 1.000000e+00 : f32
    %37 = vector.broadcast %cst_20 : f32 to vector<128x4xf32>
    %38 = arith.subf %37, %35 : vector<128x4xf32>
    %39 = arith.mulf %28, %38 : vector<128x4xf32>
    %40 = arith.addf %36, %39 : vector<128x4xf32>
    %41 = arith.maximumf %25, %29 : vector<128x4xf32>
    %42 = arith.addf %25, %29 : vector<128x4xf32>
    %43 = math.absf %30 : vector<128x4xf32>
    %cst_21 = arith.constant 0.000000e+00 : f32
    %44 = vector.broadcast %cst_21 : f32 to vector<128x4xf32>
    %45 = arith.subf %44, %43 : vector<128x4xf32>
    %46 = math.exp %45 : vector<128x4xf32>
    %cst_22 = arith.constant 1.000000e+00 : f32
    %47 = vector.broadcast %cst_22 : f32 to vector<128x4xf32>
    %48 = arith.addf %47, %46 : vector<128x4xf32>
    %49 = math.log %48 : vector<128x4xf32>
    %50 = arith.addf %41, %49 : vector<128x4xf32>
    %51 = arith.subf %42, %50 : vector<128x4xf32>
    %cst_23 = arith.constant 5.000000e-01 : f32
    %52 = vector.broadcast %cst_23 : f32 to vector<128x4xf32>
    %53 = arith.mulf %52, %25 : vector<128x4xf32>
    %54 = math.exp %53 : vector<128x4xf32>
    %55 = arith.mulf %54, %3 : vector<128x4xf32>
    %56 = arith.addf %24, %55 : vector<128x4xf32>
    %cst_24 = arith.constant 5.000000e-01 : f32
    %57 = vector.broadcast %cst_24 : f32 to vector<128x4xf32>
    %58 = arith.mulf %57, %51 : vector<128x4xf32>
    %59 = math.exp %58 : vector<128x4xf32>
    %60 = arith.mulf %59, %4 : vector<128x4xf32>
    %61 = arith.addf %40, %60 : vector<128x4xf32>
    %62 = tpu.concatenate %56, %61 in 0 : vector<128x4xf32>, vector<128x4xf32> -> vector<256x4xf32>
    %c0_25 = arith.constant 0 : index
    %c0_26 = arith.constant 0 : index
    %63 = vector.load %arg9[%c0_25, %c0_26] : memref<4x4xf32, #tpu.memory_space<vmem>>, vector<4x4xf32>
    %cst_27 = arith.constant dense<0.000000e+00> : vector<256x4xf32>
    %64 = tpu.matmul %62, %63, %cst_27 {dimension_numbers = #tpu.dot_dimension_numbers<[1], [0], [0], [1], [0, 0, 1, 1], [], []>} : vector<256x4xf32>, vector<4x4xf32>, vector<256x4xf32> -> vector<256x4xf32>
    %c0_28 = arith.constant 0 : index
    %c0_29 = arith.constant 0 : index
    %65 = vector.load %arg10[%c0_28, %c0_29] : memref<1x4xf32, #tpu.memory_space<vmem>>, vector<1x4xf32>
    %66 = vector.broadcast %65 : vector<1x4xf32> to vector<256x4xf32>
    %67 = arith.addf %64, %66 : vector<256x4xf32>
    %cst_30 = arith.constant 0.000000e+00 : f32
    %68 = vector.broadcast %cst_30 : f32 to vector<256x4xf32>
    %69 = arith.maximumf %67, %68 : vector<256x4xf32>
    %c0_31 = arith.constant 0 : index
    %c0_32 = arith.constant 0 : index
    %70 = vector.load %arg11[%c0_31, %c0_32] : memref<4x4xf32, #tpu.memory_space<vmem>>, vector<4x4xf32>
    %cst_33 = arith.constant dense<0.000000e+00> : vector<256x4xf32>
    %71 = tpu.matmul %69, %70, %cst_33 {dimension_numbers = #tpu.dot_dimension_numbers<[1], [0], [0], [1], [0, 0, 1, 1], [], []>} : vector<256x4xf32>, vector<4x4xf32>, vector<256x4xf32> -> vector<256x4xf32>
    %c0_34 = arith.constant 0 : index
    %c0_35 = arith.constant 0 : index
    %72 = vector.load %arg12[%c0_34, %c0_35] : memref<1x4xf32, #tpu.memory_space<vmem>>, vector<1x4xf32>
    %73 = vector.broadcast %72 : vector<1x4xf32> to vector<256x4xf32>
    %74 = arith.addf %71, %73 : vector<256x4xf32>
    %cst_36 = arith.constant 0.000000e+00 : f32
    %75 = vector.broadcast %cst_36 : f32 to vector<256x4xf32>
    %76 = arith.maximumf %74, %75 : vector<256x4xf32>
    %c0_37 = arith.constant 0 : index
    %c0_38 = arith.constant 0 : index
    %77 = vector.load %arg13[%c0_37, %c0_38] : memref<4x12xf32, #tpu.memory_space<vmem>>, vector<4x12xf32>
    %cst_39 = arith.constant dense<0.000000e+00> : vector<256x12xf32>
    %78 = tpu.matmul %76, %77, %cst_39 {dimension_numbers = #tpu.dot_dimension_numbers<[1], [0], [0], [1], [0, 0, 1, 1], [], []>} : vector<256x4xf32>, vector<4x12xf32>, vector<256x12xf32> -> vector<256x12xf32>
    %c0_40 = arith.constant 0 : index
    %c0_41 = arith.constant 0 : index
    %79 = vector.load %arg14[%c0_40, %c0_41] : memref<1x12xf32, #tpu.memory_space<vmem>>, vector<1x12xf32>
    %80 = vector.broadcast %79 : vector<1x12xf32> to vector<256x12xf32>
    %81 = arith.addf %78, %80 : vector<256x12xf32>
    %82 = vector.extract_strided_slice %81 {offsets = [0, 0], sizes = [256, 4], strides = [1, 1]} : vector<256x12xf32> to vector<256x4xf32>
    %83 = tpu.concatenate %62, %82 in 1 : vector<256x4xf32>, vector<256x4xf32> -> vector<256x8xf32>
    %84 = vector.extract_strided_slice %81 {offsets = [0, 4], sizes = [256, 8], strides = [1, 1]} : vector<256x12xf32> to vector<256x8xf32>
    %c0_42 = arith.constant 0 : index
    %c0_43 = arith.constant 0 : index
    %c0_44 = arith.constant 0 : index
    %85 = vector.load %arg15[%c0_42, %c0_43, %c0_44] : memref<4x8x4xf32, #tpu.memory_space<vmem>>, vector<1x8x4xf32>
    %86 = vector.shape_cast %85 : vector<1x8x4xf32> to vector<8x4xf32>
    %cst_45 = arith.constant dense<0.000000e+00> : vector<256x4xf32>
    %87 = tpu.matmul %83, %86, %cst_45 {dimension_numbers = #tpu.dot_dimension_numbers<[1], [0], [0], [1], [0, 0, 1, 1], [], []>} : vector<256x8xf32>, vector<8x4xf32>, vector<256x4xf32> -> vector<256x4xf32>
    %c0_46 = arith.constant 0 : index
    %c0_47 = arith.constant 0 : index
    %c0_48 = arith.constant 0 : index
    %88 = vector.load %arg16[%c0_46, %c0_47, %c0_48] : memref<4x1x4xf32, #tpu.memory_space<vmem>>, vector<1x1x4xf32>
    %89 = vector.shape_cast %88 : vector<1x1x4xf32> to vector<1x4xf32>
    %90 = vector.broadcast %89 : vector<1x4xf32> to vector<256x4xf32>
    %91 = arith.addf %87, %90 : vector<256x4xf32>
    %cst_49 = arith.constant 0.000000e+00 : f32
    %92 = vector.broadcast %cst_49 : f32 to vector<256x4xf32>
    %93 = arith.maximumf %91, %92 : vector<256x4xf32>
    %c0_50 = arith.constant 0 : index
    %c0_51 = arith.constant 0 : index
    %c0_52 = arith.constant 0 : index
    %94 = vector.load %arg17[%c0_50, %c0_51, %c0_52] : memref<4x4x4xf32, #tpu.memory_space<vmem>>, vector<1x4x4xf32>
    %95 = vector.shape_cast %94 : vector<1x4x4xf32> to vector<4x4xf32>
    %cst_53 = arith.constant dense<0.000000e+00> : vector<256x4xf32>
    %96 = tpu.matmul %93, %95, %cst_53 {dimension_numbers = #tpu.dot_dimension_numbers<[1], [0], [0], [1], [0, 0, 1, 1], [], []>} : vector<256x4xf32>, vector<4x4xf32>, vector<256x4xf32> -> vector<256x4xf32>
    %c0_54 = arith.constant 0 : index
    %c0_55 = arith.constant 0 : index
    %c0_56 = arith.constant 0 : index
    %97 = vector.load %arg18[%c0_54, %c0_55, %c0_56] : memref<4x1x4xf32, #tpu.memory_space<vmem>>, vector<1x1x4xf32>
    %98 = vector.shape_cast %97 : vector<1x1x4xf32> to vector<1x4xf32>
    %99 = vector.broadcast %98 : vector<1x4xf32> to vector<256x4xf32>
    %100 = arith.addf %96, %99 : vector<256x4xf32>
    %cst_57 = arith.constant 0.000000e+00 : f32
    %101 = vector.broadcast %cst_57 : f32 to vector<256x4xf32>
    %102 = arith.maximumf %100, %101 : vector<256x4xf32>
    %c0_58 = arith.constant 0 : index
    %c0_59 = arith.constant 0 : index
    %c0_60 = arith.constant 0 : index
    %103 = vector.load %arg19[%c0_58, %c0_59, %c0_60] : memref<4x4x15xf32, #tpu.memory_space<vmem>>, vector<1x4x15xf32>
    %104 = vector.shape_cast %103 : vector<1x4x15xf32> to vector<4x15xf32>
    %cst_61 = arith.constant dense<0.000000e+00> : vector<256x15xf32>
    %105 = tpu.matmul %102, %104, %cst_61 {dimension_numbers = #tpu.dot_dimension_numbers<[1], [0], [0], [1], [0, 0, 1, 1], [], []>} : vector<256x4xf32>, vector<4x15xf32>, vector<256x15xf32> -> vector<256x15xf32>
    %c0_62 = arith.constant 0 : index
    %c0_63 = arith.constant 0 : index
    %c0_64 = arith.constant 0 : index
    %106 = vector.load %arg20[%c0_62, %c0_63, %c0_64] : memref<4x1x15xf32, #tpu.memory_space<vmem>>, vector<1x1x15xf32>
    %107 = vector.shape_cast %106 : vector<1x1x15xf32> to vector<1x15xf32>
    %108 = vector.broadcast %107 : vector<1x15xf32> to vector<256x15xf32>
    %109 = arith.addf %105, %108 : vector<256x15xf32>
    %110 = vector.extract_strided_slice %109 {offsets = [0, 0], sizes = [256, 7], strides = [1, 1]} : vector<256x15xf32> to vector<256x7xf32>
    %111 = math.tanh %110 : vector<256x7xf32>
    %cst_65 = arith.constant 1.000000e-01 : f32
    %112 = vector.broadcast %cst_65 : f32 to vector<256x7xf32>
    %113 = arith.mulf %112, %111 : vector<256x7xf32>
    %114 = vector.extract_strided_slice %109 {offsets = [0, 7], sizes = [256, 8], strides = [1, 1]} : vector<256x15xf32> to vector<256x8xf32>
    %cst_66 = arith.constant dense<0.000000e+00> : vector<256xf32>
    %115 = vector.multi_reduction <add>, %113, %cst_66 [1] : vector<256x7xf32> to vector<256xf32>
    %116 = vector.shape_cast %115 : vector<256xf32> to vector<256x1xf32>
    %cst_67 = arith.constant 0.000000e+00 : f32
    %117 = vector.broadcast %cst_67 : f32 to vector<256x1xf32>
    %118 = arith.subf %117, %116 : vector<256x1xf32>
    %119 = tpu.concatenate %113, %118 in 1 : vector<256x7xf32>, vector<256x1xf32> -> vector<256x8xf32>
    %120 = math.exp %119 : vector<256x8xf32>
    %121 = arith.mulf %84, %120 : vector<256x8xf32>
    %122 = arith.addf %121, %114 : vector<256x8xf32>
    %c1 = arith.constant 1 : index
    %c0_68 = arith.constant 0 : index
    %c0_69 = arith.constant 0 : index
    %123 = vector.load %arg15[%c1, %c0_68, %c0_69] : memref<4x8x4xf32, #tpu.memory_space<vmem>>, vector<1x8x4xf32>
    %124 = vector.shape_cast %123 : vector<1x8x4xf32> to vector<8x4xf32>
    %cst_70 = arith.constant dense<0.000000e+00> : vector<256x4xf32>
    %125 = tpu.matmul %122, %124, %cst_70 {dimension_numbers = #tpu.dot_dimension_numbers<[1], [0], [0], [1], [0, 0, 1, 1], [], []>} : vector<256x8xf32>, vector<8x4xf32>, vector<256x4xf32> -> vector<256x4xf32>
    %c1_71 = arith.constant 1 : index
    %c0_72 = arith.constant 0 : index
    %c0_73 = arith.constant 0 : index
    %126 = vector.load %arg16[%c1_71, %c0_72, %c0_73] : memref<4x1x4xf32, #tpu.memory_space<vmem>>, vector<1x1x4xf32>
    %127 = vector.shape_cast %126 : vector<1x1x4xf32> to vector<1x4xf32>
    %128 = vector.broadcast %127 : vector<1x4xf32> to vector<256x4xf32>
    %129 = arith.addf %125, %128 : vector<256x4xf32>
    %cst_74 = arith.constant 0.000000e+00 : f32
    %130 = vector.broadcast %cst_74 : f32 to vector<256x4xf32>
    %131 = arith.maximumf %129, %130 : vector<256x4xf32>
    %c1_75 = arith.constant 1 : index
    %c0_76 = arith.constant 0 : index
    %c0_77 = arith.constant 0 : index
    %132 = vector.load %arg17[%c1_75, %c0_76, %c0_77] : memref<4x4x4xf32, #tpu.memory_space<vmem>>, vector<1x4x4xf32>
    %133 = vector.shape_cast %132 : vector<1x4x4xf32> to vector<4x4xf32>
    %cst_78 = arith.constant dense<0.000000e+00> : vector<256x4xf32>
    %134 = tpu.matmul %131, %133, %cst_78 {dimension_numbers = #tpu.dot_dimension_numbers<[1], [0], [0], [1], [0, 0, 1, 1], [], []>} : vector<256x4xf32>, vector<4x4xf32>, vector<256x4xf32> -> vector<256x4xf32>
    %c1_79 = arith.constant 1 : index
    %c0_80 = arith.constant 0 : index
    %c0_81 = arith.constant 0 : index
    %135 = vector.load %arg18[%c1_79, %c0_80, %c0_81] : memref<4x1x4xf32, #tpu.memory_space<vmem>>, vector<1x1x4xf32>
    %136 = vector.shape_cast %135 : vector<1x1x4xf32> to vector<1x4xf32>
    %137 = vector.broadcast %136 : vector<1x4xf32> to vector<256x4xf32>
    %138 = arith.addf %134, %137 : vector<256x4xf32>
    %cst_82 = arith.constant 0.000000e+00 : f32
    %139 = vector.broadcast %cst_82 : f32 to vector<256x4xf32>
    %140 = arith.maximumf %138, %139 : vector<256x4xf32>
    %c1_83 = arith.constant 1 : index
    %c0_84 = arith.constant 0 : index
    %c0_85 = arith.constant 0 : index
    %141 = vector.load %arg19[%c1_83, %c0_84, %c0_85] : memref<4x4x15xf32, #tpu.memory_space<vmem>>, vector<1x4x15xf32>
    %142 = vector.shape_cast %141 : vector<1x4x15xf32> to vector<4x15xf32>
    %cst_86 = arith.constant dense<0.000000e+00> : vector<256x15xf32>
    %143 = tpu.matmul %140, %142, %cst_86 {dimension_numbers = #tpu.dot_dimension_numbers<[1], [0], [0], [1], [0, 0, 1, 1], [], []>} : vector<256x4xf32>, vector<4x15xf32>, vector<256x15xf32> -> vector<256x15xf32>
    %c1_87 = arith.constant 1 : index
    %c0_88 = arith.constant 0 : index
    %c0_89 = arith.constant 0 : index
    %144 = vector.load %arg20[%c1_87, %c0_88, %c0_89] : memref<4x1x15xf32, #tpu.memory_space<vmem>>, vector<1x1x15xf32>
    %145 = vector.shape_cast %144 : vector<1x1x15xf32> to vector<1x15xf32>
    %146 = vector.broadcast %145 : vector<1x15xf32> to vector<256x15xf32>
    %147 = arith.addf %143, %146 : vector<256x15xf32>
    %148 = vector.extract_strided_slice %147 {offsets = [0, 0], sizes = [256, 7], strides = [1, 1]} : vector<256x15xf32> to vector<256x7xf32>
    %149 = math.tanh %148 : vector<256x7xf32>
    %cst_90 = arith.constant 1.000000e-01 : f32
    %150 = vector.broadcast %cst_90 : f32 to vector<256x7xf32>
    %151 = arith.mulf %150, %149 : vector<256x7xf32>
    %152 = vector.extract_strided_slice %147 {offsets = [0, 7], sizes = [256, 8], strides = [1, 1]} : vector<256x15xf32> to vector<256x8xf32>
    %cst_91 = arith.constant dense<0.000000e+00> : vector<256xf32>
    %153 = vector.multi_reduction <add>, %151, %cst_91 [1] : vector<256x7xf32> to vector<256xf32>
    %154 = vector.shape_cast %153 : vector<256xf32> to vector<256x1xf32>
    %cst_92 = arith.constant 0.000000e+00 : f32
    %155 = vector.broadcast %cst_92 : f32 to vector<256x1xf32>
    %156 = arith.subf %155, %154 : vector<256x1xf32>
    %157 = tpu.concatenate %151, %156 in 1 : vector<256x7xf32>, vector<256x1xf32> -> vector<256x8xf32>
    %158 = math.exp %157 : vector<256x8xf32>
    %159 = arith.mulf %83, %158 : vector<256x8xf32>
    %160 = arith.addf %159, %152 : vector<256x8xf32>
    %c2 = arith.constant 2 : index
    %c0_93 = arith.constant 0 : index
    %c0_94 = arith.constant 0 : index
    %161 = vector.load %arg15[%c2, %c0_93, %c0_94] : memref<4x8x4xf32, #tpu.memory_space<vmem>>, vector<1x8x4xf32>
    %162 = vector.shape_cast %161 : vector<1x8x4xf32> to vector<8x4xf32>
    %cst_95 = arith.constant dense<0.000000e+00> : vector<256x4xf32>
    %163 = tpu.matmul %160, %162, %cst_95 {dimension_numbers = #tpu.dot_dimension_numbers<[1], [0], [0], [1], [0, 0, 1, 1], [], []>} : vector<256x8xf32>, vector<8x4xf32>, vector<256x4xf32> -> vector<256x4xf32>
    %c2_96 = arith.constant 2 : index
    %c0_97 = arith.constant 0 : index
    %c0_98 = arith.constant 0 : index
    %164 = vector.load %arg16[%c2_96, %c0_97, %c0_98] : memref<4x1x4xf32, #tpu.memory_space<vmem>>, vector<1x1x4xf32>
    %165 = vector.shape_cast %164 : vector<1x1x4xf32> to vector<1x4xf32>
    %166 = vector.broadcast %165 : vector<1x4xf32> to vector<256x4xf32>
    %167 = arith.addf %163, %166 : vector<256x4xf32>
    %cst_99 = arith.constant 0.000000e+00 : f32
    %168 = vector.broadcast %cst_99 : f32 to vector<256x4xf32>
    %169 = arith.maximumf %167, %168 : vector<256x4xf32>
    %c2_100 = arith.constant 2 : index
    %c0_101 = arith.constant 0 : index
    %c0_102 = arith.constant 0 : index
    %170 = vector.load %arg17[%c2_100, %c0_101, %c0_102] : memref<4x4x4xf32, #tpu.memory_space<vmem>>, vector<1x4x4xf32>
    %171 = vector.shape_cast %170 : vector<1x4x4xf32> to vector<4x4xf32>
    %cst_103 = arith.constant dense<0.000000e+00> : vector<256x4xf32>
    %172 = tpu.matmul %169, %171, %cst_103 {dimension_numbers = #tpu.dot_dimension_numbers<[1], [0], [0], [1], [0, 0, 1, 1], [], []>} : vector<256x4xf32>, vector<4x4xf32>, vector<256x4xf32> -> vector<256x4xf32>
    %c2_104 = arith.constant 2 : index
    %c0_105 = arith.constant 0 : index
    %c0_106 = arith.constant 0 : index
    %173 = vector.load %arg18[%c2_104, %c0_105, %c0_106] : memref<4x1x4xf32, #tpu.memory_space<vmem>>, vector<1x1x4xf32>
    %174 = vector.shape_cast %173 : vector<1x1x4xf32> to vector<1x4xf32>
    %175 = vector.broadcast %174 : vector<1x4xf32> to vector<256x4xf32>
    %176 = arith.addf %172, %175 : vector<256x4xf32>
    %cst_107 = arith.constant 0.000000e+00 : f32
    %177 = vector.broadcast %cst_107 : f32 to vector<256x4xf32>
    %178 = arith.maximumf %176, %177 : vector<256x4xf32>
    %c2_108 = arith.constant 2 : index
    %c0_109 = arith.constant 0 : index
    %c0_110 = arith.constant 0 : index
    %179 = vector.load %arg19[%c2_108, %c0_109, %c0_110] : memref<4x4x15xf32, #tpu.memory_space<vmem>>, vector<1x4x15xf32>
    %180 = vector.shape_cast %179 : vector<1x4x15xf32> to vector<4x15xf32>
    %cst_111 = arith.constant dense<0.000000e+00> : vector<256x15xf32>
    %181 = tpu.matmul %178, %180, %cst_111 {dimension_numbers = #tpu.dot_dimension_numbers<[1], [0], [0], [1], [0, 0, 1, 1], [], []>} : vector<256x4xf32>, vector<4x15xf32>, vector<256x15xf32> -> vector<256x15xf32>
    %c2_112 = arith.constant 2 : index
    %c0_113 = arith.constant 0 : index
    %c0_114 = arith.constant 0 : index
    %182 = vector.load %arg20[%c2_112, %c0_113, %c0_114] : memref<4x1x15xf32, #tpu.memory_space<vmem>>, vector<1x1x15xf32>
    %183 = vector.shape_cast %182 : vector<1x1x15xf32> to vector<1x15xf32>
    %184 = vector.broadcast %183 : vector<1x15xf32> to vector<256x15xf32>
    %185 = arith.addf %181, %184 : vector<256x15xf32>
    %186 = vector.extract_strided_slice %185 {offsets = [0, 0], sizes = [256, 7], strides = [1, 1]} : vector<256x15xf32> to vector<256x7xf32>
    %187 = math.tanh %186 : vector<256x7xf32>
    %cst_115 = arith.constant 1.000000e-01 : f32
    %188 = vector.broadcast %cst_115 : f32 to vector<256x7xf32>
    %189 = arith.mulf %188, %187 : vector<256x7xf32>
    %190 = vector.extract_strided_slice %185 {offsets = [0, 7], sizes = [256, 8], strides = [1, 1]} : vector<256x15xf32> to vector<256x8xf32>
    %cst_116 = arith.constant dense<0.000000e+00> : vector<256xf32>
    %191 = vector.multi_reduction <add>, %189, %cst_116 [1] : vector<256x7xf32> to vector<256xf32>
    %192 = vector.shape_cast %191 : vector<256xf32> to vector<256x1xf32>
    %cst_117 = arith.constant 0.000000e+00 : f32
    %193 = vector.broadcast %cst_117 : f32 to vector<256x1xf32>
    %194 = arith.subf %193, %192 : vector<256x1xf32>
    %195 = tpu.concatenate %189, %194 in 1 : vector<256x7xf32>, vector<256x1xf32> -> vector<256x8xf32>
    %196 = math.exp %195 : vector<256x8xf32>
    %197 = arith.mulf %122, %196 : vector<256x8xf32>
    %198 = arith.addf %197, %190 : vector<256x8xf32>
    %c3 = arith.constant 3 : index
    %c0_118 = arith.constant 0 : index
    %c0_119 = arith.constant 0 : index
    %199 = vector.load %arg15[%c3, %c0_118, %c0_119] : memref<4x8x4xf32, #tpu.memory_space<vmem>>, vector<1x8x4xf32>
    %200 = vector.shape_cast %199 : vector<1x8x4xf32> to vector<8x4xf32>
    %cst_120 = arith.constant dense<0.000000e+00> : vector<256x4xf32>
    %201 = tpu.matmul %198, %200, %cst_120 {dimension_numbers = #tpu.dot_dimension_numbers<[1], [0], [0], [1], [0, 0, 1, 1], [], []>} : vector<256x8xf32>, vector<8x4xf32>, vector<256x4xf32> -> vector<256x4xf32>
    %c3_121 = arith.constant 3 : index
    %c0_122 = arith.constant 0 : index
    %c0_123 = arith.constant 0 : index
    %202 = vector.load %arg16[%c3_121, %c0_122, %c0_123] : memref<4x1x4xf32, #tpu.memory_space<vmem>>, vector<1x1x4xf32>
    %203 = vector.shape_cast %202 : vector<1x1x4xf32> to vector<1x4xf32>
    %204 = vector.broadcast %203 : vector<1x4xf32> to vector<256x4xf32>
    %205 = arith.addf %201, %204 : vector<256x4xf32>
    %cst_124 = arith.constant 0.000000e+00 : f32
    %206 = vector.broadcast %cst_124 : f32 to vector<256x4xf32>
    %207 = arith.maximumf %205, %206 : vector<256x4xf32>
    %c3_125 = arith.constant 3 : index
    %c0_126 = arith.constant 0 : index
    %c0_127 = arith.constant 0 : index
    %208 = vector.load %arg17[%c3_125, %c0_126, %c0_127] : memref<4x4x4xf32, #tpu.memory_space<vmem>>, vector<1x4x4xf32>
    %209 = vector.shape_cast %208 : vector<1x4x4xf32> to vector<4x4xf32>
    %cst_128 = arith.constant dense<0.000000e+00> : vector<256x4xf32>
    %210 = tpu.matmul %207, %209, %cst_128 {dimension_numbers = #tpu.dot_dimension_numbers<[1], [0], [0], [1], [0, 0, 1, 1], [], []>} : vector<256x4xf32>, vector<4x4xf32>, vector<256x4xf32> -> vector<256x4xf32>
    %c3_129 = arith.constant 3 : index
    %c0_130 = arith.constant 0 : index
    %c0_131 = arith.constant 0 : index
    %211 = vector.load %arg18[%c3_129, %c0_130, %c0_131] : memref<4x1x4xf32, #tpu.memory_space<vmem>>, vector<1x1x4xf32>
    %212 = vector.shape_cast %211 : vector<1x1x4xf32> to vector<1x4xf32>
    %213 = vector.broadcast %212 : vector<1x4xf32> to vector<256x4xf32>
    %214 = arith.addf %210, %213 : vector<256x4xf32>
    %cst_132 = arith.constant 0.000000e+00 : f32
    %215 = vector.broadcast %cst_132 : f32 to vector<256x4xf32>
    %216 = arith.maximumf %214, %215 : vector<256x4xf32>
    %c3_133 = arith.constant 3 : index
    %c0_134 = arith.constant 0 : index
    %c0_135 = arith.constant 0 : index
    %217 = vector.load %arg19[%c3_133, %c0_134, %c0_135] : memref<4x4x15xf32, #tpu.memory_space<vmem>>, vector<1x4x15xf32>
    %218 = vector.shape_cast %217 : vector<1x4x15xf32> to vector<4x15xf32>
    %cst_136 = arith.constant dense<0.000000e+00> : vector<256x15xf32>
    %219 = tpu.matmul %216, %218, %cst_136 {dimension_numbers = #tpu.dot_dimension_numbers<[1], [0], [0], [1], [0, 0, 1, 1], [], []>} : vector<256x4xf32>, vector<4x15xf32>, vector<256x15xf32> -> vector<256x15xf32>
    %c3_137 = arith.constant 3 : index
    %c0_138 = arith.constant 0 : index
    %c0_139 = arith.constant 0 : index
    %220 = vector.load %arg20[%c3_137, %c0_138, %c0_139] : memref<4x1x15xf32, #tpu.memory_space<vmem>>, vector<1x1x15xf32>
    %221 = vector.shape_cast %220 : vector<1x1x15xf32> to vector<1x15xf32>
    %222 = vector.broadcast %221 : vector<1x15xf32> to vector<256x15xf32>
    %223 = arith.addf %219, %222 : vector<256x15xf32>
    %224 = vector.extract_strided_slice %223 {offsets = [0, 0], sizes = [256, 7], strides = [1, 1]} : vector<256x15xf32> to vector<256x7xf32>
    %225 = math.tanh %224 : vector<256x7xf32>
    %cst_140 = arith.constant 1.000000e-01 : f32
    %226 = vector.broadcast %cst_140 : f32 to vector<256x7xf32>
    %227 = arith.mulf %226, %225 : vector<256x7xf32>
    %228 = vector.extract_strided_slice %223 {offsets = [0, 7], sizes = [256, 8], strides = [1, 1]} : vector<256x15xf32> to vector<256x8xf32>
    %cst_141 = arith.constant dense<0.000000e+00> : vector<256xf32>
    %229 = vector.multi_reduction <add>, %227, %cst_141 [1] : vector<256x7xf32> to vector<256xf32>
    %230 = vector.shape_cast %229 : vector<256xf32> to vector<256x1xf32>
    %cst_142 = arith.constant 0.000000e+00 : f32
    %231 = vector.broadcast %cst_142 : f32 to vector<256x1xf32>
    %232 = arith.subf %231, %230 : vector<256x1xf32>
    %233 = tpu.concatenate %227, %232 in 1 : vector<256x7xf32>, vector<256x1xf32> -> vector<256x8xf32>
    %234 = math.exp %233 : vector<256x8xf32>
    %235 = arith.mulf %160, %234 : vector<256x8xf32>
    %236 = arith.addf %235, %228 : vector<256x8xf32>
    %237 = tpu.concatenate %236, %198 in 1 : vector<256x8xf32>, vector<256x8xf32> -> vector<256x16xf32>
    %cst_143 = arith.constant 0.000000e+00 : f32
    %238 = vector.broadcast %cst_143 : f32 to vector<256x16xf32>
    %239 = arith.maximumf %237, %238 : vector<256x16xf32>
    %240 = math.absf %237 : vector<256x16xf32>
    %cst_144 = arith.constant 0.000000e+00 : f32
    %241 = vector.broadcast %cst_144 : f32 to vector<256x16xf32>
    %242 = arith.subf %241, %240 : vector<256x16xf32>
    %243 = math.exp %242 : vector<256x16xf32>
    %cst_145 = arith.constant 1.000000e+00 : f32
    %244 = vector.broadcast %cst_145 : f32 to vector<256x16xf32>
    %245 = arith.addf %244, %243 : vector<256x16xf32>
    %246 = math.log %245 : vector<256x16xf32>
    %247 = arith.addf %239, %246 : vector<256x16xf32>
    %cst_146 = arith.constant 1.000000e-07 : f32
    %cst_147 = arith.constant 1.000000e+07 : f32
    %248 = vector.broadcast %cst_146 : f32 to vector<256x16xf32>
    %249 = arith.maximumf %248, %247 : vector<256x16xf32>
    %250 = vector.broadcast %cst_147 : f32 to vector<256x16xf32>
    %251 = arith.minimumf %250, %249 : vector<256x16xf32>
    %252 = vector.extract_strided_slice %251 {offsets = [0, 0], sizes = [128, 16], strides = [1, 1]} : vector<256x16xf32> to vector<128x16xf32>
    %253 = vector.extract_strided_slice %251 {offsets = [128, 0], sizes = [128, 16], strides = [1, 1]} : vector<256x16xf32> to vector<128x16xf32>
    %cst_148 = arith.constant 0.000000e+00 : f32
    %254 = vector.broadcast %cst_148 : f32 to vector<128x64xf32>
    %255 = tpu.concatenate %252, %253, %56, %24, %25, %28, %29, %61, %40, %51, %254 in 1 : vector<128x16xf32>, vector<128x16xf32>, vector<128x4xf32>, vector<128x4xf32>, vector<128x4xf32>, vector<128x4xf32>, vector<128x4xf32>, vector<128x4xf32>, vector<128x4xf32>, vector<128x4xf32>, vector<128x64xf32> -> vector<128x128xf32>
    %c0_149 = arith.constant 0 : index
    %c0_150 = arith.constant 0 : index
    %256 = vector.load %arg21[%c0_149, %c0_150] : memref<128x128xf32, #tpu.memory_space<vmem>>, vector<128x128xf32>
    tpu.vector_store %arg21[%c0_149, %c0_150], %255 {strides = array<i32>} : memref<128x128xf32, #tpu.memory_space<vmem>>, vector<128x128xf32>,
    return
  }
  func.func @transform_0(%arg0: i32) -> (i32, i32) {
    %c0_i32 = arith.constant 0 : i32
    %c0_i32_0 = arith.constant 0 : i32
    return %arg0, %c0_i32 : i32, i32
  }
  func.func @transform_1(%arg0: i32) -> (i32, i32) {
    %c0_i32 = arith.constant 0 : i32
    %c0_i32_0 = arith.constant 0 : i32
    %c0_i32_1 = arith.constant 0 : i32
    return %c0_i32, %c0_i32_0 : i32, i32
  }
  func.func @transform_2(%arg0: i32) -> (i32, i32) {
    %c0_i32 = arith.constant 0 : i32
    %c0_i32_0 = arith.constant 0 : i32
    %c0_i32_1 = arith.constant 0 : i32
    return %c0_i32, %c0_i32_0 : i32, i32
  }
  func.func @transform_3(%arg0: i32) -> (i32, i32) {
    %c0_i32 = arith.constant 0 : i32
    %c0_i32_0 = arith.constant 0 : i32
    %c0_i32_1 = arith.constant 0 : i32
    return %c0_i32, %c0_i32_0 : i32, i32
  }
  func.func @transform_4(%arg0: i32) -> (i32, i32) {
    %c0_i32 = arith.constant 0 : i32
    %c0_i32_0 = arith.constant 0 : i32
    %c0_i32_1 = arith.constant 0 : i32
    return %c0_i32, %c0_i32_0 : i32, i32
  }
  func.func @transform_5(%arg0: i32) -> (i32, i32) {
    %c0_i32 = arith.constant 0 : i32
    %c0_i32_0 = arith.constant 0 : i32
    %c0_i32_1 = arith.constant 0 : i32
    return %c0_i32, %c0_i32_0 : i32, i32
  }
  func.func @transform_6(%arg0: i32) -> (i32, i32) {
    %c0_i32 = arith.constant 0 : i32
    %c0_i32_0 = arith.constant 0 : i32
    %c0_i32_1 = arith.constant 0 : i32
    return %c0_i32, %c0_i32_0 : i32, i32
  }
  func.func @transform_7(%arg0: i32) -> (i32, i32) {
    %c0_i32 = arith.constant 0 : i32
    %c0_i32_0 = arith.constant 0 : i32
    %c0_i32_1 = arith.constant 0 : i32
    return %c0_i32, %c0_i32_0 : i32, i32
  }
  func.func @transform_8(%arg0: i32) -> (i32, i32) {
    %c0_i32 = arith.constant 0 : i32
    %c0_i32_0 = arith.constant 0 : i32
    %c0_i32_1 = arith.constant 0 : i32
    return %c0_i32, %c0_i32_0 : i32, i32
  }
  func.func @transform_9(%arg0: i32) -> (i32, i32) {
    %c0_i32 = arith.constant 0 : i32
    %c0_i32_0 = arith.constant 0 : i32
    %c0_i32_1 = arith.constant 0 : i32
    return %c0_i32, %c0_i32_0 : i32, i32
  }
  func.func @transform_10(%arg0: i32) -> (i32, i32) {
    %c0_i32 = arith.constant 0 : i32
    %c0_i32_0 = arith.constant 0 : i32
    %c0_i32_1 = arith.constant 0 : i32
    return %c0_i32, %c0_i32_0 : i32, i32
  }
  func.func @transform_11(%arg0: i32) -> (i32, i32) {
    %c0_i32 = arith.constant 0 : i32
    %c0_i32_0 = arith.constant 0 : i32
    %c0_i32_1 = arith.constant 0 : i32
    return %c0_i32, %c0_i32_0 : i32, i32
  }
  func.func @transform_12(%arg0: i32) -> (i32, i32) {
    %c0_i32 = arith.constant 0 : i32
    %c0_i32_0 = arith.constant 0 : i32
    %c0_i32_1 = arith.constant 0 : i32
    return %c0_i32, %c0_i32_0 : i32, i32
  }
  func.func @transform_13(%arg0: i32) -> (i32, i32) {
    %c0_i32 = arith.constant 0 : i32
    %c0_i32_0 = arith.constant 0 : i32
    %c0_i32_1 = arith.constant 0 : i32
    return %c0_i32, %c0_i32_0 : i32, i32
  }
  func.func @transform_14(%arg0: i32) -> (i32, i32, i32) {
    %c0_i32 = arith.constant 0 : i32
    %c0_i32_0 = arith.constant 0 : i32
    %c0_i32_1 = arith.constant 0 : i32
    %c0_i32_2 = arith.constant 0 : i32
    return %c0_i32, %c0_i32_0, %c0_i32_1 : i32, i32, i32
  }
  func.func @transform_15(%arg0: i32) -> (i32, i32, i32) {
    %c0_i32 = arith.constant 0 : i32
    %c0_i32_0 = arith.constant 0 : i32
    %c0_i32_1 = arith.constant 0 : i32
    %c0_i32_2 = arith.constant 0 : i32
    return %c0_i32, %c0_i32_0, %c0_i32_1 : i32, i32, i32
  }
  func.func @transform_16(%arg0: i32) -> (i32, i32, i32) {
    %c0_i32 = arith.constant 0 : i32
    %c0_i32_0 = arith.constant 0 : i32
    %c0_i32_1 = arith.constant 0 : i32
    %c0_i32_2 = arith.constant 0 : i32
    return %c0_i32, %c0_i32_0, %c0_i32_1 : i32, i32, i32
  }
  func.func @transform_17(%arg0: i32) -> (i32, i32, i32) {
    %c0_i32 = arith.constant 0 : i32
    %c0_i32_0 = arith.constant 0 : i32
    %c0_i32_1 = arith.constant 0 : i32
    %c0_i32_2 = arith.constant 0 : i32
    return %c0_i32, %c0_i32_0, %c0_i32_1 : i32, i32, i32
  }
  func.func @transform_18(%arg0: i32) -> (i32, i32, i32) {
    %c0_i32 = arith.constant 0 : i32
    %c0_i32_0 = arith.constant 0 : i32
    %c0_i32_1 = arith.constant 0 : i32
    %c0_i32_2 = arith.constant 0 : i32
    return %c0_i32, %c0_i32_0, %c0_i32_1 : i32, i32, i32
  }
  func.func @transform_19(%arg0: i32) -> (i32, i32, i32) {
    %c0_i32 = arith.constant 0 : i32
    %c0_i32_0 = arith.constant 0 : i32
    %c0_i32_1 = arith.constant 0 : i32
    %c0_i32_2 = arith.constant 0 : i32
    return %c0_i32, %c0_i32_0, %c0_i32_1 : i32, i32, i32
  }
  func.func @transform_20(%arg0: i32) -> (i32, i32) {
    %c0_i32 = arith.constant 0 : i32
    %c0_i32_0 = arith.constant 0 : i32
    return %arg0, %c0_i32 : i32, i32
  }
}

</mosaic_0001>

<bundles_post_ra>
// kernel: pivae_forward.1
= control target key start
LH: loop header
LB: loop body
LE: loop exit
PB: predicated region body
PF: predicated region fallthrough
CT: control target
= control target key end

     0   :  { %s19967_s0 = inlined_call_operand.vmem [shape: f32[256,128], index: 0, kind: input, shape index: {}]   ;;  %s19968_s1 = inlined_call_operand.vmem [shape: bf16[16,128], index: 1, kind: input, shape index: {}]   ;;  %s19969_s2 = inlined_call_operand.vmem [shape: f32[1,128], index: 2, kind: input, shape index: {}]   ;;  %s19970_s3 = inlined_call_operand.vmem [shape: bf16[128,128], index: 3, kind: input, shape index: {}]   ;;  %s19971_s4 = inlined_call_operand.vmem [shape: f32[1,128], index: 4, kind: input, shape index: {}]   ;;  %s19972_s5 = inlined_call_operand.vmem [shape: f32[128,8], index: 5, kind: input, shape index: {}]   ;;  %s19973_s6 = inlined_call_operand.vmem [shape: f32[1,8], index: 6, kind: input, shape index: {}]   ;;  %s19974_s7 = inlined_call_operand.vmem [shape: f32[3,8], index: 7, kind: input, shape index: {}]   ;;  %s19975_s8 = inlined_call_operand.vmem [shape: f32[4,4], index: 8, kind: input, shape index: {}]   ;;  %s19976_s9 = inlined_call_operand.vmem [shape: f32[1,4], index: 9, kind: input, shape index: {}]   ;;  %s19977_s10 = inlined_call_operand.vmem [shape: f32[4,4], index: 10, kind: input, shape index: {}]   ;;  %s19978_s11 = inlined_call_operand.vmem [shape: f32[1,4], index: 11, kind: input, shape index: {}]   ;;  %s19979_s12 = inlined_call_operand.vmem [shape: f32[4,12], index: 12, kind: input, shape index: {}]   ;;  %s19980_s13 = inlined_call_operand.vmem [shape: f32[1,12], index: 13, kind: input, shape index: {}]   ;;  %s19981_s14 = inlined_call_operand.vmem [shape: f32[4,8,4], index: 14, kind: input, shape index: {}]   ;;  %s19982_s15 = inlined_call_operand.vmem [shape: f32[4,1,4], index: 15, kind: input, shape index: {}]   ;;  %s19983_s16 = inlined_call_operand.vmem [shape: f32[4,4,4], index: 16, kind: input, shape index: {}]   ;;  %s19984_s17 = inlined_call_operand.vmem [shape: f32[4,1,4], index: 17, kind: input, shape index: {}]   ;;  %s19985_s18 = inlined_call_operand.vmem [shape: f32[4,4,15], index: 18, kind: input, shape index: {}]   ;;  %s19986_s19 = inlined_call_operand.vmem [shape: f32[4,1,15], index: 19, kind: input, shape index: {}]   ;;  %s19987_s20 = inlined_call_operand.vmem [shape: f32[256,128], index: 20, kind: output, shape index: {}]  }
   0x1   :  { %20272 = sst [smem:[#allocation177_spill]] %s19967_s0 }
   0x2   :  { %20273 = sst [smem:[#allocation178_spill]] %s19968_s1  ;;  %s14284_s1 = smov 0  }
   0x3   :  { %20274 = sst [smem:[#allocation179_spill]] %s19969_s2 }
   0x4   :  { %20275 = sst [smem:[#allocation180_spill]] %s19970_s3 }
   0x5   :  { %20276 = sst [smem:[#allocation181_spill]] %s19971_s4 }
   0x6 LB: > { %s11161_s22 = sadd.s32 4294967295, %s14164_s1   ;;  %p11165_p0 = scmp.ge.s32.totalorder %s14164_s1, 1  ;;  %s14164_s1 = sphi %s14284_s1, %s30_s1  }
   0x7   : > { %p563_p1 = scmp.lt.s32.totalorder %s14164_s1, 3 }
   0x9   : > { %p564_p2 = pnand %p11165_p0, %p563_p1 }
   0xb   : > { %567 = sbr.rel (%p564_p2) target bundleno = 7145 (0x1be9), region = 100 }
  0x12   : > { %s20277_s2 = sld [smem:[#allocation178_spill]]  ;;  %s11166_s25 = sshll.u32 %s11161_s22, 4  ;;  %vm673_vm0 = vcmask 130048   ;;  %v1003_v33 = vld [vmem:[%s19972_s5] sm:$0xff]  ;;  %v1004_v34 = vld [vmem:[%s19972_s5 + $0x8] sm:$0xff]  ;;  %v1005_v35 = vld [vmem:[%s19972_s5 + $0x10] sm:$0xff] }
  0x13   : > { %p622_p3 = scmp.lt.s32.totalorder %s11166_s25, 31  ;;  %s20278_s27 = sld [smem:[#allocation180_spill]]  ;;  %v14414_v36 = vpack.c.bf16 %v1004_v34, %v1003_v33  ;;  %v1006_v37 = vld [vmem:[%s19972_s5 + $0x18] sm:$0xff]  ;;  %v1007_v39 = vld [vmem:[%s19972_s5 + $0x20] sm:$0xff]  ;;  %v1008_v40 = vld [vmem:[%s19972_s5 + $0x28] sm:$0xff]  ;;  %vm1253_vm1 = vcmask 1042432  }
  0x14   : > { %s20279_s23 = sld [smem:[#allocation177_spill]]  ;;  %s14166_s30 = smov 112   ;;  %v14419_v38 = vpack.c.bf16 %v1006_v37, %v1005_v35  ;;  %v14435_v41 = vpack.c.bf16 %v1008_v40, %v1007_v39  ;;  %v1009_v42 = vld [vmem:[%s19972_s5 + $0x30] sm:$0xff]  ;;  %v1010_v43 = vld [vmem:[%s19972_s5 + $0x38] sm:$0xff]  ;;  %vm1220_vm2 = vcmask 23552   ;;  %vm2355_vm3 = vcmask 1043456  }
  0x15   : > { %s20998_s25 = smov (!%p622_p3, %s11166_s25), 31  ;;  %v14449_v44 = vpack.c.bf16 %v1010_v43, %v1009_v42  ;;  %s20280_s22 = sld [smem:[#allocation179_spill]]  ;;  %vm2258_vm4 = vcmask 31744   ;;  %vm3480_vm5 = vcmask 64512   ;;  %vm4594_vm6 = vcmask 56320  }
  0x16   : > { %s11167_s29 = sshll.u32 %s20998_s25, 3  ;;  %s14167_s4 = smov 113   ;;  %vm10936_vm7 = vcmask 261120   ;;  %vm10953_vm8 = vcmask 293888   ;;  %vm10970_vm9 = vcmask 326656   ;;  %vm10987_vm10 = vcmask 359424  }
  0x17   : > { %s14168_s0 = smov 109   ;;  %s14169_s26 = smov 124   ;;  %vm11004_vm11 = vcmask 392192   ;;  %vm11021_vm12 = vcmask 424960   ;;  %vm11038_vm13 = vcmask 457728   ;;  %vm11055_vm14 = vcmask 490496  }
  0x18   : > { %v13253_v0 = vld [vmem:[%s20277_s2] sm:$0xff]   ;;  %s14172_s3 = smov 121   ;;  %s14173_s2 = smov 32   ;;  %vm11072_vm15 = vcmask 523264  }
  0x19   : > { %12302 = vmatprep.subr.bf16.mxu0 %v13253_v0  ;;  %v13254_v1 = vld [vmem:[%s20278_s27] sm:$0xff]   ;;  %v13255_v2 = vld [vmem:[%s20278_s27 + $0x8] sm:$0xff]   ;;  %v13256_v3 = vld [vmem:[%s20278_s27 + $0x10] sm:$0xff]   ;;  %s14175_s21 = smov 44  }
  0x1a   : > { %12303 = vmatpush3.bf16.msra.mxu0 %v13253_v0  ;;  %12320 = vmatprep.subr.bf16.mxu1 %v13254_v1  ;;  %s14312_s24 = scalar_lea.vmem %s20279_s23, %s11167_s29  ;;  %v13257_v28 = vld [vmem:[%s20278_s27 + $0x18] sm:$0xff]   ;;  %v13258_v29 = vld [vmem:[%s20278_s27 + $0x20] sm:$0xff]   ;;  %v13259_v30 = vld [vmem:[%s20278_s27 + $0x28] sm:$0xff]   ;;  %s19578_s23 = scalar_lea.vmem %s19987_s20, %s11167_s29 }
  0x1b   : > { %12321 = vmatpush3.bf16.msra.mxu1 %v13254_v1  ;;  %v14315_v4 = vld [vmem:[%s14312_s24] sm:$0xff]  ;;  %v14318_v5 = vld [vmem:[%s14312_s24 + $0x8] sm:$0xff]  ;;  %v14321_v6 = vld [vmem:[%s14312_s24 + $0x10] sm:$0xff]  ;;  %13185 = vmatprep.subr.bf16.mxu0 %v14414_v36 }
  0x1c   : > { %12322 = vmatprep.subr.bf16.mxu1 %v13255_v2  ;;  %v652_v7 = vpack.c.bf16 %v14318_v5, %v14315_v4  ;;  %v14326_v8 = vld [vmem:[%s14312_s24 + $0x18] sm:$0xff]  ;;  %v14329_v9 = vld [vmem:[%s14312_s24 + $0x20] sm:$0xff]  ;;  %v14332_v10 = vld [vmem:[%s14312_s24 + $0x28] sm:$0xff]  ;;  %1188 = vrot.lane.b32.xlu0 %v14315_v4, %s14166_s30 }
  0x1d   : > { %v653_v11 = vpack.c.bf16 %v14326_v8, %v14321_v6  ;;  %v654_v12 = vpack.c.bf16 %v14332_v10, %v14329_v9  ;;  %v14341_v13 = vld [vmem:[%s14312_s24 + $0x30] sm:$0xff]  ;;  %v14345_v14 = vld [vmem:[%s14312_s24 + $0x38] sm:$0xff]  ;;  %v14348_v15 = vld [vmem:[%s14312_s24 + $0x40] sm:$0xff]  ;;  %1192 = vrot.lane.b32.xlu1 %v14321_v6, %s14166_s30 }
  0x1e   : > { %12304 = vmatprep.mubr.msk.bf16.mxu0 %vm673_vm0, %v652_v7  ;;  %v14351_v16 = vld [vmem:[%s14312_s24 + $0x48] sm:$0xff]  ;;  %v655_v17 = vpack.c.bf16 %v14345_v14, %v14341_v13  ;;  %v14360_v19 = vld [vmem:[%s14312_s24 + $0x50] sm:$0xff]  ;;  %v14363_v20 = vld [vmem:[%s14312_s24 + $0x58] sm:$0xff] }
  0x1f   : > { %12323 = vmatpush3.bf16.msra.mxu1 %v13255_v2  ;;  %12305 = vmatmul.mubr.msk.bf16.vlgmr.msra.gmra.mrb[0].mxu0 %vm673_vm0, %v653_v11  ;;  %v656_v18 = vpack.c.bf16 %v14351_v16, %v14348_v15  ;;  %v14366_v21 = vld [vmem:[%s14312_s24 + $0x60] sm:$0xff]  ;;  %v14369_v22 = vld [vmem:[%s14312_s24 + $0x68] sm:$0xff]  ;;  %v657_v23 = vpack.c.bf16 %v14363_v20, %v14360_v19  ;;  %v14378_v25 = vld [vmem:[%s14312_s24 + $0x70] sm:$0xff] }
  0x20   : > { %12324 = vmatprep.subr.bf16.mxu1 %v13256_v3  ;;  %12308 = vmatprep.mubr.msk.bf16.mxu0 %vm673_vm0, %v654_v12  ;;  %v658_v24 = vpack.c.bf16 %v14369_v22, %v14366_v21  ;;  %v14381_v26 = vld [vmem:[%s14312_s24 + $0x78] sm:$0xff]  ;;  %v13260_v31 = vld [vmem:[%s20278_s27 + $0x30] sm:$0xff]   ;;  %v14477_v45 = vld [vmem:[%s20280_s22] ss:$0 sm:$0xff]  ;;  %s14171_s22 = smov 125  }
  0x21   : > { %v659_v27 = vpack.c.bf16 %v14381_v26, %v14378_v25  ;;  %v13261_v32 = vld [vmem:[%s20278_s27 + $0x38] sm:$0xff]   ;;  %13187 = vmatpush3.bf16.msra.mxu0 %v14414_v36  ;;  %1190 = vrot.lane.b32.xlu0 %v14318_v5, %s14166_s30 }
  0x22   : > { %1194 = vrot.lane.b32.xlu1 %v14326_v8, %s14166_s30  ;;  %13189 = vmatprep.subr.bf16.mxu0 %v14419_v38 }
  0x23   : > { %12325 = vmatpush3.bf16.msra.mxu1 %v13256_v3 }
  0x24   : > { %12326 = vmatprep.subr.bf16.mxu1 %v13257_v28 }
  0x25   : > { %13191 = vmatpush3.bf16.msra.mxu0 %v14419_v38  ;;  %1196 = vrot.lane.b32.xlu0 %v14329_v9, %s14166_s30 }
  0x26   : > { %1198 = vrot.lane.b32.xlu1 %v14332_v10, %s14166_s30  ;;  %13193 = vmatprep.subr.bf16.mxu0 %v14435_v41 }
  0x27   : > { %12309 = vmatmul.mubr.msk.bf16.gmra.mrb[4].mxu0 %vm673_vm0, %v655_v17  ;;  %12327 = vmatpush3.bf16.msra.mxu1 %v13257_v28 }
  0x28   : > { %12312 = vmatprep.mubr.msk.bf16.mxu0 %vm673_vm0, %v656_v18  ;;  %12328 = vmatprep.subr.bf16.mxu1 %v13258_v29 }
  0x29   : > { %13195 = vmatpush3.bf16.msra.mxu0 %v14435_v41  ;;  %1200 = vrot.lane.b32.xlu0 %v14341_v13, %s14166_s30 }
  0x2a   : > { %1202 = vrot.lane.b32.xlu1 %v14345_v14, %s14166_s30  ;;  %13197 = vmatprep.subr.bf16.mxu0 %v14449_v44 }
  0x2b   : > { %12329 = vmatpush3.bf16.msra.mxu1 %v13258_v29 }
  0x2c   : > { %12330 = vmatprep.subr.bf16.mxu1 %v13259_v30 }
  0x2d   : > { %13199 = vmatpush3.bf16.msra.mxu0 %v14449_v44  ;;  %1204 = vrot.lane.b32.xlu0 %v14348_v15, %s14166_s30 }
  0x2e   : > { %1206 = vrot.lane.b32.xlu1 %v14351_v16, %s14166_s30 }
  0x2f   : > { %12313 = vmatmul.mubr.msk.bf16.gmra.mrb[8].mxu0 %vm673_vm0, %v657_v23  ;;  %12331 = vmatpush3.bf16.msra.mxu1 %v13259_v30 }
  0x30   : > { %12316 = vmatprep.mubr.msk.bf16.mxu0 %vm673_vm0, %v658_v24  ;;  %12332 = vmatprep.subr.bf16.mxu1 %v13260_v31 }
  0x31   : > { %1208 = vrot.lane.b32.xlu0 %v14360_v19, %s14166_s30 }
  0x32   : > { %1210 = vrot.lane.b32.xlu1 %v14363_v20, %s14166_s30 }
  0x33   : > { %12333 = vmatpush3.bf16.msra.mxu1 %v13260_v31 }
  0x34   : > { %12334 = vmatprep.subr.bf16.mxu1 %v13261_v32 }
  0x35   : > { %1212 = vrot.lane.b32.xlu0 %v14366_v21, %s14166_s30 }
  0x36   : > { %1214 = vrot.lane.b32.xlu1 %v14369_v22, %s14166_s30 }
  0x37   : > { %12317 = vmatmul.mubr.msk.bf16.gmra.mrb[12].mxu0 %vm673_vm0, %v659_v27  ;;  %12335 = vmatpush3.bf16.msra.mxu1 %v13261_v32 }
  0x38   : > { %13216 = vmatprep.subr.bf16.mxu1 %v14414_v36 }
  0x39   : > { %1216 = vrot.lane.b32.xlu0 %v14378_v25, %s14166_s30 }
  0x3a   : > { %1218 = vrot.lane.b32.xlu1 %v14381_v26, %s14166_s30  ;;  %s20281_s30 = sld [smem:[#allocation181_spill]] }
  0x3d   : > { %1914 = vrot.lane.b32.xlu0 %v14315_v4, %s14167_s4 }
  0x3e   : > { %1916 = vrot.lane.b32.xlu1 %v14318_v5, %s14167_s4 }
  0x41   : > { %1918 = vrot.lane.b32.xlu0 %v14321_v6, %s14167_s4 }
  0x42   : > { %1920 = vrot.lane.b32.xlu1 %v14326_v8, %s14167_s4 }
  0x45   : > { %1922 = vrot.lane.b32.xlu0 %v14329_v9, %s14167_s4 }
  0x46   : > { %1924 = vrot.lane.b32.xlu1 %v14332_v10, %s14167_s4 }
  0x49   : > { %1926 = vrot.lane.b32.xlu0 %v14341_v13, %s14167_s4 }
  0x4a   : > { %1928 = vrot.lane.b32.xlu1 %v14345_v14, %s14167_s4 }
  0x4d   : > { %1930 = vrot.lane.b32.xlu0 %v14348_v15, %s14167_s4 }
  0x4e   : > { %1932 = vrot.lane.b32.xlu1 %v14351_v16, %s14167_s4 }
  0x51   : > { %1934 = vrot.lane.b32.xlu0 %v14360_v19, %s14167_s4 }
  0x52   : > { %1936 = vrot.lane.b32.xlu1 %v14363_v20, %s14167_s4 }
  0x55   : > { %1938 = vrot.lane.b32.xlu0 %v14366_v21, %s14167_s4 }
  0x56   : > { %1940 = vrot.lane.b32.xlu1 %v14369_v22, %s14167_s4 }
  0x59   : > { %1942 = vrot.lane.b32.xlu0 %v14378_v25, %s14167_s4 }
  0x5a   : > { %1944 = vrot.lane.b32.xlu1 %v14381_v26, %s14167_s4  ;;  %s14174_s4 = smov 36  }
  0x5d   : > { %2106 = vrot.lane.b32.xlu0 %v14315_v4, %s14168_s0  ;;  %v14572_v4 = vld [vmem:[%s20281_s30] ss:$0 sm:$0xff]  ;;  %s14176_s30 = smov 52  }
  0x5e   : > { %2108 = vrot.lane.b32.xlu1 %v14318_v5, %s14168_s0 }
  0x61   : > { %2110 = vrot.lane.b32.xlu0 %v14321_v6, %s14168_s0 }
  0x62   : > { %2112 = vrot.lane.b32.xlu1 %v14326_v8, %s14168_s0 }
  0x65   : > { %2114 = vrot.lane.b32.xlu0 %v14329_v9, %s14168_s0 }
  0x66   : > { %2116 = vrot.lane.b32.xlu1 %v14332_v10, %s14168_s0 }
  0x69   : > { %2118 = vrot.lane.b32.xlu0 %v14341_v13, %s14168_s0 }
  0x6a   : > { %2120 = vrot.lane.b32.xlu1 %v14345_v14, %s14168_s0 }
  0x6d   : > { %2122 = vrot.lane.b32.xlu0 %v14348_v15, %s14168_s0 }
  0x6e   : > { %2124 = vrot.lane.b32.xlu1 %v14351_v16, %s14168_s0 }
  0x71   : > { %2126 = vrot.lane.b32.xlu0 %v14360_v19, %s14168_s0 }
  0x72   : > { %2128 = vrot.lane.b32.xlu1 %v14363_v20, %s14168_s0 }
  0x75   : > { %2130 = vrot.lane.b32.xlu0 %v14366_v21, %s14168_s0 }
  0x76   : > { %2132 = vrot.lane.b32.xlu1 %v14369_v22, %s14168_s0 }
  0x7a   : > { %2134 = vrot.lane.b32.xlu1 %v14378_v25, %s14168_s0 }
  0x7e   : > { %2136 = vrot.lane.b32.xlu1 %v14381_v26, %s14168_s0  ;;  %s14170_s0 = smov 4  }
  0xf2   : > { %v12306_v46 = vpop.f32.mrb[0].mxu0 }
  0xf3   : > { %v741_v47 = vadd.f32 %v12306_v46, %v14477_v45  ;;  %v732_v48 = vpop.f32.mrb[1].mxu0 }
  0xf4   : > { %v733_v49 = vadd.f32 %v14477_v45, %v732_v48  ;;  %v12307_v50 = vpop.f32.mrb[2].mxu0 }
  0xf5   : > { %13262 = vtanh.f32 %v741_v47  ;;  %v744_v51 = vadd.f32 %v12307_v50, %v14477_v45  ;;  %v735_v52 = vpop.f32.mrb[3].mxu0 }
  0xf6   : > { %13264 = vtanh.f32 %v733_v49  ;;  %v736_v53 = vadd.f32 %v14477_v45, %v735_v52 }
  0xf7   : > { %13266 = vtanh.f32 %v744_v51 }
  0xf8   : > { %13268 = vtanh.f32 %v736_v53 }
  0xfa   : > { %v12310_v54 = vpop.f32.mrb[4].mxu0 }
  0xfb   : > { %v757_v55 = vadd.f32 %v12310_v54, %v14477_v45  ;;  %v748_v56 = vpop.f32.mrb[5].mxu0 }
  0xfc   : > { %v749_v57 = vadd.f32 %v14477_v45, %v748_v56  ;;  %v12311_v58 = vpop.f32.mrb[6].mxu0  ;;  %v1012_v56 = vld [vmem:[%s19972_s5 + $0x48] sm:$0xff] }
  0xfd   : > { %13270 = vtanh.f32 %v757_v55  ;;  %v760_v59 = vadd.f32 %v12311_v58, %v14477_v45  ;;  %v751_v60 = vpop.f32.mrb[7].mxu0  ;;  %v1014_v58 = vld [vmem:[%s19972_s5 + $0x58] sm:$0xff] }
  0xfe   : > { %13272 = vtanh.f32 %v749_v57  ;;  %v752_v61 = vadd.f32 %v14477_v45, %v751_v60  ;;  %v1015_v60 = vld [vmem:[%s19972_s5 + $0x60] sm:$0xff] }
  0xff   : > { %v13263_v62 = vpop.eup %13262  ;;  %13274 = vtanh.f32 %v760_v59 }
 0x100   : > { %v13265_v63 = vpop.eup %13264  ;;  %13276 = vtanh.f32 %v752_v61  ;;  %v1016_v61 = vld [vmem:[%s19972_s5 + $0x68] sm:$0xff] }
 0x101   : > { %v13267_v0 = vpop.eup %13266 }
 0x102   : > { %v13269_v1 = vpop.eup %13268  ;;  %v12314_v2 = vpop.f32.mrb[8].mxu0  ;;  %v828_v3 = vpack.c.bf16 %v13267_v0, %v13263_v62  ;;  %v13208_v62 = vpack.c.bf16 %v1016_v61, %v1015_v60  ;;  %v1018_v0 = vld [vmem:[%s19972_s5 + $0x78] sm:$0xff] }
 0x103   : > { %v773_v7 = vadd.f32 %v12314_v2, %v14477_v45  ;;  %v764_v11 = vpop.f32.mrb[9].mxu0  ;;  %v827_v12 = vpack.c.bf16 %v13269_v1, %v13265_v63  ;;  %v1017_v63 = vld [vmem:[%s19972_s5 + $0x70] sm:$0xff]  ;;  %v14529_v2 = vld [vmem:[%s19974_s7] sm:$0x7] }
 0x104   : > { %v765_v17 = vadd.f32 %v14477_v45, %v764_v11  ;;  %v12315_v18 = vpop.f32.mrb[10].mxu0  ;;  %v13212_v1 = vpack.c.bf16 %v1018_v0, %v1017_v63 }
 0x105   : > { %13278 = vtanh.f32 %v773_v7  ;;  %v776_v23 = vadd.f32 %v12315_v18, %v14477_v45  ;;  %v767_v24 = vpop.f32.mrb[11].mxu0  ;;  %12336 = vmatprep.mubr.bf16.mxu1 %v827_v12 }
 0x106   : > { %13280 = vtanh.f32 %v765_v17  ;;  %v768_v27 = vadd.f32 %v14477_v45, %v767_v24  ;;  %12337 = vmatmul.mubr.bf16.vlgmr.msra.gmra.mrb[0].mxu1 %v828_v3 }
 0x107   : > { %v13271_v28 = vpop.eup %13270  ;;  %13282 = vtanh.f32 %v776_v23  ;;  %13224 = vmatpush3.bf16.msra.mxu1 %v14414_v36 }
 0x108   : > { %v13273_v29 = vpop.eup %13272  ;;  %13284 = vtanh.f32 %v768_v27  ;;  %13217 = vmatprep.subr.bf16.mxu1 %v14419_v38 }
 0x109   : > { %v13275_v30 = vpop.eup %13274 }
 0x10a   : > { %v13277_v31 = vpop.eup %13276  ;;  %v12318_v32 = vpop.f32.mrb[12].mxu0  ;;  %v830_v33 = vpack.c.bf16 %v13275_v30, %v13271_v28 }
 0x10b   : > { %v789_v34 = vadd.f32 %v12318_v32, %v14477_v45  ;;  %v780_v35 = vpop.f32.mrb[13].mxu0  ;;  %v829_v37 = vpack.c.bf16 %v13277_v31, %v13273_v29  ;;  %13225 = vmatpush3.bf16.msra.mxu1 %v14419_v38 }
 0x10c   : > { %v781_v39 = vadd.f32 %v14477_v45, %v780_v35  ;;  %v12319_v40 = vpop.f32.mrb[14].mxu0  ;;  %13218 = vmatprep.subr.bf16.mxu1 %v14435_v41 }
 0x10d   : > { %13286 = vtanh.f32 %v789_v34  ;;  %v792_v36 = vadd.f32 %v12319_v40, %v14477_v45  ;;  %v783_v42 = vpop.f32.mrb[15].mxu0  ;;  %12340 = vmatprep.mubr.bf16.mxu1 %v829_v37 }
 0x10e   : > { %13288 = vtanh.f32 %v781_v39  ;;  %v784_v43 = vadd.f32 %v14477_v45, %v783_v42  ;;  %12341 = vmatmul.mubr.bf16.gmra.mrb[4].mxu1 %v830_v33 }
 0x10f   : > { %v13279_v46 = vpop.eup %13278  ;;  %13290 = vtanh.f32 %v792_v36  ;;  %13226 = vmatpush3.bf16.msra.mxu1 %v14435_v41  ;;  %v1011_v41 = vld [vmem:[%s19972_s5 + $0x40] sm:$0xff] }
 0x110   : > { %v13281_v47 = vpop.eup %13280  ;;  %13292 = vtanh.f32 %v784_v43  ;;  %13219 = vmatprep.subr.bf16.mxu1 %v14449_v44  ;;  %v13200_v57 = vpack.c.bf16 %v1012_v56, %v1011_v41 }
 0x111   : > { %v13283_v38 = vpop.eup %13282 }
 0x112   : > { %v13285_v48 = vpop.eup %13284  ;;  %v832_v49 = vpack.c.bf16 %v13283_v38, %v13279_v46  ;;  %13201 = vmatprep.subr.bf16.mxu0 %v13200_v57 }
 0x113   : > { %v831_v50 = vpack.c.bf16 %v13285_v48, %v13281_v47  ;;  %13227 = vmatpush3.bf16.msra.mxu1 %v14449_v44  ;;  %13203 = vmatpush3.bf16.msra.mxu0 %v13200_v57  ;;  %v1013_v44 = vld [vmem:[%s19972_s5 + $0x50] sm:$0xff] }
 0x114   : > { %13220 = vmatprep.subr.bf16.mxu1 %v13200_v57  ;;  %v13204_v59 = vpack.c.bf16 %v1014_v58, %v1013_v44 }
 0x115   : > { %12344 = vmatprep.mubr.bf16.mxu1 %v831_v50  ;;  %v1189_v50 = vpop.permute.xlu0 %1188 }
 0x116   : > { %12345 = vmatmul.mubr.bf16.gmra.mrb[8].mxu1 %v832_v49  ;;  %13205 = vmatprep.subr.bf16.mxu0 %v13204_v59 }
 0x117   : > { %v13287_v51 = vpop.eup %13286  ;;  %13228 = vmatpush3.bf16.msra.mxu1 %v13200_v57  ;;  %13207 = vmatpush3.bf16.msra.mxu0 %v13204_v59 }
 0x118   : > { %v13289_v52 = vpop.eup %13288  ;;  %13221 = vmatprep.subr.bf16.mxu1 %v13204_v59  ;;  %13209 = vmatprep.subr.bf16.mxu0 %v13208_v62 }
 0x119   : > { %v13291_v45 = vpop.eup %13290 }
 0x11a   : > { %v13293_v53 = vpop.eup %13292  ;;  %v834_v54 = vpack.c.bf16 %v13291_v45, %v13287_v51 }
 0x11b   : > { %v833_v55 = vpack.c.bf16 %v13293_v53, %v13289_v52  ;;  %13229 = vmatpush3.bf16.msra.mxu1 %v13204_v59  ;;  %13211 = vmatpush3.bf16.msra.mxu0 %v13208_v62  ;;  %v1193_v52 = vpop.permute.xlu1 %1192 }
 0x11c   : > { %13222 = vmatprep.subr.bf16.mxu1 %v13208_v62  ;;  %13213 = vmatprep.subr.bf16.mxu0 %v13212_v1 }
 0x11d   : > { %12348 = vmatprep.mubr.bf16.mxu1 %v833_v55 }
 0x11e   : > { %12349 = vmatmul.mubr.bf16.gmra.mrb[12].mxu1 %v834_v54  ;;  %v1191_v54 = vpop.permute.xlu0 %1190 }
 0x11f   : > { %13230 = vmatpush3.bf16.msra.mxu1 %v13208_v62  ;;  %13215 = vmatpush3.bf16.msra.mxu0 %v13212_v1  ;;  %v1195_v41 = vpop.permute.xlu1 %1194 }
 0x120   : > { %13223 = vmatprep.subr.bf16.mxu1 %v13212_v1 }
 0x122   : > { %v1197_v57 = vpop.permute.xlu0 %1196 }
 0x123   : > { %13231 = vmatpush3.bf16.msra.mxu1 %v13212_v1  ;;  %v1199_v44 = vpop.permute.xlu1 %1198 }
 0x124   : > { %12408 = vmatprep.subr.msk.mxu1 %vm1253_vm1, %v14529_v2 }
 0x126   : > { %v1201_v58 = vpop.permute.xlu0 %1200 }
 0x127   : > { %v1203_v59 = vpop.permute.xlu1 %1202 }
 0x12a   : > { %v1205_v60 = vpop.permute.xlu0 %1204 }
 0x12b   : > { %v1207_v61 = vpop.permute.xlu1 %1206 }
 0x12e   : > { %v1209_v62 = vpop.permute.xlu0 %1208 }
 0x12f   : > { %v1211_v63 = vpop.permute.xlu1 %1210 }
 0x132   : > { %v1213_v0 = vpop.permute.xlu0 %1212 }
 0x133   : > { %v1215_v1 = vpop.permute.xlu1 %1214 }
 0x1d9   : > { %v12338_v5 = vpop.f32.mrb[0].mxu1 }
 0x1da   : > { %v924_v6 = vpop.f32.mrb[1].mxu1  ;;  %v933_v10 = vadd.f32 %v12338_v5, %v14572_v4  ;;  %v14623_v5 = vld [vmem:[%s19973_s6] ss:$0 sm:$0xff] }
 0x1db   : > { %v925_v8 = vadd.f32 %v14572_v4, %v924_v6  ;;  %v12339_v9 = vpop.f32.mrb[2].mxu1 }
 0x1dc   : > { %v927_v13 = vpop.f32.mrb[3].mxu1  ;;  %v936_v15 = vadd.f32 %v12339_v9, %v14572_v4 }
 0x1dd   : > { %13294 = vtanh.f32 %v925_v8  ;;  %v928_v14 = vadd.f32 %v14572_v4, %v927_v13 }
 0x1df   : > { %13296 = vtanh.f32 %v928_v14 }
 0x1e0   : > { %13298 = vtanh.f32 %v933_v10 }
 0x1e1   : > { %v12342_v16 = vpop.f32.mrb[4].mxu1  ;;  %13300 = vtanh.f32 %v936_v15 }
 0x1e2   : > { %v940_v20 = vpop.f32.mrb[5].mxu1  ;;  %v949_v7 = vadd.f32 %v12342_v16, %v14572_v4 }
 0x1e3   : > { %v941_v19 = vadd.f32 %v14572_v4, %v940_v20  ;;  %v12343_v3 = vpop.f32.mrb[6].mxu1 }
 0x1e4   : > { %v943_v11 = vpop.f32.mrb[7].mxu1  ;;  %v952_v17 = vadd.f32 %v12343_v3, %v14572_v4 }
 0x1e5   : > { %13302 = vtanh.f32 %v941_v19  ;;  %v944_v12 = vadd.f32 %v14572_v4, %v943_v11 }
 0x1e7   : > { %v13295_v22 = vpop.eup %13294  ;;  %13304 = vtanh.f32 %v944_v12 }
 0x1e8   : > { %13306 = vtanh.f32 %v949_v7  ;;  %12384 = vmatprep.mubr.f32.mxu0 %v13295_v22 }
 0x1e9   : > { %v13297_v21 = vpop.eup %13296  ;;  %v12346_v18 = vpop.f32.mrb[8].mxu1  ;;  %13308 = vtanh.f32 %v952_v17 }
 0x1ea   : > { %v13299_v23 = vpop.eup %13298  ;;  %v965_v25 = vadd.f32 %v12346_v18, %v14572_v4  ;;  %v956_v24 = vpop.f32.mrb[9].mxu1  ;;  %12385 = vmatmul.mubr.f32.vlgmr.msra.gmra.mrb[16].mxu0 %v13297_v21 }
 0x1eb   : > { %v957_v27 = vadd.f32 %v14572_v4, %v956_v24  ;;  %v12347_v28 = vpop.f32.mrb[10].mxu1  ;;  %12387 = vmatprep.mubr.f32.mxu0 %v13299_v23  ;;  %v13301_v30 = vpop.eup %13300 }
 0x1ec   : > { %v959_v29 = vpop.f32.mrb[11].mxu1  ;;  %v968_v31 = vadd.f32 %v12347_v28, %v14572_v4 }
 0x1ed   : > { %13310 = vtanh.f32 %v957_v27  ;;  %v960_v26 = vadd.f32 %v14572_v4, %v959_v29 }
 0x1ee   : > { %13312 = vtanh.f32 %v965_v25  ;;  %12388 = vmatmul.mubr.f32.gmra.mrb[18].mxu0 %v13301_v30 }
 0x1ef   : > { %v13303_v32 = vpop.eup %13302  ;;  %13314 = vtanh.f32 %v960_v26 }
 0x1f0   : > { %12390 = vmatprep.mubr.f32.mxu0 %v13303_v32  ;;  %13316 = vtanh.f32 %v968_v31 }
 0x1f1   : > { %v13305_v33 = vpop.eup %13304  ;;  %v12350_v34 = vpop.f32.mrb[12].mxu1 }
 0x1f2   : > { %v13307_v35 = vpop.eup %13306  ;;  %v981_v37 = vadd.f32 %v12350_v34, %v14572_v4  ;;  %v972_v39 = vpop.f32.mrb[13].mxu1  ;;  %12391 = vmatmul.mubr.f32.gmra.mrb[20].mxu0 %v13305_v33 }
 0x1f3   : > { %v973_v40 = vadd.f32 %v14572_v4, %v972_v39  ;;  %v12351_v36 = vpop.f32.mrb[14].mxu1  ;;  %12393 = vmatprep.mubr.f32.mxu0 %v13307_v35  ;;  %v13309_v43 = vpop.eup %13308 }
 0x1f4   : > { %v975_v42 = vpop.f32.mrb[15].mxu1  ;;  %v984_v46 = vadd.f32 %v12351_v36, %v14572_v4 }
 0x1f5   : > { %13318 = vtanh.f32 %v973_v40  ;;  %v976_v47 = vadd.f32 %v14572_v4, %v975_v42  ;;  %v1219_v4 = vpop.permute.xlu1 %1218 }
 0x1f6   : > { %13320 = vtanh.f32 %v981_v37  ;;  %12394 = vmatmul.mubr.f32.gmra.mrb[22].mxu0 %v13309_v43 }
 0x1f7   : > { %v13311_v38 = vpop.eup %13310  ;;  %13322 = vtanh.f32 %v976_v47 }
 0x1f8   : > { %v13313_v48 = vpop.eup %13312  ;;  %12396 = vmatprep.mubr.f32.mxu1 %v13311_v38  ;;  %13324 = vtanh.f32 %v984_v46 }
 0x1f9   : > { %v13315_v49 = vpop.eup %13314  ;;  %v1917_v19 = vpop.permute.xlu1 %1916 }
 0x1fa   : > { %12397 = vmatmul.mubr.f32.vlgmr.msra.gmra.mrb[16].mxu1 %v13315_v49  ;;  %v13317_v51 = vpop.eup %13316 }
 0x1fb   : > { %12399 = vmatprep.mubr.f32.mxu1 %v13313_v48  ;;  %12409 = vmatpush3.msk.msra.mxu1 %vm1253_vm1, %v14529_v2  ;;  %v1217_v2 = vpop.permute.xlu0 %1216 }
 0x1fd   : > { %v1921_v28 = vpop.permute.xlu1 %1920 }
 0x1fe   : > { %12400 = vmatmul.mubr.f32.gmra.mrb[18].mxu1 %v13317_v51 }
 0x1ff   : > { %v13319_v45 = vpop.eup %13318  ;;  %v1915_v23 = vpop.permute.xlu0 %1914 }
 0x200   : > { %v13321_v53 = vpop.eup %13320  ;;  %12402 = vmatprep.mubr.f32.mxu1 %v13319_v45  ;;  %v2250_v45 = vld [vmem:[%s19975_s8] sm:$0xf] }
 0x201   : > { %v13323_v55 = vpop.eup %13322  ;;  %v1925_v47 = vpop.permute.xlu1 %1924  ;;  %12434 = vmatprep.subr.msk.mxu0 %vm2355_vm3, %v2250_v45 }
 0x202   : > { %12403 = vmatmul.mubr.f32.gmra.mrb[20].mxu1 %v13323_v55  ;;  %v13325_v56 = vpop.eup %13324  ;;  %12435 = vmatpush3.msk.msra.mxu0 %vm2355_vm3, %v2250_v45 }
 0x203   : > { %12405 = vmatprep.mubr.f32.mxu1 %v13321_v53  ;;  %v1919_v37 = vpop.permute.xlu0 %1918 }
 0x206   : > { %12406 = vmatmul.mubr.f32.gmra.mrb[22].mxu1 %v13325_v56 }
 0x207   : > { %12410 = vmatprep.mubr.msk.f32.mxu1 %vm1220_vm2, %v1189_v50 }
 0x20a   : > { %12411 = vmatmul.mubr.msk.f32.vlgmr.msra.gmra.mrb[24].mxu1 %vm1220_vm2, %v1191_v54 }
 0x20b   : > { %12413 = vmatprep.mubr.msk.f32.mxu1 %vm1220_vm2, %v1193_v52 }
 0x20e   : > { %12414 = vmatmul.mubr.msk.f32.gmra.mrb[26].mxu1 %vm1220_vm2, %v1195_v41 }
 0x20f   : > { %12416 = vmatprep.mubr.msk.f32.mxu1 %vm1220_vm2, %v1197_v57  ;;  %v1923_v57 = vpop.permute.xlu0 %1922 }
 0x212   : > { %12417 = vmatmul.mubr.msk.f32.gmra.mrb[28].mxu1 %vm1220_vm2, %v1199_v44 }
 0x213   : > { %12419 = vmatprep.mubr.msk.f32.mxu1 %vm1220_vm2, %v1201_v58 }
 0x216   : > { %12420 = vmatmul.mubr.msk.f32.gmra.mrb[30].mxu1 %vm1220_vm2, %v1203_v59 }
 0x217   : > { %12422 = vmatprep.mubr.msk.f32.mxu1 %vm1220_vm2, %v1205_v60 }
 0x21a   : > { %12423 = vmatmul.mubr.msk.f32.gmra.mrb[32].mxu1 %vm1220_vm2, %v1207_v61 }
 0x21b   : > { %12425 = vmatprep.mubr.msk.f32.mxu1 %vm1220_vm2, %v1209_v62 }
 0x21e   : > { %12426 = vmatmul.mubr.msk.f32.gmra.mrb[34].mxu1 %vm1220_vm2, %v1211_v63  ;;  %v1929_v63 = vpop.permute.xlu1 %1928 }
 0x21f   : > { %12428 = vmatprep.mubr.msk.f32.mxu1 %vm1220_vm2, %v1213_v0 }
 0x222   : > { %12429 = vmatmul.mubr.msk.f32.gmra.mrb[36].mxu1 %vm1220_vm2, %v1215_v1 }
 0x223   : > { %12431 = vmatprep.mubr.msk.f32.mxu1 %vm1220_vm2, %v1217_v2 }
 0x226   : > { %12432 = vmatmul.mubr.msk.f32.gmra.mrb[38].mxu1 %vm1220_vm2, %v1219_v4 }
 0x2bd   : > { %v12386_v6 = vpop.f32.mrb[16].mxu0 }
 0x2be   : > { %v14626_v8 = vadd.f32 %v12386_v6, %v14623_v5  ;;  %v1092_v9 = vpop.f32.mrb[17].mxu0 }
 0x2bf   : > { %v14629_v10 = vadd.f32 %v14623_v5, %v1092_v9 }
 0x2c0   : > { %20282 = vst [vmem:[#allocation2_spill] sm:$0xff] %v14626_v8  ;;  %v1867_v13 = vmul.f32 0.5, %v14626_v8 }
 0x2c1   : > { %20283 = vst [vmem:[#allocation3_spill] sm:$0xff] %v14629_v10  ;;  %v12389_v14 = vpop.f32.mrb[18].mxu0  ;;  %v1866_v15 = vmul.f32 0.5, %v14629_v10 }
 0x2c2   : > { %v14634_v16 = vadd.f32 %v12389_v14, %v14623_v5  ;;  %v1102_v20 = vpop.f32.mrb[19].mxu0  ;;  %v1884_v3 = vmul.f32 1.442695, %v1867_v13 }
 0x2c3   : > { %v14637_v7 = vadd.f32 %v14623_v5, %v1102_v20  ;;  %v1882_v11 = vmul.f32 1.442695, %v1866_v15 }
 0x2c4   : > { %20284 = vst [vmem:[#allocation4_spill] sm:$0xff] %v14634_v16  ;;  %13326 = vpow2.f32 %v1884_v3  ;;  %v1869_v12 = vmul.f32 0.5, %v14634_v16 }
 0x2c5   : > { %20285 = vst [vmem:[#allocation5_spill] sm:$0xff] %v14637_v7  ;;  %v12392_v22 = vpop.f32.mrb[20].mxu0  ;;  %v1868_v17 = vmul.f32 0.5, %v14637_v7  ;;  %13328 = vpow2.f32 %v1882_v11  ;;  %v1927_v11 = vpop.permute.xlu0 %1926 }
 0x2c6   : > { %v14642_v21 = vadd.f32 %v12392_v22, %v14623_v5  ;;  %v1112_v18 = vpop.f32.mrb[21].mxu0  ;;  %v1888_v25 = vmul.f32 1.442695, %v1869_v12 }
 0x2c7   : > { %v14645_v24 = vadd.f32 %v14623_v5, %v1112_v18  ;;  %v1886_v27 = vmul.f32 1.442695, %v1868_v17 }
 0x2c8   : > { %20286 = vst [vmem:[#allocation6_spill] sm:$0xff] %v14642_v21  ;;  %13330 = vpow2.f32 %v1888_v25  ;;  %v1871_v29 = vmul.f32 0.5, %v14642_v21 }
 0x2c9   : > { %20287 = vst [vmem:[#allocation7_spill] sm:$0xff] %v14645_v24  ;;  %v12395_v30 = vpop.f32.mrb[22].mxu0  ;;  %v1870_v31 = vmul.f32 0.5, %v14645_v24  ;;  %13332 = vpow2.f32 %v1886_v27 }
 0x2ca   : > { %v14650_v26 = vadd.f32 %v12395_v30, %v14623_v5  ;;  %v1122_v32 = vpop.f32.mrb[23].mxu0  ;;  %v1892_v33 = vmul.f32 1.442695, %v1871_v29  ;;  %v1931_v30 = vpop.permute.xlu0 %1930 }
 0x2cb   : > { %v14653_v34 = vadd.f32 %v14623_v5, %v1122_v32  ;;  %v1890_v35 = vmul.f32 1.442695, %v1870_v31 }
 0x2cc   : > { %20288 = vst [vmem:[#allocation8_spill] sm:$0xff] %v14650_v26  ;;  %13334 = vpow2.f32 %v1892_v33  ;;  %v1873_v39 = vmul.f32 0.5, %v14650_v26 }
 0x2cd   : > { %20289 = vst [vmem:[#allocation9_spill] sm:$0xff] %v14653_v34  ;;  %v12398_v40 = vpop.f32.mrb[16].mxu1  ;;  %v1872_v36 = vmul.f32 0.5, %v14653_v34  ;;  %13336 = vpow2.f32 %v1890_v35 }
 0x2ce   : > { %v13327_v42 = vpop.eup %13326  ;;  %v14658_v43 = vadd.f32 %v12398_v40, %v14623_v5  ;;  %v1132_v46 = vpop.f32.mrb[17].mxu1  ;;  %v1896_v38 = vmul.f32 1.442695, %v1873_v39 }
 0x2cf   : > { %v1963_v48 = vmul.f32 %v13327_v42, %v1917_v19  ;;  %v14661_v49 = vadd.f32 %v14623_v5, %v1132_v46  ;;  %v1894_v50 = vmul.f32 1.442695, %v1872_v36  ;;  %v13329_v51 = vpop.eup %13328 }
 0x2d0   : > { %20290 = vst [vmem:[#allocation10_spill] sm:$0xff] %v14658_v43  ;;  %13338 = vpow2.f32 %v1896_v38  ;;  %v1875_v52 = vmul.f32 0.5, %v14658_v43  ;;  %v1962_v58 = vmul.f32 %v13329_v51, %v1915_v23  ;;  %v1933_v23 = vpop.permute.xlu1 %1932 }
 0x2d1   : > { %20291 = vst [vmem:[#allocation11_spill] sm:$0xff] %v14661_v49  ;;  %v12401_v53 = vpop.f32.mrb[18].mxu1  ;;  %1996 = vrot.lane.b32.xlu0 %v1963_v48, %s14169_s26  ;;  %v1874_v54 = vmul.f32 0.5, %v14661_v49  ;;  %13340 = vpow2.f32 %v1894_v50 }
 0x2d2   : > { %v13331_v55 = vpop.eup %13330  ;;  %v14671_v41 = vadd.f32 %v12401_v53, %v14623_v5  ;;  %v1142_v56 = vpop.f32.mrb[19].mxu1  ;;  %v1900_v44 = vmul.f32 1.442695, %v1875_v52 }
 0x2d3   : > { %v1965_v59 = vmul.f32 %v13331_v55, %v1921_v28  ;;  %v14675_v60 = vadd.f32 %v14623_v5, %v1142_v56  ;;  %v1898_v61 = vmul.f32 1.442695, %v1874_v54  ;;  %v13333_v62 = vpop.eup %13332  ;;  %v1935_v55 = vpop.permute.xlu0 %1934 }
 0x2d4   : > { %20292 = vst [vmem:[#allocation12_spill] sm:$0xff] %v14671_v41  ;;  %13342 = vpow2.f32 %v1900_v44  ;;  %v1877_v0 = vmul.f32 0.5, %v14671_v41  ;;  %v1964_v13 = vmul.f32 %v13333_v62, %v1919_v37  ;;  %v1937_v38 = vpop.permute.xlu1 %1936 }
 0x2d5   : > { %20293 = vst [vmem:[#allocation13_spill] sm:$0xff] %v14675_v60  ;;  %2000 = vrot.lane.b32.xlu1 %v1965_v59, %s14169_s26  ;;  %1994 = vrot.lane.b32.xlu0 %v1962_v58, %s14169_s26  ;;  %v12404_v1 = vpop.f32.mrb[20].mxu1  ;;  %13344 = vpow2.f32 %v1898_v61  ;;  %v1876_v2 = vmul.f32 0.5, %v14675_v60 }
 0x2d6   : > { %v13335_v4 = vpop.eup %13334  ;;  %v1152_v6 = vpop.f32.mrb[21].mxu1  ;;  %v1904_v9 = vmul.f32 1.442695, %v1877_v0  ;;  %v14685_v3 = vadd.f32 %v12404_v1, %v14623_v5 }
 0x2d7   : > { %v1967_v14 = vmul.f32 %v13335_v4, %v1925_v47  ;;  %v14682_v15 = vadd.f32 %v14623_v5, %v1152_v6  ;;  %v1902_v20 = vmul.f32 1.442695, %v1876_v2  ;;  %v13337_v19 = vpop.eup %13336 }
 0x2d8   : > { %20295 = vst [vmem:[#allocation15_spill] sm:$0xff] %v14685_v3  ;;  %13346 = vpow2.f32 %v1904_v9  ;;  %v1966_v25 = vmul.f32 %v13337_v19, %v1923_v57  ;;  %v1879_v31 = vmul.f32 0.5, %v14685_v3 }
 0x2d9   : > { %20294 = vst [vmem:[#allocation14_spill] sm:$0xff] %v14682_v15  ;;  %2004 = vrot.lane.b32.xlu1 %v1967_v14, %s14169_s26  ;;  %1998 = vrot.lane.b32.xlu0 %v1964_v13, %s14169_s26  ;;  %v12407_v12 = vpop.f32.mrb[22].mxu1  ;;  %13348 = vpow2.f32 %v1902_v20  ;;  %v1878_v22 = vmul.f32 0.5, %v14682_v15  ;;  %v1939_v13 = vpop.permute.xlu0 %1938 }
 0x2da   : > { %v13339_v17 = vpop.eup %13338  ;;  %v14690_v18 = vpop.f32.mrb[23].mxu1  ;;  %v14698_v35 = vadd.f32 %v12407_v12, %v14623_v5  ;;  %v1908_v48 = vmul.f32 1.442695, %v1879_v31 }
 0x2db   : > { %v1969_v27 = vmul.f32 %v13339_v17, %v1929_v63  ;;  %v1906_v28 = vmul.f32 1.442695, %v1878_v22  ;;  %v13341_v29 = vpop.eup %13340 }
 0x2dc   : > { %20297 = vst [vmem:[#allocation17_spill] sm:$0xff] %v14698_v35  ;;  %v1968_v36 = vmul.f32 %v13341_v29, %v1927_v11  ;;  %v1881_v44 = vmul.f32 0.5, %v14698_v35  ;;  %v1941_v29 = vpop.permute.xlu1 %1940 }
 0x2dd   : > { %v14693_v32 = vpop.f32.mrb[24].mxu1  ;;  %2008 = vrot.lane.b32.xlu1 %v1969_v27, %s14169_s26  ;;  %2002 = vrot.lane.b32.xlu0 %v1966_v25, %s14169_s26  ;;  %13350 = vpow2.f32 %v1906_v28 }
 0x2de   : > { %20296 = vst [vmem:[#allocation16_spill] sm:$0xff] %v14693_v32  ;;  %v13343_v33 = vpop.eup %13342  ;;  %v1403_v37 = vsub.f32 %v14626_v8, %v14693_v32  ;;  %v14702_v39 = vpop.f32.mrb[25].mxu1  ;;  %v1912_v2 = vmul.f32 1.442695, %v1881_v44 }
 0x2df   : > { %20298 = vst [vmem:[#allocation18_spill] sm:$0xff] %v14702_v39  ;;  %v13345_v40 = vpop.eup %13344  ;;  %v1971_v42 = vmul.f32 %v13343_v33, %v1933_v23  ;;  %v14706_v46 = vsub.f32 %v14629_v10, %v14702_v39 }
 0x2e0   : > { %v1420_v47 = vmul.f32 1.442695, %v1403_v37  ;;  %v1970_v52 = vmul.f32 %v13345_v40, %v1931_v30  ;;  %v1723_v4 = vand.u32 2147483647, %v1403_v37 }
 0x2e1   : > { %v1418_v50 = vmul.f32 1.442695, %v14706_v46  ;;  %v14709_v51 = vpop.f32.mrb[26].mxu1  ;;  %2012 = vrot.lane.b32.xlu1 %v1971_v42, %s14169_s26  ;;  %2006 = vrot.lane.b32.xlu0 %v1968_v36, %s14169_s26 }
 0x2e2   : > { %20299 = vst [vmem:[#allocation19_spill] sm:$0xff] %v14709_v51  ;;  %v13347_v45 = vpop.eup %13346  ;;  %13352 = vpow2.f32 %v1420_v47  ;;  %v14715_v53 = vsub.f32 %v14634_v16, %v14709_v51  ;;  %v14717_v54 = vpop.f32.mrb[27].mxu1  ;;  %v1739_v11 = vsub.f32 0.0, %v1723_v4  ;;  %v1722_v47 = vand.u32 2147483647, %v14706_v46 }
 0x2e3   : > { %20300 = vst [vmem:[#allocation20_spill] sm:$0xff] %v14717_v54  ;;  %v13349_v56 = vpop.eup %13348  ;;  %13354 = vpow2.f32 %v1418_v50  ;;  %v1973_v57 = vmul.f32 %v13347_v45, %v1937_v38  ;;  %v14722_v58 = vsub.f32 %v14637_v7, %v14717_v54 }
 0x2e4   : > { %13356 = vpow2.f32 %v1908_v48  ;;  %v1424_v59 = vmul.f32 1.442695, %v14715_v53  ;;  %v1972_v62 = vmul.f32 %v13349_v56, %v1935_v55  ;;  %v1756_v31 = vmul.f32 1.442695, %v1739_v11  ;;  %v1945_v55 = vpop.permute.xlu1 %1944 }
 0x2e5   : > { %v14725_v61 = vpop.f32.mrb[28].mxu1  ;;  %2016 = vrot.lane.b32.xlu1 %v1973_v57, %s14169_s26  ;;  %2010 = vrot.lane.b32.xlu0 %v1970_v52, %s14169_s26  ;;  %v1422_v63 = vmul.f32 1.442695, %v14722_v58  ;;  %v1725_v48 = vand.u32 2147483647, %v14715_v53  ;;  %v1738_v53 = vsub.f32 0.0, %v1722_v47 }
 0x2e6   : > { %20301 = vst [vmem:[#allocation21_spill] sm:$0xff] %v14725_v61  ;;  %v14730_v0 = vpop.f32.mrb[29].mxu1  ;;  %v1407_v1 = vsub.f32 %v14642_v21, %v14725_v61  ;;  %13358 = vpow2.f32 %v1424_v59  ;;  %v14768_v59 = vadd.f32 %v14623_v5, %v14690_v18 }
 0x2e7   : > { %20302 = vst [vmem:[#allocation22_spill] sm:$0xff] %v14730_v0  ;;  %v13351_v6 = vpop.eup %13350  ;;  %13360 = vpow2.f32 %v1422_v63  ;;  %v14743_v28 = vsub.f32 %v14645_v24, %v14730_v0  ;;  %v1741_v63 = vsub.f32 0.0, %v1725_v48  ;;  %v1754_v18 = vmul.f32 1.442695, %v1738_v53 }
 0x2e8   : > { %v1428_v20 = vmul.f32 1.442695, %v1407_v1  ;;  %13362 = vpow2.f32 %v1912_v2  ;;  %v1974_v12 = vmul.f32 %v13351_v6, %v1939_v13  ;;  %v1727_v45 = vand.u32 2147483647, %v1407_v1  ;;  %20311 = vst [vmem:[#allocation31_spill] sm:$0xff] %v14768_v59 }
 0x2e9   : > { %v14734_v9 = vpop.f32.mrb[30].mxu1  ;;  %2014 = vrot.lane.b32.xlu0 %v1972_v62, %s14169_s26  ;;  %v1426_v40 = vmul.f32 1.442695, %v14743_v28 }
 0x2ea   : > { %20303 = vst [vmem:[#allocation23_spill] sm:$0xff] %v14734_v9  ;;  %v14737_v14 = vpop.f32.mrb[31].mxu1  ;;  %13364 = vpow2.f32 %v1428_v20  ;;  %v1409_v50 = vsub.f32 %v14650_v26, %v14734_v9  ;;  %v1743_v6 = vsub.f32 0.0, %v1727_v45 }
 0x2eb   : > { %20304 = vst [vmem:[#allocation24_spill] sm:$0xff] %v14737_v14  ;;  %v14762_v44 = vsub.f32 %v14653_v34, %v14737_v14 }
 0x2ec   : > { %v13353_v19 = vpop.eup %13352  ;;  %v1432_v2 = vmul.f32 1.442695, %v1409_v50 }
 0x2ed   : > { %v13355_v22 = vpop.eup %13354  ;;  %v1451_v17 = vadd.f32 1.0, %v13353_v19  ;;  %v14739_v23 = vpop.f32.mrb[32].mxu1  ;;  %2018 = vrot.lane.b32.xlu0 %v1974_v12, %s14169_s26  ;;  %v1430_v19 = vmul.f32 1.442695, %v14762_v44  ;;  %v1880_v12 = vmul.f32 0.5, %v14768_v59 }
 0x2ee   : > { %20305 = vst [vmem:[#allocation25_spill] sm:$0xff] %v14739_v23  ;;  %v13357_v25 = vpop.eup %13356  ;;  %v1450_v27 = vadd.f32 1.0, %v13355_v22  ;;  %v14746_v30 = vpop.f32.mrb[33].mxu1  ;;  %v1760_v22 = vmul.f32 1.442695, %v1741_v63 }
 0x2ef   : > { %20306 = vst [vmem:[#allocation26_spill] sm:$0xff] %v14746_v30  ;;  %13366 = vrcp.f32 %v1451_v17  ;;  %v1975_v33 = vmul.f32 %v13357_v25, %v1941_v29  ;;  %v1724_v17 = vand.u32 2147483647, %v14722_v58  ;;  %v1764_v25 = vmul.f32 1.442695, %v1743_v6 }
 0x2f0   : > { %13368 = vrcp.f32 %v1450_v27  ;;  %v13359_v42 = vpop.eup %13358  ;;  %v1726_v27 = vand.u32 2147483647, %v14743_v28  ;;  %v1910_v47 = vmul.f32 1.442695, %v1880_v12  ;;  %v14790_v28 = vsub.f32 %v14661_v49, %v14746_v30 }
 0x2f1   : > { %v14748_v37 = vpop.f32.mrb[34].mxu1  ;;  %2020 = vrot.lane.b32.xlu1 %v1975_v33, %s14169_s26  ;;  %v13361_v38 = vpop.eup %13360  ;;  %13370 = vpow2.f32 %v1756_v31  ;;  %v1453_v57 = vadd.f32 1.0, %v13359_v42  ;;  %v1411_v33 = vsub.f32 %v14658_v43, %v14739_v23  ;;  %v1729_v42 = vand.u32 2147483647, %v1409_v50 }
 0x2f2   : > { %20307 = vst [vmem:[#allocation27_spill] sm:$0xff] %v14748_v37  ;;  %v14751_v36 = vpop.f32.mrb[35].mxu1  ;;  %v13363_v52 = vpop.eup %13362  ;;  %13372 = vpow2.f32 %v1426_v40  ;;  %v1452_v62 = vadd.f32 1.0, %v13361_v38  ;;  %v1742_v45 = vsub.f32 0.0, %v1726_v27  ;;  %v1413_v50 = vsub.f32 %v14671_v41, %v14748_v37 }
 0x2f3   : > { %20308 = vst [vmem:[#allocation28_spill] sm:$0xff] %v14751_v36  ;;  %v1977_v1 = vmul.f32 %v13363_v52, %v1945_v55  ;;  %13374 = vrcp.f32 %v1453_v57  ;;  %v1436_v58 = vmul.f32 1.442695, %v1411_v33  ;;  %v1740_v52 = vsub.f32 0.0, %v1724_v17 }
 0x2f4   : > { %v13365_v4 = vpop.eup %13364  ;;  %13376 = vrcp.f32 %v1452_v62  ;;  %v1434_v55 = vmul.f32 1.442695, %v14790_v28  ;;  %v1745_v53 = vsub.f32 0.0, %v1729_v42  ;;  %v1731_v63 = vand.u32 2147483647, %v1411_v33 }
 0x2f5   : > { %v14758_v56 = vpop.f32.mrb[36].mxu1  ;;  %2024 = vrot.lane.b32.xlu1 %v1977_v1, %s14169_s26  ;;  %13378 = vpow2.f32 %v1432_v2  ;;  %v1455_v31 = vadd.f32 1.0, %v13365_v4  ;;  %v1758_v1 = vmul.f32 1.442695, %v1740_v52  ;;  %v1762_v6 = vmul.f32 1.442695, %v1742_v45 }
 0x2f6   : > { %20309 = vst [vmem:[#allocation29_spill] sm:$0xff] %v14758_v56  ;;  %v14764_v46 = vpop.f32.mrb[37].mxu1  ;;  %13380 = vpow2.f32 %v1430_v19  ;;  %v1768_v19 = vmul.f32 1.442695, %v1745_v53  ;;  %v1440_v17 = vmul.f32 1.442695, %v1413_v50  ;;  %v1415_v33 = vsub.f32 %v14685_v3, %v14758_v56 }
 0x2f7   : > { %20310 = vst [vmem:[#allocation30_spill] sm:$0xff] %v14764_v46  ;;  %13382 = vpow2.f32 %v1754_v18  ;;  %v1733_v18 = vand.u32 2147483647, %v1413_v50  ;;  %v1728_v45 = vand.u32 2147483647, %v14762_v44 }
 0x2f8   : > { %13384 = vpow2.f32 %v1760_v22  ;;  %v1747_v22 = vsub.f32 0.0, %v1731_v63  ;;  %v1735_v50 = vand.u32 2147483647, %v1415_v33 }
 0x2f9   : > { %v14770_v13 = vpop.f32.mrb[38].mxu1  ;;  %v14772_v20 = vpop.eup %13366  ;;  %13386 = vpow2.f32 %v1764_v25  ;;  %v14804_v25 = vsub.f32 %v14675_v60, %v14751_v36  ;;  %v1744_v44 = vsub.f32 0.0, %v1728_v45 }
 0x2fa   : > { %20312 = vst [vmem:[#allocation32_spill] sm:$0xff] %v14770_v13  ;;  %v14776_v11 = vpop.f32.mrb[39].mxu1  ;;  %v14778_v5 = vpop.eup %13368  ;;  %1516 = vrot.lane.b32.xlu1 %v14772_v20, %s14169_s26  ;;  %13388 = vrcp.f32 %v1455_v31 }
 0x2fb   : > { %20313 = vst [vmem:[#allocation33_spill] sm:$0xff] %v14776_v11  ;;  %v13371_v29 = vpop.eup %13370  ;;  %v1578_v40 = vsub.f32 1.0, %v14778_v5  ;;  %13390 = vpow2.f32 %v1910_v47  ;;  %v1438_v42 = vmul.f32 1.442695, %v14804_v25  ;;  %v14824_v45 = vpop.permute.xlu1 %2108 }
 0x2fc   : > { %v13373_v38 = vpop.eup %13372  ;;  %v1787_v48 = vadd.f32 1.0, %v13371_v29  ;;  %13392 = vpow2.f32 %v1436_v58  ;;  %v1943_v58 = vpop.permute.xlu0 %1942 }
 0x2fd   : > { %v1454_v57 = vadd.f32 1.0, %v13373_v38  ;;  %v14796_v62 = vpop.eup %13374 }
 0x2fe   : > { %1610 = vrot.lane.b32.xlu1 %v1578_v40, %s14169_s26  ;;  %v14798_v2 = vpop.eup %13376  ;;  %13394 = vlog2.f32 %v1787_v48  ;;  %v1749_v48 = vsub.f32 0.0, %v1733_v18 }
 0x2ff   : > { %v13379_v4 = vpop.eup %13378  ;;  %13396 = vpow2.f32 %v1434_v55  ;;  %v1580_v27 = vsub.f32 1.0, %v14798_v2  ;;  %v1772_v55 = vmul.f32 1.442695, %v1747_v22  ;;  %v1444_v22 = vmul.f32 1.442695, %v1415_v33 }
 0x300   : > { %13398 = vrcp.f32 %v1454_v57  ;;  %v13381_v12 = vpop.eup %13380  ;;  %v1457_v31 = vadd.f32 1.0, %v13379_v4  ;;  %v1776_v18 = vmul.f32 1.442695, %v1749_v48 }
 0x301   : > { %v13383_v29 = vpop.eup %13382  ;;  %13400 = vpow2.f32 %v1758_v1  ;;  %v1456_v38 = vadd.f32 1.0, %v13381_v12 }
 0x302   : > { %1520 = vrot.lane.b32.xlu1 %v14796_v62, %s14169_s26  ;;  %v13385_v40 = vpop.eup %13384  ;;  %13402 = vpow2.f32 %v1762_v6  ;;  %v1786_v1 = vadd.f32 1.0, %v13383_v29  ;;  %v1730_v6 = vand.u32 2147483647, %v14790_v28  ;;  %v1751_v29 = vsub.f32 0.0, %v1735_v50 }
 0x303   : > { %v13387_v47 = vpop.eup %13386  ;;  %13404 = vpow2.f32 %v1768_v19  ;;  %v1789_v53 = vadd.f32 1.0, %v13385_v40  ;;  %v1691_v50 = vmax.f32 %v14626_v8, %v14693_v32 }
 0x304   : > { %v14811_v52 = vpop.eup %13388  ;;  %13406 = vpow2.f32 %v1440_v17  ;;  %v1417_v17 = vsub.f32 %v14698_v35, %v14770_v13  ;;  %v1746_v40 = vsub.f32 0.0, %v1730_v6  ;;  %v1579_v6 = vsub.f32 1.0, %v14772_v20 }
 0x305   : > { %v13391_v57 = vpop.eup %13390  ;;  %13408 = vrcp.f32 %v1457_v31  ;;  %v1791_v31 = vadd.f32 1.0, %v13387_v47  ;;  %v1707_v20 = vadd.f32 %v14693_v32, %v14626_v8 }
 0x306   : > { %1614 = vrot.lane.b32.xlu1 %v1580_v27, %s14169_s26  ;;  %v13393_v63 = vpop.eup %13392  ;;  %v1976_v4 = vmul.f32 %v13391_v57, %v1943_v58  ;;  %13410 = vpow2.f32 %v1438_v42  ;;  %v1737_v48 = vand.u32 2147483647, %v1417_v17  ;;  %v14832_v57 = vsub.f32 %v14682_v15, %v14764_v46 }
 0x307   : > { %13412 = vrcp.f32 %v1456_v38  ;;  %v1459_v28 = vadd.f32 1.0, %v13393_v63  ;;  %v1780_v63 = vmul.f32 1.442695, %v1751_v29 }
 0x308   : > { %v13395_v19 = vpop.eup %13394  ;;  %13414 = vpow2.f32 %v1772_v55  ;;  %2022 = vrot.lane.b32.xlu0 %v1976_v4, %s14169_s26  ;;  %v1766_v55 = vmul.f32 1.442695, %v1744_v44  ;;  %v1732_v44 = vand.u32 2147483647, %v14804_v25 }
 0x309   : > { %v13397_v12 = vpop.eup %13396  ;;  %13416 = vlog2.f32 %v1789_v53  ;;  %v1805_v38 = vmul.f32 0.6931472, %v13395_v19 }
 0x30a   : > { %1524 = vrot.lane.b32.xlu1 %v14811_v52, %s14169_s26  ;;  %v14820_v27 = vpop.eup %13398  ;;  %13418 = vlog2.f32 %v1786_v1  ;;  %v1458_v58 = vadd.f32 1.0, %v13397_v12  ;;  %v1753_v1 = vsub.f32 0.0, %v1737_v48  ;;  %v1770_v12 = vmul.f32 1.442695, %v1746_v40 }
 0x30b   : > { %v14822_v42 = vpop.eup %13400  ;;  %13420 = vpow2.f32 %v1776_v18  ;;  %v1582_v47 = vsub.f32 1.0, %v14820_v27  ;;  %v1835_v18 = vadd.f32 %v1805_v38, %v1691_v50  ;;  %v1448_v50 = vmul.f32 1.442695, %v1417_v17 }
 0x30c   : > { %v14826_v33 = vpop.eup %13402  ;;  %1514 = vrot.lane.b32.xlu0 %v14778_v5, %s14169_s26  ;;  %13422 = vpow2.f32 %v1444_v22  ;;  %v1442_v5 = vmul.f32 1.442695, %v14832_v57  ;;  %v1784_v29 = vmul.f32 1.442695, %v1753_v1  ;;  %v1416_v17 = vsub.f32 %v14768_v59, %v14776_v11 }
 0x30d   : > { %v13405_v53 = vpop.eup %13404  ;;  %13424 = vrcp.f32 %v1459_v28  ;;  %v14852_v40 = vsub.f32 %v1707_v20, %v1835_v18  ;;  %v1693_v20 = vmax.f32 %v14634_v16, %v14709_v51 }
 0x30e   : > { %v13407_v4 = vpop.eup %13406  ;;  %13426 = vlog2.f32 %v1791_v31  ;;  %1618 = vrot.lane.b32.xlu1 %v1582_v47, %s14169_s26  ;;  %v1793_v15 = vadd.f32 1.0, %v13405_v53  ;;  %v14848_v31 = vpop.permute.xlu1 %2112 }
 0x30f   : > { %v14840_v19 = vpop.eup %13408  ;;  %13428 = vrcp.f32 %v1458_v58  ;;  %v1461_v38 = vadd.f32 1.0, %v13407_v4  ;;  %20314 = vst [vmem:[#allocation34_spill] sm:$0xff] %v14852_v40  ;;  %v14854_v47 = vpop.permute.xlu0 %2106 }
 0x310   : > { %v13411_v22 = vpop.eup %13410  ;;  %13430 = vpow2.f32 %v1766_v55  ;;  %1612 = vrot.lane.b32.xlu0 %v1579_v6, %s14169_s26  ;;  %v1748_v55 = vsub.f32 0.0, %v1732_v44  ;;  %v1734_v6 = vand.u32 2147483647, %v14832_v57 }
 0x311   : > { %v14844_v28 = vpop.eup %13412  ;;  %13432 = vpow2.f32 %v1780_v63  ;;  %v1460_v58 = vadd.f32 1.0, %v13411_v22 }
 0x312   : > { %v13415_v48 = vpop.eup %13414  ;;  %13434 = vpow2.f32 %v1442_v5  ;;  %1528 = vrot.lane.b32.xlu1 %v14840_v19, %s14169_s26  ;;  %v1584_v63 = vsub.f32 1.0, %v14844_v28  ;;  %v14869_v22 = vpop.permute.xlu1 %2116 }
 0x313   : > { %v13417_v25 = vpop.eup %13416  ;;  %13436 = vpow2.f32 %v1770_v12  ;;  %v1795_v4 = vadd.f32 1.0, %v13415_v48  ;;  %v1581_v12 = vsub.f32 1.0, %v14796_v62 }
 0x314   : > { %v14856_v53 = vpop.eup %13418  ;;  %13438 = vlog2.f32 %v1793_v15  ;;  %1518 = vrot.lane.b32.xlu0 %v14798_v2, %s14169_s26  ;;  %v1809_v18 = vmul.f32 0.6931472, %v13417_v25  ;;  %v2059_v15 = vmul.f32 0.5, %v14852_v40  ;;  %v1774_v2 = vmul.f32 1.442695, %v1748_v55  ;;  %v14876_v25 = vpop.permute.xlu0 %2110 }
 0x315   : > { %v13421_v1 = vpop.eup %13420  ;;  %13440 = vpow2.f32 %v1784_v29  ;;  %20315 = vst [vmem:[#allocation35_spill] sm:$0xff] %v14876_v25 }
 0x316   : > { %v13423_v5 = vpop.eup %13422  ;;  %13442 = vrcp.f32 %v1461_v38  ;;  %1622 = vrot.lane.b32.xlu1 %v1584_v63, %s14169_s26  ;;  %v1797_v29 = vadd.f32 1.0, %v13421_v1  ;;  %v1750_v38 = vsub.f32 0.0, %v1734_v6  ;;  %v1837_v55 = vadd.f32 %v1809_v18, %v1693_v20 }
 0x317   : > { %v14864_v44 = vpop.eup %13424  ;;  %13444 = vrcp.f32 %v1460_v58  ;;  %v1463_v48 = vadd.f32 1.0, %v13423_v5  ;;  %v1446_v63 = vmul.f32 1.442695, %v1416_v17  ;;  %v2076_v32 = vmul.f32 1.442695, %v2059_v15 }
 0x318   : > { %v13427_v57 = vpop.eup %13426  ;;  %1616 = vrot.lane.b32.xlu0 %v1581_v12, %s14169_s26  ;;  %13446 = vpow2.f32 %v1448_v50  ;;  %v1736_v1 = vand.u32 2147483647, %v1416_v17  ;;  %v1709_v50 = vadd.f32 %v14709_v51, %v14634_v16  ;;  %v1778_v18 = vmul.f32 1.442695, %v1750_v38  ;;  %v14886_v12 = vpop.permute.xlu1 %2120 }
 0x319   : > { %v14874_v62 = vpop.eup %13428  ;;  %13448 = vlog2.f32 %v1795_v4  ;;  %v1788_v4 = vadd.f32 1.0, %v14822_v42  ;;  %v1583_v20 = vsub.f32 1.0, %v14811_v52  ;;  %v14892_v25 = vpop.permute.xlu0 %2114  ;;  %v1695_v38 = vmax.f32 %v14642_v21, %v14725_v61 }
 0x31a   : > { %v13431_v58 = vpop.eup %13430  ;;  %1532 = vrot.lane.b32.xlu1 %v14864_v44, %s14169_s26  ;;  %13450 = vpow2.f32 %v1774_v2  ;;  %v1586_v6 = vsub.f32 1.0, %v14874_v62  ;;  %v14888_v2 = vsub.f32 %v1709_v50, %v1837_v55  ;;  %20317 = vst [vmem:[#allocation37_spill] sm:$0xff] %v14892_v25  ;;  %v1803_v55 = vmul.f32 0.6931472, %v14856_v53 }
 0x31b   : > { %v13433_v40 = vpop.eup %13432  ;;  %13452 = vlog2.f32 %v1797_v29  ;;  %v1813_v29 = vmul.f32 0.6931472, %v13427_v57 }
 0x31c   : > { %v13435_v59 = vpop.eup %13434  ;;  %1522 = vrot.lane.b32.xlu0 %v14820_v27, %s14169_s26  ;;  %13454 = vrcp.f32 %v1463_v48  ;;  %20316 = vst [vmem:[#allocation36_spill] sm:$0xff] %v14888_v2  ;;  %v1799_v17 = vadd.f32 1.0, %v13433_v40  ;;  %v1752_v27 = vsub.f32 0.0, %v1736_v1  ;;  %v1790_v40 = vadd.f32 1.0, %v14826_v33 }
 0x31d   : > { %v13437_v5 = vpop.eup %13436  ;;  %13456 = vpow2.f32 %v1446_v63  ;;  %v1462_v51 = vadd.f32 1.0, %v13435_v59  ;;  %v1792_v59 = vadd.f32 1.0, %v13431_v58  ;;  %v1690_v63 = vmax.f32 %v14629_v10, %v14702_v39  ;;  %v14910_v58 = vpop.permute.xlu1 %2124 }
 0x31e   : > { %v13439_v15 = vpop.eup %13438  ;;  %1626 = vrot.lane.b32.xlu1 %v1586_v6, %s14169_s26  ;;  %13458 = vpow2.f32 %v2076_v32  ;;  %v1697_v1 = vmax.f32 %v14650_v26, %v14734_v9  ;;  %v1839_v6 = vadd.f32 %v1813_v29, %v1695_v38  ;;  %v1782_v53 = vmul.f32 1.442695, %v1752_v27  ;;  %v14917_v29 = vpop.permute.xlu0 %2118 }
 0x31f   : > { %v13441_v42 = vpop.eup %13440  ;;  %13460 = vlog2.f32 %v1788_v4  ;;  %v1817_v57 = vmul.f32 0.6931472, %v13439_v15  ;;  %v2061_v4 = vmul.f32 0.5, %v14888_v2  ;;  %v1794_v15 = vadd.f32 1.0, %v13437_v5 }
 0x320   : > { %v14894_v48 = vpop.eup %13442  ;;  %1620 = vrot.lane.b32.xlu0 %v1583_v20, %s14169_s26  ;;  %13462 = vpow2.f32 %v1778_v18  ;;  %v1801_v50 = vadd.f32 1.0, %v13441_v42  ;;  %v1711_v18 = vadd.f32 %v14725_v61, %v14642_v21  ;;  %v1834_v42 = vadd.f32 %v1803_v55, %v1690_v63 }
 0x321   : > { %v14900_v52 = vpop.eup %13444  ;;  %13464 = vlog2.f32 %v1799_v17  ;;  %v1841_v25 = vadd.f32 %v1817_v57, %v1697_v1  ;;  %v1706_v27 = vadd.f32 %v14702_v39, %v14629_v10  ;;  %v1585_v5 = vsub.f32 1.0, %v14840_v19  ;;  %v14936_v1 = vpop.permute.xlu1 %2128 }
 0x322   : > { %v13447_v32 = vpop.eup %13446  ;;  %1536 = vrot.lane.b32.xlu1 %v14894_v48, %s14169_s26  ;;  %13466 = vrcp.f32 %v1462_v51  ;;  %v1588_v17 = vsub.f32 1.0, %v14900_v52  ;;  %v14925_v61 = vsub.f32 %v1711_v18, %v1839_v6  ;;  %v1713_v55 = vadd.f32 %v14734_v9, %v14650_v26 }
 0x323   : > { %v13449_v33 = vpop.eup %13448  ;;  %13468 = vlog2.f32 %v1790_v40  ;;  %v1465_v2 = vadd.f32 1.0, %v13447_v32  ;;  %v2080_v40 = vmul.f32 1.442695, %v2061_v4  ;;  %v14932_v19 = vsub.f32 %v1706_v27, %v1834_v42 }
 0x324   : > { %1526 = vrot.lane.b32.xlu0 %v14844_v28, %s14169_s26  ;;  %v13451_v20 = vpop.eup %13450  ;;  %13470 = vlog2.f32 %v1792_v59  ;;  %v1821_v38 = vmul.f32 0.6931472, %v13449_v33  ;;  %20318 = vst [vmem:[#allocation38_spill] sm:$0xff] %v14925_v61  ;;  %v1699_v59 = vmax.f32 %v14658_v43, %v14739_v23  ;;  %v14934_v63 = vsub.f32 %v1713_v55, %v1841_v25 }
 0x325   : > { %v13453_v51 = vpop.eup %13452  ;;  %13472 = vlog2.f32 %v1801_v50  ;;  %20319 = vst [vmem:[#allocation39_spill] sm:$0xff] %v14932_v19  ;;  %v1796_v4 = vadd.f32 1.0, %v13451_v20  ;;  %v1692_v25 = vmax.f32 %v14637_v7, %v14717_v54  ;;  %v1701_v20 = vmax.f32 %v14671_v41, %v14748_v37 }
 0x326   : > { %1630 = vrot.lane.b32.xlu1 %v1588_v17, %s14169_s26  ;;  %v14923_v28 = vpop.eup %13454  ;;  %13474 = vpow2.f32 %v1782_v53  ;;  %20320 = vst [vmem:[#allocation40_spill] sm:$0xff] %v14934_v63  ;;  %v1843_v33 = vadd.f32 %v1821_v38, %v1699_v59  ;;  %v2063_v53 = vmul.f32 0.5, %v14925_v61  ;;  %v1825_v18 = vmul.f32 0.6931472, %v13453_v51  ;;  %v14941_v17 = vpop.permute.xlu0 %2122 }
 0x327   : > { %v13457_v57 = vpop.eup %13456  ;;  %13476 = vlog2.f32 %v1794_v15  ;;  %v2058_v38 = vmul.f32 0.5, %v14932_v19  ;;  %v1703_v55 = vmax.f32 %v14685_v3, %v14758_v56  ;;  %v1708_v9 = vadd.f32 %v14717_v54, %v14637_v7 }
 0x328   : > { %1624 = vrot.lane.b32.xlu0 %v1585_v5, %s14169_s26  ;;  %v13459_v32 = vpop.eup %13458  ;;  %13478 = vrcp.f32 %v1465_v2  ;;  %v1464_v15 = vadd.f32 1.0, %v13457_v57  ;;  %v1715_v2 = vadd.f32 %v14739_v23, %v14658_v43  ;;  %v14958_v57 = vpop.permute.xlu1 %2132  ;;  %v2084_v19 = vmul.f32 1.442695, %v2063_v53 }
 0x329   : > { %v13461_v50 = vpop.eup %13460  ;;  %13480 = vpow2.f32 %v2080_v40  ;;  %v2155_v27 = vmul.f32 %v13459_v32, %v14824_v45  ;;  %v2065_v40 = vmul.f32 0.5, %v14934_v63  ;;  %v1587_v45 = vsub.f32 1.0, %v14864_v44 }
 0x32a   : > { %1540 = vrot.lane.b32.xlu1 %v14923_v28, %s14169_s26  ;;  %v13463_v6 = vpop.eup %13462  ;;  %v1807_v5 = vmul.f32 0.6931472, %v13461_v50  ;;  %v14960_v61 = vsub.f32 %v1715_v2, %v1843_v33  ;;  %13482 = vlog2.f32 %v1796_v4  ;;  %v1845_v50 = vadd.f32 %v1825_v18, %v1701_v20  ;;  %v14972_v18 = vpop.permute.xlu0 %2126 }
 0x32b   : > { %v13465_v42 = vpop.eup %13464  ;;  %13484 = vrcp.f32 %v1464_v15  ;;  %v1694_v33 = vmax.f32 %v14645_v24, %v14730_v0  ;;  %v1798_v2 = vadd.f32 1.0, %v13463_v6  ;;  %v2074_v4 = vmul.f32 1.442695, %v2058_v38 }
 0x32c   : > { %1530 = vrot.lane.b32.xlu0 %v14874_v62, %s14169_s26  ;;  %v14952_v51 = vpop.eup %13466  ;;  %20321 = vst [vmem:[#allocation41_spill] sm:$0xff] %v14960_v61  ;;  %v1829_v23 = vmul.f32 0.6931472, %v13465_v42  ;;  %v1717_v53 = vadd.f32 %v14748_v37, %v14671_v41  ;;  %v2088_v42 = vmul.f32 1.442695, %v2065_v40  ;;  %v2067_v20 = vmul.f32 0.5, %v14960_v61 }
 0x32d   : > { %v13469_v59 = vpop.eup %13468  ;;  %v1590_v62 = vsub.f32 1.0, %v14952_v51  ;;  %v1719_v54 = vadd.f32 %v14758_v56, %v14685_v3  ;;  %v1705_v6 = vmax.f32 %v14698_v35, %v14770_v13  ;;  %13486 = vpow2.f32 %v2084_v19 }
 0x32e   : > { %2188 = vrot.lane.b32.xlu1 %v2155_v27, %s14169_s26  ;;  %v13471_v32 = vpop.eup %13470  ;;  %v1836_v27 = vadd.f32 %v1807_v5, %v1692_v25  ;;  %v1811_v39 = vmul.f32 0.6931472, %v13469_v59  ;;  %v14982_v25 = vsub.f32 %v1717_v53, %v1845_v50  ;;  %v1847_v5 = vadd.f32 %v1829_v23, %v1703_v55  ;;  %v14994_v19 = vpop.permute.xlu0 %2130 }
 0x32f   : > { %v13473_v63 = vpop.eup %13472  ;;  %v1710_v40 = vadd.f32 %v14730_v0, %v14645_v24  ;;  %v1815_v61 = vmul.f32 0.6931472, %v13471_v32  ;;  %13488 = vlog2.f32 %v1798_v2  ;;  %v1696_v23 = vmax.f32 %v14653_v34, %v14737_v14 }
 0x330   : > { %1628 = vrot.lane.b32.xlu0 %v1587_v45, %s14169_s26  ;;  %v13475_v44 = vpop.eup %13474  ;;  %20322 = vst [vmem:[#allocation42_spill] sm:$0xff] %v14982_v25  ;;  %v1833_v59 = vmul.f32 0.6931472, %v13473_v63  ;;  %v14984_v45 = vpop.permute.xlu1 %2134  ;;  %v1838_v3 = vadd.f32 %v1811_v39, %v1694_v33  ;;  %13490 = vpow2.f32 %v2074_v4  ;;  %v2092_v63 = vmul.f32 1.442695, %v2067_v20 }
 0x331   : > { %v13477_v15 = vpop.eup %13476  ;;  %v1800_v56 = vadd.f32 1.0, %v13475_v44  ;;  %v1721_v32 = vadd.f32 %v14770_v13, %v14698_v35  ;;  %v1589_v50 = vsub.f32 1.0, %v14894_v48  ;;  %13492 = vpow2.f32 %v2088_v42 }
 0x332   : > { %1634 = vrot.lane.b32.xlu1 %v1590_v62, %s14169_s26  ;;  %v14980_v38 = vpop.eup %13478  ;;  %v14990_v62 = vsub.f32 %v1708_v9, %v1836_v27  ;;  %v1819_v55 = vmul.f32 0.6931472, %v13477_v15  ;;  %v2069_v9 = vmul.f32 0.5, %v14982_v25  ;;  %v1849_v39 = vadd.f32 %v1833_v59, %v1705_v6 }
 0x333   : > { %v13481_v37 = vpop.eup %13480  ;;  %v1840_v2 = vadd.f32 %v1815_v61, %v1696_v23  ;;  %v1698_v44 = vmax.f32 %v14661_v49, %v14746_v30  ;;  %13494 = vlog2.f32 %v1800_v56  ;;  %v15011_v53 = vsub.f32 %v1710_v40, %v1838_v3 }
 0x334   : > { %1534 = vrot.lane.b32.xlu0 %v14900_v52, %s14169_s26  ;;  %20323 = vst [vmem:[#allocation43_spill] sm:$0xff] %v14990_v62  ;;  %v15002_v52 = vsub.f32 %v1719_v54, %v1847_v5  ;;  %v13483_v33 = vpop.eup %13482  ;;  %v2157_v4 = vmul.f32 %v13481_v37, %v14848_v31  ;;  %v2060_v27 = vmul.f32 0.5, %v14990_v62  ;;  %v15013_v54 = vpop.permute.xlu1 %2136  ;;  %v1712_v15 = vadd.f32 %v14737_v14, %v14653_v34 }
 0x335   : > { %v15008_v48 = vpop.eup %13484  ;;  %20325 = vst [vmem:[#allocation45_spill] sm:$0xff] %v15011_v53  ;;  %v1842_v61 = vadd.f32 %v1819_v55, %v1698_v44  ;;  %v2096_v42 = vmul.f32 1.442695, %v2069_v9  ;;  %v15020_v31 = vsub.f32 %v1721_v32, %v1849_v39  ;;  %13496 = vpow2.f32 %v2092_v63  ;;  %v20328_v32 = vld [vmem:[#allocation14_spill] sm:$0xff] }
 0x336   : > { %1544 = vrot.lane.b32.xlu1 %v14980_v38, %s14169_s26  ;;  %20324 = vst [vmem:[#allocation44_spill] sm:$0xff] %v15002_v52  ;;  %v1592_v56 = vsub.f32 1.0, %v15008_v48  ;;  %v2071_v37 = vmul.f32 0.5, %v15002_v52  ;;  %v15022_v6 = vsub.f32 %v1712_v15, %v1840_v2  ;;  %v1823_v3 = vmul.f32 0.6931472, %v13483_v33 }
 0x337   : > { %20326 = vst [vmem:[#allocation46_spill] sm:$0xff] %v15020_v31  ;;  %v1591_v5 = vsub.f32 1.0, %v14923_v28  ;;  %v13487_v59 = vpop.eup %13486  ;;  %v2078_v40 = vmul.f32 1.442695, %v2060_v27  ;;  %v2062_v23 = vmul.f32 0.5, %v15011_v53  ;;  %v1714_v55 = vadd.f32 %v14746_v30, %v14661_v49 }
 0x338   : > { %1632 = vrot.lane.b32.xlu0 %v1589_v50, %s14169_s26  ;;  %20327 = vst [vmem:[#allocation47_spill] sm:$0xff] %v15022_v6  ;;  %v1700_v63 = vmax.f32 %v14675_v60, %v14751_v36  ;;  %v1702_v9 = vmax.f32 %v20328_v32, %v14764_v46  ;;  %v2100_v28 = vmul.f32 1.442695, %v2071_v37  ;;  %v2073_v33 = vmul.f32 0.5, %v15020_v31 }
 0x339   : > { %v13489_v50 = vpop.eup %13488  ;;  %v15035_v39 = vsub.f32 %v1714_v55, %v1842_v61  ;;  %13498 = vpow2.f32 %v2096_v42  ;;  %v2159_v15 = vmul.f32 %v13487_v59, %v14869_v22  ;;  %v2082_v53 = vmul.f32 1.442695, %v2062_v23 }
 0x33a   : > { %2192 = vrot.lane.b32.xlu1 %v2157_v4, %s14169_s26  ;;  %v2064_v4 = vmul.f32 0.5, %v15022_v6  ;;  %v1844_v27 = vadd.f32 %v1823_v3, %v1700_v63  ;;  %v1827_v61 = vmul.f32 0.6931472, %v13489_v50  ;;  %13500 = vpow2.f32 %v2078_v40 }
 0x33b   : > { %20329 = vst [vmem:[#allocation48_spill] sm:$0xff] %v15035_v39  ;;  %v1716_v55 = vadd.f32 %v14751_v36, %v14675_v60  ;;  %v1718_v3 = vadd.f32 %v14764_v46, %v20328_v32  ;;  %v2104_v59 = vmul.f32 1.442695, %v2073_v33  ;;  %13502 = vpow2.f32 %v2100_v28 }
 0x33c   : > { %1538 = vrot.lane.b32.xlu0 %v14952_v51, %s14169_s26  ;;  %v13491_v51 = vpop.eup %13490  ;;  %v2086_v63 = vmul.f32 1.442695, %v2064_v4  ;;  %13504 = vpow2.f32 %v2082_v53 }
 0x33d   : > { %v2154_v22 = vmul.f32 %v13491_v51, %v14854_v47  ;;  %13506 = vpow2.f32 %v2104_v59 }
 0x33e   : > { %1638 = vrot.lane.b32.xlu1 %v1592_v56, %s14169_s26  ;;  %v13493_v56 = vpop.eup %13492  ;;  %13508 = vpow2.f32 %v2086_v63 }
 0x33f   : > { %v13495_v42 = vpop.eup %13494  ;;  %v2161_v47 = vmul.f32 %v13493_v56, %v14886_v12  ;;  %v1593_v56 = vsub.f32 1.0, %v14980_v38 }
 0x340   : > { %1636 = vrot.lane.b32.xlu0 %v1591_v5, %s14169_s26  ;;  %v2066_v5 = vmul.f32 0.5, %v15035_v39  ;;  %v13497_v33 = vpop.eup %13496  ;;  %v1831_v31 = vmul.f32 0.6931472, %v13495_v42 }
 0x342   : > { %2196 = vrot.lane.b32.xlu1 %v2159_v15, %s14169_s26  ;;  %v1846_v15 = vadd.f32 %v1827_v61, %v1702_v9  ;;  %v2090_v4 = vmul.f32 1.442695, %v2066_v5 }
 0x343   : > { %v1997_v20 = vpop.permute.xlu0 %1996  ;;  %v13499_v42 = vpop.eup %13498 }
 0x344   : > { %v15045_v37 = vadd.f32 %v1997_v20, %v14626_v8  ;;  %v20332_v20 = vld [vmem:[#allocation31_spill] sm:$0xff]  ;;  %2186 = vrot.lane.b32.xlu0 %v2154_v22, %s14169_s26  ;;  %v2165_v59 = vmul.f32 %v13499_v42, %v14936_v1  ;;  %13510 = vpow2.f32 %v2090_v4 }
 0x345   : > { %v1704_v40 = vmax.f32 %v20332_v20, %v14776_v11  ;;  %v1720_v12 = vadd.f32 %v14776_v11, %v20332_v20 }
 0x346   : > { %20331 = vst [vmem:[#allocation50_spill] sm:$0xff] %v15045_v37  ;;  %2200 = vrot.lane.b32.xlu1 %v2161_v47, %s14169_s26  ;;  %v20342_v47 = vld [vmem:[#allocation35_spill] sm:$0xff] }
 0x347   : > { %v2001_v2 = vpop.permute.xlu1 %2000  ;;  %v1995_v44 = vpop.permute.xlu0 %1994  ;;  %v1848_v22 = vadd.f32 %v1831_v31, %v1704_v40 }
 0x348   : > { %v15042_v52 = vadd.f32 %v1995_v44, %v14629_v10  ;;  %v15060_v44 = vsub.f32 %v1716_v55, %v1844_v27  ;;  %v15068_v28 = vadd.f32 %v2001_v2, %v14634_v16  ;;  %v2163_v2 = vmul.f32 %v13497_v33, %v14910_v58  ;;  %1542 = vrot.lane.b32.xlu0 %v15008_v48, %s14169_s26  ;;  %v13501_v58 = vpop.eup %13500 }
 0x349   : > { %v15085_v55 = vsub.f32 %v1718_v3, %v1846_v15  ;;  %v13503_v40 = vpop.eup %13502  ;;  %v2156_v33 = vmul.f32 %v13501_v58, %v20342_v47 }
 0x34a   : > { %20330 = vst [vmem:[#allocation49_spill] sm:$0xff] %v15042_v52  ;;  %12436 = vmatprep.mubr.msk.f32.mxu0 %vm2258_vm4, %v15042_v52  ;;  %20333 = vst [vmem:[#allocation51_spill] sm:$0xff] %v15060_v44  ;;  %v2068_v53 = vmul.f32 0.5, %v15060_v44  ;;  %2204 = vrot.lane.b32.xlu1 %v2163_v2, %s14169_s26  ;;  %v13505_v1 = vpop.eup %13504 }
 0x34b   : > { %v2005_v23 = vpop.permute.xlu1 %2004  ;;  %12437 = vmatmul.mubr.msk.f32.vlgmr.msra.gmra.mrb[24].mxu0 %vm2258_vm4, %v15045_v37  ;;  %v1999_v50 = vpop.permute.xlu0 %1998  ;;  %20335 = vst [vmem:[#allocation53_spill] sm:$0xff] %v15068_v28  ;;  %20337 = vst [vmem:[#allocation55_spill] sm:$0xff] %v15085_v55 }
 0x34c   : > { %v15065_v51 = vadd.f32 %v1999_v50, %v14637_v7  ;;  %v15088_v5 = vadd.f32 %v2005_v23, %v14642_v21  ;;  %v2094_v48 = vmul.f32 1.442695, %v2068_v53  ;;  %1640 = vrot.lane.b32.xlu0 %v1593_v56, %s14169_s26  ;;  %v2070_v23 = vmul.f32 0.5, %v15085_v55  ;;  %v20345_v56 = vld [vmem:[#allocation37_spill] sm:$0xff] }
 0x34d   : > { %v15101_v50 = vsub.f32 %v1720_v12, %v1848_v22  ;;  %v13507_v12 = vpop.eup %13506  ;;  %v2158_v42 = vmul.f32 %v13505_v1, %v20345_v56 }
 0x34e   : > { %20334 = vst [vmem:[#allocation52_spill] sm:$0xff] %v15065_v51  ;;  %12439 = vmatprep.mubr.msk.f32.mxu0 %vm2258_vm4, %v15065_v51  ;;  %20338 = vst [vmem:[#allocation56_spill] sm:$0xff] %v15088_v5  ;;  %2208 = vrot.lane.b32.xlu1 %v2165_v59, %s14169_s26  ;;  %13512 = vpow2.f32 %v2094_v48 }
 0x34f   : > { %v2009_v27 = vpop.permute.xlu1 %2008  ;;  %12440 = vmatmul.mubr.msk.f32.gmra.mrb[26].mxu0 %vm2258_vm4, %v15068_v28  ;;  %v2003_v9 = vpop.permute.xlu0 %2002  ;;  %20340 = vst [vmem:[#allocation58_spill] sm:$0xff] %v15101_v50  ;;  %v2072_v53 = vmul.f32 0.5, %v15101_v50 }
 0x350   : > { %v15083_v61 = vadd.f32 %v2003_v9, %v14645_v24  ;;  %v15104_v63 = vadd.f32 %v2009_v27, %v14650_v26  ;;  %v2167_v9 = vmul.f32 %v13503_v40, %v14958_v57  ;;  %2190 = vrot.lane.b32.xlu0 %v2156_v33, %s14169_s26  ;;  %v2098_v27 = vmul.f32 1.442695, %v2070_v23  ;;  %v13509_v57 = vpop.eup %13508 }
 0x351   : > { %v2102_v59 = vmul.f32 1.442695, %v2072_v53  ;;  %v2160_v40 = vmul.f32 %v13509_v57, %v14917_v29  ;;  %v13511_v23 = vpop.eup %13510 }
 0x352   : > { %20336 = vst [vmem:[#allocation54_spill] sm:$0xff] %v15083_v61  ;;  %12442 = vmatprep.mubr.msk.f32.mxu0 %vm2258_vm4, %v15083_v61  ;;  %20341 = vst [vmem:[#allocation59_spill] sm:$0xff] %v15104_v63  ;;  %2212 = vrot.lane.b32.xlu1 %v2167_v9, %s14169_s26  ;;  %13514 = vpow2.f32 %v2098_v27  ;;  %v2162_v33 = vmul.f32 %v13511_v23, %v14941_v17  ;;  %v20349_v9 = vld [vmem:[#allocation15_spill] sm:$0xff]  ;;  %v2616_v27 = vld [vmem:[%s19977_s10] sm:$0xf] }
 0x353   : > { %12443 = vmatmul.mubr.msk.f32.gmra.mrb[28].mxu0 %vm2258_vm4, %v15088_v5  ;;  %v2007_v38 = vpop.permute.xlu0 %2006  ;;  %v2013_v31 = vpop.permute.xlu1 %2012  ;;  %13516 = vpow2.f32 %v2102_v59  ;;  %12484 = vmatprep.subr.msk.mxu1 %vm2355_vm3, %v2616_v27 }
 0x354   : > { %v15098_v3 = vadd.f32 %v2007_v38, %v14653_v34  ;;  %v15119_v2 = vadd.f32 %v2013_v31, %v14658_v43  ;;  %v2169_v38 = vmul.f32 %v13507_v12, %v15013_v54  ;;  %2194 = vrot.lane.b32.xlu0 %v2158_v42, %s14169_s26  ;;  %12485 = vmatpush3.msk.msra.mxu1 %vm2355_vm3, %v2616_v27 }
 0x356   : > { %20339 = vst [vmem:[#allocation57_spill] sm:$0xff] %v15098_v3  ;;  %12445 = vmatprep.mubr.msk.f32.mxu0 %vm2258_vm4, %v15098_v3  ;;  %20344 = vst [vmem:[#allocation60_spill] sm:$0xff] %v15119_v2  ;;  %2216 = vrot.lane.b32.xlu1 %v2169_v38, %s14169_s26 }
 0x357   : > { %12446 = vmatmul.mubr.msk.f32.gmra.mrb[30].mxu0 %vm2258_vm4, %v15104_v63  ;;  %v2011_v15 = vpop.permute.xlu0 %2010  ;;  %v2017_v22 = vpop.permute.xlu1 %2016 }
 0x358   : > { %v15115_v4 = vadd.f32 %v2011_v15, %v14661_v49  ;;  %v15133_v31 = vadd.f32 %v2017_v22, %v14671_v41  ;;  %2198 = vrot.lane.b32.xlu0 %v2160_v40, %s14169_s26  ;;  %v13513_v1 = vpop.eup %13512 }
 0x359   : > { %v2164_v15 = vmul.f32 %v13513_v1, %v14972_v18 }
 0x35a   : > { %20343 = vst [vmem:[#allocation35_spill] sm:$0xff] %v15115_v4  ;;  %12448 = vmatprep.mubr.msk.f32.mxu0 %vm2258_vm4, %v15115_v4  ;;  %20347 = vst [vmem:[#allocation61_spill] sm:$0xff] %v15133_v31  ;;  %v20355_v4 = vld [vmem:[#allocation16_spill] sm:$0xff] }
 0x35b   : > { %12449 = vmatmul.mubr.msk.f32.gmra.mrb[32].mxu0 %vm2258_vm4, %v15119_v2  ;;  %v2015_v58 = vpop.permute.xlu0 %2014 }
 0x35c   : > { %v15130_v48 = vadd.f32 %v2015_v58, %v14675_v60  ;;  %2202 = vrot.lane.b32.xlu0 %v2162_v33, %s14169_s26  ;;  %v13515_v53 = vpop.eup %13514 }
 0x35d   : > { %v2166_v17 = vmul.f32 %v13515_v53, %v14994_v19  ;;  %v13517_v18 = vpop.eup %13516 }
 0x35e   : > { %20346 = vst [vmem:[#allocation37_spill] sm:$0xff] %v15130_v48  ;;  %12451 = vmatprep.mubr.msk.f32.mxu0 %vm2258_vm4, %v15130_v48  ;;  %v2168_v42 = vmul.f32 %v13517_v18, %v14984_v45  ;;  %v20354_v48 = vld [vmem:[#allocation18_spill] sm:$0xff] }
 0x35f   : > { %12452 = vmatmul.mubr.msk.f32.gmra.mrb[34].mxu0 %vm2258_vm4, %v15133_v31  ;;  %v2019_v54 = vpop.permute.xlu0 %2018 }
 0x360   : > { %v15143_v47 = vadd.f32 %v2019_v54, %v20328_v32  ;;  %2206 = vrot.lane.b32.xlu0 %v2164_v15, %s14169_s26 }
 0x362   : > { %20348 = vst [vmem:[#allocation62_spill] sm:$0xff] %v15143_v47  ;;  %12454 = vmatprep.mubr.msk.f32.mxu0 %vm2258_vm4, %v15143_v47 }
 0x363   : > { %v2021_v29 = vpop.permute.xlu1 %2020 }
 0x364   : > { %v15151_v12 = vadd.f32 %v2021_v29, %v20349_v9  ;;  %2210 = vrot.lane.b32.xlu0 %v2166_v17, %s14169_s26 }
 0x366   : > { %20350 = vst [vmem:[#allocation63_spill] sm:$0xff] %v15151_v12  ;;  %12455 = vmatmul.mubr.msk.f32.gmra.mrb[36].mxu0 %vm2258_vm4, %v15151_v12 }
 0x367   : > { %v2025_v56 = vpop.permute.xlu1 %2024 }
 0x368   : > { %2214 = vrot.lane.b32.xlu0 %v2168_v42, %s14169_s26  ;;  %v15166_v40 = vadd.f32 %v2025_v56, %v14698_v35 }
 0x36a   : > { %20351 = vst [vmem:[#allocation64_spill] sm:$0xff] %v15166_v40 }
 0x36c   : > { %v1517_v22 = vpop.permute.xlu1 %1516 }
 0x36d   : > { %v1563_v61 = vmul.f32 %v1517_v22, %v14626_v8  ;;  %v20363_v8 = vld [vmem:[#allocation21_spill] sm:$0xff] }
 0x370   : > { %v1611_v57 = vpop.permute.xlu1 %1610 }
 0x371   : > { %v1658_v2 = vmul.f32 %v1611_v57, %v20354_v48 }
 0x374   : > { %v1521_v58 = vpop.permute.xlu1 %1520 }
 0x378   : > { %v1615_v38 = vpop.permute.xlu1 %1614 }
 0x37a   : > { %v2023_v59 = vpop.permute.xlu0 %2022 }
 0x37b   : > { %v15169_v54 = vadd.f32 %v2023_v59, %v20332_v20 }
 0x37c   : > { %v1525_v23 = vpop.permute.xlu1 %1524 }
 0x37d   : > { %20352 = vst [vmem:[#allocation65_spill] sm:$0xff] %v15169_v54  ;;  %12457 = vmatprep.mubr.msk.f32.mxu0 %vm2258_vm4, %v15169_v54 }
 0x37e   : > { %12458 = vmatmul.mubr.msk.f32.gmra.mrb[38].mxu0 %vm2258_vm4, %v15166_v40  ;;  %v1515_v45 = vpop.permute.xlu0 %1514 }
 0x37f   : > { %v1562_v5 = vmul.f32 %v1515_v45, %v14629_v10 }
 0x380   : > { %v1619_v19 = vpop.permute.xlu1 %1618 }
 0x381   : > { %v15197_v28 = vadd.f32 %v1658_v2, %v1562_v5  ;;  %v20360_v2 = vld [vmem:[#allocation20_spill] sm:$0xff] }
 0x382   : > { %v1613_v33 = vpop.permute.xlu0 %1612  ;;  %v1660_v22 = vmul.f32 %v1615_v38, %v20360_v2 }
 0x383   : > { %v1659_v63 = vmul.f32 %v20355_v4, %v1613_v33  ;;  %20356 = vst [vmem:[#allocation67_spill] sm:$0xff] %v15197_v28 }
 0x384   : > { %v1529_v1 = vpop.permute.xlu1 %1528 }
 0x385   : > { %v15201_v37 = vadd.f32 %v1659_v63, %v1563_v61  ;;  %v20361_v61 = vld [vmem:[#allocation19_spill] sm:$0xff] }
 0x386   : > { %v1519_v29 = vpop.permute.xlu0 %1518 }
 0x387   : > { %20357 = vst [vmem:[#allocation68_spill] sm:$0xff] %v15201_v37 }
 0x388   : > { %v1623_v15 = vpop.permute.xlu1 %1622 }
 0x38a   : > { %v1617_v27 = vpop.permute.xlu0 %1616 }
 0x38b   : > { %v1661_v63 = vmul.f32 %v20361_v61, %v1617_v27  ;;  %v1567_v61 = vmul.f32 %v1525_v23, %v14642_v21  ;;  %v20417_v21 = vld [vmem:[#allocation56_spill] sm:$0xff] }
 0x38c   : > { %v15175_v53 = vpop.permute.xlu1 %1532 }
 0x38e   : > { %v1523_v17 = vpop.permute.xlu0 %1522 }
 0x38f   : > { %v1566_v38 = vmul.f32 %v1523_v17, %v14645_v24 }
 0x390   : > { %v1627_v18 = vpop.permute.xlu1 %1626 }
 0x392   : > { %v1621_v56 = vpop.permute.xlu0 %1620 }
 0x393   : > { %v1663_v48 = vmul.f32 %v20363_v8, %v1621_v56  ;;  %v20368_v56 = vld [vmem:[#allocation23_spill] sm:$0xff] }
 0x394   : > { %v15177_v42 = vpop.permute.xlu1 %1536 }
 0x396   : > { %v1527_v59 = vpop.permute.xlu0 %1526 }
 0x397   : > { %v1568_v23 = vmul.f32 %v1527_v59, %v14653_v34 }
 0x398   : > { %v15179_v50 = vpop.permute.xlu1 %1630 }
 0x39a   : > { %v1625_v55 = vpop.permute.xlu0 %1624 }
 0x39c   : > { %v15181_v44 = vpop.permute.xlu1 %1540 }
 0x39e   : > { %v1531_v39 = vpop.permute.xlu0 %1530 }
 0x3a0   : > { %v2189_v6 = vpop.permute.xlu1 %2188 }
 0x3a1   : > { %v15207_v57 = vadd.f32 %v2189_v6, %v15201_v37  ;;  %v1565_v6 = vmul.f32 %v1521_v58, %v14634_v16  ;;  %v1664_v58 = vmul.f32 %v1623_v15, %v14737_v14  ;;  %v1569_v15 = vmul.f32 %v1529_v1, %v14650_v26  ;;  %v20422_v14 = vld [vmem:[#allocation59_spill] sm:$0xff] }
 0x3a2   : > { %v1629_v62 = vpop.permute.xlu0 %1628  ;;  %v1570_v1 = vmul.f32 %v1531_v39, %v14661_v49  ;;  %v20434_v49 = vld [vmem:[#allocation61_spill] sm:$0xff] }
 0x3a3   : > { %20359 = vst [vmem:[#allocation70_spill] sm:$0xff] %v15207_v57  ;;  %v15225_v10 = vadd.f32 %v1661_v63, %v1565_v6  ;;  %v15241_v63 = vadd.f32 %v1663_v48, %v1567_v61  ;;  %v20373_v48 = vld [vmem:[#allocation25_spill] sm:$0xff] }
 0x3a4   : > { %v15183_v25 = vpop.permute.xlu1 %1634  ;;  %v1667_v61 = vmul.f32 %v20373_v48, %v1629_v62  ;;  %v1668_v62 = vmul.f32 %v15179_v50, %v14751_v36  ;;  %v1573_v50 = vmul.f32 %v15177_v42, %v14671_v41 }
 0x3a5   : > { %20364 = vst [vmem:[#allocation72_spill] sm:$0xff] %v15225_v10  ;;  %20369 = vst [vmem:[#allocation76_spill] sm:$0xff] %v15241_v63 }
 0x3a6   : > { %v15185_v40 = vpop.permute.xlu0 %1534 }
 0x3a8   : > { %v15187_v54 = vpop.permute.xlu1 %1544 }
 0x3a9   : > { %20353 = vst [vmem:[#allocation66_spill] sm:$0xff] %v15187_v54 }
 0x3aa   : > { %v1633_v12 = vpop.permute.xlu0 %1632 }
 0x3ac   : > { %v2193_v31 = vpop.permute.xlu1 %2192 }
 0x3ae   : > { %v15189_v47 = vpop.permute.xlu0 %1538 }
 0x3af   : > { %v1574_v42 = vmul.f32 %v15189_v47, %v20328_v32 }
 0x3b0   : > { %v15199_v51 = vpop.permute.xlu1 %1638 }
 0x3b2   : > { %v15193_v3 = vpop.permute.xlu0 %1636 }
 0x3b4   : > { %v2197_v5 = vpop.permute.xlu1 %2196 }
 0x3b6   : > { %v2187_v52 = vpop.permute.xlu0 %2186 }
 0x3b7   : > { %v15204_v54 = vadd.f32 %v2187_v52, %v15197_v28  ;;  %v1564_v52 = vmul.f32 %v1519_v29, %v14637_v7  ;;  %v1662_v28 = vmul.f32 %v1619_v19, %v14730_v0  ;;  %v15233_v29 = vadd.f32 %v2193_v31, %v15225_v10 }
 0x3b8   : > { %v2201_v4 = vpop.permute.xlu1 %2200 }
 0x3b9   : > { %20358 = vst [vmem:[#allocation69_spill] sm:$0xff] %v15204_v54  ;;  %12460 = vmatprep.mubr.msk.f32.mxu0 %vm2258_vm4, %v15204_v54  ;;  %v15222_v37 = vadd.f32 %v1660_v22, %v1564_v52  ;;  %20366 = vst [vmem:[#allocation74_spill] sm:$0xff] %v15233_v29  ;;  %v15238_v19 = vadd.f32 %v1662_v28, %v1566_v38  ;;  %v1665_v22 = vmul.f32 %v20368_v56, %v1625_v55 }
 0x3ba   : > { %v15211_v33 = vpop.permute.xlu0 %1542  ;;  %12461 = vmatmul.mubr.msk.f32.gmra.mrb[40].mxu0 %vm2258_vm4, %v15207_v57  ;;  %v15251_v52 = vadd.f32 %v2197_v5, %v15241_v63  ;;  %v1666_v28 = vmul.f32 %v1627_v18, %v14746_v30  ;;  %v15256_v55 = vadd.f32 %v1664_v58, %v1568_v23  ;;  %v1571_v18 = vmul.f32 %v15175_v53, %v14658_v43  ;;  %v20415_v43 = vld [vmem:[#allocation54_spill] sm:$0xff] }
 0x3bb   : > { %20362 = vst [vmem:[#allocation71_spill] sm:$0xff] %v15222_v37  ;;  %20367 = vst [vmem:[#allocation75_spill] sm:$0xff] %v15238_v19  ;;  %v15259_v6 = vadd.f32 %v1665_v22, %v1569_v15 }
 0x3bc   : > { %20371 = vst [vmem:[#allocation78_spill] sm:$0xff] %v15251_v52  ;;  %20372 = vst [vmem:[#allocation79_spill] sm:$0xff] %v15256_v55  ;;  %v15276_v58 = vadd.f32 %v1666_v28, %v1570_v1  ;;  %v15279_v23 = vadd.f32 %v1667_v61, %v1571_v18 }
 0x3bd   : > { %20374 = vst [vmem:[#allocation80_spill] sm:$0xff] %v15259_v6  ;;  %v15270_v38 = vadd.f32 %v2201_v4, %v15259_v6  ;;  %v1572_v4 = vmul.f32 %v15185_v40, %v14675_v60 }
 0x3be   : > { %v15217_v45 = vpop.permute.xlu0 %1640  ;;  %20377 = vst [vmem:[#allocation83_spill] sm:$0xff] %v15276_v58  ;;  %20379 = vst [vmem:[#allocation84_spill] sm:$0xff] %v15279_v23 }
 0x3bf   : > { %20376 = vst [vmem:[#allocation82_spill] sm:$0xff] %v15270_v38  ;;  %v15297_v61 = vadd.f32 %v1668_v62, %v1572_v4  ;;  %v1575_v62 = vmul.f32 %v15181_v44, %v20349_v9  ;;  %v1673_v47 = vmul.f32 %v14770_v13, %v15217_v45  ;;  %v1576_v44 = vmul.f32 %v15211_v33, %v20332_v20  ;;  %v20405_v13 = vld [vmem:[#allocation49_spill] sm:$0xff] }
 0x3c1   : > { %20382 = vst [vmem:[#allocation87_spill] sm:$0xff] %v15297_v61 }
 0x3c2   : > { %v2191_v57 = vpop.permute.xlu0 %2190 }
 0x3c3   : > { %v15229_v27 = vadd.f32 %v2191_v57, %v15222_v37  ;;  %v2205_v57 = vpop.permute.xlu1 %2204 }
 0x3c4   : > { %v15291_v28 = vadd.f32 %v2205_v57, %v15279_v23 }
 0x3c5   : > { %20365 = vst [vmem:[#allocation73_spill] sm:$0xff] %v15229_v27  ;;  %12463 = vmatprep.mubr.msk.f32.mxu0 %vm2258_vm4, %v15229_v27 }
 0x3c6   : > { %v2195_v17 = vpop.permute.xlu0 %2194  ;;  %12464 = vmatmul.mubr.msk.f32.gmra.mrb[42].mxu0 %vm2258_vm4, %v15233_v29  ;;  %20381 = vst [vmem:[#allocation86_spill] sm:$0xff] %v15291_v28 }
 0x3c7   : > { %v15247_v31 = vadd.f32 %v2195_v17, %v15238_v19  ;;  %v2209_v22 = vpop.permute.xlu1 %2208  ;;  %v20378_v17 = vld [vmem:[#allocation27_spill] sm:$0xff] }
 0x3c8   : > { %v1669_v39 = vmul.f32 %v20378_v17, %v1633_v12  ;;  %v1670_v12 = vmul.f32 %v15183_v25, %v14764_v46  ;;  %v20419_v46 = vld [vmem:[#allocation57_spill] sm:$0xff] }
 0x3c9   : > { %20370 = vst [vmem:[#allocation77_spill] sm:$0xff] %v15247_v31  ;;  %12466 = vmatprep.mubr.msk.f32.mxu0 %vm2258_vm4, %v15247_v31 }
 0x3ca   : > { %v2199_v59 = vpop.permute.xlu0 %2198  ;;  %12467 = vmatmul.mubr.msk.f32.gmra.mrb[44].mxu0 %vm2258_vm4, %v15251_v52  ;;  %v15301_v1 = vadd.f32 %v1669_v39, %v1573_v50  ;;  %v15319_v39 = vadd.f32 %v1670_v12, %v1574_v42 }
 0x3cb   : > { %v15265_v5 = vadd.f32 %v2199_v59, %v15256_v55  ;;  %v20383_v59 = vld [vmem:[#allocation29_spill] sm:$0xff]  ;;  %v2213_v25 = vpop.permute.xlu1 %2212 }
 0x3cc   : > { %v1671_v40 = vmul.f32 %v20383_v59, %v15193_v3  ;;  %20384 = vst [vmem:[#allocation88_spill] sm:$0xff] %v15301_v1  ;;  %v1672_v3 = vmul.f32 %v15199_v51, %v14776_v11  ;;  %20387 = vst [vmem:[#allocation91_spill] sm:$0xff] %v15319_v39  ;;  %v20390_v51 = vld [vmem:[#allocation66_spill] sm:$0xff] }
 0x3cd   : > { %20375 = vst [vmem:[#allocation81_spill] sm:$0xff] %v15265_v5  ;;  %12469 = vmatprep.mubr.msk.f32.mxu0 %vm2258_vm4, %v15265_v5 }
 0x3ce   : > { %v2203_v15 = vpop.permute.xlu0 %2202  ;;  %12470 = vmatmul.mubr.msk.f32.gmra.mrb[46].mxu0 %vm2258_vm4, %v15270_v38  ;;  %v15323_v4 = vadd.f32 %v1671_v40, %v1575_v62  ;;  %v15339_v40 = vadd.f32 %v1672_v3, %v1576_v44 }
 0x3cf   : > { %v15286_v53 = vadd.f32 %v2203_v15, %v15276_v58  ;;  %v15313_v15 = vadd.f32 %v2209_v22, %v15301_v1  ;;  %v2217_v45 = vpop.permute.xlu1 %2216 }
 0x3d0   : > { %20388 = vst [vmem:[#allocation92_spill] sm:$0xff] %v15323_v4  ;;  %v15335_v12 = vadd.f32 %v2213_v25, %v15323_v4  ;;  %20392 = vst [vmem:[#allocation94_spill] sm:$0xff] %v15339_v40  ;;  %v15358_v25 = vld [vmem:[%s19976_s9] ss:$0 sm:$0xff] }
 0x3d1   : > { %20380 = vst [vmem:[#allocation85_spill] sm:$0xff] %v15286_v53  ;;  %12472 = vmatprep.mubr.msk.f32.mxu0 %vm2258_vm4, %v15286_v53  ;;  %20386 = vst [vmem:[#allocation90_spill] sm:$0xff] %v15313_v15 }
 0x3d2   : > { %v2207_v18 = vpop.permute.xlu0 %2206  ;;  %12473 = vmatmul.mubr.msk.f32.gmra.mrb[48].mxu0 %vm2258_vm4, %v15291_v28  ;;  %20391 = vst [vmem:[#allocation66_spill] sm:$0xff] %v15335_v12 }
 0x3d3   : > { %v15308_v57 = vadd.f32 %v2207_v18, %v15297_v61  ;;  %v1577_v18 = vmul.f32 %v20390_v51, %v14698_v35  ;;  %v20413_v35 = vld [vmem:[#allocation53_spill] sm:$0xff] }
 0x3d5   : > { %20385 = vst [vmem:[#allocation89_spill] sm:$0xff] %v15308_v57  ;;  %12475 = vmatprep.mubr.msk.f32.mxu0 %vm2258_vm4, %v15308_v57  ;;  %v15341_v42 = vadd.f32 %v1673_v47, %v1577_v18 }
 0x3d6   : > { %v2211_v50 = vpop.permute.xlu0 %2210  ;;  %12476 = vmatmul.mubr.msk.f32.gmra.mrb[50].mxu0 %vm2258_vm4, %v15313_v15 }
 0x3d7   : > { %v15330_v22 = vadd.f32 %v2211_v50, %v15319_v39  ;;  %20393 = vst [vmem:[#allocation95_spill] sm:$0xff] %v15341_v42  ;;  %v15349_v50 = vadd.f32 %v2217_v45, %v15341_v42 }
 0x3d9   : > { %20389 = vst [vmem:[#allocation93_spill] sm:$0xff] %v15330_v22  ;;  %12478 = vmatprep.mubr.msk.f32.mxu0 %vm2258_vm4, %v15330_v22  ;;  %20395 = vst [vmem:[#allocation97_spill] sm:$0xff] %v15349_v50 }
 0x3da   : > { %v2215_v62 = vpop.permute.xlu0 %2214  ;;  %12479 = vmatmul.mubr.msk.f32.gmra.mrb[52].mxu0 %vm2258_vm4, %v15335_v12 }
 0x3db   : > { %v15346_v33 = vadd.f32 %v2215_v62, %v15339_v40 }
 0x3dd   : > { %20394 = vst [vmem:[#allocation96_spill] sm:$0xff] %v15346_v33  ;;  %12481 = vmatprep.mubr.msk.f32.mxu0 %vm2258_vm4, %v15346_v33 }
 0x3de   : > { %12482 = vmatmul.mubr.msk.f32.gmra.mrb[54].mxu0 %vm2258_vm4, %v15349_v50 }
 0x41e   : > { %v12438_v3 = vpop.f32.mrb[24].mxu0 }
 0x41f   : > { %v2431_v47 = vadd.f32 %v12438_v3, %v15358_v25  ;;  %v2425_v44 = vpop.f32.mrb[25].mxu0 }
 0x420   : > { %v2426_v51 = vadd.f32 %v15358_v25, %v2425_v44 }
 0x421   : > { %v2585_v62 = vmax.f32 %v2431_v47, 0.0 }
 0x422   : > { %v2584_v18 = vmax.f32 %v2426_v51, 0.0  ;;  %v12441_v45 = vpop.f32.mrb[26].mxu0 }
 0x423   : > { %v2441_v40 = vadd.f32 %v12441_v45, %v15358_v25  ;;  %v2435_v39 = vpop.f32.mrb[27].mxu0 }
 0x424   : > { %v2436_v61 = vadd.f32 %v15358_v25, %v2435_v39  ;;  %12486 = vmatprep.mubr.msk.f32.mxu1 %vm2258_vm4, %v2584_v18 }
 0x425   : > { %12487 = vmatmul.mubr.msk.f32.vlgmr.msra.gmra.mrb[40].mxu1 %vm2258_vm4, %v2585_v62  ;;  %v2587_v19 = vmax.f32 %v2441_v40, 0.0 }
 0x426   : > { %v2586_v58 = vmax.f32 %v2436_v61, 0.0  ;;  %v12444_v55 = vpop.f32.mrb[28].mxu0 }
 0x427   : > { %v2451_v3 = vadd.f32 %v12444_v55, %v15358_v25  ;;  %v2445_v37 = vpop.f32.mrb[29].mxu0 }
 0x428   : > { %v2446_v44 = vadd.f32 %v15358_v25, %v2445_v37  ;;  %12489 = vmatprep.mubr.msk.f32.mxu1 %vm2258_vm4, %v2586_v58 }
 0x429   : > { %12490 = vmatmul.mubr.msk.f32.gmra.mrb[42].mxu1 %vm2258_vm4, %v2587_v19  ;;  %v2589_v45 = vmax.f32 %v2451_v3, 0.0 }
 0x42a   : > { %v2588_v47 = vmax.f32 %v2446_v44, 0.0  ;;  %v12447_v51 = vpop.f32.mrb[30].mxu0 }
 0x42b   : > { %v2461_v39 = vadd.f32 %v12447_v51, %v15358_v25  ;;  %v2455_v18 = vpop.f32.mrb[31].mxu0 }
 0x42c   : > { %v2456_v62 = vadd.f32 %v15358_v25, %v2455_v18  ;;  %12492 = vmatprep.mubr.msk.f32.mxu1 %vm2258_vm4, %v2588_v47 }
 0x42d   : > { %12493 = vmatmul.mubr.msk.f32.gmra.mrb[44].mxu1 %vm2258_vm4, %v2589_v45  ;;  %v2591_v40 = vmax.f32 %v2461_v39, 0.0 }
 0x42e   : > { %v2590_v55 = vmax.f32 %v2456_v62, 0.0  ;;  %v12450_v61 = vpop.f32.mrb[32].mxu0 }
 0x42f   : > { %v2471_v37 = vadd.f32 %v12450_v61, %v15358_v25  ;;  %v2465_v58 = vpop.f32.mrb[33].mxu0 }
 0x430   : > { %v2466_v19 = vadd.f32 %v15358_v25, %v2465_v58  ;;  %12495 = vmatprep.mubr.msk.f32.mxu1 %vm2258_vm4, %v2590_v55 }
 0x431   : > { %12496 = vmatmul.mubr.msk.f32.gmra.mrb[46].mxu1 %vm2258_vm4, %v2591_v40  ;;  %v2593_v51 = vmax.f32 %v2471_v37, 0.0 }
 0x432   : > { %v2592_v3 = vmax.f32 %v2466_v19, 0.0  ;;  %v12453_v44 = vpop.f32.mrb[34].mxu0 }
 0x433   : > { %v2481_v18 = vadd.f32 %v12453_v44, %v15358_v25  ;;  %v2475_v47 = vpop.f32.mrb[35].mxu0 }
 0x434   : > { %v2476_v45 = vadd.f32 %v15358_v25, %v2475_v47  ;;  %12498 = vmatprep.mubr.msk.f32.mxu1 %vm2258_vm4, %v2592_v3  ;;  %v2980_v3 = vld [vmem:[%s19979_s12] sm:$0xf] }
 0x435   : > { %12499 = vmatmul.mubr.msk.f32.gmra.mrb[48].mxu1 %vm2258_vm4, %v2593_v51  ;;  %v2595_v62 = vmax.f32 %v2481_v18, 0.0  ;;  %12534 = vmatprep.subr.msk.mxu0 %vm2355_vm3, %v2980_v3 }
 0x436   : > { %v2594_v39 = vmax.f32 %v2476_v45, 0.0  ;;  %12535 = vmatpush3.msk.msra.mxu0 %vm2355_vm3, %v2980_v3 }
 0x438   : > { %12501 = vmatprep.mubr.msk.f32.mxu1 %vm2258_vm4, %v2594_v39 }
 0x439   : > { %12502 = vmatmul.mubr.msk.f32.gmra.mrb[50].mxu1 %vm2258_vm4, %v2595_v62  ;;  %v12456_v55 = vpop.f32.mrb[36].mxu0 }
 0x43a   : > { %v2491_v61 = vadd.f32 %v12456_v55, %v15358_v25  ;;  %v2485_v40 = vpop.f32.mrb[37].mxu0 }
 0x43b   : > { %v2486_v37 = vadd.f32 %v15358_v25, %v2485_v40 }
 0x43c   : > { %v2597_v58 = vmax.f32 %v2491_v61, 0.0 }
 0x43d   : > { %v2596_v19 = vmax.f32 %v2486_v37, 0.0 }
 0x43f   : > { %12504 = vmatprep.mubr.msk.f32.mxu1 %vm2258_vm4, %v2596_v19 }
 0x440   : > { %12505 = vmatmul.mubr.msk.f32.gmra.mrb[52].mxu1 %vm2258_vm4, %v2597_v58 }
 0x451   : > { %v12459_v44 = vpop.f32.mrb[38].mxu0 }
 0x452   : > { %v2501_v51 = vadd.f32 %v12459_v44, %v15358_v25  ;;  %v2495_v18 = vpop.f32.mrb[39].mxu0 }
 0x453   : > { %v2496_v47 = vadd.f32 %v15358_v25, %v2495_v18 }
 0x454   : > { %v2599_v45 = vmax.f32 %v2501_v51, 0.0 }
 0x455   : > { %v2598_v39 = vmax.f32 %v2496_v47, 0.0 }
 0x457   : > { %12507 = vmatprep.mubr.msk.f32.mxu1 %vm2258_vm4, %v2598_v39 }
 0x458   : > { %12508 = vmatmul.mubr.msk.f32.gmra.mrb[54].mxu1 %vm2258_vm4, %v2599_v45 }
 0x48d   : > { %v12462_v62 = vpop.f32.mrb[40].mxu0 }
 0x48e   : > { %v2511_v55 = vadd.f32 %v12462_v62, %v15358_v25  ;;  %v2505_v61 = vpop.f32.mrb[41].mxu0 }
 0x48f   : > { %v2506_v40 = vadd.f32 %v15358_v25, %v2505_v61 }
 0x490   : > { %v2601_v58 = vmax.f32 %v2511_v55, 0.0 }
 0x491   : > { %v2600_v37 = vmax.f32 %v2506_v40, 0.0 }
 0x493   : > { %12510 = vmatprep.mubr.msk.f32.mxu1 %vm2258_vm4, %v2600_v37 }
 0x494   : > { %12511 = vmatmul.mubr.msk.f32.gmra.mrb[56].mxu1 %vm2258_vm4, %v2601_v58 }
 0x499   : > { %v12465_v19 = vpop.f32.mrb[42].mxu0 }
 0x49a   : > { %v2521_v3 = vadd.f32 %v12465_v19, %v15358_v25  ;;  %v2515_v44 = vpop.f32.mrb[43].mxu0 }
 0x49b   : > { %v2516_v51 = vadd.f32 %v15358_v25, %v2515_v44 }
 0x49c   : > { %v2603_v45 = vmax.f32 %v2521_v3, 0.0 }
 0x49d   : > { %v2602_v18 = vmax.f32 %v2516_v51, 0.0  ;;  %v12468_v47 = vpop.f32.mrb[44].mxu0 }
 0x49e   : > { %v2531_v39 = vadd.f32 %v12468_v47, %v15358_v25  ;;  %v2525_v62 = vpop.f32.mrb[45].mxu0 }
 0x49f   : > { %v2526_v61 = vadd.f32 %v15358_v25, %v2525_v62  ;;  %12513 = vmatprep.mubr.msk.f32.mxu1 %vm2258_vm4, %v2602_v18 }
 0x4a0   : > { %12514 = vmatmul.mubr.msk.f32.gmra.mrb[58].mxu1 %vm2258_vm4, %v2603_v45  ;;  %v2605_v37 = vmax.f32 %v2531_v39, 0.0 }
 0x4a1   : > { %v2604_v55 = vmax.f32 %v2526_v61, 0.0  ;;  %v12471_v40 = vpop.f32.mrb[46].mxu0 }
 0x4a2   : > { %v2541_v58 = vadd.f32 %v12471_v40, %v15358_v25  ;;  %v2535_v19 = vpop.f32.mrb[47].mxu0 }
 0x4a3   : > { %v2536_v44 = vadd.f32 %v15358_v25, %v2535_v19  ;;  %12516 = vmatprep.mubr.msk.f32.mxu1 %vm2258_vm4, %v2604_v55 }
 0x4a4   : > { %12517 = vmatmul.mubr.msk.f32.gmra.mrb[60].mxu1 %vm2258_vm4, %v2605_v37  ;;  %v2607_v47 = vmax.f32 %v2541_v58, 0.0 }
 0x4a5   : > { %v2606_v3 = vmax.f32 %v2536_v44, 0.0  ;;  %v12474_v51 = vpop.f32.mrb[48].mxu0 }
 0x4a6   : > { %v2551_v62 = vadd.f32 %v12474_v51, %v15358_v25  ;;  %v2545_v18 = vpop.f32.mrb[49].mxu0 }
 0x4a7   : > { %v2546_v45 = vadd.f32 %v15358_v25, %v2545_v18  ;;  %12519 = vmatprep.mubr.msk.f32.mxu1 %vm2258_vm4, %v2606_v3 }
 0x4a8   : > { %12520 = vmatmul.mubr.msk.f32.gmra.mrb[62].mxu1 %vm2258_vm4, %v2607_v47  ;;  %v2609_v40 = vmax.f32 %v2551_v62, 0.0 }
 0x4a9   : > { %v2608_v39 = vmax.f32 %v2546_v45, 0.0  ;;  %v12477_v61 = vpop.f32.mrb[50].mxu0 }
 0x4aa   : > { %v2561_v19 = vadd.f32 %v12477_v61, %v15358_v25  ;;  %v2555_v55 = vpop.f32.mrb[51].mxu0 }
 0x4ab   : > { %v2556_v37 = vadd.f32 %v15358_v25, %v2555_v55  ;;  %12522 = vmatprep.mubr.msk.f32.mxu1 %vm2258_vm4, %v2608_v39 }
 0x4ac   : > { %12523 = vmatmul.mubr.msk.f32.gmra.mrb[64].mxu1 %vm2258_vm4, %v2609_v40  ;;  %v2611_v51 = vmax.f32 %v2561_v19, 0.0 }
 0x4ad   : > { %v2610_v58 = vmax.f32 %v2556_v37, 0.0  ;;  %v12480_v44 = vpop.f32.mrb[52].mxu0 }
 0x4ae   : > { %v2571_v18 = vadd.f32 %v12480_v44, %v15358_v25  ;;  %v2565_v3 = vpop.f32.mrb[53].mxu0 }
 0x4af   : > { %v2566_v47 = vadd.f32 %v15358_v25, %v2565_v3  ;;  %12525 = vmatprep.mubr.msk.f32.mxu1 %vm2258_vm4, %v2610_v58  ;;  %v15432_v58 = vld [vmem:[%s19978_s11] ss:$0 sm:$0xff] }
 0x4b0   : > { %12526 = vmatmul.mubr.msk.f32.gmra.mrb[66].mxu1 %vm2258_vm4, %v2611_v51  ;;  %v2613_v61 = vmax.f32 %v2571_v18, 0.0 }
 0x4b1   : > { %v2612_v62 = vmax.f32 %v2566_v47, 0.0  ;;  %v12483_v45 = vpop.f32.mrb[54].mxu0 }
 0x4b2   : > { %v2581_v55 = vadd.f32 %v12483_v45, %v15358_v25  ;;  %v2575_v39 = vpop.f32.mrb[55].mxu0 }
 0x4b3   : > { %v2576_v40 = vadd.f32 %v15358_v25, %v2575_v39  ;;  %12528 = vmatprep.mubr.msk.f32.mxu1 %vm2258_vm4, %v2612_v62 }
 0x4b4   : > { %12529 = vmatmul.mubr.msk.f32.gmra.mrb[68].mxu1 %vm2258_vm4, %v2613_v61  ;;  %v2615_v37 = vmax.f32 %v2581_v55, 0.0 }
 0x4b5   : > { %v2614_v19 = vmax.f32 %v2576_v40, 0.0 }
 0x4b7   : > { %12531 = vmatprep.mubr.msk.f32.mxu1 %vm2258_vm4, %v2614_v19 }
 0x4b8   : > { %12532 = vmatmul.mubr.msk.f32.gmra.mrb[70].mxu1 %vm2258_vm4, %v2615_v37 }
 0x4f8   : > { %v12488_v44 = vpop.f32.mrb[40].mxu1 }
 0x4f9   : > { %v2795_v51 = vadd.f32 %v12488_v44, %v15432_v58  ;;  %v2789_v18 = vpop.f32.mrb[41].mxu1 }
 0x4fa   : > { %v2790_v25 = vadd.f32 %v15432_v58, %v2789_v18 }
 0x4fb   : > { %v2949_v62 = vmax.f32 %v2795_v51, 0.0 }
 0x4fc   : > { %v2948_v3 = vmax.f32 %v2790_v25, 0.0  ;;  %v12491_v47 = vpop.f32.mrb[42].mxu1 }
 0x4fd   : > { %v2805_v45 = vadd.f32 %v12491_v47, %v15432_v58  ;;  %v2799_v61 = vpop.f32.mrb[43].mxu1 }
 0x4fe   : > { %v2800_v55 = vadd.f32 %v15432_v58, %v2799_v61  ;;  %12536 = vmatprep.mubr.msk.f32.mxu0 %vm2258_vm4, %v2948_v3 }
 0x4ff   : > { %12537 = vmatmul.mubr.msk.f32.vlgmr.msra.gmra.mrb[56].mxu0 %vm2258_vm4, %v2949_v62  ;;  %v2951_v19 = vmax.f32 %v2805_v45, 0.0 }
 0x500   : > { %v2950_v39 = vmax.f32 %v2800_v55, 0.0  ;;  %v12494_v40 = vpop.f32.mrb[44].mxu1 }
 0x501   : > { %v2815_v37 = vadd.f32 %v12494_v40, %v15432_v58  ;;  %v2809_v44 = vpop.f32.mrb[45].mxu1 }
 0x502   : > { %v2810_v18 = vadd.f32 %v15432_v58, %v2809_v44  ;;  %12539 = vmatprep.mubr.msk.f32.mxu0 %vm2258_vm4, %v2950_v39 }
 0x503   : > { %12540 = vmatmul.mubr.msk.f32.gmra.mrb[58].mxu0 %vm2258_vm4, %v2951_v19  ;;  %v2953_v47 = vmax.f32 %v2815_v37, 0.0 }
 0x504   : > { %v2952_v51 = vmax.f32 %v2810_v18, 0.0  ;;  %v12497_v25 = vpop.f32.mrb[46].mxu1 }
 0x505   : > { %v2825_v61 = vadd.f32 %v12497_v25, %v15432_v58  ;;  %v2819_v3 = vpop.f32.mrb[47].mxu1 }
 0x506   : > { %v2820_v62 = vadd.f32 %v15432_v58, %v2819_v3  ;;  %12542 = vmatprep.mubr.msk.f32.mxu0 %vm2258_vm4, %v2952_v51 }
 0x507   : > { %12543 = vmatmul.mubr.msk.f32.gmra.mrb[60].mxu0 %vm2258_vm4, %v2953_v47  ;;  %v2955_v40 = vmax.f32 %v2825_v61, 0.0 }
 0x508   : > { %v2954_v45 = vmax.f32 %v2820_v62, 0.0  ;;  %v12500_v55 = vpop.f32.mrb[48].mxu1 }
 0x509   : > { %v2835_v44 = vadd.f32 %v12500_v55, %v15432_v58  ;;  %v2829_v39 = vpop.f32.mrb[49].mxu1 }
 0x50a   : > { %v2830_v19 = vadd.f32 %v15432_v58, %v2829_v39  ;;  %12545 = vmatprep.mubr.msk.f32.mxu0 %vm2258_vm4, %v2954_v45 }
 0x50b   : > { %12546 = vmatmul.mubr.msk.f32.gmra.mrb[62].mxu0 %vm2258_vm4, %v2955_v40  ;;  %v2957_v25 = vmax.f32 %v2835_v44, 0.0 }
 0x50c   : > { %v2956_v37 = vmax.f32 %v2830_v19, 0.0  ;;  %v12503_v18 = vpop.f32.mrb[50].mxu1 }
 0x50d   : > { %v2845_v3 = vadd.f32 %v12503_v18, %v15432_v58  ;;  %v2839_v51 = vpop.f32.mrb[51].mxu1 }
 0x50e   : > { %v2840_v47 = vadd.f32 %v15432_v58, %v2839_v51  ;;  %12548 = vmatprep.mubr.msk.f32.mxu0 %vm2258_vm4, %v2956_v37 }
 0x50f   : > { %12549 = vmatmul.mubr.msk.f32.gmra.mrb[64].mxu0 %vm2258_vm4, %v2957_v25  ;;  %v2959_v62 = vmax.f32 %v2845_v3, 0.0 }
 0x510   : > { %v2958_v61 = vmax.f32 %v2840_v47, 0.0 }
 0x512   : > { %12551 = vmatprep.mubr.msk.f32.mxu0 %vm2258_vm4, %v2958_v61 }
 0x513   : > { %12552 = vmatmul.mubr.msk.f32.gmra.mrb[66].mxu0 %vm2258_vm4, %v2959_v62  ;;  %v12506_v45 = vpop.f32.mrb[52].mxu1 }
 0x514   : > { %v2855_v55 = vadd.f32 %v12506_v45, %v15432_v58  ;;  %v2849_v40 = vpop.f32.mrb[53].mxu1 }
 0x515   : > { %v2850_v44 = vadd.f32 %v15432_v58, %v2849_v40 }
 0x516   : > { %v2961_v39 = vmax.f32 %v2855_v55, 0.0 }
 0x517   : > { %v2960_v19 = vmax.f32 %v2850_v44, 0.0 }
 0x519   : > { %12554 = vmatprep.mubr.msk.f32.mxu0 %vm2258_vm4, %v2960_v19 }
 0x51a   : > { %12555 = vmatmul.mubr.msk.f32.gmra.mrb[68].mxu0 %vm2258_vm4, %v2961_v39 }
 0x52b   : > { %v12509_v37 = vpop.f32.mrb[54].mxu1 }
 0x52c   : > { %v2865_v18 = vadd.f32 %v12509_v37, %v15432_v58  ;;  %v2859_v25 = vpop.f32.mrb[55].mxu1 }
 0x52d   : > { %v2860_v3 = vadd.f32 %v15432_v58, %v2859_v25 }
 0x52e   : > { %v2963_v51 = vmax.f32 %v2865_v18, 0.0 }
 0x52f   : > { %v2962_v47 = vmax.f32 %v2860_v3, 0.0 }
 0x531   : > { %12557 = vmatprep.mubr.msk.f32.mxu0 %vm2258_vm4, %v2962_v47 }
 0x532   : > { %12558 = vmatmul.mubr.msk.f32.gmra.mrb[70].mxu0 %vm2258_vm4, %v2963_v51 }
 0x567   : > { %v12512_v61 = vpop.f32.mrb[56].mxu1 }
 0x568   : > { %v2875_v62 = vadd.f32 %v12512_v61, %v15432_v58  ;;  %v2869_v45 = vpop.f32.mrb[57].mxu1 }
 0x569   : > { %v2870_v55 = vadd.f32 %v15432_v58, %v2869_v45 }
 0x56a   : > { %v2965_v44 = vmax.f32 %v2875_v62, 0.0 }
 0x56b   : > { %v2964_v40 = vmax.f32 %v2870_v55, 0.0 }
 0x56d   : > { %12560 = vmatprep.mubr.msk.f32.mxu0 %vm2258_vm4, %v2964_v40 }
 0x56e   : > { %12561 = vmatmul.mubr.msk.f32.gmra.mrb[72].mxu0 %vm2258_vm4, %v2965_v44 }
 0x573   : > { %v12515_v39 = vpop.f32.mrb[58].mxu1 }
 0x574   : > { %v2885_v19 = vadd.f32 %v12515_v39, %v15432_v58  ;;  %v2879_v37 = vpop.f32.mrb[59].mxu1 }
 0x575   : > { %v2880_v18 = vadd.f32 %v15432_v58, %v2879_v37 }
 0x576   : > { %v2967_v51 = vmax.f32 %v2885_v19, 0.0 }
 0x577   : > { %v2966_v25 = vmax.f32 %v2880_v18, 0.0  ;;  %v12518_v3 = vpop.f32.mrb[60].mxu1 }
 0x578   : > { %v2895_v47 = vadd.f32 %v12518_v3, %v15432_v58  ;;  %v2889_v61 = vpop.f32.mrb[61].mxu1 }
 0x579   : > { %v2890_v45 = vadd.f32 %v15432_v58, %v2889_v61  ;;  %12563 = vmatprep.mubr.msk.f32.mxu0 %vm2258_vm4, %v2966_v25 }
 0x57a   : > { %12564 = vmatmul.mubr.msk.f32.gmra.mrb[74].mxu0 %vm2258_vm4, %v2967_v51  ;;  %v2969_v40 = vmax.f32 %v2895_v47, 0.0 }
 0x57b   : > { %v2968_v62 = vmax.f32 %v2890_v45, 0.0  ;;  %v12521_v55 = vpop.f32.mrb[62].mxu1 }
 0x57c   : > { %v2905_v44 = vadd.f32 %v12521_v55, %v15432_v58  ;;  %v2899_v39 = vpop.f32.mrb[63].mxu1 }
 0x57d   : > { %v2900_v37 = vadd.f32 %v15432_v58, %v2899_v39  ;;  %12566 = vmatprep.mubr.msk.f32.mxu0 %vm2258_vm4, %v2968_v62 }
 0x57e   : > { %12567 = vmatmul.mubr.msk.f32.gmra.mrb[76].mxu0 %vm2258_vm4, %v2969_v40  ;;  %v2971_v3 = vmax.f32 %v2905_v44, 0.0 }
 0x57f   : > { %v2970_v19 = vmax.f32 %v2900_v37, 0.0  ;;  %v12524_v18 = vpop.f32.mrb[64].mxu1 }
 0x580   : > { %v2915_v61 = vadd.f32 %v12524_v18, %v15432_v58  ;;  %v2909_v25 = vpop.f32.mrb[65].mxu1 }
 0x581   : > { %v2910_v51 = vadd.f32 %v15432_v58, %v2909_v25  ;;  %12569 = vmatprep.mubr.msk.f32.mxu0 %vm2258_vm4, %v2970_v19 }
 0x582   : > { %12570 = vmatmul.mubr.msk.f32.gmra.mrb[78].mxu0 %vm2258_vm4, %v2971_v3  ;;  %v2973_v55 = vmax.f32 %v2915_v61, 0.0  ;;  %v3472_v61 = vld [vmem:[%s19981_s14] sm:$0xff] }
 0x583   : > { %v2972_v47 = vmax.f32 %v2910_v51, 0.0  ;;  %v12527_v45 = vpop.f32.mrb[66].mxu1  ;;  %12584 = vmatprep.subr.mxu1 %v3472_v61 }
 0x584   : > { %v2925_v39 = vadd.f32 %v12527_v45, %v15432_v58  ;;  %v2919_v62 = vpop.f32.mrb[67].mxu1  ;;  %12585 = vmatpush3.msra.mxu1 %v3472_v61 }
 0x585   : > { %v2920_v40 = vadd.f32 %v15432_v58, %v2919_v62  ;;  %12572 = vmatprep.mubr.msk.f32.mxu0 %vm2258_vm4, %v2972_v47 }
 0x586   : > { %12573 = vmatmul.mubr.msk.f32.gmra.mrb[80].mxu0 %vm2258_vm4, %v2973_v55  ;;  %v2975_v18 = vmax.f32 %v2925_v39, 0.0 }
 0x587   : > { %v2974_v44 = vmax.f32 %v2920_v40, 0.0  ;;  %v12530_v37 = vpop.f32.mrb[68].mxu1 }
 0x588   : > { %v2935_v25 = vadd.f32 %v12530_v37, %v15432_v58  ;;  %v2929_v19 = vpop.f32.mrb[69].mxu1  ;;  %v15504_v37 = vld [vmem:[%s19980_s13] ss:$0 sm:$0xff] }
 0x589   : > { %v2930_v3 = vadd.f32 %v15432_v58, %v2929_v19  ;;  %12575 = vmatprep.mubr.msk.f32.mxu0 %vm2258_vm4, %v2974_v44 }
 0x58a   : > { %12576 = vmatmul.mubr.msk.f32.gmra.mrb[82].mxu0 %vm2258_vm4, %v2975_v18  ;;  %v2977_v45 = vmax.f32 %v2935_v25, 0.0 }
 0x58b   : > { %v2976_v51 = vmax.f32 %v2930_v3, 0.0  ;;  %v12533_v47 = vpop.f32.mrb[70].mxu1 }
 0x58c   : > { %v2945_v55 = vadd.f32 %v12533_v47, %v15432_v58  ;;  %v2939_v39 = vpop.f32.mrb[71].mxu1 }
 0x58d   : > { %v2940_v62 = vadd.f32 %v15432_v58, %v2939_v39  ;;  %12578 = vmatprep.mubr.msk.f32.mxu0 %vm2258_vm4, %v2976_v51 }
 0x58e   : > { %12579 = vmatmul.mubr.msk.f32.gmra.mrb[84].mxu0 %vm2258_vm4, %v2977_v45  ;;  %v2979_v44 = vmax.f32 %v2945_v55, 0.0 }
 0x58f   : > { %v2978_v40 = vmax.f32 %v2940_v62, 0.0 }
 0x591   : > { %12581 = vmatprep.mubr.msk.f32.mxu0 %vm2258_vm4, %v2978_v40 }
 0x592   : > { %12582 = vmatmul.mubr.msk.f32.gmra.mrb[86].mxu0 %vm2258_vm4, %v2979_v44 }
 0x5d2   : > { %v12538_v18 = vpop.f32.mrb[56].mxu0 }
 0x5d3   : > { %v15507_v25 = vadd.f32 %v12538_v18, %v15504_v37  ;;  %v3153_v58 = vpop.f32.mrb[57].mxu0 }
 0x5d4   : > { %v15510_v19 = vadd.f32 %v15504_v37, %v3153_v58 }
 0x5d5   : > { %3346 = vrot.lane.b32.xlu1 %v15507_v25, %s14170_s0 }
 0x5d6   : > { %v12541_v3 = vpop.f32.mrb[58].mxu0  ;;  %3344 = vrot.lane.b32.xlu0 %v15510_v19, %s14170_s0 }
 0x5d7   : > { %v15517_v61 = vadd.f32 %v12541_v3, %v15504_v37  ;;  %v3163_v51 = vpop.f32.mrb[59].mxu0 }
 0x5d8   : > { %v15520_v47 = vadd.f32 %v15504_v37, %v3163_v51 }
 0x5d9   : > { %3350 = vrot.lane.b32.xlu1 %v15517_v61, %s14170_s0 }
 0x5da   : > { %v12544_v45 = vpop.f32.mrb[60].mxu0  ;;  %3348 = vrot.lane.b32.xlu0 %v15520_v47, %s14170_s0 }
 0x5db   : > { %v15527_v55 = vadd.f32 %v12544_v45, %v15504_v37  ;;  %v3173_v39 = vpop.f32.mrb[61].mxu0 }
 0x5dc   : > { %v15530_v62 = vadd.f32 %v15504_v37, %v3173_v39 }
 0x5dd   : > { %20396 = vst [vmem:[#allocation98_spill] sm:$0xff] %v15527_v55  ;;  %3354 = vrot.lane.b32.xlu1 %v15527_v55, %s14170_s0 }
 0x5de   : > { %v12547_v40 = vpop.f32.mrb[62].mxu0  ;;  %3352 = vrot.lane.b32.xlu0 %v15530_v62, %s14170_s0 }
 0x5df   : > { %v15537_v44 = vadd.f32 %v12547_v40, %v15504_v37  ;;  %v3183_v18 = vpop.f32.mrb[63].mxu0 }
 0x5e0   : > { %v15540_v58 = vadd.f32 %v15504_v37, %v3183_v18 }
 0x5e1   : > { %20397 = vst [vmem:[#allocation99_spill] sm:$0xff] %v15537_v44  ;;  %3358 = vrot.lane.b32.xlu1 %v15537_v44, %s14170_s0 }
 0x5e2   : > { %v12550_v3 = vpop.f32.mrb[64].mxu0  ;;  %3356 = vrot.lane.b32.xlu0 %v15540_v58, %s14170_s0 }
 0x5e3   : > { %v15547_v51 = vadd.f32 %v12550_v3, %v15504_v37  ;;  %v3193_v45 = vpop.f32.mrb[65].mxu0 }
 0x5e4   : > { %v15550_v39 = vadd.f32 %v15504_v37, %v3193_v45 }
 0x5e5   : > { %20398 = vst [vmem:[#allocation100_spill] sm:$0xff] %v15547_v51  ;;  %3362 = vrot.lane.b32.xlu1 %v15547_v51, %s14170_s0 }
 0x5e6   : > { %v12553_v40 = vpop.f32.mrb[66].mxu0  ;;  %3360 = vrot.lane.b32.xlu0 %v15550_v39, %s14170_s0 }
 0x5e7   : > { %v15557_v18 = vadd.f32 %v12553_v40, %v15504_v37  ;;  %v3203_v42 = vpop.f32.mrb[67].mxu0 }
 0x5e8   : > { %v15560_v4 = vadd.f32 %v15504_v37, %v3203_v42 }
 0x5e9   : > { %20399 = vst [vmem:[#allocation101_spill] sm:$0xff] %v15557_v18  ;;  %3366 = vrot.lane.b32.xlu1 %v15557_v18, %s14170_s0 }
 0x5ea   : > { %20400 = vst [vmem:[#allocation102_spill] sm:$0xff] %v15560_v4  ;;  %3364 = vrot.lane.b32.xlu0 %v15560_v4, %s14170_s0 }
 0x5ed   : > { %v12556_v3 = vpop.f32.mrb[68].mxu0 }
 0x5ee   : > { %v15567_v45 = vadd.f32 %v12556_v3, %v15504_v37  ;;  %v3213_v1 = vpop.f32.mrb[69].mxu0 }
 0x5ef   : > { %v15570_v23 = vadd.f32 %v15504_v37, %v3213_v1 }
 0x5f0   : > { %20401 = vst [vmem:[#allocation103_spill] sm:$0xff] %v15567_v45  ;;  %3370 = vrot.lane.b32.xlu1 %v15567_v45, %s14170_s0 }
 0x5f1   : > { %20402 = vst [vmem:[#allocation104_spill] sm:$0xff] %v15570_v23  ;;  %3368 = vrot.lane.b32.xlu0 %v15570_v23, %s14170_s0 }
 0x605   : > { %v12559_v42 = vpop.f32.mrb[70].mxu0 }
 0x606   : > { %v15577_v40 = vadd.f32 %v12559_v42, %v15504_v37  ;;  %v3223_v6 = vpop.f32.mrb[71].mxu0 }
 0x607   : > { %v15580_v63 = vadd.f32 %v15504_v37, %v3223_v6  ;;  %v20408_v6 = vld [vmem:[#allocation50_spill] sm:$0xff] }
 0x608   : > { %20403 = vst [vmem:[#allocation105_spill] sm:$0xff] %v15577_v40  ;;  %3374 = vrot.lane.b32.xlu1 %v15577_v40, %s14170_s0 }
 0x609   : > { %20404 = vst [vmem:[#allocation106_spill] sm:$0xff] %v15580_v63  ;;  %3372 = vrot.lane.b32.xlu0 %v15580_v63, %s14170_s0 }
 0x641   : > { %v12562_v10 = vpop.f32.mrb[72].mxu0 }
 0x642   : > { %v15591_v42 = vadd.f32 %v12562_v10, %v15504_v37  ;;  %v3233_v17 = vpop.f32.mrb[73].mxu0 }
 0x643   : > { %v15600_v56 = vadd.f32 %v15504_v37, %v3233_v17 }
 0x644   : > { %20407 = vst [vmem:[#allocation108_spill] sm:$0xff] %v15591_v42  ;;  %3378 = vrot.lane.b32.xlu1 %v15591_v42, %s14170_s0 }
 0x645   : > { %20410 = vst [vmem:[#allocation110_spill] sm:$0xff] %v15600_v56  ;;  %3376 = vrot.lane.b32.xlu0 %v15600_v56, %s14170_s0 }
 0x647   : > { %v3347_v1 = vpop.permute.xlu1 %3346 }
 0x648   : > { %v3345_v3 = vpop.permute.xlu0 %3344  ;;  %v15595_v48 = vsel %vm2258_vm4, %v20408_v6, %v3347_v1  ;;  %v20428_v6 = vld [vmem:[#allocation60_spill] sm:$0xff] }
 0x649   : > { %v15588_v59 = vsel %vm2258_vm4, %v20405_v13, %v3345_v3  ;;  %20409 = vst [vmem:[#allocation109_spill] sm:$0xff] %v15595_v48  ;;  %v20411_v3 = vld [vmem:[#allocation52_spill] sm:$0xff]  ;;  %v20443_v13 = vld [vmem:[#allocation63_spill] sm:$0xff] }
 0x64a   : > { %20406 = vst [vmem:[#allocation107_spill] sm:$0xff] %v15588_v59  ;;  %12586 = vmatprep.mubr.msk.f32.mxu1 %vm3480_vm5, %v15588_v59 }
 0x64b   : > { %v3351_v8 = vpop.permute.xlu1 %3350  ;;  %12587 = vmatmul.mubr.msk.f32.vlgmr.msra.gmra.mrb[72].mxu1 %vm3480_vm5, %v15595_v48 }
 0x64c   : > { %v3349_v10 = vpop.permute.xlu0 %3348  ;;  %v15614_v9 = vsel %vm2258_vm4, %v20413_v35, %v3351_v8 }
 0x64d   : > { %v15610_v1 = vsel %vm2258_vm4, %v20411_v3, %v3349_v10  ;;  %20414 = vst [vmem:[#allocation112_spill] sm:$0xff] %v15614_v9  ;;  %v12565_v11 = vpop.f32.mrb[74].mxu0 }
 0x64e   : > { %20412 = vst [vmem:[#allocation111_spill] sm:$0xff] %v15610_v1  ;;  %12589 = vmatprep.mubr.msk.f32.mxu1 %vm3480_vm5, %v15610_v1  ;;  %v3243_v30 = vpop.f32.mrb[75].mxu0 }
 0x64f   : > { %v3355_v17 = vpop.permute.xlu1 %3354  ;;  %12590 = vmatmul.mubr.msk.f32.gmra.mrb[74].mxu1 %vm3480_vm5, %v15614_v9 }
 0x650   : > { %v3353_v41 = vpop.permute.xlu0 %3352  ;;  %v15626_v10 = vsel %vm2258_vm4, %v20417_v21, %v3355_v17  ;;  %v15646_v21 = vadd.f32 %v15504_v37, %v3243_v30 }
 0x651   : > { %v15622_v26 = vsel %vm2258_vm4, %v20415_v43, %v3353_v41  ;;  %20418 = vst [vmem:[#allocation114_spill] sm:$0xff] %v15626_v10  ;;  %v15637_v41 = vadd.f32 %v12565_v11, %v15504_v37  ;;  %v12568_v11 = vpop.f32.mrb[76].mxu0  ;;  %v20440_v43 = vld [vmem:[#allocation62_spill] sm:$0xff] }
 0x652   : > { %20416 = vst [vmem:[#allocation113_spill] sm:$0xff] %v15622_v26  ;;  %12592 = vmatprep.mubr.msk.f32.mxu1 %vm3480_vm5, %v15622_v26  ;;  %20424 = vst [vmem:[#allocation118_spill] sm:$0xff] %v15646_v21  ;;  %3380 = vrot.lane.b32.xlu0 %v15646_v21, %s14170_s0  ;;  %v15659_v0 = vadd.f32 %v12568_v11, %v15504_v37  ;;  %v3253_v30 = vpop.f32.mrb[77].mxu0 }
 0x653   : > { %v3359_v8 = vpop.permute.xlu1 %3358  ;;  %12593 = vmatmul.mubr.msk.f32.gmra.mrb[76].mxu1 %vm3480_vm5, %v15626_v10  ;;  %20421 = vst [vmem:[#allocation116_spill] sm:$0xff] %v15637_v41  ;;  %3382 = vrot.lane.b32.xlu1 %v15637_v41, %s14170_s0  ;;  %v15668_v20 = vadd.f32 %v15504_v37, %v3253_v30 }
 0x654   : > { %v3357_v16 = vpop.permute.xlu0 %3356  ;;  %v15641_v17 = vsel %vm2258_vm4, %v20422_v14, %v3359_v8  ;;  %v20425_v8 = vld [vmem:[#allocation35_spill] sm:$0xff]  ;;  %20427 = vst [vmem:[#allocation120_spill] sm:$0xff] %v15659_v0 }
 0x655   : > { %v15634_v36 = vsel %vm2258_vm4, %v20419_v46, %v3357_v16  ;;  %20423 = vst [vmem:[#allocation117_spill] sm:$0xff] %v15641_v17  ;;  %20430 = vst [vmem:[#allocation122_spill] sm:$0xff] %v15668_v20  ;;  %v12571_v11 = vpop.f32.mrb[78].mxu0 }
 0x656   : > { %20420 = vst [vmem:[#allocation115_spill] sm:$0xff] %v15634_v36  ;;  %12595 = vmatprep.mubr.msk.f32.mxu1 %vm3480_vm5, %v15634_v36  ;;  %3384 = vrot.lane.b32.xlu0 %v15668_v20, %s14170_s0  ;;  %v15681_v60 = vadd.f32 %v12571_v11, %v15504_v37  ;;  %v3263_v30 = vpop.f32.mrb[79].mxu0 }
 0x657   : > { %v3363_v35 = vpop.permute.xlu1 %3362  ;;  %12596 = vmatmul.mubr.msk.f32.gmra.mrb[78].mxu1 %vm3480_vm5, %v15641_v17  ;;  %3386 = vrot.lane.b32.xlu1 %v15659_v0, %s14170_s0  ;;  %v15690_v24 = vadd.f32 %v15504_v37, %v3263_v30  ;;  %v20454_v17 = vld [vmem:[#allocation70_spill] sm:$0xff] }
 0x658   : > { %v3361_v16 = vpop.permute.xlu0 %3360  ;;  %v15663_v2 = vsel %vm2258_vm4, %v20428_v6, %v3363_v35  ;;  %v20431_v35 = vld [vmem:[#allocation37_spill] sm:$0xff]  ;;  %20433 = vst [vmem:[#allocation124_spill] sm:$0xff] %v15681_v60 }
 0x659   : > { %v15656_v14 = vsel %vm2258_vm4, %v20425_v8, %v3361_v16  ;;  %20429 = vst [vmem:[#allocation121_spill] sm:$0xff] %v15663_v2  ;;  %20436 = vst [vmem:[#allocation126_spill] sm:$0xff] %v15690_v24 }
 0x65a   : > { %20426 = vst [vmem:[#allocation119_spill] sm:$0xff] %v15656_v14  ;;  %12598 = vmatprep.mubr.msk.f32.mxu1 %vm3480_vm5, %v15656_v14  ;;  %3388 = vrot.lane.b32.xlu0 %v15690_v24, %s14170_s0 }
 0x65b   : > { %v3367_v32 = vpop.permute.xlu1 %3366  ;;  %12599 = vmatmul.mubr.msk.f32.gmra.mrb[80].mxu1 %vm3480_vm5, %v15663_v2  ;;  %3390 = vrot.lane.b32.xlu1 %v15681_v60, %s14170_s0 }
 0x65c   : > { %v3365_v16 = vpop.permute.xlu0 %3364  ;;  %v15685_v34 = vsel %vm2258_vm4, %v20434_v49, %v3367_v32 }
 0x65d   : > { %v15678_v6 = vsel %vm2258_vm4, %v20431_v35, %v3365_v16  ;;  %20435 = vst [vmem:[#allocation125_spill] sm:$0xff] %v15685_v34  ;;  %v12574_v16 = vpop.f32.mrb[80].mxu0 }
 0x65e   : > { %20432 = vst [vmem:[#allocation123_spill] sm:$0xff] %v15678_v6  ;;  %12601 = vmatprep.mubr.msk.f32.mxu1 %vm3480_vm5, %v15678_v6  ;;  %v15699_v11 = vadd.f32 %v12574_v16, %v15504_v37  ;;  %v3273_v32 = vpop.f32.mrb[81].mxu0  ;;  %v20451_v6 = vld [vmem:[#allocation64_spill] sm:$0xff] }
 0x65f   : > { %12602 = vmatmul.mubr.msk.f32.gmra.mrb[82].mxu1 %vm3480_vm5, %v15685_v34  ;;  %v15702_v49 = vadd.f32 %v15504_v37, %v3273_v32  ;;  %v12577_v7 = vpop.f32.mrb[82].mxu0  ;;  %v3834_v32 = vld [vmem:[%s19983_s16] sm:$0xf] }
 0x660   : > { %20437 = vst [vmem:[#allocation127_spill] sm:$0xff] %v15699_v11  ;;  %3394 = vrot.lane.b32.xlu1 %v15699_v11, %s14170_s0  ;;  %v15709_v8 = vadd.f32 %v12577_v7, %v15504_v37  ;;  %v3283_v46 = vpop.f32.mrb[83].mxu0  ;;  %12634 = vmatprep.subr.msk.mxu0 %vm2355_vm3, %v3834_v32 }
 0x661   : > { %20438 = vst [vmem:[#allocation128_spill] sm:$0xff] %v15702_v49  ;;  %3392 = vrot.lane.b32.xlu0 %v15702_v49, %s14170_s0  ;;  %v15719_v3 = vadd.f32 %v15504_v37, %v3283_v46  ;;  %v12580_v7 = vpop.f32.mrb[84].mxu0  ;;  %12635 = vmatpush3.msk.msra.mxu0 %vm2355_vm3, %v3834_v32 }
 0x662   : > { %v3371_v30 = vpop.permute.xlu1 %3370  ;;  %20439 = vst [vmem:[#allocation129_spill] sm:$0xff] %v15709_v8  ;;  %v15736_v46 = vadd.f32 %v12580_v7, %v15504_v37 }
 0x663   : > { %v3369_v35 = vpop.permute.xlu0 %3368  ;;  %20442 = vst [vmem:[#allocation131_spill] sm:$0xff] %v15719_v3  ;;  %v15723_v34 = vsel %vm2258_vm4, %v20443_v13, %v3371_v30 }
 0x664   : > { %v15713_v16 = vsel %vm2258_vm4, %v20440_v43, %v3369_v35  ;;  %20444 = vst [vmem:[#allocation132_spill] sm:$0xff] %v15723_v34  ;;  %3398 = vrot.lane.b32.xlu1 %v15709_v8, %s14170_s0  ;;  %20445 = vst [vmem:[#allocation133_spill] sm:$0xff] %v15736_v46  ;;  %v3293_v35 = vpop.f32.mrb[85].mxu0 }
 0x665   : > { %20441 = vst [vmem:[#allocation130_spill] sm:$0xff] %v15713_v16  ;;  %12604 = vmatprep.mubr.msk.f32.mxu1 %vm3480_vm5, %v15713_v16  ;;  %3396 = vrot.lane.b32.xlu0 %v15719_v3, %s14170_s0  ;;  %v15739_v30 = vadd.f32 %v15504_v37, %v3293_v35  ;;  %v12583_v13 = vpop.f32.mrb[86].mxu0  ;;  %v20449_v16 = vld [vmem:[#allocation65_spill] sm:$0xff] }
 0x666   : > { %12605 = vmatmul.mubr.msk.f32.gmra.mrb[84].mxu1 %vm3480_vm5, %v15723_v34  ;;  %v15746_v43 = vadd.f32 %v12583_v13, %v15504_v37  ;;  %v3303_v34 = vpop.f32.mrb[87].mxu0 }
 0x667   : > { %20446 = vst [vmem:[#allocation134_spill] sm:$0xff] %v15739_v30  ;;  %v15749_v32 = vadd.f32 %v15504_v37, %v3303_v34 }
 0x668   : > { %3402 = vrot.lane.b32.xlu1 %v15736_v46, %s14170_s0  ;;  %20447 = vst [vmem:[#allocation135_spill] sm:$0xff] %v15746_v43 }
 0x669   : > { %3400 = vrot.lane.b32.xlu0 %v15739_v30, %s14170_s0  ;;  %20448 = vst [vmem:[#allocation136_spill] sm:$0xff] %v15749_v32 }
 0x66c   : > { %3406 = vrot.lane.b32.xlu1 %v15746_v43, %s14170_s0 }
 0x66d   : > { %3404 = vrot.lane.b32.xlu0 %v15749_v32, %s14170_s0 }
 0x67a   : > { %v3375_v7 = vpop.permute.xlu1 %3374 }
 0x67b   : > { %v3373_v35 = vpop.permute.xlu0 %3372  ;;  %v15761_v13 = vsel %vm2258_vm4, %v20451_v6, %v3375_v7 }
 0x67c   : > { %v15757_v2 = vsel %vm2258_vm4, %v20449_v16, %v3373_v35  ;;  %20452 = vst [vmem:[#allocation138_spill] sm:$0xff] %v15761_v13 }
 0x67d   : > { %20450 = vst [vmem:[#allocation137_spill] sm:$0xff] %v15757_v2  ;;  %12607 = vmatprep.mubr.msk.f32.mxu1 %vm3480_vm5, %v15757_v2 }
 0x67e   : > { %12608 = vmatmul.mubr.msk.f32.gmra.mrb[86].mxu1 %vm3480_vm5, %v15761_v13 }
 0x6b6   : > { %v3379_v34 = vpop.permute.xlu1 %3378 }
 0x6b7   : > { %v3377_v37 = vpop.permute.xlu0 %3376  ;;  %v15773_v35 = vsel %vm2258_vm4, %v20454_v17, %v3379_v34 }
 0x6b8   : > { %v15769_v14 = vsel %vm2258_vm4, %v15204_v54, %v3377_v37  ;;  %20455 = vst [vmem:[#allocation140_spill] sm:$0xff] %v15773_v35 }
 0x6b9   : > { %20453 = vst [vmem:[#allocation139_spill] sm:$0xff] %v15769_v14  ;;  %12610 = vmatprep.mubr.msk.f32.mxu1 %vm3480_vm5, %v15769_v14 }
 0x6ba   : > { %12611 = vmatmul.mubr.msk.f32.gmra.mrb[88].mxu1 %vm3480_vm5, %v15773_v35 }
 0x6c4   : > { %v3381_v6 = vpop.permute.xlu0 %3380 }
 0x6c5   : > { %v3383_v7 = vpop.permute.xlu1 %3382  ;;  %v15781_v16 = vsel %vm2258_vm4, %v15229_v27, %v3381_v6 }
 0x6c6   : > { %20456 = vst [vmem:[#allocation141_spill] sm:$0xff] %v15781_v16  ;;  %v15785_v37 = vsel %vm2258_vm4, %v15233_v29, %v3383_v7  ;;  %12613 = vmatprep.mubr.msk.f32.mxu1 %vm3480_vm5, %v15781_v16 }
 0x6c7   : > { %20457 = vst [vmem:[#allocation142_spill] sm:$0xff] %v15785_v37  ;;  %12614 = vmatmul.mubr.msk.f32.gmra.mrb[90].mxu1 %vm3480_vm5, %v15785_v37 }
 0x6c8   : > { %v3385_v17 = vpop.permute.xlu0 %3384 }
 0x6c9   : > { %v3387_v34 = vpop.permute.xlu1 %3386  ;;  %v15793_v54 = vsel %vm2258_vm4, %v15247_v31, %v3385_v17 }
 0x6ca   : > { %20458 = vst [vmem:[#allocation143_spill] sm:$0xff] %v15793_v54  ;;  %v15797_v6 = vsel %vm2258_vm4, %v15251_v52, %v3387_v34  ;;  %12616 = vmatprep.mubr.msk.f32.mxu1 %vm3480_vm5, %v15793_v54 }
 0x6cb   : > { %20459 = vst [vmem:[#allocation144_spill] sm:$0xff] %v15797_v6  ;;  %12617 = vmatmul.mubr.msk.f32.gmra.mrb[92].mxu1 %vm3480_vm5, %v15797_v6 }
 0x6cc   : > { %v3389_v29 = vpop.permute.xlu0 %3388 }
 0x6cd   : > { %v3391_v7 = vpop.permute.xlu1 %3390  ;;  %v15805_v27 = vsel %vm2258_vm4, %v15265_v5, %v3389_v29 }
 0x6ce   : > { %20460 = vst [vmem:[#allocation145_spill] sm:$0xff] %v15805_v27  ;;  %v15809_v17 = vsel %vm2258_vm4, %v15270_v38, %v3391_v7  ;;  %12619 = vmatprep.mubr.msk.f32.mxu1 %vm3480_vm5, %v15805_v27 }
 0x6cf   : > { %20461 = vst [vmem:[#allocation146_spill] sm:$0xff] %v15809_v17  ;;  %12620 = vmatmul.mubr.msk.f32.gmra.mrb[94].mxu1 %vm3480_vm5, %v15809_v17 }
 0x6d2   : > { %v3395_v34 = vpop.permute.xlu1 %3394 }
 0x6d3   : > { %v3393_v52 = vpop.permute.xlu0 %3392  ;;  %v15821_v29 = vsel %vm2258_vm4, %v15291_v28, %v3395_v34 }
 0x6d4   : > { %v15817_v31 = vsel %vm2258_vm4, %v15286_v53, %v3393_v52  ;;  %20463 = vst [vmem:[#allocation148_spill] sm:$0xff] %v15821_v29 }
 0x6d5   : > { %20462 = vst [vmem:[#allocation147_spill] sm:$0xff] %v15817_v31  ;;  %12622 = vmatprep.mubr.msk.f32.mxu1 %vm3480_vm5, %v15817_v31 }
 0x6d6   : > { %v3399_v7 = vpop.permute.xlu1 %3398  ;;  %12623 = vmatmul.mubr.msk.f32.gmra.mrb[96].mxu1 %vm3480_vm5, %v15821_v29 }
 0x6d7   : > { %v3397_v38 = vpop.permute.xlu0 %3396  ;;  %v15833_v52 = vsel %vm2258_vm4, %v15313_v15, %v3399_v7 }
 0x6d8   : > { %v15829_v5 = vsel %vm2258_vm4, %v15308_v57, %v3397_v38  ;;  %20465 = vst [vmem:[#allocation150_spill] sm:$0xff] %v15833_v52 }
 0x6d9   : > { %20464 = vst [vmem:[#allocation149_spill] sm:$0xff] %v15829_v5  ;;  %12625 = vmatprep.mubr.msk.f32.mxu1 %vm3480_vm5, %v15829_v5 }
 0x6da   : > { %v3403_v34 = vpop.permute.xlu1 %3402  ;;  %12626 = vmatmul.mubr.msk.f32.gmra.mrb[98].mxu1 %vm3480_vm5, %v15833_v52 }
 0x6db   : > { %v3401_v53 = vpop.permute.xlu0 %3400  ;;  %v15845_v38 = vsel %vm2258_vm4, %v15335_v12, %v3403_v34  ;;  %v15866_v34 = vld [vmem:[%s19982_s15] ss:$0 sm:$0xff] }
 0x6dc   : > { %v15841_v28 = vsel %vm2258_vm4, %v15330_v22, %v3401_v53  ;;  %20467 = vst [vmem:[#allocation152_spill] sm:$0xff] %v15845_v38 }
 0x6dd   : > { %20466 = vst [vmem:[#allocation151_spill] sm:$0xff] %v15841_v28  ;;  %12628 = vmatprep.mubr.msk.f32.mxu1 %vm3480_vm5, %v15841_v28 }
 0x6de   : > { %12629 = vmatmul.mubr.msk.f32.gmra.mrb[100].mxu1 %vm3480_vm5, %v15845_v38  ;;  %v3407_v7 = vpop.permute.xlu1 %3406 }
 0x6df   : > { %v3405_v57 = vpop.permute.xlu0 %3404  ;;  %v15857_v53 = vsel %vm2258_vm4, %v15349_v50, %v3407_v7 }
 0x6e0   : > { %v15853_v15 = vsel %vm2258_vm4, %v15346_v33, %v3405_v57  ;;  %20469 = vst [vmem:[#allocation154_spill] sm:$0xff] %v15857_v53 }
 0x6e1   : > { %20468 = vst [vmem:[#allocation153_spill] sm:$0xff] %v15853_v15  ;;  %12631 = vmatprep.mubr.msk.f32.mxu1 %vm3480_vm5, %v15853_v15 }
 0x6e2   : > { %12632 = vmatmul.mubr.msk.f32.gmra.mrb[102].mxu1 %vm3480_vm5, %v15857_v53 }
 0x71e   : > { %v12588_v22 = vpop.f32.mrb[72].mxu1 }
 0x71f   : > { %v3649_v12 = vadd.f32 %v12588_v22, %v15866_v34  ;;  %v3643_v57 = vpop.f32.mrb[73].mxu1 }
 0x720   : > { %v3644_v33 = vadd.f32 %v15866_v34, %v3643_v57 }
 0x721   : > { %v3803_v50 = vmax.f32 %v3649_v12, 0.0 }
 0x722   : > { %v3802_v38 = vmax.f32 %v3644_v33, 0.0  ;;  %v12591_v7 = vpop.f32.mrb[74].mxu1 }
 0x723   : > { %v3659_v28 = vadd.f32 %v12591_v7, %v15866_v34  ;;  %v3653_v15 = vpop.f32.mrb[75].mxu1 }
 0x724   : > { %v3654_v52 = vadd.f32 %v15866_v34, %v3653_v15  ;;  %12636 = vmatprep.mubr.msk.f32.mxu0 %vm2258_vm4, %v3802_v38 }
 0x725   : > { %12637 = vmatmul.mubr.msk.f32.vlgmr.msra.gmra.mrb[88].mxu0 %vm2258_vm4, %v3803_v50  ;;  %v3805_v29 = vmax.f32 %v3659_v28, 0.0 }
 0x726   : > { %v3804_v53 = vmax.f32 %v3654_v52, 0.0  ;;  %v12594_v5 = vpop.f32.mrb[76].mxu1 }
 0x727   : > { %v3669_v22 = vadd.f32 %v12594_v5, %v15866_v34  ;;  %v3663_v31 = vpop.f32.mrb[77].mxu1 }
 0x728   : > { %v3664_v57 = vadd.f32 %v15866_v34, %v3663_v31  ;;  %12639 = vmatprep.mubr.msk.f32.mxu0 %vm2258_vm4, %v3804_v53 }
 0x729   : > { %12640 = vmatmul.mubr.msk.f32.gmra.mrb[90].mxu0 %vm2258_vm4, %v3805_v29  ;;  %v3807_v7 = vmax.f32 %v3669_v22, 0.0 }
 0x72a   : > { %v3806_v12 = vmax.f32 %v3664_v57, 0.0  ;;  %v12597_v33 = vpop.f32.mrb[78].mxu1 }
 0x72b   : > { %v3679_v15 = vadd.f32 %v12597_v33, %v15866_v34  ;;  %v3673_v38 = vpop.f32.mrb[79].mxu1 }
 0x72c   : > { %v3674_v50 = vadd.f32 %v15866_v34, %v3673_v38  ;;  %12642 = vmatprep.mubr.msk.f32.mxu0 %vm2258_vm4, %v3806_v12 }
 0x72d   : > { %12643 = vmatmul.mubr.msk.f32.gmra.mrb[92].mxu0 %vm2258_vm4, %v3807_v7  ;;  %v3809_v52 = vmax.f32 %v3679_v15, 0.0 }
 0x72e   : > { %v3808_v5 = vmax.f32 %v3674_v50, 0.0  ;;  %v12600_v28 = vpop.f32.mrb[80].mxu1 }
 0x72f   : > { %v3689_v31 = vadd.f32 %v12600_v28, %v15866_v34  ;;  %v3683_v53 = vpop.f32.mrb[81].mxu1 }
 0x730   : > { %v3684_v29 = vadd.f32 %v15866_v34, %v3683_v53  ;;  %12645 = vmatprep.mubr.msk.f32.mxu0 %vm2258_vm4, %v3808_v5 }
 0x731   : > { %12646 = vmatmul.mubr.msk.f32.gmra.mrb[94].mxu0 %vm2258_vm4, %v3809_v52  ;;  %v3811_v33 = vmax.f32 %v3689_v31, 0.0 }
 0x732   : > { %v3810_v22 = vmax.f32 %v3684_v29, 0.0  ;;  %v12603_v57 = vpop.f32.mrb[82].mxu1 }
 0x733   : > { %v3699_v38 = vadd.f32 %v12603_v57, %v15866_v34  ;;  %v3693_v12 = vpop.f32.mrb[83].mxu1 }
 0x734   : > { %v3694_v7 = vadd.f32 %v15866_v34, %v3693_v12  ;;  %12648 = vmatprep.mubr.msk.f32.mxu0 %vm2258_vm4, %v3810_v22  ;;  %v4198_v22 = vld [vmem:[%s19985_s18] sm:$0xf] }
 0x735   : > { %12649 = vmatmul.mubr.msk.f32.gmra.mrb[96].mxu0 %vm2258_vm4, %v3811_v33  ;;  %v3813_v50 = vmax.f32 %v3699_v38, 0.0  ;;  %12684 = vmatprep.subr.msk.mxu1 %vm2355_vm3, %v4198_v22 }
 0x736   : > { %v3812_v15 = vmax.f32 %v3694_v7, 0.0  ;;  %12685 = vmatpush3.msk.msra.mxu1 %vm2355_vm3, %v4198_v22 }
 0x738   : > { %12651 = vmatprep.mubr.msk.f32.mxu0 %vm2258_vm4, %v3812_v15 }
 0x739   : > { %12652 = vmatmul.mubr.msk.f32.gmra.mrb[98].mxu0 %vm2258_vm4, %v3813_v50  ;;  %v12606_v5 = vpop.f32.mrb[84].mxu1 }
 0x73a   : > { %v3709_v28 = vadd.f32 %v12606_v5, %v15866_v34  ;;  %v3703_v52 = vpop.f32.mrb[85].mxu1 }
 0x73b   : > { %v3704_v31 = vadd.f32 %v15866_v34, %v3703_v52 }
 0x73c   : > { %v3815_v29 = vmax.f32 %v3709_v28, 0.0 }
 0x73d   : > { %v3814_v53 = vmax.f32 %v3704_v31, 0.0 }
 0x73f   : > { %12654 = vmatprep.mubr.msk.f32.mxu0 %vm2258_vm4, %v3814_v53 }
 0x740   : > { %12655 = vmatmul.mubr.msk.f32.gmra.mrb[100].mxu0 %vm2258_vm4, %v3815_v29 }
 0x751   : > { %v12609_v57 = vpop.f32.mrb[86].mxu1 }
 0x752   : > { %v3719_v33 = vadd.f32 %v12609_v57, %v15866_v34  ;;  %v3713_v38 = vpop.f32.mrb[87].mxu1 }
 0x753   : > { %v3714_v12 = vadd.f32 %v15866_v34, %v3713_v38 }
 0x754   : > { %v3817_v15 = vmax.f32 %v3719_v33, 0.0 }
 0x755   : > { %v3816_v7 = vmax.f32 %v3714_v12, 0.0 }
 0x757   : > { %12657 = vmatprep.mubr.msk.f32.mxu0 %vm2258_vm4, %v3816_v7 }
 0x758   : > { %12658 = vmatmul.mubr.msk.f32.gmra.mrb[102].mxu0 %vm2258_vm4, %v3817_v15 }
 0x78d   : > { %v12612_v50 = vpop.f32.mrb[88].mxu1 }
 0x78e   : > { %v3729_v5 = vadd.f32 %v12612_v50, %v15866_v34  ;;  %v3723_v28 = vpop.f32.mrb[89].mxu1 }
 0x78f   : > { %v3724_v52 = vadd.f32 %v15866_v34, %v3723_v28 }
 0x790   : > { %v3819_v53 = vmax.f32 %v3729_v5, 0.0 }
 0x791   : > { %v3818_v31 = vmax.f32 %v3724_v52, 0.0 }
 0x793   : > { %12660 = vmatprep.mubr.msk.f32.mxu0 %vm2258_vm4, %v3818_v31 }
 0x794   : > { %12661 = vmatmul.mubr.msk.f32.gmra.mrb[104].mxu0 %vm2258_vm4, %v3819_v53 }
 0x79a   : > { %v12615_v29 = vpop.f32.mrb[90].mxu1 }
 0x79b   : > { %v3739_v22 = vadd.f32 %v12615_v29, %v15866_v34  ;;  %v3733_v57 = vpop.f32.mrb[91].mxu1 }
 0x79c   : > { %v3734_v33 = vadd.f32 %v15866_v34, %v3733_v57 }
 0x79d   : > { %v3821_v7 = vmax.f32 %v3739_v22, 0.0 }
 0x79e   : > { %v3820_v38 = vmax.f32 %v3734_v33, 0.0  ;;  %v12618_v12 = vpop.f32.mrb[92].mxu1 }
 0x79f   : > { %v3749_v15 = vadd.f32 %v12618_v12, %v15866_v34  ;;  %v3743_v50 = vpop.f32.mrb[93].mxu1 }
 0x7a0   : > { %v3744_v28 = vadd.f32 %v15866_v34, %v3743_v50  ;;  %12663 = vmatprep.mubr.msk.f32.mxu0 %vm2258_vm4, %v3820_v38 }
 0x7a1   : > { %12664 = vmatmul.mubr.msk.f32.gmra.mrb[106].mxu0 %vm2258_vm4, %v3821_v7  ;;  %v3823_v31 = vmax.f32 %v3749_v15, 0.0 }
 0x7a2   : > { %v3822_v5 = vmax.f32 %v3744_v28, 0.0  ;;  %v12621_v52 = vpop.f32.mrb[94].mxu1 }
 0x7a3   : > { %v3759_v53 = vadd.f32 %v12621_v52, %v15866_v34  ;;  %v3753_v29 = vpop.f32.mrb[95].mxu1 }
 0x7a4   : > { %v3754_v57 = vadd.f32 %v15866_v34, %v3753_v29  ;;  %12666 = vmatprep.mubr.msk.f32.mxu0 %vm2258_vm4, %v3822_v5 }
 0x7a5   : > { %12667 = vmatmul.mubr.msk.f32.gmra.mrb[108].mxu0 %vm2258_vm4, %v3823_v31  ;;  %v3825_v12 = vmax.f32 %v3759_v53, 0.0 }
 0x7a6   : > { %v3824_v22 = vmax.f32 %v3754_v57, 0.0 }
 0x7a8   : > { %12669 = vmatprep.mubr.msk.f32.mxu0 %vm2258_vm4, %v3824_v22 }
 0x7a9   : > { %v12624_v33 = vpop.f32.mrb[96].mxu1  ;;  %12670 = vmatmul.mubr.msk.f32.gmra.mrb[110].mxu0 %vm2258_vm4, %v3825_v12 }
 0x7aa   : > { %v3769_v50 = vadd.f32 %v12624_v33, %v15866_v34  ;;  %v3763_v38 = vpop.f32.mrb[97].mxu1 }
 0x7ab   : > { %v3764_v7 = vadd.f32 %v15866_v34, %v3763_v38 }
 0x7ac   : > { %v3827_v52 = vmax.f32 %v3769_v50, 0.0 }
 0x7ad   : > { %v3826_v15 = vmax.f32 %v3764_v7, 0.0  ;;  %v12627_v28 = vpop.f32.mrb[98].mxu1 }
 0x7ae   : > { %v3779_v29 = vadd.f32 %v12627_v28, %v15866_v34  ;;  %v3773_v5 = vpop.f32.mrb[99].mxu1 }
 0x7af   : > { %v3774_v31 = vadd.f32 %v15866_v34, %v3773_v5  ;;  %12672 = vmatprep.mubr.msk.f32.mxu0 %vm2258_vm4, %v3826_v15 }
 0x7b0   : > { %12673 = vmatmul.mubr.msk.f32.gmra.mrb[112].mxu0 %vm2258_vm4, %v3827_v52  ;;  %v3829_v33 = vmax.f32 %v3779_v29, 0.0 }
 0x7b1   : > { %v3828_v53 = vmax.f32 %v3774_v31, 0.0  ;;  %v12630_v57 = vpop.f32.mrb[100].mxu1 }
 0x7b2   : > { %v3789_v38 = vadd.f32 %v12630_v57, %v15866_v34  ;;  %v3783_v22 = vpop.f32.mrb[101].mxu1 }
 0x7b3   : > { %v3784_v12 = vadd.f32 %v15866_v34, %v3783_v22  ;;  %12675 = vmatprep.mubr.msk.f32.mxu0 %vm2258_vm4, %v3828_v53  ;;  %v15940_v53 = vld [vmem:[%s19984_s17] ss:$0 sm:$0xff] }
 0x7b4   : > { %12676 = vmatmul.mubr.msk.f32.gmra.mrb[114].mxu0 %vm2258_vm4, %v3829_v33  ;;  %v3831_v28 = vmax.f32 %v3789_v38, 0.0 }
 0x7b5   : > { %v3830_v50 = vmax.f32 %v3784_v12, 0.0  ;;  %v12633_v7 = vpop.f32.mrb[102].mxu1 }
 0x7b6   : > { %v3799_v5 = vadd.f32 %v12633_v7, %v15866_v34  ;;  %v3793_v15 = vpop.f32.mrb[103].mxu1 }
 0x7b7   : > { %v3794_v52 = vadd.f32 %v15866_v34, %v3793_v15  ;;  %12678 = vmatprep.mubr.msk.f32.mxu0 %vm2258_vm4, %v3830_v50 }
 0x7b8   : > { %12679 = vmatmul.mubr.msk.f32.gmra.mrb[116].mxu0 %vm2258_vm4, %v3831_v28  ;;  %v3833_v31 = vmax.f32 %v3799_v5, 0.0 }
 0x7b9   : > { %v3832_v29 = vmax.f32 %v3794_v52, 0.0 }
 0x7bb   : > { %12681 = vmatprep.mubr.msk.f32.mxu0 %vm2258_vm4, %v3832_v29 }
 0x7bc   : > { %12682 = vmatmul.mubr.msk.f32.gmra.mrb[118].mxu0 %vm2258_vm4, %v3833_v31 }
 0x7f8   : > { %v12638_v57 = vpop.f32.mrb[88].mxu0 }
 0x7f9   : > { %v4013_v33 = vadd.f32 %v12638_v57, %v15940_v53  ;;  %v4007_v38 = vpop.f32.mrb[89].mxu0 }
 0x7fa   : > { %v4008_v34 = vadd.f32 %v15940_v53, %v4007_v38 }
 0x7fb   : > { %v4167_v50 = vmax.f32 %v4013_v33, 0.0 }
 0x7fc   : > { %v4166_v22 = vmax.f32 %v4008_v34, 0.0  ;;  %v12641_v12 = vpop.f32.mrb[90].mxu0 }
 0x7fd   : > { %v4023_v7 = vadd.f32 %v12641_v12, %v15940_v53  ;;  %v4017_v28 = vpop.f32.mrb[91].mxu0 }
 0x7fe   : > { %v4018_v5 = vadd.f32 %v15940_v53, %v4017_v28  ;;  %12686 = vmatprep.mubr.msk.f32.mxu1 %vm2258_vm4, %v4166_v22 }
 0x7ff   : > { %12687 = vmatmul.mubr.msk.f32.vlgmr.msra.gmra.mrb[104].mxu1 %vm2258_vm4, %v4167_v50  ;;  %v4169_v29 = vmax.f32 %v4023_v7, 0.0 }
 0x800   : > { %v4168_v15 = vmax.f32 %v4018_v5, 0.0  ;;  %v12644_v52 = vpop.f32.mrb[92].mxu0 }
 0x801   : > { %v4033_v31 = vadd.f32 %v12644_v52, %v15940_v53  ;;  %v4027_v57 = vpop.f32.mrb[93].mxu0 }
 0x802   : > { %v4028_v38 = vadd.f32 %v15940_v53, %v4027_v57  ;;  %12689 = vmatprep.mubr.msk.f32.mxu1 %vm2258_vm4, %v4168_v15 }
 0x803   : > { %12690 = vmatmul.mubr.msk.f32.gmra.mrb[106].mxu1 %vm2258_vm4, %v4169_v29  ;;  %v4171_v12 = vmax.f32 %v4033_v31, 0.0 }
 0x804   : > { %v4170_v33 = vmax.f32 %v4028_v38, 0.0  ;;  %v12647_v34 = vpop.f32.mrb[94].mxu0 }
 0x805   : > { %v4043_v28 = vadd.f32 %v12647_v34, %v15940_v53  ;;  %v4037_v22 = vpop.f32.mrb[95].mxu0 }
 0x806   : > { %v4038_v50 = vadd.f32 %v15940_v53, %v4037_v22  ;;  %12692 = vmatprep.mubr.msk.f32.mxu1 %vm2258_vm4, %v4170_v33 }
 0x807   : > { %12693 = vmatmul.mubr.msk.f32.gmra.mrb[108].mxu1 %vm2258_vm4, %v4171_v12  ;;  %v4173_v52 = vmax.f32 %v4043_v28, 0.0 }
 0x808   : > { %v4172_v7 = vmax.f32 %v4038_v50, 0.0  ;;  %v12650_v5 = vpop.f32.mrb[96].mxu0 }
 0x809   : > { %v4053_v57 = vadd.f32 %v12650_v5, %v15940_v53  ;;  %v4047_v15 = vpop.f32.mrb[97].mxu0 }
 0x80a   : > { %v4048_v29 = vadd.f32 %v15940_v53, %v4047_v15  ;;  %12695 = vmatprep.mubr.msk.f32.mxu1 %vm2258_vm4, %v4172_v7 }
 0x80b   : > { %12696 = vmatmul.mubr.msk.f32.gmra.mrb[110].mxu1 %vm2258_vm4, %v4173_v52  ;;  %v4175_v34 = vmax.f32 %v4053_v57, 0.0 }
 0x80c   : > { %v4174_v31 = vmax.f32 %v4048_v29, 0.0  ;;  %v12653_v38 = vpop.f32.mrb[98].mxu0 }
 0x80d   : > { %v4063_v22 = vadd.f32 %v12653_v38, %v15940_v53  ;;  %v4057_v33 = vpop.f32.mrb[99].mxu0 }
 0x80e   : > { %v4058_v12 = vadd.f32 %v15940_v53, %v4057_v33  ;;  %12698 = vmatprep.mubr.msk.f32.mxu1 %vm2258_vm4, %v4174_v31 }
 0x80f   : > { %12699 = vmatmul.mubr.msk.f32.gmra.mrb[112].mxu1 %vm2258_vm4, %v4175_v34  ;;  %v4177_v50 = vmax.f32 %v4063_v22, 0.0 }
 0x810   : > { %v4176_v28 = vmax.f32 %v4058_v12, 0.0 }
 0x812   : > { %12701 = vmatprep.mubr.msk.f32.mxu1 %vm2258_vm4, %v4176_v28 }
 0x813   : > { %12702 = vmatmul.mubr.msk.f32.gmra.mrb[114].mxu1 %vm2258_vm4, %v4177_v50  ;;  %v12656_v7 = vpop.f32.mrb[100].mxu0 }
 0x814   : > { %v4073_v5 = vadd.f32 %v12656_v7, %v15940_v53  ;;  %v4067_v52 = vpop.f32.mrb[101].mxu0 }
 0x815   : > { %v4068_v57 = vadd.f32 %v15940_v53, %v4067_v52 }
 0x816   : > { %v4179_v29 = vmax.f32 %v4073_v5, 0.0 }
 0x817   : > { %v4178_v15 = vmax.f32 %v4068_v57, 0.0 }
 0x819   : > { %12704 = vmatprep.mubr.msk.f32.mxu1 %vm2258_vm4, %v4178_v15 }
 0x81a   : > { %12705 = vmatmul.mubr.msk.f32.gmra.mrb[116].mxu1 %vm2258_vm4, %v4179_v29 }
 0x82b   : > { %v12659_v31 = vpop.f32.mrb[102].mxu0 }
 0x82c   : > { %v4083_v38 = vadd.f32 %v12659_v31, %v15940_v53  ;;  %v4077_v34 = vpop.f32.mrb[103].mxu0 }
 0x82d   : > { %v4078_v22 = vadd.f32 %v15940_v53, %v4077_v34 }
 0x82e   : > { %v4181_v12 = vmax.f32 %v4083_v38, 0.0 }
 0x82f   : > { %v4180_v33 = vmax.f32 %v4078_v22, 0.0 }
 0x831   : > { %12707 = vmatprep.mubr.msk.f32.mxu1 %vm2258_vm4, %v4180_v33 }
 0x832   : > { %12708 = vmatmul.mubr.msk.f32.gmra.mrb[118].mxu1 %vm2258_vm4, %v4181_v12 }
 0x867   : > { %v12662_v28 = vpop.f32.mrb[104].mxu0 }
 0x868   : > { %v4093_v50 = vadd.f32 %v12662_v28, %v15940_v53  ;;  %v4087_v7 = vpop.f32.mrb[105].mxu0 }
 0x869   : > { %v4088_v5 = vadd.f32 %v15940_v53, %v4087_v7 }
 0x86a   : > { %v4183_v57 = vmax.f32 %v4093_v50, 0.0 }
 0x86b   : > { %v4182_v52 = vmax.f32 %v4088_v5, 0.0 }
 0x86d   : > { %12710 = vmatprep.mubr.msk.f32.mxu1 %vm2258_vm4, %v4182_v52 }
 0x86e   : > { %12711 = vmatmul.mubr.msk.f32.gmra.mrb[120].mxu1 %vm2258_vm4, %v4183_v57 }
 0x874   : > { %v12665_v15 = vpop.f32.mrb[106].mxu0 }
 0x875   : > { %v4103_v29 = vadd.f32 %v12665_v15, %v15940_v53  ;;  %v4097_v31 = vpop.f32.mrb[107].mxu0 }
 0x876   : > { %v4098_v38 = vadd.f32 %v15940_v53, %v4097_v31 }
 0x877   : > { %v4185_v33 = vmax.f32 %v4103_v29, 0.0 }
 0x878   : > { %v4184_v34 = vmax.f32 %v4098_v38, 0.0  ;;  %v12668_v22 = vpop.f32.mrb[108].mxu0 }
 0x879   : > { %v4113_v12 = vadd.f32 %v12668_v22, %v15940_v53  ;;  %v4107_v28 = vpop.f32.mrb[109].mxu0 }
 0x87a   : > { %v4108_v7 = vadd.f32 %v15940_v53, %v4107_v28  ;;  %12713 = vmatprep.mubr.msk.f32.mxu1 %vm2258_vm4, %v4184_v34 }
 0x87b   : > { %12714 = vmatmul.mubr.msk.f32.gmra.mrb[122].mxu1 %vm2258_vm4, %v4185_v33  ;;  %v4187_v52 = vmax.f32 %v4113_v12, 0.0 }
 0x87c   : > { %v4186_v50 = vmax.f32 %v4108_v7, 0.0  ;;  %v12671_v5 = vpop.f32.mrb[110].mxu0 }
 0x87d   : > { %v4123_v57 = vadd.f32 %v12671_v5, %v15940_v53  ;;  %v4117_v15 = vpop.f32.mrb[111].mxu0 }
 0x87e   : > { %v4118_v31 = vadd.f32 %v15940_v53, %v4117_v15  ;;  %12716 = vmatprep.mubr.msk.f32.mxu1 %vm2258_vm4, %v4186_v50 }
 0x87f   : > { %12717 = vmatmul.mubr.msk.f32.gmra.mrb[124].mxu1 %vm2258_vm4, %v4187_v52  ;;  %v4189_v22 = vmax.f32 %v4123_v57, 0.0 }
 0x880   : > { %v4188_v29 = vmax.f32 %v4118_v31, 0.0 }
 0x882   : > { %12719 = vmatprep.mubr.msk.f32.mxu1 %vm2258_vm4, %v4188_v29 }
 0x883   : > { %v12674_v38 = vpop.f32.mrb[112].mxu0  ;;  %12720 = vmatmul.mubr.msk.f32.gmra.mrb[126].mxu1 %vm2258_vm4, %v4189_v22 }
 0x884   : > { %v4133_v28 = vadd.f32 %v12674_v38, %v15940_v53  ;;  %v4127_v34 = vpop.f32.mrb[113].mxu0 }
 0x885   : > { %v4128_v33 = vadd.f32 %v15940_v53, %v4127_v34 }
 0x886   : > { %v4191_v5 = vmax.f32 %v4133_v28, 0.0 }
 0x887   : > { %v4190_v12 = vmax.f32 %v4128_v33, 0.0  ;;  %v12677_v7 = vpop.f32.mrb[114].mxu0 }
 0x888   : > { %v4143_v15 = vadd.f32 %v12677_v7, %v15940_v53  ;;  %v4137_v50 = vpop.f32.mrb[115].mxu0 }
 0x889   : > { %v4138_v52 = vadd.f32 %v15940_v53, %v4137_v50  ;;  %12722 = vmatprep.mubr.msk.f32.mxu1 %vm2258_vm4, %v4190_v12 }
 0x88a   : > { %12723 = vmatmul.mubr.msk.f32.gmra.mrb[128].mxu1 %vm2258_vm4, %v4191_v5  ;;  %v4193_v38 = vmax.f32 %v4143_v15, 0.0 }
 0x88b   : > { %v4192_v57 = vmax.f32 %v4138_v52, 0.0  ;;  %v12680_v31 = vpop.f32.mrb[116].mxu0 }
 0x88c   : > { %v4153_v34 = vadd.f32 %v12680_v31, %v15940_v53  ;;  %v4147_v29 = vpop.f32.mrb[117].mxu0 }
 0x88d   : > { %v4148_v22 = vadd.f32 %v15940_v53, %v4147_v29  ;;  %12725 = vmatprep.mubr.msk.f32.mxu1 %vm2258_vm4, %v4192_v57  ;;  %v16009_v57 = vld [vmem:[%s19986_s19] ss:$0 sm:$0xff] }
 0x88e   : > { %12726 = vmatmul.mubr.msk.f32.gmra.mrb[130].mxu1 %vm2258_vm4, %v4193_v38  ;;  %v4195_v7 = vmax.f32 %v4153_v34, 0.0 }
 0x88f   : > { %v4194_v28 = vmax.f32 %v4148_v22, 0.0  ;;  %v12683_v33 = vpop.f32.mrb[118].mxu0 }
 0x890   : > { %v4163_v50 = vadd.f32 %v12683_v33, %v15940_v53  ;;  %v4157_v12 = vpop.f32.mrb[119].mxu0 }
 0x891   : > { %v4158_v5 = vadd.f32 %v15940_v53, %v4157_v12  ;;  %12728 = vmatprep.mubr.msk.f32.mxu1 %vm2258_vm4, %v4194_v28 }
 0x892   : > { %12729 = vmatmul.mubr.msk.f32.gmra.mrb[132].mxu1 %vm2258_vm4, %v4195_v7  ;;  %v4197_v52 = vmax.f32 %v4163_v50, 0.0 }
 0x893   : > { %v4196_v15 = vmax.f32 %v4158_v5, 0.0 }
 0x895   : > { %12731 = vmatprep.mubr.msk.f32.mxu1 %vm2258_vm4, %v4196_v15 }
 0x896   : > { %12732 = vmatmul.mubr.msk.f32.gmra.mrb[134].mxu1 %vm2258_vm4, %v4197_v52 }
 0x8d2   : > { %v12688_v31 = vpop.f32.mrb[104].mxu1 }
 0x8d3   : > { %v4377_v38 = vadd.f32 %v12688_v31, %v16009_v57  ;;  %v4371_v34 = vpop.f32.mrb[105].mxu1 }
 0x8d4   : > { %v4372_v29 = vadd.f32 %v16009_v57, %v4371_v34 }
 0x8d5   : > { %5013 = vrot.lane.b32.xlu1 %v4377_v38, %s14171_s22 }
 0x8d6   : > { %v12691_v53 = vpop.f32.mrb[106].mxu1  ;;  %13518 = vtanh.f32 %v4372_v29 }
 0x8d7   : > { %v4381_v22 = vpop.f32.mrb[107].mxu1  ;;  %v4387_v7 = vadd.f32 %v12691_v53, %v16009_v57  ;;  %13520 = vtanh.f32 %v4377_v38 }
 0x8d8   : > { %v4382_v28 = vadd.f32 %v16009_v57, %v4381_v22 }
 0x8d9   : > { %5011 = vrot.lane.b32.xlu1 %v4372_v29, %s14171_s22  ;;  %13522 = vtanh.f32 %v4387_v7 }
 0x8da   : > { %v12694_v33 = vpop.f32.mrb[108].mxu1  ;;  %5015 = vrot.lane.b32.xlu0 %v4382_v28, %s14171_s22  ;;  %13524 = vtanh.f32 %v4382_v28 }
 0x8db   : > { %v4391_v50 = vpop.f32.mrb[109].mxu1  ;;  %v4397_v15 = vadd.f32 %v12694_v33, %v16009_v57 }
 0x8dc   : > { %v4392_v12 = vadd.f32 %v16009_v57, %v4391_v50 }
 0x8dd   : > { %5017 = vrot.lane.b32.xlu1 %v4387_v7, %s14171_s22 }
 0x8de   : > { %v12697_v5 = vpop.f32.mrb[110].mxu1  ;;  %5019 = vrot.lane.b32.xlu0 %v4392_v12, %s14171_s22  ;;  %13526 = vtanh.f32 %v4392_v12 }
 0x8df   : > { %v4401_v52 = vpop.f32.mrb[111].mxu1  ;;  %v16026_v53 = vadd.f32 %v12697_v5, %v16009_v57  ;;  %13528 = vtanh.f32 %v4397_v15 }
 0x8e0   : > { %v4402_v31 = vadd.f32 %v16009_v57, %v4401_v52  ;;  %v13519_v52 = vpop.eup %13518 }
 0x8e1   : > { %5021 = vrot.lane.b32.xlu1 %v4397_v15, %s14171_s22  ;;  %v16032_v6 = vmul.f32 0.1, %v13519_v52  ;;  %v13521_v5 = vpop.eup %13520 }
 0x8e2   : > { %v12700_v34 = vpop.f32.mrb[112].mxu1  ;;  %5023 = vrot.lane.b32.xlu0 %v4402_v31, %s14171_s22  ;;  %v16036_v16 = vmul.f32 0.1, %v13521_v5  ;;  %13530 = vtanh.f32 %v4402_v31 }
 0x8e3   : > { %v4411_v22 = vpop.f32.mrb[113].mxu1  ;;  %v4595_v54 = vsel %vm4594_vm6, %v16032_v6, 0.0  ;;  %v16043_v38 = vadd.f32 %v12700_v34, %v16009_v57  ;;  %13532 = vtanh.f32 %v16026_v53 }
 0x8e4   : > { %v4598_v37 = vsel %vm4594_vm6, %v16036_v16, 0.0  ;;  %v4412_v35 = vadd.f32 %v16009_v57, %v4411_v22 }
 0x8e5   : > { %5025 = vrot.lane.b32.xlu1 %v16026_v53, %s14171_s22 }
 0x8e6   : > { %v12703_v50 = vpop.f32.mrb[114].mxu1  ;;  %13534 = vtanh.f32 %v4412_v35 }
 0x8e7   : > { %v4421_v17 = vpop.f32.mrb[115].mxu1 }
 0x8ed   : > { %v12706_v27 = vpop.f32.mrb[116].mxu1 }
 0x8ee   : > { %v16030_v33 = vpop.f32.mrb[117].mxu1 }
 0x8ef   : > { %v4432_v32 = vadd.f32 %v16009_v57, %v16030_v33 }
 0x901   : > { %4596 = vadd.xlane.f32.xlu0 %v4595_v54  ;;  %v16048_v54 = vadd.f32 %v12703_v50, %v16009_v57 }
 0x905   : > { %v12709_v29 = vpop.f32.mrb[118].mxu1 }
 0x906   : > { %v4441_v14 = vpop.f32.mrb[119].mxu1 }
 0x909   : > { %4599 = vadd.xlane.f32.xlu1 %v4598_v37  ;;  %v13523_v37 = vpop.eup %13522 }
 0x90a   : > { %v16052_v52 = vmul.f32 0.1, %v13523_v37  ;;  %v13525_v22 = vpop.eup %13524  ;;  %v4422_v37 = vadd.f32 %v16009_v57, %v4421_v17 }
 0x90b   : > { %v16056_v5 = vmul.f32 0.1, %v13525_v22  ;;  %v13527_v13 = vpop.eup %13526  ;;  %v4437_v22 = vadd.f32 %v12706_v27, %v16009_v57 }
 0x90c   : > { %v4604_v34 = vsel %vm4594_vm6, %v16052_v52, 0.0  ;;  %v16060_v2 = vmul.f32 0.1, %v13527_v13  ;;  %v13529_v9 = vpop.eup %13528  ;;  %13536 = vtanh.f32 %v4422_v37 }
 0x90d   : > { %v4601_v50 = vsel %vm4594_vm6, %v16056_v5, 0.0  ;;  %v16088_v43 = vmul.f32 0.1, %v13529_v9  ;;  %v13531_v11 = vpop.eup %13530  ;;  %v4447_v9 = vadd.f32 %v12709_v29, %v16009_v57  ;;  %13538 = vtanh.f32 %v4432_v32 }
 0x90e   : > { %v4607_v28 = vsel %vm4594_vm6, %v16060_v2, 0.0  ;;  %v16096_v31 = vmul.f32 0.1, %v13531_v11  ;;  %v13533_v30 = vpop.eup %13532  ;;  %v4442_v11 = vadd.f32 %v16009_v57, %v4441_v14 }
 0x90f   : > { %v4610_v8 = vsel %vm4594_vm6, %v16088_v43, 0.0  ;;  %v13535_v33 = vpop.eup %13534 }
 0x910   : > { %v4613_v60 = vsel %vm4594_vm6, %v16096_v31, 0.0  ;;  %13540 = vtanh.f32 %v4442_v11  ;;  %v16111_v0 = vmul.f32 0.1, %v13535_v33 }
 0x911   : > { %13542 = vtanh.f32 %v16043_v38 }
 0x912   : > { %v4619_v53 = vsel %vm4594_vm6, %v16111_v0, 0.0  ;;  %13544 = vtanh.f32 %v16048_v54 }
 0x913   : > { %13546 = vtanh.f32 %v4437_v22 }
 0x914   : > { %13548 = vtanh.f32 %v4447_v9 }
 0x916   : > { %v13537_v29 = vpop.eup %13536 }
 0x917   : > { %5027 = vrot.lane.b32.xlu0 %v4412_v35, %s14171_s22  ;;  %v16115_v35 = vmul.f32 0.1, %v13537_v29 }
 0x91a   : > { %5029 = vrot.lane.b32.xlu1 %v16043_v38, %s14171_s22 }
 0x91e   : > { %5033 = vrot.lane.b32.xlu1 %v16048_v54, %s14171_s22 }
 0x936   : > { %4605 = vadd.xlane.f32.xlu0 %v4604_v34 }
 0x93a   : > { %4602 = vadd.xlane.f32.xlu0 %v4601_v50 }
 0x941   : > { %v12712_v7 = vpop.f32.mrb[120].mxu1 }
 0x942   : > { %4608 = vadd.xlane.f32.xlu1 %v4607_v28  ;;  %v16064_v12 = vpop.f32.mrb[121].mxu1  ;;  %v4457_v29 = vadd.f32 %v12712_v7, %v16009_v57 }
 0x94e   : > { %v12715_v34 = vpop.f32.mrb[122].mxu1 }
 0x94f   : > { %v16070_v36 = vpop.f32.mrb[123].mxu1 }
 0x950   : > { %5031 = vrot.lane.b32.xlu0 %v4422_v37, %s14171_s22  ;;  %v13539_v37 = vpop.eup %13538 }
 0x951   : > { %v16119_v14 = vmul.f32 0.1, %v13539_v37 }
 0x952   : > { %v12718_v13 = vpop.f32.mrb[124].mxu1 }
 0x953   : > { %5037 = vrot.lane.b32.xlu1 %v4437_v22, %s14171_s22  ;;  %v16072_v50 = vpop.f32.mrb[125].mxu1  ;;  %v16135_v37 = vadd.f32 %v12718_v13, %v16009_v57 }
 0x956   : > { %v12721_v10 = vpop.f32.mrb[126].mxu1 }
 0x957   : > { %v16074_v28 = vpop.f32.mrb[127].mxu1 }
 0x95d   : > { %v16076_v26 = vpop.f32.mrb[128].mxu1 }
 0x95e   : > { %v16078_v1 = vpop.f32.mrb[129].mxu1 }
 0x961   : > { %v16080_v17 = vpop.f32.mrb[130].mxu1 }
 0x962   : > { %v16082_v27 = vpop.f32.mrb[131].mxu1 }
 0x963   : > { %v4502_v49 = vadd.f32 %v16009_v57, %v16082_v27 }
 0x965   : > { %v16084_v48 = vpop.f32.mrb[132].mxu1 }
 0x966   : > { %v16086_v59 = vpop.f32.mrb[133].mxu1 }
 0x969   : > { %v16090_v15 = vpop.f32.mrb[134].mxu1 }
 0x96a   : > { %v16092_v46 = vpop.f32.mrb[135].mxu1 }
 0x96f   : > { %4611 = vadd.xlane.f32.xlu0 %v4610_v8  ;;  %v16106_v8 = vmul.f32 0.1, %v13533_v30  ;;  %v4625_v30 = vsel %vm4594_vm6, %v16115_v35, 0.0 }
 0x977   : > { %4614 = vadd.xlane.f32.xlu1 %v4613_v60  ;;  %v4616_v60 = vsel %vm4594_vm6, %v16106_v8, 0.0 }
 0x985   : > { %5035 = vrot.lane.b32.xlu0 %v4432_v32, %s14171_s22  ;;  %v13541_v32 = vpop.eup %13540 }
 0x986   : > { %v16123_v33 = vmul.f32 0.1, %v13541_v32 }
 0x988   : > { %5041 = vrot.lane.b32.xlu1 %v4447_v9, %s14171_s22  ;;  %v4637_v3 = vsel %vm4594_vm6, %v16123_v33, 0.0 }
 0x9a4   : > { %4617 = vadd.xlane.f32.xlu0 %v4616_v60  ;;  %v4631_v60 = vsel %vm4594_vm6, %v16119_v14, 0.0 }
 0x9ac   : > { %4620 = vadd.xlane.f32.xlu1 %v4619_v53  ;;  %v4467_v53 = vadd.f32 %v12715_v34, %v16009_v57 }
 0x9b0   : > { %4626 = vadd.xlane.f32.xlu1 %v4625_v30  ;;  %v13543_v30 = vpop.eup %13542 }
 0x9b1   : > { %v16142_v38 = vmul.f32 0.1, %v13543_v30  ;;  %v13545_v7 = vpop.eup %13544 }
 0x9b2   : > { %v16148_v22 = vmul.f32 0.1, %v13545_v7  ;;  %v13547_v34 = vpop.eup %13546 }
 0x9b3   : > { %v4622_v54 = vsel %vm4594_vm6, %v16142_v38, 0.0  ;;  %v16152_v9 = vmul.f32 0.1, %v13547_v34 }
 0x9b4   : > { %4632 = vadd.xlane.f32.xlu1 %v4631_v60  ;;  %v4628_v13 = vsel %vm4594_vm6, %v16148_v22, 0.0  ;;  %v4452_v60 = vadd.f32 %v16009_v57, %v16064_v12  ;;  %v4472_v12 = vadd.f32 %v16009_v57, %v16072_v50 }
 0x9b6   : > { %13550 = vtanh.f32 %v4452_v60 }
 0x9b7   : > { %13552 = vtanh.f32 %v4457_v29 }
 0x9b8   : > { %4638 = vadd.xlane.f32.xlu1 %v4637_v3  ;;  %v16140_v3 = vadd.f32 %v12721_v10, %v16009_v57  ;;  %v13549_v10 = vpop.eup %13548 }
 0x9b9   : > { %v16156_v32 = vmul.f32 0.1, %v13549_v10  ;;  %v4482_v10 = vadd.f32 %v16009_v57, %v16074_v28 }
 0x9ba   : > { %5039 = vrot.lane.b32.xlu0 %v4442_v11, %s14171_s22  ;;  %v4634_v11 = vsel %vm4594_vm6, %v16152_v9, 0.0 }
 0x9bb   : > { %v4640_v30 = vsel %vm4594_vm6, %v16156_v32, 0.0 }
 0x9c0   : > { %v13551_v7 = vpop.eup %13550 }
 0x9c9   : > { %5045 = vrot.lane.b32.xlu1 %v4457_v29, %s14171_s22  ;;  %v16195_v29 = vadd.f32 %v16080_v17, %v16009_v57 }
 0x9cd   : > { %5049 = vrot.lane.b32.xlu1 %v4467_v53, %s14171_s22 }
 0x9d1   : > { %5053 = vrot.lane.b32.xlu1 %v16135_v37, %s14171_s22 }
 0x9d5   : > { %5057 = vrot.lane.b32.xlu1 %v16140_v3, %s14171_s22 }
 0x9d9   : > { %4623 = vadd.xlane.f32.xlu0 %v4622_v54  ;;  %v16162_v54 = vmul.f32 0.1, %v13551_v7 }
 0x9db   : > { %v4643_v34 = vsel %vm4594_vm6, %v16162_v54, 0.0 }
 0x9dd   : > { %4629 = vadd.xlane.f32.xlu0 %v4628_v13  ;;  %v4462_v13 = vadd.f32 %v16009_v57, %v16070_v36  ;;  %v13553_v36 = vpop.eup %13552 }
 0x9df   : > { %13554 = vtanh.f32 %v4462_v13 }
 0x9e0   : > { %13556 = vtanh.f32 %v4467_v53 }
 0x9e1   : > { %4635 = vadd.xlane.f32.xlu0 %v4634_v11  ;;  %v16178_v11 = vadd.f32 %v16076_v26, %v16009_v57  ;;  %v4492_v26 = vadd.f32 %v16009_v57, %v16078_v1  ;;  %13558 = vtanh.f32 %v4472_v12 }
 0x9e2   : > { %13560 = vtanh.f32 %v16135_v37  ;;  %v16241_v37 = vadd.f32 %v16009_v57, %v16092_v46 }
 0x9e3   : > { %13562 = vtanh.f32 %v4482_v10 }
 0x9e4   : > { %13564 = vtanh.f32 %v4492_v26 }
 0x9e5   : > { %4641 = vadd.xlane.f32.xlu0 %v4640_v30  ;;  %13566 = vtanh.f32 %v4502_v49 }
 0x9e9   : > { %v13555_v30 = vpop.eup %13554 }
 0x9ea   : > { %v16186_v28 = vmul.f32 0.1, %v13555_v30 }
 0x9ec   : > { %v4649_v7 = vsel %vm4594_vm6, %v16186_v28, 0.0 }
 0x9f9   : > { %4644 = vadd.xlane.f32.xlu1 %v4643_v34  ;;  %v13557_v34 = vpop.eup %13556 }
 0x9fa   : > { %v13559_v30 = vpop.eup %13558 }
 0x9fb   : > { %5043 = vrot.lane.b32.xlu0 %v4452_v60, %s14171_s22  ;;  %v16182_v60 = vmul.f32 0.1, %v13553_v36  ;;  %v16201_v36 = vmul.f32 0.1, %v13557_v34  ;;  %v13561_v27 = vpop.eup %13560 }
 0x9fc   : > { %v16231_v20 = vmul.f32 0.1, %v13561_v27  ;;  %v13563_v18 = vpop.eup %13562 }
 0x9fd   : > { %v4646_v50 = vsel %vm4594_vm6, %v16182_v60, 0.0  ;;  %v4652_v1 = vsel %vm4594_vm6, %v16201_v36, 0.0  ;;  %v13565_v27 = vpop.eup %13564 }
 0x9fe   : > { %v4658_v21 = vsel %vm4594_vm6, %v16231_v20, 0.0  ;;  %v13567_v56 = vpop.eup %13566 }
 0x9ff   : > { %5047 = vrot.lane.b32.xlu0 %v4462_v13, %s14171_s22  ;;  %v16199_v13 = vpop.permute.xlu0 %5015  ;;  %v16254_v51 = vmul.f32 0.1, %v13567_v56 }
 0xa03   : > { %5051 = vrot.lane.b32.xlu0 %v4472_v12, %s14171_s22 }
 0xa07   : > { %5055 = vrot.lane.b32.xlu0 %v4482_v10, %s14171_s22 }
 0xa0a   : > { %5061 = vrot.lane.b32.xlu1 %v16178_v11, %s14171_s22 }
 0xa26   : > { %4647 = vadd.xlane.f32.xlu0 %v4646_v50  ;;  %v16203_v50 = vpop.permute.xlu0 %5019 }
 0xa2a   : > { %v16209_v17 = vpop.permute.xlu0 %5023 }
 0xa2e   : > { %4650 = vadd.xlane.f32.xlu1 %v4649_v7  ;;  %v16207_v7 = vmul.f32 0.1, %v13559_v30  ;;  %v4597_v12 = vpop.xlane.xlu0 %4596 }
 0xa30   : > { %v4655_v53 = vsel %vm4594_vm6, %v16207_v7, 0.0 }
 0xa32   : > { %v16213_v41 = vpop.permute.xlu0 %5027 }
 0xa33   : > { %20470 = vst [vmem:[#allocation155_spill] sm:$0xff] %v16213_v41 }
 0xa36   : > { %v4606_v34 = vpop.xlane.xlu0 %4605 }
 0xa37   : > { %v4694_v4 = vsub.f32 0.0, %v4606_v34 }
 0xa3a   : > { %v16222_v30 = vpop.xlane.xlu0 %4602 }
 0xa3c   : > { %5059 = vrot.lane.b32.xlu0 %v4492_v26, %s14171_s22  ;;  %v16243_v26 = vmul.f32 0.1, %v13563_v18 }
 0xa3e   : > { %v16226_v42 = vpop.permute.xlu0 %5031 }
 0xa3f   : > { %5065 = vrot.lane.b32.xlu1 %v16195_v29, %s14171_s22  ;;  %20471 = vst [vmem:[#allocation156_spill] sm:$0xff] %v16226_v42 }
 0xa5b   : > { %4653 = vadd.xlane.f32.xlu0 %v4652_v1  ;;  %v16220_v1 = vadd.f32 %v16084_v48, %v16009_v57  ;;  %v4512_v48 = vadd.f32 %v16009_v57, %v16086_v59  ;;  %v16248_v59 = vmul.f32 0.1, %v13565_v27 }
 0xa5d   : > { %13568 = vtanh.f32 %v4512_v48  ;;  %v4667_v46 = vsel %vm4594_vm6, %v16248_v59, 0.0 }
 0xa5e   : > { %13570 = vtanh.f32 %v16241_v37 }
 0xa63   : > { %4656 = vadd.xlane.f32.xlu1 %v4655_v53  ;;  %v4612_v53 = vpop.xlane.xlu0 %4611 }
 0xa67   : > { %v16229_v24 = vpop.permute.xlu0 %5035  ;;  %v13569_v18 = vpop.eup %13568 }
 0xa68   : > { %20472 = vst [vmem:[#allocation157_spill] sm:$0xff] %v16229_v24  ;;  %v4673_v24 = vsel %vm4594_vm6, %v16254_v51, 0.0  ;;  %v16258_v44 = vmul.f32 0.1, %v13569_v18  ;;  %v13571_v27 = vpop.eup %13570 }
 0xa69   : > { %v16264_v55 = vmul.f32 0.1, %v13571_v27  ;;  %v4726_v27 = vsel %vm4594_vm6, %v16052_v52, %v4694_v4 }
 0xa6a   : > { %v4679_v42 = vsel %vm4594_vm6, %v16258_v44, 0.0 }
 0xa6b   : > { %v4618_v40 = vpop.xlane.xlu0 %4617 }
 0xa6f   : > { %v16235_v45 = vpop.permute.xlu0 %5039 }
 0xa70   : > { %20473 = vst [vmem:[#allocation158_spill] sm:$0xff] %v16235_v45 }
 0xa71   : > { %5063 = vrot.lane.b32.xlu0 %v4502_v49, %s14171_s22  ;;  %v4661_v49 = vsel %vm4594_vm6, %v16243_v26, 0.0 }
 0xa73   : > { %v4624_v10 = vpop.xlane.xlu0 %4623 }
 0xa74   : > { %5069 = vrot.lane.b32.xlu1 %v16220_v1, %s14171_s22  ;;  %v4700_v52 = vsub.f32 0.0, %v4624_v10 }
 0xa77   : > { %v4630_v45 = vpop.xlane.xlu0 %4629 }
 0xa7b   : > { %v4636_v63 = vpop.xlane.xlu0 %4635 }
 0xa7f   : > { %v4642_v56 = vpop.xlane.xlu0 %4641 }
 0xa83   : > { %v16273_v41 = vpop.permute.xlu0 %5043 }
 0xa87   : > { %v16281_v34 = vpop.permute.xlu0 %5047 }
 0xa90   : > { %4659 = vadd.xlane.f32.xlu0 %v4658_v21  ;;  %v16250_v21 = vpop.permute.xlu1 %5013 }
 0xa91   : > { %20474 = vst [vmem:[#allocation159_spill] sm:$0xff] %v16250_v21  ;;  %v4696_v21 = vsub.f32 0.0, %v4612_v53 }
 0xa94   : > { %v16260_v23 = vpop.permute.xlu1 %5011 }
 0xa98   : > { %4662 = vadd.xlane.f32.xlu1 %v4661_v49  ;;  %v4691_v49 = vsub.f32 0.0, %v4597_v12 }
 0xa9a   : > { %v4723_v18 = vsel %vm4594_vm6, %v16032_v6, %v4691_v49  ;;  %v4698_v6 = vsub.f32 0.0, %v4618_v40  ;;  %v4702_v40 = vsub.f32 0.0, %v4630_v45 }
 0xa9b   : > { %v4755_v12 = vmul.f32 1.442695, %v4723_v18 }
 0xa9c   : > { %4668 = vadd.xlane.f32.xlu1 %v4667_v46  ;;  %v16267_v46 = vpop.permute.xlu1 %5017  ;;  %v4730_v4 = vsel %vm4594_vm6, %v16106_v8, %v4698_v6  ;;  %v4704_v8 = vsub.f32 0.0, %v4636_v63 }
 0xa9d   : > { %20475 = vst [vmem:[#allocation160_spill] sm:$0xff] %v16267_v46  ;;  %13572 = vpow2.f32 %v4755_v12  ;;  %v4728_v46 = vsel %vm4594_vm6, %v16088_v43, %v4696_v21  ;;  %v4769_v53 = vmul.f32 1.442695, %v4730_v4  ;;  %v4732_v43 = vsel %vm4594_vm6, %v16142_v38, %v4700_v52 }
 0xa9e   : > { %v4765_v49 = vmul.f32 1.442695, %v4728_v46  ;;  %v4734_v46 = vsel %vm4594_vm6, %v16148_v22, %v4702_v40  ;;  %v4736_v45 = vsel %vm4594_vm6, %v16152_v9, %v4704_v8 }
 0xa9f   : > { %v4777_v38 = vmul.f32 1.442695, %v4734_v46  ;;  %v4781_v63 = vmul.f32 1.442695, %v4736_v45 }
 0xaa0   : > { %4674 = vadd.xlane.f32.xlu1 %v4673_v24  ;;  %v4685_v24 = vsel %vm4594_vm6, %v16264_v55, 0.0 }
 0xaa4   : > { %4680 = vadd.xlane.f32.xlu1 %v4679_v42  ;;  %v16277_v42 = vpop.permute.xlu1 %5021 }
 0xaa6   : > { %5067 = vrot.lane.b32.xlu0 %v4512_v48, %s14171_s22  ;;  %v4761_v48 = vmul.f32 1.442695, %v4726_v27 }
 0xaa7   : > { %v13573_v21 = vpop.eup %13572 }
 0xaa8   : > { %4686 = vadd.xlane.f32.xlu1 %v4685_v24  ;;  %13574 = vpow2.f32 %v4761_v48  ;;  %v16284_v18 = vpop.permute.xlu1 %5025  ;;  %v16288_v24 = vpop.permute.xlu0 %5051 }
 0xaa9   : > { %13576 = vtanh.f32 %v16140_v3  ;;  %v4773_v3 = vmul.f32 1.442695, %v4732_v43 }
 0xaaa   : > { %13578 = vpow2.f32 %v4765_v49  ;;  %v4706_v49 = vsub.f32 0.0, %v4642_v56 }
 0xaab   : > { %13580 = vpow2.f32 %v4769_v53 }
 0xaac   : > { %v16290_v12 = vpop.xlane.xlu1 %4599  ;;  %v16297_v27 = vpop.permute.xlu0 %5055  ;;  %13582 = vpow2.f32 %v4773_v3  ;;  %v4738_v43 = vsel %vm4594_vm6, %v16156_v32, %v4706_v49 }
 0xaad   : > { %13584 = vpow2.f32 %v4777_v38  ;;  %v4785_v9 = vmul.f32 1.442695, %v4738_v43 }
 0xaae   : > { %13586 = vpow2.f32 %v4781_v63 }
 0xaaf   : > { %13588 = vpow2.f32 %v4785_v9 }
 0xab0   : > { %v16299_v6 = vpop.permute.xlu1 %5029 }
 0xab2   : > { %v13575_v10 = vpop.eup %13574 }
 0xab3   : > { %v13577_v48 = vpop.eup %13576  ;;  %v4648_v52 = vpop.xlane.xlu0 %4647 }
 0xab4   : > { %v13579_v4 = vpop.eup %13578  ;;  %v16304_v53 = vmul.f32 0.1, %v13577_v48  ;;  %v16307_v22 = vpop.permute.xlu1 %5033  ;;  %v4708_v40 = vsub.f32 0.0, %v4648_v52 }
 0xab6   : > { %v4664_v3 = vsel %vm4594_vm6, %v16304_v53, 0.0  ;;  %v4740_v46 = vsel %vm4594_vm6, %v16182_v60, %v4708_v40 }
 0xab7   : > { %v4789_v32 = vmul.f32 1.442695, %v4740_v46  ;;  %v16331_v43 = vpop.permute.xlu0 %5059 }
 0xab8   : > { %v16314_v56 = vpop.xlane.xlu1 %4608  ;;  %20476 = vst [vmem:[#allocation161_spill] sm:$0xff] %v16331_v43 }
 0xab9   : > { %4851 = vrot.lane.b32.xlu1 %v13573_v21, %s14170_s0  ;;  %v13581_v21 = vpop.eup %13580  ;;  %13590 = vpow2.f32 %v4789_v32 }
 0xaba   : > { %v13583_v8 = vpop.eup %13582  ;;  %13592 = vtanh.f32 %v16178_v11 }
 0xabb   : > { %13594 = vtanh.f32 %v16195_v29 }
 0xabc   : > { %v16319_v48 = vpop.permute.xlu1 %5037 }
 0xabd   : > { %4857 = vrot.lane.b32.xlu1 %v13575_v10, %s14170_s0  ;;  %v13585_v10 = vpop.eup %13584 }
 0xabe   : > { %v13587_v38 = vpop.eup %13586 }
 0xabf   : > { %v13589_v49 = vpop.eup %13588 }
 0xac0   : > { %v4615_v45 = vpop.xlane.xlu1 %4614 }
 0xac1   : > { %4861 = vrot.lane.b32.xlu1 %v13579_v4, %s14170_s0 }
 0xac3   : > { %v13591_v60 = vpop.eup %13590 }
 0xac4   : > { %v16324_v4 = vpop.permute.xlu1 %5041  ;;  %v13593_v32 = vpop.eup %13592 }
 0xac5   : > { %4665 = vadd.xlane.f32.xlu0 %v4664_v3  ;;  %4865 = vrot.lane.b32.xlu1 %v13581_v21, %s14170_s0  ;;  %v16349_v11 = vmul.f32 0.1, %v13593_v32 }
 0xac8   : > { %v4621_v52 = vpop.xlane.xlu1 %4620 }
 0xac9   : > { %4869 = vrot.lane.b32.xlu1 %v13583_v8, %s14170_s0 }
 0xacc   : > { %v16329_v63 = vpop.xlane.xlu1 %4626 }
 0xacd   : > { %4873 = vrot.lane.b32.xlu1 %v13585_v10, %s14170_s0 }
 0xad0   : > { %v16333_v40 = vpop.xlane.xlu1 %4632 }
 0xad1   : > { %4877 = vrot.lane.b32.xlu1 %v13587_v38, %s14170_s0 }
 0xad4   : > { %v16339_v8 = vpop.xlane.xlu1 %4638 }
 0xad5   : > { %4881 = vrot.lane.b32.xlu1 %v13589_v49, %s14170_s0 }
 0xad8   : > { %v16346_v10 = vpop.permute.xlu1 %5045 }
 0xad9   : > { %4885 = vrot.lane.b32.xlu1 %v13591_v60, %s14170_s0  ;;  %20477 = vst [vmem:[#allocation162_spill] sm:$0xff] %v16346_v10 }
 0xadb   : > { %5071 = vrot.lane.b32.xlu0 %v16241_v37, %s14171_s22  ;;  %v16344_v37 = vadd.f32 %v16090_v15, %v16009_v57 }
 0xadc   : > { %v16351_v29 = vpop.permute.xlu1 %5049 }
 0xadd   : > { %20478 = vst [vmem:[#allocation163_spill] sm:$0xff] %v16351_v29 }
 0xae8   : > { %v4654_v21 = vpop.xlane.xlu0 %4653 }
 0xae9   : > { %v4710_v3 = vsub.f32 0.0, %v4654_v21 }
 0xaeb   : > { %v4742_v9 = vsel %vm4594_vm6, %v16201_v36, %v4710_v3  ;;  %v13595_v36 = vpop.eup %13594  ;;  %v16362_v3 = vpop.permute.xlu1 %5053 }
 0xaec   : > { %v4793_v46 = vmul.f32 1.442695, %v4742_v9  ;;  %v16356_v49 = vmul.f32 0.1, %v13595_v36  ;;  %20479 = vst [vmem:[#allocation164_spill] sm:$0xff] %v16362_v3 }
 0xaee   : > { %13596 = vpow2.f32 %v4793_v46  ;;  %v4676_v15 = vsel %vm4594_vm6, %v16356_v49, 0.0 }
 0xaef   : > { %13598 = vtanh.f32 %v16220_v1  ;;  %v4670_v1 = vsel %vm4594_vm6, %v16349_v11, 0.0  ;;  %v16368_v32 = vpop.permute.xlu1 %5057 }
 0xaf0   : > { %13600 = vtanh.f32 %v16344_v37  ;;  %20480 = vst [vmem:[#allocation165_spill] sm:$0xff] %v16368_v32 }
 0xaf8   : > { %v13597_v38 = vpop.eup %13596 }
 0xaf9   : > { %4889 = vrot.lane.b32.xlu1 %v13597_v38, %s14170_s0  ;;  %v13599_v57 = vpop.eup %13598  ;;  %v4692_v38 = vsub.f32 0.0, %v16290_v12 }
 0xafa   : > { %4671 = vadd.xlane.f32.xlu0 %v4670_v1  ;;  %v16360_v60 = vmul.f32 0.1, %v13599_v57  ;;  %v13601_v21 = vpop.eup %13600  ;;  %v4645_v1 = vpop.xlane.xlu1 %4644 }
 0xafb   : > { %v16366_v46 = vmul.f32 0.1, %v13601_v21  ;;  %v4724_v57 = vsel %vm4594_vm6, %v16036_v16, %v4692_v38 }
 0xafc   : > { %v4682_v9 = vsel %vm4594_vm6, %v16360_v60, 0.0  ;;  %v4757_v3 = vmul.f32 1.442695, %v4724_v57  ;;  %v4701_v57 = vsub.f32 0.0, %v16329_v63 }
 0xafd   : > { %v4688_v36 = vsel %vm4594_vm6, %v16366_v46, 0.0 }
 0xafe   : > { %4677 = vadd.xlane.f32.xlu0 %v4676_v15  ;;  %v4693_v15 = vsub.f32 0.0, %v16222_v30  ;;  %v16379_v29 = vpop.permute.xlu1 %5061  ;;  %13602 = vpow2.f32 %v4757_v3  ;;  %v4699_v30 = vsub.f32 0.0, %v4621_v52  ;;  %v4703_v52 = vsub.f32 0.0, %v16333_v40 }
 0xaff   : > { %v4707_v40 = vsub.f32 0.0, %v4645_v1 }
 0xb00   : > { %v4725_v21 = vsel %vm4594_vm6, %v16056_v5, %v4693_v15  ;;  %v4731_v3 = vsel %vm4594_vm6, %v16111_v0, %v4699_v30 }
 0xb01   : > { %v4759_v32 = vmul.f32 1.442695, %v4725_v21 }
 0xb02   : > { %4683 = vadd.xlane.f32.xlu0 %v4682_v9  ;;  %v4695_v9 = vsub.f32 0.0, %v16314_v56  ;;  %v4651_v43 = vpop.xlane.xlu1 %4650  ;;  %v16387_v56 = vpop.permute.xlu0 %5063 }
 0xb03   : > { %13604 = vpow2.f32 %v4759_v32 }
 0xb04   : > { %v4727_v12 = vsel %vm4594_vm6, %v16060_v2, %v4695_v9 }
 0xb05   : > { %v4763_v10 = vmul.f32 1.442695, %v4727_v12  ;;  %v4735_v12 = vsel %vm4594_vm6, %v16119_v14, %v4703_v52 }
 0xb06   : > { %4689 = vadd.xlane.f32.xlu0 %v4688_v36  ;;  %v4697_v36 = vsub.f32 0.0, %v4615_v45  ;;  %v16385_v5 = vpop.permute.xlu1 %5065  ;;  %v4771_v45 = vmul.f32 1.442695, %v4731_v3 }
 0xb07   : > { %13606 = vpow2.f32 %v4763_v10 }
 0xb08   : > { %v4729_v16 = vsel %vm4594_vm6, %v16096_v31, %v4697_v36  ;;  %v13603_v2 = vpop.eup %13602  ;;  %v4733_v31 = vsel %vm4594_vm6, %v16115_v35, %v4701_v57  ;;  %v4705_v36 = vsub.f32 0.0, %v16339_v8  ;;  %v4779_v35 = vmul.f32 1.442695, %v4735_v12 }
 0xb09   : > { %v4767_v38 = vmul.f32 1.442695, %v4729_v16  ;;  %v4775_v0 = vmul.f32 1.442695, %v4733_v31  ;;  %v4739_v8 = vsel %vm4594_vm6, %v16162_v54, %v4707_v40  ;;  %v4709_v57 = vsub.f32 0.0, %v4651_v43 }
 0xb0a   : > { %v4657_v32 = vpop.xlane.xlu1 %4656 }
 0xb0b   : > { %13608 = vpow2.f32 %v4767_v38  ;;  %v4711_v1 = vsub.f32 0.0, %v4657_v32 }
 0xb0c   : > { %13610 = vpow2.f32 %v4771_v45 }
 0xb0d   : > { %v13605_v21 = vpop.eup %13604  ;;  %v4743_v54 = vsel %vm4594_vm6, %v16207_v7, %v4711_v1 }
 0xb0e   : > { %v16402_v30 = vpop.permute.xlu1 %5069 }
 0xb11   : > { %v13607_v16 = vpop.eup %13606 }
 0xb15   : > { %v13609_v38 = vpop.eup %13608 }
 0xb1c   : > { %4853 = vrot.lane.b32.xlu0 %v13603_v2, %s14170_s0  ;;  %v13611_v2 = vpop.eup %13610 }
 0xb1d   : > { %v4660_v15 = vpop.xlane.xlu0 %4659 }
 0xb1e   : > { %v4712_v10 = vsub.f32 0.0, %v4660_v15  ;;  %v4787_v15 = vmul.f32 1.442695, %v4739_v8 }
 0xb20   : > { %v4744_v9 = vsel %vm4594_vm6, %v16231_v20, %v4712_v10  ;;  %4855 = vrot.lane.b32.xlu0 %v13605_v21, %s14170_s0  ;;  %v4737_v20 = vsel %vm4594_vm6, %v16123_v33, %v4705_v36  ;;  %v4741_v33 = vsel %vm4594_vm6, %v16186_v28, %v4709_v57 }
 0xb21   : > { %v4797_v63 = vmul.f32 1.442695, %v4744_v9  ;;  %v4783_v14 = vmul.f32 1.442695, %v4737_v20  ;;  %v4791_v10 = vmul.f32 1.442695, %v4741_v33  ;;  %v16434_v33 = vpop.permute.xlu0 %5067 }
 0xb23   : > { %13612 = vpow2.f32 %v4797_v63 }
 0xb24   : > { %4859 = vrot.lane.b32.xlu0 %v13607_v16, %s14170_s0  ;;  %13614 = vpow2.f32 %v4775_v0  ;;  %v4795_v0 = vmul.f32 1.442695, %v4743_v54 }
 0xb25   : > { %v4663_v3 = vpop.xlane.xlu1 %4662  ;;  %13616 = vpow2.f32 %v4779_v35 }
 0xb26   : > { %13618 = vpow2.f32 %v4783_v14  ;;  %v4713_v43 = vsub.f32 0.0, %v4663_v3 }
 0xb27   : > { %13620 = vpow2.f32 %v4787_v15 }
 0xb28   : > { %4863 = vrot.lane.b32.xlu0 %v13609_v38, %s14170_s0  ;;  %13622 = vpow2.f32 %v4791_v10  ;;  %v4745_v28 = vsel %vm4594_vm6, %v16243_v26, %v4713_v43 }
 0xb29   : > { %v4669_v31 = vpop.xlane.xlu1 %4668  ;;  %13624 = vpow2.f32 %v4795_v0  ;;  %v4799_v12 = vmul.f32 1.442695, %v4745_v28 }
 0xb2a   : > { %v4715_v32 = vsub.f32 0.0, %v4669_v31 }
 0xb2b   : > { %13626 = vpow2.f32 %v4799_v12 }
 0xb2c   : > { %4867 = vrot.lane.b32.xlu0 %v13611_v2, %s14170_s0  ;;  %v4747_v7 = vsel %vm4594_vm6, %v16248_v59, %v4715_v32 }
 0xb2d   : > { %v13613_v45 = vpop.eup %13612  ;;  %v4675_v9 = vpop.xlane.xlu1 %4674  ;;  %v4803_v20 = vmul.f32 1.442695, %v4747_v7 }
 0xb2e   : > { %4893 = vrot.lane.b32.xlu1 %v13613_v45, %s14170_s0  ;;  %v13615_v52 = vpop.eup %13614  ;;  %v4717_v16 = vsub.f32 0.0, %v4675_v9 }
 0xb2f   : > { %v13617_v21 = vpop.eup %13616  ;;  %13628 = vpow2.f32 %v4803_v20 }
 0xb30   : > { %4871 = vrot.lane.b32.xlu0 %v13615_v52, %s14170_s0  ;;  %v13619_v63 = vpop.eup %13618  ;;  %v4749_v40 = vsel %vm4594_vm6, %v16254_v51, %v4717_v16 }
 0xb31   : > { %v4681_v36 = vpop.xlane.xlu1 %4680  ;;  %v13621_v35 = vpop.eup %13620  ;;  %v4807_v14 = vmul.f32 1.442695, %v4749_v40 }
 0xb32   : > { %v4719_v26 = vsub.f32 0.0, %v4681_v36  ;;  %v13623_v38 = vpop.eup %13622 }
 0xb33   : > { %v13625_v57 = vpop.eup %13624  ;;  %13630 = vpow2.f32 %v4807_v14 }
 0xb34   : > { %4875 = vrot.lane.b32.xlu0 %v13617_v21, %s14170_s0  ;;  %v4751_v8 = vsel %vm4594_vm6, %v16258_v44, %v4719_v26  ;;  %v11410_v21 = vld [vmem:[%s19981_s14 + $0x8] sm:$0xff] }
 0xb35   : > { %v4687_v3 = vpop.xlane.xlu1 %4686  ;;  %v4811_v2 = vmul.f32 1.442695, %v4751_v8  ;;  %v13627_v51 = vpop.eup %13626  ;;  %12734 = vmatprep.subr.mxu0 %v11410_v21 }
 0xb36   : > { %v4721_v59 = vsub.f32 0.0, %v4687_v3  ;;  %12735 = vmatpush3.msra.mxu0 %v11410_v21 }
 0xb37   : > { %13632 = vpow2.f32 %v4811_v2 }
 0xb38   : > { %4879 = vrot.lane.b32.xlu0 %v13619_v63, %s14170_s0  ;;  %v4753_v45 = vsel %vm4594_vm6, %v16264_v55, %v4721_v59 }
 0xb39   : > { %v4815_v15 = vmul.f32 1.442695, %v4753_v45  ;;  %v13629_v31 = vpop.eup %13628  ;;  %v4852_v40 = vpop.permute.xlu1 %4851 }
 0xb3b   : > { %13634 = vpow2.f32 %v4815_v15 }
 0xb3c   : > { %4883 = vrot.lane.b32.xlu0 %v13621_v35, %s14170_s0 }
 0xb3d   : > { %v13631_v44 = vpop.eup %13630 }
 0xb40   : > { %4887 = vrot.lane.b32.xlu0 %v13623_v38, %s14170_s0 }
 0xb41   : > { %v13633_v52 = vpop.eup %13632 }
 0xb44   : > { %4891 = vrot.lane.b32.xlu0 %v13625_v57, %s14170_s0 }
 0xb45   : > { %v13635_v43 = vpop.eup %13634 }
 0xb48   : > { %4895 = vrot.lane.b32.xlu0 %v13627_v51, %s14170_s0 }
 0xb4c   : > { %4899 = vrot.lane.b32.xlu0 %v13629_v31, %s14170_s0 }
 0xb50   : > { %4903 = vrot.lane.b32.xlu0 %v13631_v44, %s14170_s0  ;;  %v4947_v44 = vmul.f32 %v4852_v40, %v15510_v19  ;;  %v20490_v40 = vld [vmem:[#allocation99_spill] sm:$0xff] }
 0xb52   : > { %v4666_v1 = vpop.xlane.xlu0 %4665 }
 0xb53   : > { %v4714_v10 = vsub.f32 0.0, %v4666_v1 }
 0xb54   : > { %4907 = vrot.lane.b32.xlu0 %v13633_v52, %s14170_s0 }
 0xb55   : > { %v4746_v55 = vsel %vm4594_vm6, %v16304_v53, %v4714_v10  ;;  %v16476_v10 = vadd.f32 %v16260_v23, %v4947_v44  ;;  %v20482_v23 = vld [vmem:[#allocation155_spill] sm:$0xff] }
 0xb56   : > { %v4801_v54 = vmul.f32 1.442695, %v4746_v55  ;;  %v16447_v0 = vpop.permute.xlu0 %5071 }
 0xb58   : > { %13636 = vpow2.f32 %v4801_v54  ;;  %4911 = vrot.lane.b32.xlu0 %v13635_v43, %s14170_s0  ;;  %v20481_v43 = vld [vmem:[#allocation159_spill] sm:$0xff] }
 0xb5c   : > { %5073 = vrot.lane.b32.xlu0 %v16344_v37, %s14171_s22 }
 0xb62   : > { %v13637_v9 = vpop.eup %13636 }
 0xb63   : > { %4897 = vrot.lane.b32.xlu1 %v13637_v9, %s14170_s0 }
 0xb87   : > { %v4672_v53 = vpop.xlane.xlu0 %4671 }
 0xb88   : > { %v4716_v28 = vsub.f32 0.0, %v4672_v53  ;;  %v20483_v53 = vld [vmem:[#allocation102_spill] sm:$0xff] }
 0xb8a   : > { %v4748_v32 = vsel %vm4594_vm6, %v16349_v11, %v4716_v28 }
 0xb8b   : > { %v4805_v63 = vmul.f32 1.442695, %v4748_v32  ;;  %v4678_v12 = vpop.xlane.xlu0 %4677 }
 0xb8c   : > { %v4718_v36 = vsub.f32 0.0, %v4678_v12  ;;  %v20486_v12 = vld [vmem:[#allocation156_spill] sm:$0xff] }
 0xb8d   : > { %13638 = vpow2.f32 %v4805_v63 }
 0xb8e   : > { %v4750_v7 = vsel %vm4594_vm6, %v16356_v49, %v4718_v36  ;;  %v4858_v49 = vpop.permute.xlu1 %4857 }
 0xb8f   : > { %v4809_v16 = vmul.f32 1.442695, %v4750_v7  ;;  %v4684_v37 = vpop.xlane.xlu0 %4683 }
 0xb90   : > { %v4720_v35 = vsub.f32 0.0, %v4684_v37 }
 0xb91   : > { %13640 = vpow2.f32 %v4809_v16  ;;  %v20488_v16 = vld [vmem:[#allocation104_spill] sm:$0xff] }
 0xb92   : > { %v4752_v20 = vsel %vm4594_vm6, %v16360_v60, %v4720_v35  ;;  %v4862_v15 = vpop.permute.xlu1 %4861 }
 0xb93   : > { %v4813_v26 = vmul.f32 1.442695, %v4752_v20  ;;  %v4690_v38 = vpop.xlane.xlu0 %4689 }
 0xb94   : > { %v4722_v3 = vsub.f32 0.0, %v4690_v38  ;;  %v20491_v38 = vld [vmem:[#allocation157_spill] sm:$0xff] }
 0xb95   : > { %13642 = vpow2.f32 %v4813_v26 }
 0xb96   : > { %v4754_v11 = vsel %vm4594_vm6, %v16366_v46, %v4722_v3 }
 0xb97   : > { %v13639_v14 = vpop.eup %13638  ;;  %v4817_v8 = vmul.f32 1.442695, %v4754_v11  ;;  %v4854_v59 = vpop.permute.xlu0 %4853 }
 0xb98   : > { %4901 = vrot.lane.b32.xlu1 %v13639_v14, %s14170_s0  ;;  %v4948_v55 = vmul.f32 %v4854_v59, %v15507_v25  ;;  %v20493_v14 = vld [vmem:[#allocation106_spill] sm:$0xff] }
 0xb99   : > { %13644 = vpow2.f32 %v4817_v8 }
 0xb9a   : > { %v16489_v21 = vadd.f32 %v20481_v43, %v4948_v55  ;;  %v20506_v43 = vld [vmem:[#allocation122_spill] sm:$0xff] }
 0xb9b   : > { %v13641_v57 = vpop.eup %13640  ;;  %v4856_v2 = vpop.permute.xlu0 %4855 }
 0xb9c   : > { %v4949_v45 = vmul.f32 %v4856_v2, %v15520_v47  ;;  %4905 = vrot.lane.b32.xlu1 %v13641_v57, %s14170_s0  ;;  %v20496_v57 = vld [vmem:[#allocation158_spill] sm:$0xff] }
 0xb9e   : > { %v16461_v60 = vadd.f32 %v16199_v13, %v4949_v45 }
 0xb9f   : > { %v13643_v51 = vpop.eup %13642  ;;  %v4860_v31 = vpop.permute.xlu0 %4859 }
 0xba0   : > { %v4951_v46 = vmul.f32 %v4860_v31, %v15530_v62  ;;  %4909 = vrot.lane.b32.xlu1 %v13643_v51, %s14170_s0  ;;  %5185 = vrot.lane.b32.xlu0 %v16461_v60, %s14169_s26  ;;  %v4866_v62 = vpop.permute.xlu1 %4865 }
 0xba1   : > { %v4954_v26 = vmul.f32 %v4866_v62, %v20490_v40  ;;  %v20515_v40 = vld [vmem:[#allocation162_spill] sm:$0xff] }
 0xba2   : > { %v16469_v1 = vadd.f32 %v16203_v50, %v4951_v46 }
 0xba3   : > { %v13645_v47 = vpop.eup %13644  ;;  %v4864_v52 = vpop.permute.xlu0 %4863  ;;  %v16524_v59 = vadd.f32 %v16284_v18, %v4954_v26  ;;  %v20500_v18 = vld [vmem:[#allocation101_spill] sm:$0xff] }
 0xba4   : > { %v4953_v13 = vmul.f32 %v4864_v52, %v15540_v58  ;;  %4913 = vrot.lane.b32.xlu1 %v13645_v47, %s14170_s0  ;;  %5189 = vrot.lane.b32.xlu0 %v16469_v1, %s14169_s26  ;;  %v4950_v58 = vmul.f32 %v4858_v49, %v15517_v61  ;;  %v4870_v25 = vpop.permute.xlu1 %4869  ;;  %v20485_v61 = vld [vmem:[#allocation98_spill] sm:$0xff]  ;;  %v20495_v49 = vld [vmem:[#allocation100_spill] sm:$0xff] }
 0xba5   : > { %v4952_v63 = vmul.f32 %v4862_v15, %v20485_v61  ;;  %v20498_v15 = vld [vmem:[#allocation110_spill] sm:$0xff] }
 0xba6   : > { %v16480_v19 = vadd.f32 %v16209_v17, %v4953_v13  ;;  %v20502_v13 = vld [vmem:[#allocation118_spill] sm:$0xff] }
 0xba7   : > { %v4868_v50 = vpop.permute.xlu0 %4867  ;;  %v16512_v20 = vadd.f32 %v16277_v42, %v4952_v63  ;;  %v4956_v42 = vmul.f32 %v4870_v25, %v20495_v49  ;;  %v20520_v49 = vld [vmem:[#allocation131_spill] sm:$0xff] }
 0xba8   : > { %v4955_v54 = vmul.f32 %v4868_v50, %v15550_v39  ;;  %5193 = vrot.lane.b32.xlu0 %v16480_v19, %s14169_s26  ;;  %5181 = vrot.lane.b32.xlu1 %v16476_v10, %s14169_s26  ;;  %v20484_v39 = vld [vmem:[#allocation160_spill] sm:$0xff]  ;;  %v4874_v35 = vpop.permute.xlu1 %4873 }
 0xba9   : > { %v16500_v32 = vadd.f32 %v20484_v39, %v4950_v58  ;;  %20489 = vst [vmem:[#allocation155_spill] sm:$0xff] %v16512_v20  ;;  %20494 = vst [vmem:[#allocation160_spill] sm:$0xff] %v16524_v59  ;;  %v16536_v46 = vadd.f32 %v16299_v6, %v4956_v42  ;;  %v4958_v44 = vmul.f32 %v4874_v35, %v20500_v18  ;;  %v20504_v6 = vld [vmem:[#allocation103_spill] sm:$0xff]  ;;  %v20510_v39 = vld [vmem:[#allocation126_spill] sm:$0xff] }
 0xbaa   : > { %v16492_v9 = vadd.f32 %v20482_v23, %v4955_v54 }
 0xbab   : > { %v4872_v17 = vpop.permute.xlu0 %4871  ;;  %20499 = vst [vmem:[#allocation156_spill] sm:$0xff] %v16536_v46  ;;  %v16548_v50 = vadd.f32 %v16307_v22, %v4958_v44  ;;  %v20525_v44 = vld [vmem:[#allocation134_spill] sm:$0xff] }
 0xbac   : > { %v4957_v28 = vmul.f32 %v4872_v17, %v20483_v53  ;;  %5197 = vrot.lane.b32.xlu0 %v16492_v9, %s14169_s26  ;;  %5183 = vrot.lane.b32.xlu1 %v16489_v21, %s14169_s26  ;;  %v4878_v45 = vpop.permute.xlu1 %4877  ;;  %v20508_v17 = vld [vmem:[#allocation105_spill] sm:$0xff] }
 0xbad   : > { %20503 = vst [vmem:[#allocation99_spill] sm:$0xff] %v16548_v50  ;;  %v4960_v54 = vmul.f32 %v4878_v45, %v20504_v6 }
 0xbae   : > { %v16504_v36 = vadd.f32 %v20486_v12, %v4957_v28 }
 0xbaf   : > { %v4876_v7 = vpop.permute.xlu0 %4875  ;;  %v16560_v25 = vadd.f32 %v16319_v48, %v4960_v54  ;;  %v20512_v48 = vld [vmem:[#allocation108_spill] sm:$0xff] }
 0xbb0   : > { %20487 = vst [vmem:[#allocation159_spill] sm:$0xff] %v16504_v36  ;;  %v4959_v37 = vmul.f32 %v4876_v7, %v20488_v16  ;;  %5201 = vrot.lane.b32.xlu0 %v16504_v36, %s14169_s26  ;;  %5187 = vrot.lane.b32.xlu1 %v16500_v32, %s14169_s26  ;;  %v4882_v55 = vpop.permute.xlu1 %4881  ;;  %v20529_v54 = vld [vmem:[#allocation136_spill] sm:$0xff] }
 0xbb1   : > { %20507 = vst [vmem:[#allocation106_spill] sm:$0xff] %v16560_v25  ;;  %v4962_v22 = vmul.f32 %v4882_v55, %v20508_v17 }
 0xbb2   : > { %v16516_v3 = vadd.f32 %v20491_v38, %v4959_v37  ;;  %v20514_v37 = vld [vmem:[#allocation128_spill] sm:$0xff] }
 0xbb3   : > { %v4880_v11 = vpop.permute.xlu0 %4879  ;;  %v16572_v63 = vadd.f32 %v16324_v4, %v4962_v22  ;;  %v20517_v4 = vld [vmem:[#allocation116_spill] sm:$0xff]  ;;  %v20532_v22 = vld [vmem:[#allocation165_spill] sm:$0xff] }
 0xbb4   : > { %20492 = vst [vmem:[#allocation102_spill] sm:$0xff] %v16516_v3  ;;  %v4961_v8 = vmul.f32 %v4880_v11, %v20493_v14  ;;  %5205 = vrot.lane.b32.xlu0 %v16516_v3, %s14169_s26  ;;  %5191 = vrot.lane.b32.xlu1 %v16512_v20, %s14169_s26  ;;  %v4886_v28 = vpop.permute.xlu1 %4885  ;;  %v20518_v11 = vld [vmem:[#allocation161_spill] sm:$0xff] }
 0xbb5   : > { %20511 = vst [vmem:[#allocation158_spill] sm:$0xff] %v16572_v63  ;;  %v4964_v12 = vmul.f32 %v4886_v28, %v20512_v48 }
 0xbb6   : > { %v16528_v2 = vadd.f32 %v20496_v57, %v4961_v8  ;;  %v20521_v57 = vld [vmem:[#allocation163_spill] sm:$0xff] }
 0xbb7   : > { %v4884_v51 = vpop.permute.xlu0 %4883  ;;  %v16584_v26 = vadd.f32 %v20515_v40, %v4964_v12  ;;  %v11445_v12 = vld [vmem:[%s19983_s16 + $0x4] sm:$0xf]  ;;  %v20538_v40 = vld [vmem:[#allocation133_spill] sm:$0xff] }
 0xbb8   : > { %20497 = vst [vmem:[#allocation98_spill] sm:$0xff] %v16528_v2  ;;  %v4963_v31 = vmul.f32 %v4884_v51, %v20498_v15  ;;  %5209 = vrot.lane.b32.xlu0 %v16528_v2, %s14169_s26  ;;  %5195 = vrot.lane.b32.xlu1 %v16524_v59, %s14169_s26  ;;  %v20523_v51 = vld [vmem:[#allocation120_spill] sm:$0xff] }
 0xbb9   : > { %20516 = vst [vmem:[#allocation101_spill] sm:$0xff] %v16584_v26  ;;  %12784 = vmatprep.subr.msk.mxu1 %vm2355_vm3, %v11445_v12 }
 0xbba   : > { %v16540_v47 = vadd.f32 %v16273_v41, %v4963_v31  ;;  %12785 = vmatpush3.msk.msra.mxu1 %vm2355_vm3, %v11445_v12 }
 0xbbb   : > { %v4888_v52 = vpop.permute.xlu0 %4887 }
 0xbbc   : > { %20501 = vst [vmem:[#allocation104_spill] sm:$0xff] %v16540_v47  ;;  %v4965_v62 = vmul.f32 %v4888_v52, %v20502_v13  ;;  %5213 = vrot.lane.b32.xlu0 %v16540_v47, %s14169_s26  ;;  %5199 = vrot.lane.b32.xlu1 %v16536_v46, %s14169_s26  ;;  %v20526_v13 = vld [vmem:[#allocation164_spill] sm:$0xff] }
 0xbbe   : > { %v16552_v58 = vadd.f32 %v16281_v34, %v4965_v62 }
 0xbbf   : > { %v4892_v41 = vpop.permute.xlu0 %4891 }
 0xbc0   : > { %20505 = vst [vmem:[#allocation157_spill] sm:$0xff] %v16552_v58  ;;  %v4967_v23 = vmul.f32 %v4892_v41, %v20506_v43  ;;  %5217 = vrot.lane.b32.xlu0 %v16552_v58, %s14169_s26  ;;  %5203 = vrot.lane.b32.xlu1 %v16548_v50, %s14169_s26 }
 0xbc2   : > { %v16564_v53 = vadd.f32 %v16288_v24, %v4967_v23  ;;  %v4890_v24 = vpop.permute.xlu1 %4889  ;;  %v20531_v23 = vld [vmem:[#allocation124_spill] sm:$0xff] }
 0xbc3   : > { %v4896_v34 = vpop.permute.xlu0 %4895  ;;  %v4966_v38 = vmul.f32 %v4890_v24, %v20517_v4  ;;  %v20536_v24 = vld [vmem:[#allocation129_spill] sm:$0xff] }
 0xbc4   : > { %20509 = vst [vmem:[#allocation100_spill] sm:$0xff] %v16564_v53  ;;  %v4969_v61 = vmul.f32 %v4896_v34, %v20510_v39  ;;  %5221 = vrot.lane.b32.xlu0 %v16564_v53, %s14169_s26  ;;  %5207 = vrot.lane.b32.xlu1 %v16560_v25, %s14169_s26  ;;  %v20534_v34 = vld [vmem:[#allocation127_spill] sm:$0xff] }
 0xbc5   : > { %v16596_v45 = vadd.f32 %v20521_v57, %v4966_v38 }
 0xbc6   : > { %v16576_v7 = vadd.f32 %v16297_v27, %v4969_v61  ;;  %v4894_v27 = vpop.permute.xlu1 %4893 }
 0xbc7   : > { %v4900_v16 = vpop.permute.xlu0 %4899  ;;  %20522 = vst [vmem:[#allocation103_spill] sm:$0xff] %v16596_v45  ;;  %v4968_v15 = vmul.f32 %v4894_v27, %v20523_v51 }
 0xbc8   : > { %20513 = vst [vmem:[#allocation110_spill] sm:$0xff] %v16576_v7  ;;  %v4971_v35 = vmul.f32 %v4900_v16, %v20514_v37  ;;  %5225 = vrot.lane.b32.xlu0 %v16576_v7, %s14169_s26  ;;  %5211 = vrot.lane.b32.xlu1 %v16572_v63, %s14169_s26 }
 0xbc9   : > { %v16608_v62 = vadd.f32 %v20526_v13, %v4968_v15 }
 0xbca   : > { %v16588_v14 = vadd.f32 %v20518_v11, %v4971_v35 }
 0xbcb   : > { %v4904_v8 = vpop.permute.xlu0 %4903  ;;  %20527 = vst [vmem:[#allocation105_spill] sm:$0xff] %v16608_v62 }
 0xbcc   : > { %20519 = vst [vmem:[#allocation118_spill] sm:$0xff] %v16588_v14  ;;  %v4973_v42 = vmul.f32 %v4904_v8, %v20520_v49  ;;  %5229 = vrot.lane.b32.xlu0 %v16588_v14, %s14169_s26  ;;  %5215 = vrot.lane.b32.xlu1 %v16584_v26, %s14169_s26  ;;  %v20540_v8 = vld [vmem:[#allocation135_spill] sm:$0xff] }
 0xbce   : > { %v16600_v31 = vadd.f32 %v16387_v56, %v4973_v42 }
 0xbcf   : > { %v4908_v18 = vpop.permute.xlu0 %4907 }
 0xbd0   : > { %20524 = vst [vmem:[#allocation122_spill] sm:$0xff] %v16600_v31  ;;  %v4975_v52 = vmul.f32 %v4908_v18, %v20525_v44  ;;  %5233 = vrot.lane.b32.xlu0 %v16600_v31, %s14169_s26  ;;  %5219 = vrot.lane.b32.xlu1 %v16596_v45, %s14169_s26 }
 0xbd2   : > { %v16611_v55 = vadd.f32 %v16434_v33, %v4975_v52 }
 0xbd3   : > { %v4912_v6 = vpop.permute.xlu0 %4911 }
 0xbd4   : > { %20528 = vst [vmem:[#allocation126_spill] sm:$0xff] %v16611_v55  ;;  %v4977_v41 = vmul.f32 %v4912_v6, %v20529_v54  ;;  %5237 = vrot.lane.b32.xlu0 %v16611_v55, %s14169_s26  ;;  %5223 = vrot.lane.b32.xlu1 %v16608_v62, %s14169_s26 }
 0xbd5   : > { %v4898_v56 = vpop.permute.xlu1 %4897 }
 0xbd6   : > { %v16619_v43 = vadd.f32 %v16447_v0, %v4977_v41  ;;  %v4970_v17 = vmul.f32 %v4898_v56, %v20531_v23 }
 0xbd7   : > { %v5074_v48 = vpop.permute.xlu0 %5073 }
 0xbd8   : > { %20530 = vst [vmem:[#allocation108_spill] sm:$0xff] %v16619_v43  ;;  %v16623_v28 = vadd.f32 %v20532_v22, %v4970_v17  ;;  %5241 = vrot.lane.b32.xlu0 %v16619_v43, %s14169_s26 }
 0xbda   : > { %20533 = vst [vmem:[#allocation128_spill] sm:$0xff] %v16623_v28  ;;  %5227 = vrot.lane.b32.xlu1 %v16623_v28, %s14169_s26 }
 0xc0a   : > { %v4902_v33 = vpop.permute.xlu1 %4901 }
 0xc0b   : > { %v4972_v39 = vmul.f32 %v4902_v33, %v20534_v34 }
 0xc0d   : > { %v16631_v61 = vadd.f32 %v16379_v29, %v4972_v39 }
 0xc0e   : > { %v4906_v0 = vpop.permute.xlu1 %4905 }
 0xc0f   : > { %20535 = vst [vmem:[#allocation162_spill] sm:$0xff] %v16631_v61  ;;  %v4974_v16 = vmul.f32 %v4906_v0, %v20536_v24  ;;  %5231 = vrot.lane.b32.xlu1 %v16631_v61, %s14169_s26 }
 0xc11   : > { %v16642_v37 = vadd.f32 %v16385_v5, %v4974_v16 }
 0xc12   : > { %v5186_v29 = vpop.permute.xlu0 %5185  ;;  %v4910_v35 = vpop.permute.xlu1 %4909 }
 0xc13   : > { %20537 = vst [vmem:[#allocation116_spill] sm:$0xff] %v16642_v37  ;;  %v4976_v4 = vmul.f32 %v4910_v35, %v20538_v40  ;;  %5235 = vrot.lane.b32.xlu1 %v16642_v37, %s14169_s26 }
 0xc15   : > { %v16648_v38 = vadd.f32 %v16402_v30, %v4976_v4 }
 0xc16   : > { %v5190_v11 = vpop.permute.xlu0 %5189  ;;  %v4914_v27 = vpop.permute.xlu1 %4913 }
 0xc17   : > { %20539 = vst [vmem:[#allocation161_spill] sm:$0xff] %v16648_v38  ;;  %v4978_v49 = vmul.f32 %v4914_v27, %v20540_v8  ;;  %5239 = vrot.lane.b32.xlu1 %v16648_v38, %s14169_s26  ;;  %v11481_v8 = vld [vmem:[%s19985_s18 + $0x4] sm:$0xf] }
 0xc18   : > { %12834 = vmatprep.subr.msk.mxu0 %vm2355_vm3, %v11481_v8 }
 0xc19   : > { %v16653_v42 = vadd.f32 %v5074_v48, %v4978_v49  ;;  %v16697_v49 = vld [vmem:[%s19982_s15 + $0x1] ss:$0 sm:$0xff] }
 0xc1a   : > { %v5194_v5 = vpop.permute.xlu0 %5193  ;;  %v5182_v57 = vpop.permute.xlu1 %5181 }
 0xc1b   : > { %20541 = vst [vmem:[#allocation131_spill] sm:$0xff] %v16653_v42  ;;  %5243 = vrot.lane.b32.xlu1 %v16653_v42, %s14169_s26  ;;  %12736 = vmatprep.mubr.msk.f32.mxu0 %vm3480_vm5, %v5182_v57 }
 0xc1e   : > { %v5198_v51 = vpop.permute.xlu0 %5197  ;;  %v5184_v15 = vpop.permute.xlu1 %5183 }
 0xc1f   : > { %12737 = vmatmul.mubr.msk.f32.vlgmr.msra.gmra.mrb[120].mxu0 %vm3480_vm5, %v5184_v15 }
 0xc20   : > { %12739 = vmatprep.mubr.msk.f32.mxu0 %vm3480_vm5, %v5186_v29  ;;  %12835 = vmatpush3.msk.msra.mxu0 %vm2355_vm3, %v11481_v8 }
 0xc22   : > { %v5188_v30 = vpop.permute.xlu1 %5187  ;;  %v5202_v18 = vpop.permute.xlu0 %5201 }
 0xc23   : > { %12740 = vmatmul.mubr.msk.f32.gmra.mrb[122].mxu0 %vm3480_vm5, %v5188_v30 }
 0xc24   : > { %12742 = vmatprep.mubr.msk.f32.mxu0 %vm3480_vm5, %v5190_v11 }
 0xc26   : > { %v5192_v44 = vpop.permute.xlu1 %5191  ;;  %v5206_v52 = vpop.permute.xlu0 %5205 }
 0xc27   : > { %12743 = vmatmul.mubr.msk.f32.gmra.mrb[124].mxu0 %vm3480_vm5, %v5192_v44 }
 0xc28   : > { %12745 = vmatprep.mubr.msk.f32.mxu0 %vm3480_vm5, %v5194_v5 }
 0xc2a   : > { %v5196_v13 = vpop.permute.xlu1 %5195  ;;  %v5210_v54 = vpop.permute.xlu0 %5209 }
 0xc2b   : > { %12746 = vmatmul.mubr.msk.f32.gmra.mrb[126].mxu0 %vm3480_vm5, %v5196_v13 }
 0xc2c   : > { %12748 = vmatprep.mubr.msk.f32.mxu0 %vm3480_vm5, %v5198_v51 }
 0xc2e   : > { %v5200_v6 = vpop.permute.xlu1 %5199  ;;  %v5214_v56 = vpop.permute.xlu0 %5213 }
 0xc2f   : > { %12749 = vmatmul.mubr.msk.f32.gmra.mrb[128].mxu0 %vm3480_vm5, %v5200_v6 }
 0xc30   : > { %12751 = vmatprep.mubr.msk.f32.mxu0 %vm3480_vm5, %v5202_v18 }
 0xc32   : > { %v5204_v41 = vpop.permute.xlu1 %5203  ;;  %v5218_v22 = vpop.permute.xlu0 %5217 }
 0xc33   : > { %12752 = vmatmul.mubr.msk.f32.gmra.mrb[130].mxu0 %vm3480_vm5, %v5204_v41 }
 0xc34   : > { %12754 = vmatprep.mubr.msk.f32.mxu0 %vm3480_vm5, %v5206_v52 }
 0xc36   : > { %v5208_v23 = vpop.permute.xlu1 %5207  ;;  %v5222_v34 = vpop.permute.xlu0 %5221 }
 0xc37   : > { %12755 = vmatmul.mubr.msk.f32.gmra.mrb[132].mxu0 %vm3480_vm5, %v5208_v23 }
 0xc38   : > { %12757 = vmatprep.mubr.msk.f32.mxu0 %vm3480_vm5, %v5210_v54 }
 0xc3a   : > { %v5212_v17 = vpop.permute.xlu1 %5211  ;;  %v5226_v0 = vpop.permute.xlu0 %5225 }
 0xc3b   : > { %12758 = vmatmul.mubr.msk.f32.gmra.mrb[134].mxu0 %vm3480_vm5, %v5212_v17 }
 0xc3c   : > { %12760 = vmatprep.mubr.msk.f32.mxu0 %vm3480_vm5, %v5214_v56 }
 0xc3e   : > { %v5216_v33 = vpop.permute.xlu1 %5215  ;;  %v5230_v24 = vpop.permute.xlu0 %5229 }
 0xc3f   : > { %12761 = vmatmul.mubr.msk.f32.gmra.mrb[136].mxu0 %vm3480_vm5, %v5216_v33 }
 0xc40   : > { %12763 = vmatprep.mubr.msk.f32.mxu0 %vm3480_vm5, %v5218_v22 }
 0xc42   : > { %v5220_v39 = vpop.permute.xlu1 %5219  ;;  %v5234_v16 = vpop.permute.xlu0 %5233 }
 0xc43   : > { %12764 = vmatmul.mubr.msk.f32.gmra.mrb[138].mxu0 %vm3480_vm5, %v5220_v39 }
 0xc44   : > { %12766 = vmatprep.mubr.msk.f32.mxu0 %vm3480_vm5, %v5222_v34 }
 0xc46   : > { %v5224_v48 = vpop.permute.xlu1 %5223  ;;  %v5238_v35 = vpop.permute.xlu0 %5237 }
 0xc47   : > { %12767 = vmatmul.mubr.msk.f32.gmra.mrb[140].mxu0 %vm3480_vm5, %v5224_v48 }
 0xc48   : > { %12769 = vmatprep.mubr.msk.f32.mxu0 %vm3480_vm5, %v5226_v0 }
 0xc4a   : > { %v5242_v11 = vpop.permute.xlu0 %5241 }
 0xc4c   : > { %v5228_v12 = vpop.permute.xlu1 %5227 }
 0xc4d   : > { %12770 = vmatmul.mubr.msk.f32.gmra.mrb[142].mxu0 %vm3480_vm5, %v5228_v12 }
 0xc4e   : > { %12772 = vmatprep.mubr.msk.f32.mxu0 %vm3480_vm5, %v5230_v24 }
 0xc81   : > { %v5232_v29 = vpop.permute.xlu1 %5231 }
 0xc82   : > { %12773 = vmatmul.mubr.msk.f32.gmra.mrb[144].mxu0 %vm3480_vm5, %v5232_v29 }
 0xc83   : > { %12775 = vmatprep.mubr.msk.f32.mxu0 %vm3480_vm5, %v5234_v16 }
 0xc85   : > { %v5236_v40 = vpop.permute.xlu1 %5235 }
 0xc86   : > { %12776 = vmatmul.mubr.msk.f32.gmra.mrb[146].mxu0 %vm3480_vm5, %v5236_v40 }
 0xc87   : > { %12778 = vmatprep.mubr.msk.f32.mxu0 %vm3480_vm5, %v5238_v35 }
 0xc89   : > { %v5240_v4 = vpop.permute.xlu1 %5239 }
 0xc8a   : > { %12779 = vmatmul.mubr.msk.f32.gmra.mrb[148].mxu0 %vm3480_vm5, %v5240_v4 }
 0xc8b   : > { %12781 = vmatprep.mubr.msk.f32.mxu0 %vm3480_vm5, %v5242_v11 }
 0xc8d   : > { %v5244_v27 = vpop.permute.xlu1 %5243 }
 0xc8e   : > { %12782 = vmatmul.mubr.msk.f32.gmra.mrb[150].mxu0 %vm3480_vm5, %v5244_v27 }
 0xcf2   : > { %v12738_v5 = vpop.f32.mrb[120].mxu0 }
 0xcf3   : > { %v5381_v57 = vadd.f32 %v12738_v5, %v16697_v49  ;;  %v5375_v51 = vpop.f32.mrb[121].mxu0 }
 0xcf4   : > { %v5376_v15 = vadd.f32 %v16697_v49, %v5375_v51 }
 0xcf5   : > { %v5535_v44 = vmax.f32 %v5381_v57, 0.0 }
 0xcf6   : > { %v5534_v30 = vmax.f32 %v5376_v15, 0.0  ;;  %v12741_v18 = vpop.f32.mrb[122].mxu0 }
 0xcf7   : > { %v5391_v52 = vadd.f32 %v12741_v18, %v16697_v49  ;;  %v5385_v13 = vpop.f32.mrb[123].mxu0 }
 0xcf8   : > { %v5386_v6 = vadd.f32 %v16697_v49, %v5385_v13  ;;  %12786 = vmatprep.mubr.msk.f32.mxu1 %vm2258_vm4, %v5534_v30 }
 0xcf9   : > { %12787 = vmatmul.mubr.msk.f32.vlgmr.msra.gmra.mrb[136].mxu1 %vm2258_vm4, %v5535_v44  ;;  %v5537_v56 = vmax.f32 %v5391_v52, 0.0 }
 0xcfa   : > { %v5536_v54 = vmax.f32 %v5386_v6, 0.0  ;;  %v12744_v41 = vpop.f32.mrb[124].mxu0 }
 0xcfb   : > { %v5401_v23 = vadd.f32 %v12744_v41, %v16697_v49  ;;  %v5395_v17 = vpop.f32.mrb[125].mxu0 }
 0xcfc   : > { %v5396_v22 = vadd.f32 %v16697_v49, %v5395_v17  ;;  %12789 = vmatprep.mubr.msk.f32.mxu1 %vm2258_vm4, %v5536_v54 }
 0xcfd   : > { %12790 = vmatmul.mubr.msk.f32.gmra.mrb[138].mxu1 %vm2258_vm4, %v5537_v56  ;;  %v5539_v39 = vmax.f32 %v5401_v23, 0.0 }
 0xcfe   : > { %v5538_v33 = vmax.f32 %v5396_v22, 0.0  ;;  %v12747_v34 = vpop.f32.mrb[126].mxu0 }
 0xcff   : > { %v5411_v48 = vadd.f32 %v12747_v34, %v16697_v49  ;;  %v5405_v0 = vpop.f32.mrb[127].mxu0 }
 0xd00   : > { %v5406_v12 = vadd.f32 %v16697_v49, %v5405_v0  ;;  %12792 = vmatprep.mubr.msk.f32.mxu1 %vm2258_vm4, %v5538_v33 }
 0xd01   : > { %12793 = vmatmul.mubr.msk.f32.gmra.mrb[140].mxu1 %vm2258_vm4, %v5539_v39  ;;  %v5541_v29 = vmax.f32 %v5411_v48, 0.0 }
 0xd02   : > { %v5540_v24 = vmax.f32 %v5406_v12, 0.0  ;;  %v12750_v16 = vpop.f32.mrb[128].mxu0 }
 0xd03   : > { %v5421_v35 = vadd.f32 %v12750_v16, %v16697_v49  ;;  %v5415_v40 = vpop.f32.mrb[129].mxu0 }
 0xd04   : > { %v5416_v4 = vadd.f32 %v16697_v49, %v5415_v40  ;;  %12795 = vmatprep.mubr.msk.f32.mxu1 %vm2258_vm4, %v5540_v24 }
 0xd05   : > { %12796 = vmatmul.mubr.msk.f32.gmra.mrb[142].mxu1 %vm2258_vm4, %v5541_v29  ;;  %v5543_v8 = vmax.f32 %v5421_v35, 0.0 }
 0xd06   : > { %v5542_v11 = vmax.f32 %v5416_v4, 0.0  ;;  %v12753_v27 = vpop.f32.mrb[130].mxu0 }
 0xd07   : > { %v5431_v5 = vadd.f32 %v12753_v27, %v16697_v49  ;;  %v5425_v57 = vpop.f32.mrb[131].mxu0 }
 0xd08   : > { %v5426_v51 = vadd.f32 %v16697_v49, %v5425_v57  ;;  %12798 = vmatprep.mubr.msk.f32.mxu1 %vm2258_vm4, %v5542_v11 }
 0xd09   : > { %12799 = vmatmul.mubr.msk.f32.gmra.mrb[144].mxu1 %vm2258_vm4, %v5543_v8  ;;  %v5545_v18 = vmax.f32 %v5431_v5, 0.0 }
 0xd0a   : > { %v5544_v15 = vmax.f32 %v5426_v51, 0.0  ;;  %v12756_v30 = vpop.f32.mrb[132].mxu0 }
 0xd0b   : > { %v5441_v44 = vadd.f32 %v12756_v30, %v16697_v49  ;;  %v5435_v52 = vpop.f32.mrb[133].mxu0 }
 0xd0c   : > { %v5436_v13 = vadd.f32 %v16697_v49, %v5435_v52  ;;  %12801 = vmatprep.mubr.msk.f32.mxu1 %vm2258_vm4, %v5544_v15 }
 0xd0d   : > { %12802 = vmatmul.mubr.msk.f32.gmra.mrb[146].mxu1 %vm2258_vm4, %v5545_v18  ;;  %v5547_v41 = vmax.f32 %v5441_v44, 0.0 }
 0xd0e   : > { %v5546_v6 = vmax.f32 %v5436_v13, 0.0  ;;  %v12759_v54 = vpop.f32.mrb[134].mxu0 }
 0xd0f   : > { %v5451_v56 = vadd.f32 %v12759_v54, %v16697_v49  ;;  %v5445_v23 = vpop.f32.mrb[135].mxu0 }
 0xd10   : > { %v5446_v17 = vadd.f32 %v16697_v49, %v5445_v23  ;;  %12804 = vmatprep.mubr.msk.f32.mxu1 %vm2258_vm4, %v5546_v6 }
 0xd11   : > { %12805 = vmatmul.mubr.msk.f32.gmra.mrb[148].mxu1 %vm2258_vm4, %v5547_v41  ;;  %v5549_v34 = vmax.f32 %v5451_v56, 0.0 }
 0xd12   : > { %v5548_v22 = vmax.f32 %v5446_v17, 0.0  ;;  %v12762_v33 = vpop.f32.mrb[136].mxu0 }
 0xd13   : > { %v5461_v39 = vadd.f32 %v12762_v33, %v16697_v49  ;;  %v5455_v48 = vpop.f32.mrb[137].mxu0 }
 0xd14   : > { %v5456_v0 = vadd.f32 %v16697_v49, %v5455_v48  ;;  %12807 = vmatprep.mubr.msk.f32.mxu1 %vm2258_vm4, %v5548_v22 }
 0xd15   : > { %12808 = vmatmul.mubr.msk.f32.gmra.mrb[150].mxu1 %vm2258_vm4, %v5549_v34  ;;  %v5551_v16 = vmax.f32 %v5461_v39, 0.0 }
 0xd16   : > { %v5550_v12 = vmax.f32 %v5456_v0, 0.0  ;;  %v12765_v24 = vpop.f32.mrb[138].mxu0 }
 0xd17   : > { %v5471_v29 = vadd.f32 %v12765_v24, %v16697_v49  ;;  %v5465_v35 = vpop.f32.mrb[139].mxu0 }
 0xd18   : > { %v5466_v40 = vadd.f32 %v16697_v49, %v5465_v35  ;;  %12810 = vmatprep.mubr.msk.f32.mxu1 %vm2258_vm4, %v5550_v12 }
 0xd19   : > { %12811 = vmatmul.mubr.msk.f32.gmra.mrb[152].mxu1 %vm2258_vm4, %v5551_v16  ;;  %v5553_v27 = vmax.f32 %v5471_v29, 0.0 }
 0xd1a   : > { %v5552_v4 = vmax.f32 %v5466_v40, 0.0  ;;  %v12768_v11 = vpop.f32.mrb[140].mxu0 }
 0xd1b   : > { %v5481_v8 = vadd.f32 %v12768_v11, %v16697_v49  ;;  %v5475_v5 = vpop.f32.mrb[141].mxu0 }
 0xd1c   : > { %v5476_v57 = vadd.f32 %v16697_v49, %v5475_v5  ;;  %12813 = vmatprep.mubr.msk.f32.mxu1 %vm2258_vm4, %v5552_v4 }
 0xd1d   : > { %12814 = vmatmul.mubr.msk.f32.gmra.mrb[154].mxu1 %vm2258_vm4, %v5553_v27  ;;  %v5555_v15 = vmax.f32 %v5481_v8, 0.0 }
 0xd1e   : > { %v5554_v51 = vmax.f32 %v5476_v57, 0.0 }
 0xd20   : > { %v12771_v30 = vpop.f32.mrb[142].mxu0  ;;  %12816 = vmatprep.mubr.msk.f32.mxu1 %vm2258_vm4, %v5554_v51 }
 0xd21   : > { %v5491_v18 = vadd.f32 %v12771_v30, %v16697_v49  ;;  %v5485_v44 = vpop.f32.mrb[143].mxu0  ;;  %12817 = vmatmul.mubr.msk.f32.gmra.mrb[156].mxu1 %vm2258_vm4, %v5555_v15  ;;  %v16766_v15 = vld [vmem:[%s19984_s17 + $0x1] ss:$0 sm:$0xff] }
 0xd22   : > { %v5486_v52 = vadd.f32 %v16697_v49, %v5485_v44 }
 0xd23   : > { %v5557_v6 = vmax.f32 %v5491_v18, 0.0 }
 0xd24   : > { %v5556_v13 = vmax.f32 %v5486_v52, 0.0 }
 0xd26   : > { %12819 = vmatprep.mubr.msk.f32.mxu1 %vm2258_vm4, %v5556_v13 }
 0xd27   : > { %12820 = vmatmul.mubr.msk.f32.gmra.mrb[158].mxu1 %vm2258_vm4, %v5557_v6 }
 0xd55   : > { %v12774_v54 = vpop.f32.mrb[144].mxu0 }
 0xd56   : > { %v5501_v41 = vadd.f32 %v12774_v54, %v16697_v49  ;;  %v5495_v56 = vpop.f32.mrb[145].mxu0 }
 0xd57   : > { %v5496_v23 = vadd.f32 %v16697_v49, %v5495_v56 }
 0xd58   : > { %v5559_v33 = vmax.f32 %v5501_v41, 0.0 }
 0xd59   : > { %v5558_v17 = vmax.f32 %v5496_v23, 0.0  ;;  %v12777_v22 = vpop.f32.mrb[146].mxu0 }
 0xd5a   : > { %v5511_v34 = vadd.f32 %v12777_v22, %v16697_v49  ;;  %v5505_v39 = vpop.f32.mrb[147].mxu0 }
 0xd5b   : > { %v5506_v48 = vadd.f32 %v16697_v49, %v5505_v39  ;;  %12822 = vmatprep.mubr.msk.f32.mxu1 %vm2258_vm4, %v5558_v17 }
 0xd5c   : > { %12823 = vmatmul.mubr.msk.f32.gmra.mrb[160].mxu1 %vm2258_vm4, %v5559_v33  ;;  %v5561_v24 = vmax.f32 %v5511_v34, 0.0 }
 0xd5d   : > { %v5560_v0 = vmax.f32 %v5506_v48, 0.0  ;;  %v12780_v12 = vpop.f32.mrb[148].mxu0 }
 0xd5e   : > { %v5521_v16 = vadd.f32 %v12780_v12, %v16697_v49  ;;  %v5515_v29 = vpop.f32.mrb[149].mxu0 }
 0xd5f   : > { %v5516_v35 = vadd.f32 %v16697_v49, %v5515_v29  ;;  %12825 = vmatprep.mubr.msk.f32.mxu1 %vm2258_vm4, %v5560_v0 }
 0xd60   : > { %12826 = vmatmul.mubr.msk.f32.gmra.mrb[162].mxu1 %vm2258_vm4, %v5561_v24  ;;  %v5563_v11 = vmax.f32 %v5521_v16, 0.0 }
 0xd61   : > { %v5562_v40 = vmax.f32 %v5516_v35, 0.0  ;;  %v12783_v4 = vpop.f32.mrb[150].mxu0 }
 0xd62   : > { %v5531_v27 = vadd.f32 %v12783_v4, %v16697_v49  ;;  %v5525_v8 = vpop.f32.mrb[151].mxu0 }
 0xd63   : > { %v5526_v5 = vadd.f32 %v16697_v49, %v5525_v8  ;;  %12828 = vmatprep.mubr.msk.f32.mxu1 %vm2258_vm4, %v5562_v40 }
 0xd64   : > { %12829 = vmatmul.mubr.msk.f32.gmra.mrb[164].mxu1 %vm2258_vm4, %v5563_v11  ;;  %v5565_v51 = vmax.f32 %v5531_v27, 0.0 }
 0xd65   : > { %v5564_v57 = vmax.f32 %v5526_v5, 0.0 }
 0xd67   : > { %12831 = vmatprep.mubr.msk.f32.mxu1 %vm2258_vm4, %v5564_v57 }
 0xd68   : > { %12832 = vmatmul.mubr.msk.f32.gmra.mrb[166].mxu1 %vm2258_vm4, %v5565_v51 }
 0xdcc   : > { %v12788_v30 = vpop.f32.mrb[136].mxu1 }
 0xdcd   : > { %v5747_v18 = vadd.f32 %v12788_v30, %v16766_v15  ;;  %v5741_v44 = vpop.f32.mrb[137].mxu1 }
 0xdce   : > { %v5742_v49 = vadd.f32 %v16766_v15, %v5741_v44 }
 0xdcf   : > { %v5901_v6 = vmax.f32 %v5747_v18, 0.0 }
 0xdd0   : > { %v5900_v52 = vmax.f32 %v5742_v49, 0.0  ;;  %v12791_v13 = vpop.f32.mrb[138].mxu1 }
 0xdd1   : > { %v5757_v54 = vadd.f32 %v12791_v13, %v16766_v15  ;;  %v5751_v41 = vpop.f32.mrb[139].mxu1 }
 0xdd2   : > { %v5752_v56 = vadd.f32 %v16766_v15, %v5751_v41  ;;  %12836 = vmatprep.mubr.msk.f32.mxu0 %vm2258_vm4, %v5900_v52 }
 0xdd3   : > { %12837 = vmatmul.mubr.msk.f32.vlgmr.msra.gmra.mrb[152].mxu0 %vm2258_vm4, %v5901_v6  ;;  %v5903_v22 = vmax.f32 %v5757_v54, 0.0 }
 0xdd4   : > { %v5902_v23 = vmax.f32 %v5752_v56, 0.0  ;;  %v12794_v17 = vpop.f32.mrb[140].mxu1 }
 0xdd5   : > { %v5767_v33 = vadd.f32 %v12794_v17, %v16766_v15  ;;  %v5761_v34 = vpop.f32.mrb[141].mxu1 }
 0xdd6   : > { %v5762_v39 = vadd.f32 %v16766_v15, %v5761_v34  ;;  %12839 = vmatprep.mubr.msk.f32.mxu0 %vm2258_vm4, %v5902_v23 }
 0xdd7   : > { %12840 = vmatmul.mubr.msk.f32.gmra.mrb[154].mxu0 %vm2258_vm4, %v5903_v22  ;;  %v5905_v12 = vmax.f32 %v5767_v33, 0.0 }
 0xdd8   : > { %v5904_v48 = vmax.f32 %v5762_v39, 0.0  ;;  %v12797_v0 = vpop.f32.mrb[142].mxu1 }
 0xdd9   : > { %v5777_v24 = vadd.f32 %v12797_v0, %v16766_v15  ;;  %v5771_v16 = vpop.f32.mrb[143].mxu1 }
 0xdda   : > { %v5772_v29 = vadd.f32 %v16766_v15, %v5771_v16  ;;  %12842 = vmatprep.mubr.msk.f32.mxu0 %vm2258_vm4, %v5904_v48 }
 0xddb   : > { %12843 = vmatmul.mubr.msk.f32.gmra.mrb[156].mxu0 %vm2258_vm4, %v5905_v12  ;;  %v5907_v4 = vmax.f32 %v5777_v24, 0.0 }
 0xddc   : > { %v5906_v35 = vmax.f32 %v5772_v29, 0.0  ;;  %v12800_v40 = vpop.f32.mrb[144].mxu1 }
 0xddd   : > { %v5787_v11 = vadd.f32 %v12800_v40, %v16766_v15  ;;  %v5781_v27 = vpop.f32.mrb[145].mxu1 }
 0xdde   : > { %v5782_v8 = vadd.f32 %v16766_v15, %v5781_v27  ;;  %12845 = vmatprep.mubr.msk.f32.mxu0 %vm2258_vm4, %v5906_v35 }
 0xddf   : > { %12846 = vmatmul.mubr.msk.f32.gmra.mrb[158].mxu0 %vm2258_vm4, %v5907_v4  ;;  %v5909_v51 = vmax.f32 %v5787_v11, 0.0 }
 0xde0   : > { %v5908_v5 = vmax.f32 %v5782_v8, 0.0  ;;  %v12803_v57 = vpop.f32.mrb[146].mxu1 }
 0xde1   : > { %v5797_v30 = vadd.f32 %v12803_v57, %v16766_v15  ;;  %v5791_v18 = vpop.f32.mrb[147].mxu1 }
 0xde2   : > { %v5792_v44 = vadd.f32 %v16766_v15, %v5791_v18  ;;  %12848 = vmatprep.mubr.msk.f32.mxu0 %vm2258_vm4, %v5908_v5 }
 0xde3   : > { %12849 = vmatmul.mubr.msk.f32.gmra.mrb[160].mxu0 %vm2258_vm4, %v5909_v51  ;;  %v5911_v13 = vmax.f32 %v5797_v30, 0.0 }
 0xde4   : > { %v5910_v49 = vmax.f32 %v5792_v44, 0.0  ;;  %v12806_v52 = vpop.f32.mrb[148].mxu1 }
 0xde5   : > { %v5807_v6 = vadd.f32 %v12806_v52, %v16766_v15  ;;  %v5801_v54 = vpop.f32.mrb[149].mxu1 }
 0xde6   : > { %v5802_v41 = vadd.f32 %v16766_v15, %v5801_v54  ;;  %12851 = vmatprep.mubr.msk.f32.mxu0 %vm2258_vm4, %v5910_v49 }
 0xde7   : > { %12852 = vmatmul.mubr.msk.f32.gmra.mrb[162].mxu0 %vm2258_vm4, %v5911_v13  ;;  %v5913_v17 = vmax.f32 %v5807_v6, 0.0 }
 0xde8   : > { %v5912_v56 = vmax.f32 %v5802_v41, 0.0  ;;  %v12809_v23 = vpop.f32.mrb[150].mxu1 }
 0xde9   : > { %v5817_v22 = vadd.f32 %v12809_v23, %v16766_v15  ;;  %v5811_v33 = vpop.f32.mrb[151].mxu1 }
 0xdea   : > { %v5812_v34 = vadd.f32 %v16766_v15, %v5811_v33  ;;  %12854 = vmatprep.mubr.msk.f32.mxu0 %vm2258_vm4, %v5912_v56 }
 0xdeb   : > { %12855 = vmatmul.mubr.msk.f32.gmra.mrb[164].mxu0 %vm2258_vm4, %v5913_v17  ;;  %v5915_v0 = vmax.f32 %v5817_v22, 0.0 }
 0xdec   : > { %v5914_v39 = vmax.f32 %v5812_v34, 0.0  ;;  %v12812_v48 = vpop.f32.mrb[152].mxu1 }
 0xded   : > { %v5827_v12 = vadd.f32 %v12812_v48, %v16766_v15  ;;  %v5821_v24 = vpop.f32.mrb[153].mxu1 }
 0xdee   : > { %v5822_v16 = vadd.f32 %v16766_v15, %v5821_v24  ;;  %12857 = vmatprep.mubr.msk.f32.mxu0 %vm2258_vm4, %v5914_v39 }
 0xdef   : > { %12858 = vmatmul.mubr.msk.f32.gmra.mrb[166].mxu0 %vm2258_vm4, %v5915_v0  ;;  %v5917_v40 = vmax.f32 %v5827_v12, 0.0 }
 0xdf0   : > { %v5916_v29 = vmax.f32 %v5822_v16, 0.0  ;;  %v12815_v35 = vpop.f32.mrb[154].mxu1 }
 0xdf1   : > { %v5837_v4 = vadd.f32 %v12815_v35, %v16766_v15  ;;  %v5831_v11 = vpop.f32.mrb[155].mxu1 }
 0xdf2   : > { %v5832_v27 = vadd.f32 %v16766_v15, %v5831_v11  ;;  %12860 = vmatprep.mubr.msk.f32.mxu0 %vm2258_vm4, %v5916_v29 }
 0xdf3   : > { %12861 = vmatmul.mubr.msk.f32.gmra.mrb[168].mxu0 %vm2258_vm4, %v5917_v40  ;;  %v5919_v57 = vmax.f32 %v5837_v4, 0.0 }
 0xdf4   : > { %v5918_v8 = vmax.f32 %v5832_v27, 0.0  ;;  %v12818_v5 = vpop.f32.mrb[156].mxu1 }
 0xdf5   : > { %v5847_v51 = vadd.f32 %v12818_v5, %v16766_v15  ;;  %v5841_v30 = vpop.f32.mrb[157].mxu1 }
 0xdf6   : > { %v5842_v18 = vadd.f32 %v16766_v15, %v5841_v30  ;;  %12863 = vmatprep.mubr.msk.f32.mxu0 %vm2258_vm4, %v5918_v8 }
 0xdf7   : > { %12864 = vmatmul.mubr.msk.f32.gmra.mrb[170].mxu0 %vm2258_vm4, %v5919_v57  ;;  %v5921_v49 = vmax.f32 %v5847_v51, 0.0 }
 0xdf8   : > { %v5920_v44 = vmax.f32 %v5842_v18, 0.0 }
 0xdfa   : > { %v12821_v52 = vpop.f32.mrb[158].mxu1  ;;  %12866 = vmatprep.mubr.msk.f32.mxu0 %vm2258_vm4, %v5920_v44 }
 0xdfb   : > { %v5857_v13 = vadd.f32 %v12821_v52, %v16766_v15  ;;  %v5851_v6 = vpop.f32.mrb[159].mxu1  ;;  %12867 = vmatmul.mubr.msk.f32.gmra.mrb[172].mxu0 %vm2258_vm4, %v5921_v49  ;;  %v16835_v49 = vld [vmem:[%s19986_s19 + $0x1] ss:$0 sm:$0xff] }
 0xdfc   : > { %v5852_v54 = vadd.f32 %v16766_v15, %v5851_v6 }
 0xdfd   : > { %v5923_v56 = vmax.f32 %v5857_v13, 0.0 }
 0xdfe   : > { %v5922_v41 = vmax.f32 %v5852_v54, 0.0 }
 0xe00   : > { %12869 = vmatprep.mubr.msk.f32.mxu0 %vm2258_vm4, %v5922_v41 }
 0xe01   : > { %12870 = vmatmul.mubr.msk.f32.gmra.mrb[174].mxu0 %vm2258_vm4, %v5923_v56 }
 0xe2f   : > { %v12824_v23 = vpop.f32.mrb[160].mxu1 }
 0xe30   : > { %v5867_v17 = vadd.f32 %v12824_v23, %v16766_v15  ;;  %v5861_v22 = vpop.f32.mrb[161].mxu1 }
 0xe31   : > { %v5862_v33 = vadd.f32 %v16766_v15, %v5861_v22 }
 0xe32   : > { %v5925_v48 = vmax.f32 %v5867_v17, 0.0 }
 0xe33   : > { %v5924_v34 = vmax.f32 %v5862_v33, 0.0  ;;  %v12827_v39 = vpop.f32.mrb[162].mxu1 }
 0xe34   : > { %v5877_v0 = vadd.f32 %v12827_v39, %v16766_v15  ;;  %v5871_v12 = vpop.f32.mrb[163].mxu1 }
 0xe35   : > { %v5872_v24 = vadd.f32 %v16766_v15, %v5871_v12  ;;  %12872 = vmatprep.mubr.msk.f32.mxu0 %vm2258_vm4, %v5924_v34 }
 0xe36   : > { %12873 = vmatmul.mubr.msk.f32.gmra.mrb[176].mxu0 %vm2258_vm4, %v5925_v48  ;;  %v5927_v35 = vmax.f32 %v5877_v0, 0.0 }
 0xe37   : > { %v5926_v16 = vmax.f32 %v5872_v24, 0.0  ;;  %v12830_v29 = vpop.f32.mrb[164].mxu1 }
 0xe38   : > { %v5887_v40 = vadd.f32 %v12830_v29, %v16766_v15  ;;  %v5881_v4 = vpop.f32.mrb[165].mxu1 }
 0xe39   : > { %v5882_v11 = vadd.f32 %v16766_v15, %v5881_v4  ;;  %12875 = vmatprep.mubr.msk.f32.mxu0 %vm2258_vm4, %v5926_v16 }
 0xe3a   : > { %12876 = vmatmul.mubr.msk.f32.gmra.mrb[178].mxu0 %vm2258_vm4, %v5927_v35  ;;  %v5929_v5 = vmax.f32 %v5887_v40, 0.0 }
 0xe3b   : > { %v5928_v27 = vmax.f32 %v5882_v11, 0.0  ;;  %v12833_v8 = vpop.f32.mrb[166].mxu1 }
 0xe3c   : > { %v5897_v57 = vadd.f32 %v12833_v8, %v16766_v15  ;;  %v5891_v51 = vpop.f32.mrb[167].mxu1 }
 0xe3d   : > { %v5892_v30 = vadd.f32 %v16766_v15, %v5891_v51  ;;  %12878 = vmatprep.mubr.msk.f32.mxu0 %vm2258_vm4, %v5928_v27 }
 0xe3e   : > { %12879 = vmatmul.mubr.msk.f32.gmra.mrb[180].mxu0 %vm2258_vm4, %v5929_v5  ;;  %v5931_v44 = vmax.f32 %v5897_v57, 0.0 }
 0xe3f   : > { %v5930_v18 = vmax.f32 %v5892_v30, 0.0 }
 0xe41   : > { %12881 = vmatprep.mubr.msk.f32.mxu0 %vm2258_vm4, %v5930_v18 }
 0xe42   : > { %12882 = vmatmul.mubr.msk.f32.gmra.mrb[182].mxu0 %vm2258_vm4, %v5931_v44 }
 0xea6   : > { %v12838_v52 = vpop.f32.mrb[152].mxu0 }
 0xea7   : > { %v6113_v13 = vadd.f32 %v12838_v52, %v16835_v49  ;;  %v6107_v6 = vpop.f32.mrb[153].mxu0 }
 0xea8   : > { %v6108_v15 = vadd.f32 %v16835_v49, %v6107_v6 }
 0xea9   : > { %6620 = vrot.lane.b32.xlu1 %v6113_v13, %s14172_s3 }
 0xeaa   : > { %v12841_v54 = vpop.f32.mrb[154].mxu0  ;;  %6618 = vrot.lane.b32.xlu0 %v6108_v15, %s14172_s3  ;;  %13646 = vtanh.f32 %v6108_v15 }
 0xeab   : > { %v6123_v41 = vadd.f32 %v12841_v54, %v16835_v49  ;;  %v6117_v56 = vpop.f32.mrb[155].mxu0  ;;  %13648 = vtanh.f32 %v6113_v13 }
 0xeac   : > { %v6118_v23 = vadd.f32 %v16835_v49, %v6117_v56 }
 0xead   : > { %13650 = vtanh.f32 %v6123_v41 }
 0xeae   : > { %v12844_v17 = vpop.f32.mrb[156].mxu0  ;;  %6622 = vrot.lane.b32.xlu1 %v6118_v23, %s14172_s3  ;;  %6624 = vrot.lane.b32.xlu0 %v6123_v41, %s14172_s3  ;;  %13652 = vtanh.f32 %v6118_v23 }
 0xeaf   : > { %v16846_v22 = vadd.f32 %v12844_v17, %v16835_v49  ;;  %v6127_v33 = vpop.f32.mrb[157].mxu0 }
 0xeb0   : > { %v6128_v48 = vadd.f32 %v16835_v49, %v6127_v33 }
 0xeb2   : > { %v12847_v34 = vpop.f32.mrb[158].mxu0  ;;  %6628 = vrot.lane.b32.xlu1 %v16846_v22, %s14172_s3  ;;  %13654 = vtanh.f32 %v6128_v48 }
 0xeb3   : > { %v6137_v39 = vpop.f32.mrb[159].mxu0  ;;  %v16858_v16 = vadd.f32 %v12847_v34, %v16835_v49  ;;  %13656 = vtanh.f32 %v16846_v22 }
 0xeb4   : > { %v16852_v0 = vadd.f32 %v16835_v49, %v6137_v39  ;;  %v13647_v30 = vpop.eup %13646 }
 0xeb5   : > { %v16880_v52 = vmul.f32 0.1, %v13647_v30  ;;  %v13649_v56 = vpop.eup %13648 }
 0xeb6   : > { %v12850_v12 = vpop.f32.mrb[160].mxu0  ;;  %6626 = vrot.lane.b32.xlu1 %v6128_v48, %s14172_s3  ;;  %6630 = vrot.lane.b32.xlu0 %v16852_v0, %s14172_s3  ;;  %v16888_v17 = vmul.f32 0.1, %v13649_v56  ;;  %13658 = vtanh.f32 %v16852_v0 }
 0xeb7   : > { %v6147_v24 = vpop.f32.mrb[161].mxu0  ;;  %v6330_v15 = vsel %vm4594_vm6, %v16880_v52, 0.0  ;;  %v16893_v33 = vadd.f32 %v12850_v12, %v16835_v49  ;;  %v11517_v12 = vld [vmem:[%s19981_s14 + $0x10] sm:$0xff]  ;;  %v13651_v30 = vpop.eup %13650  ;;  %13660 = vtanh.f32 %v16858_v16 }
 0xeb8   : > { %v6333_v13 = vsel %vm4594_vm6, %v16888_v17, 0.0  ;;  %v16898_v34 = vadd.f32 %v16835_v49, %v6147_v24  ;;  %12884 = vmatprep.subr.mxu1 %v11517_v12  ;;  %v16910_v24 = vmul.f32 0.1, %v13651_v30 }
 0xeb9   : > { %12885 = vmatpush3.msra.mxu1 %v11517_v12 }
 0xeba   : > { %v12853_v29 = vpop.f32.mrb[162].mxu0  ;;  %6632 = vrot.lane.b32.xlu1 %v16858_v16, %s14172_s3 }
 0xebb   : > { %v6157_v35 = vpop.f32.mrb[163].mxu0  ;;  %v16939_v43 = vadd.f32 %v12853_v29, %v16835_v49 }
 0xebc   : > { %v16903_v39 = vadd.f32 %v16835_v49, %v6157_v35  ;;  %v6339_v35 = vsel %vm4594_vm6, %v16910_v24, 0.0 }
 0xebe   : > { %v16862_v40 = vpop.f32.mrb[164].mxu0 }
 0xebf   : > { %v6167_v4 = vpop.f32.mrb[165].mxu0  ;;  %v16959_v22 = vadd.f32 %v16862_v40, %v16835_v49 }
 0xec2   : > { %v16864_v11 = vpop.f32.mrb[166].mxu0 }
 0xec3   : > { %v16866_v27 = vpop.f32.mrb[167].mxu0 }
 0xec6   : > { %v16868_v8 = vpop.f32.mrb[168].mxu0 }
 0xec7   : > { %v16870_v5 = vpop.f32.mrb[169].mxu0 }
 0xeca   : > { %v16872_v57 = vpop.f32.mrb[170].mxu0 }
 0xecb   : > { %v16874_v51 = vpop.f32.mrb[171].mxu0 }
 0xece   : > { %v16876_v18 = vpop.f32.mrb[172].mxu0 }
 0xecf   : > { %v16878_v44 = vpop.f32.mrb[173].mxu0 }
 0xed4   : > { %v16882_v6 = vpop.f32.mrb[174].mxu0 }
 0xed5   : > { %v16886_v54 = vpop.f32.mrb[175].mxu0  ;;  %6331 = vadd.xlane.f32.xlu0 %v6330_v15  ;;  %v13653_v15 = vpop.eup %13652 }
 0xed6   : > { %v13655_v48 = vpop.eup %13654 }
 0xed7   : > { %v16930_v37 = vmul.f32 0.1, %v13655_v48  ;;  %v13657_v48 = vpop.eup %13656 }
 0xed8   : > { %v16947_v28 = vmul.f32 0.1, %v13657_v48  ;;  %v13659_v29 = vpop.eup %13658  ;;  %v6178_v48 = vadd.f32 %v16835_v49, %v16866_v27 }
 0xed9   : > { %v16951_v55 = vmul.f32 0.1, %v13659_v29  ;;  %v13661_v50 = vpop.eup %13660 }
 0xeda   : > { %v16984_v16 = vmul.f32 0.1, %v13661_v50 }
 0xedb   : > { %v6348_v62 = vsel %vm4594_vm6, %v16951_v55, 0.0 }
 0xede   : > { %6334 = vadd.xlane.f32.xlu1 %v6333_v13  ;;  %v16916_v13 = vmul.f32 0.1, %v13653_v15 }
 0xee0   : > { %v6336_v12 = vsel %vm4594_vm6, %v16916_v13, 0.0 }
 0xeeb   : > { %6636 = vrot.lane.b32.xlu0 %v16893_v33, %s14172_s3 }
 0xeef   : > { %6634 = vrot.lane.b32.xlu1 %v16898_v34, %s14172_s3 }
 0xef3   : > { %6638 = vrot.lane.b32.xlu1 %v16903_v39, %s14172_s3 }
 0xf09   : > { %v16912_v56 = vpop.f32.mrb[176].mxu0 }
 0xf0a   : > { %v16918_v41 = vpop.f32.mrb[177].mxu0  ;;  %6340 = vadd.xlane.f32.xlu0 %v6339_v35  ;;  %v6342_v35 = vsel %vm4594_vm6, %v16930_v37, 0.0 }
 0xf0d   : > { %v16920_v23 = vpop.f32.mrb[178].mxu0 }
 0xf0e   : > { %v16924_v42 = vpop.f32.mrb[179].mxu0  ;;  %6337 = vadd.xlane.f32.xlu0 %v6336_v12  ;;  %v6168_v12 = vadd.f32 %v16835_v49, %v6167_v4 }
 0xf11   : > { %v16926_v30 = vpop.f32.mrb[180].mxu0 }
 0xf12   : > { %v16928_v38 = vpop.f32.mrb[181].mxu0 }
 0xf15   : > { %v16932_v15 = vpop.f32.mrb[182].mxu0 }
 0xf16   : > { %v16934_v61 = vpop.f32.mrb[183].mxu0 }
 0xf17   : > { %6343 = vadd.xlane.f32.xlu1 %v6342_v35  ;;  %v6345_v35 = vsel %vm4594_vm6, %v16947_v28, 0.0 }
 0xf1b   : > { %v6621_v4 = vpop.permute.xlu1 %6620 }
 0xf1c   : > { %v6619_v31 = vpop.permute.xlu0 %6618 }
 0xf20   : > { %v16955_v45 = vpop.permute.xlu1 %6622  ;;  %v16963_v0 = vpop.permute.xlu0 %6624 }
 0xf24   : > { %6640 = vrot.lane.b32.xlu0 %v16939_v43, %s14172_s3 }
 0xf28   : > { %6642 = vrot.lane.b32.xlu1 %v6168_v12, %s14172_s3 }
 0xf43   : > { %6346 = vadd.xlane.f32.xlu0 %v6345_v35  ;;  %v16967_v35 = vpop.permute.xlu1 %6628 }
 0xf47   : > { %v16972_v29 = vpop.permute.xlu1 %6626 }
 0xf4b   : > { %v16977_v63 = vpop.permute.xlu1 %6632 }
 0xf4c   : > { %6349 = vadd.xlane.f32.xlu1 %v6348_v62  ;;  %v16970_v62 = vpop.permute.xlu0 %6630 }
 0xf59   : > { %6644 = vrot.lane.b32.xlu0 %v16959_v22, %s14172_s3 }
 0xf5d   : > { %6646 = vrot.lane.b32.xlu1 %v6178_v48, %s14172_s3 }
 0xf62   : > { %v6332_v14 = vpop.xlane.xlu0 %6331 }
 0xf63   : > { %v6426_v26 = vsub.f32 0.0, %v6332_v14 }
 0xf65   : > { %v6458_v40 = vsel %vm4594_vm6, %v16880_v52, %v6426_v26  ;;  %v20542_v26 = vld [vmem:[#allocation107_spill] sm:$0xff] }
 0xf66   : > { %v6490_v7 = vmul.f32 1.442695, %v6458_v40 }
 0xf68   : > { %13662 = vpow2.f32 %v6490_v7 }
 0xf69   : > { %13664 = vtanh.f32 %v16898_v34 }
 0xf6b   : > { %v6335_v27 = vpop.xlane.xlu1 %6334 }
 0xf6c   : > { %v6427_v53 = vsub.f32 0.0, %v6335_v27 }
 0xf6e   : > { %v6459_v25 = vsel %vm4594_vm6, %v16888_v17, %v6427_v53  ;;  %v6351_v53 = vsel %vm4594_vm6, %v16984_v16, 0.0 }
 0xf6f   : > { %v6492_v58 = vmul.f32 1.442695, %v6459_v25 }
 0xf71   : > { %13666 = vpow2.f32 %v6492_v58  ;;  %v20544_v58 = vld [vmem:[#allocation109_spill] sm:$0xff] }
 0xf72   : > { %v13663_v14 = vpop.eup %13662  ;;  %13668 = vtanh.f32 %v16903_v39 }
 0xf73   : > { %v6554_v52 = vmul.f32 %v13663_v14, %v20542_v26  ;;  %13670 = vtanh.f32 %v6168_v12  ;;  %v13665_v25 = vpop.eup %13664 }
 0xf74   : > { %13672 = vtanh.f32 %v6178_v48  ;;  %v16993_v34 = vmul.f32 0.1, %v13665_v25 }
 0xf75   : > { %v16986_v40 = vadd.f32 %v6619_v31, %v6554_v52  ;;  %13674 = vtanh.f32 %v16893_v33 }
 0xf76   : > { %v6354_v31 = vsel %vm4594_vm6, %v16993_v34, 0.0 }
 0xf77   : > { %20543 = vst [vmem:[#allocation163_spill] sm:$0xff] %v16986_v40  ;;  %12886 = vmatprep.mubr.msk.f32.mxu1 %vm3480_vm5, %v16986_v40 }
 0xf78   : > { %6352 = vadd.xlane.f32.xlu0 %v6351_v53  ;;  %v6183_v53 = vadd.f32 %v16864_v11, %v16835_v49  ;;  %v6193_v11 = vadd.f32 %v16868_v8, %v16835_v49 }
 0xf7b   : > { %v13667_v7 = vpop.eup %13666 }
 0xf7c   : > { %v6555_v17 = vmul.f32 %v13667_v7, %v20544_v58  ;;  %v13669_v39 = vpop.eup %13668  ;;  %v17016_v7 = vpop.permute.xlu0 %6636 }
 0xf7d   : > { %v17001_v12 = vmul.f32 0.1, %v13669_v39  ;;  %v13671_v27 = vpop.eup %13670  ;;  %v17018_v39 = vpop.permute.xlu1 %6634 }
 0xf7e   : > { %v16995_v50 = vadd.f32 %v6621_v4, %v6555_v17  ;;  %v17005_v14 = vmul.f32 0.1, %v13671_v27  ;;  %v13673_v26 = vpop.eup %13672 }
 0xf7f   : > { %v6360_v48 = vsel %vm4594_vm6, %v17001_v12, 0.0  ;;  %v17009_v52 = vmul.f32 0.1, %v13673_v26 }
 0xf80   : > { %20545 = vst [vmem:[#allocation120_spill] sm:$0xff] %v16995_v50  ;;  %12887 = vmatmul.mubr.msk.f32.vlgmr.msra.gmra.mrb[168].mxu1 %vm3480_vm5, %v16995_v50  ;;  %v6366_v4 = vsel %vm4594_vm6, %v17005_v14, 0.0 }
 0xf81   : > { %6355 = vadd.xlane.f32.xlu1 %v6354_v31  ;;  %v6372_v25 = vsel %vm4594_vm6, %v17009_v52, 0.0  ;;  %v17033_v33 = vpop.permute.xlu1 %6638 }
 0xf85   : > { %6361 = vadd.xlane.f32.xlu1 %v6360_v48 }
 0xf89   : > { %6367 = vadd.xlane.f32.xlu1 %v6366_v4 }
 0xf8d   : > { %6373 = vadd.xlane.f32.xlu1 %v6372_v25 }
 0xf8e   : > { %6648 = vrot.lane.b32.xlu0 %v6183_v53, %s14172_s3 }
 0xf97   : > { %v6341_v58 = vpop.xlane.xlu0 %6340 }
 0xf98   : > { %v6429_v17 = vsub.f32 0.0, %v6341_v58  ;;  %v13675_v58 = vpop.eup %13674 }
 0xf9a   : > { %v6461_v31 = vsel %vm4594_vm6, %v16910_v24, %v6429_v17  ;;  %v17031_v24 = vadd.f32 %v16882_v6, %v16835_v49 }
 0xf9b   : > { %v6496_v27 = vmul.f32 1.442695, %v6461_v31  ;;  %v6338_v48 = vpop.xlane.xlu0 %6337 }
 0xf9c   : > { %v6428_v26 = vsub.f32 0.0, %v6338_v48 }
 0xf9d   : > { %13676 = vpow2.f32 %v6496_v27  ;;  %v17040_v27 = vmul.f32 0.1, %v13675_v58 }
 0xf9e   : > { %v6460_v4 = vsel %vm4594_vm6, %v16916_v13, %v6428_v26  ;;  %6652 = vrot.lane.b32.xlu1 %v6193_v11, %s14172_s3  ;;  %13678 = vtanh.f32 %v16939_v43  ;;  %v20546_v26 = vld [vmem:[#allocation112_spill] sm:$0xff] }
 0xf9f   : > { %v6494_v25 = vmul.f32 1.442695, %v6460_v4 }
 0xfa1   : > { %13680 = vpow2.f32 %v6494_v25  ;;  %v6357_v25 = vsel %vm4594_vm6, %v17040_v27, 0.0 }
 0xfa2   : > { %6664 = vrot.lane.b32.xlu1 %v17031_v24, %s14172_s3  ;;  %13682 = vtanh.f32 %v16959_v22  ;;  %v20547_v22 = vld [vmem:[#allocation111_spill] sm:$0xff] }
 0xfa3   : > { %13684 = vtanh.f32 %v6183_v53 }
 0xfa4   : > { %v6344_v8 = vpop.xlane.xlu1 %6343 }
 0xfa5   : > { %v6430_v13 = vsub.f32 0.0, %v6344_v8 }
 0xfa7   : > { %v6462_v43 = vsel %vm4594_vm6, %v16930_v37, %v6430_v13  ;;  %v13677_v17 = vpop.eup %13676 }
 0xfa8   : > { %v6498_v31 = vmul.f32 1.442695, %v6462_v43  ;;  %v13679_v6 = vpop.eup %13678  ;;  %v6557_v4 = vmul.f32 %v13677_v17, %v20546_v26 }
 0xfa9   : > { %v17046_v50 = vmul.f32 0.1, %v13679_v6 }
 0xfaa   : > { %13686 = vpow2.f32 %v6498_v31  ;;  %v17052_v8 = vadd.f32 %v16963_v0, %v6557_v4  ;;  %v20550_v31 = vld [vmem:[#allocation113_spill] sm:$0xff] }
 0xfab   : > { %v13681_v48 = vpop.eup %13680  ;;  %v6363_v58 = vsel %vm4594_vm6, %v17046_v50, 0.0  ;;  %13688 = vtanh.f32 %v6193_v11 }
 0xfac   : > { %v6556_v40 = vmul.f32 %v13681_v48, %v20547_v22  ;;  %v13683_v53 = vpop.eup %13682  ;;  %20549 = vst [vmem:[#allocation164_spill] sm:$0xff] %v17052_v8 }
 0xfad   : > { %6358 = vadd.xlane.f32.xlu0 %v6357_v25  ;;  %v17058_v13 = vmul.f32 0.1, %v13683_v53  ;;  %v13685_v43 = vpop.eup %13684  ;;  %v17084_v53 = vpop.permute.xlu0 %6640 }
 0xfae   : > { %v17049_v37 = vadd.f32 %v16955_v45, %v6556_v40  ;;  %v6188_v45 = vadd.f32 %v16835_v49, %v16870_v5  ;;  %v17066_v40 = vmul.f32 0.1, %v13685_v43  ;;  %v6203_v43 = vadd.f32 %v16872_v57, %v16835_v49 }
 0xfaf   : > { %v6369_v0 = vsel %vm4594_vm6, %v17058_v13, 0.0  ;;  %v17101_v57 = vadd.f32 %v16912_v56, %v16835_v49 }
 0xfb0   : > { %20548 = vst [vmem:[#allocation134_spill] sm:$0xff] %v17049_v37  ;;  %12889 = vmatprep.mubr.msk.f32.mxu1 %vm3480_vm5, %v17049_v37  ;;  %13690 = vtanh.f32 %v6188_v45  ;;  %v6375_v26 = vsel %vm4594_vm6, %v17066_v40, 0.0 }
 0xfb1   : > { %6364 = vadd.xlane.f32.xlu0 %v6363_v58  ;;  %12890 = vmatmul.mubr.msk.f32.gmra.mrb[170].mxu1 %vm3480_vm5, %v17052_v8 }
 0xfb4   : > { %v13687_v17 = vpop.eup %13686 }
 0xfb5   : > { %6370 = vadd.xlane.f32.xlu0 %v6369_v0  ;;  %v6558_v6 = vmul.f32 %v13687_v17, %v20550_v31  ;;  %v13689_v5 = vpop.eup %13688 }
 0xfb6   : > { %v17076_v11 = vmul.f32 0.1, %v13689_v5 }
 0xfb7   : > { %v17070_v48 = vadd.f32 %v16972_v29, %v6558_v6  ;;  %v6198_v6 = vadd.f32 %v16835_v49, %v16874_v51 }
 0xfb8   : > { %v6381_v25 = vsel %vm4594_vm6, %v17076_v11, 0.0 }
 0xfb9   : > { %20551 = vst [vmem:[#allocation136_spill] sm:$0xff] %v17070_v48  ;;  %6376 = vadd.xlane.f32.xlu0 %v6375_v26  ;;  %12892 = vmatprep.mubr.msk.f32.mxu1 %vm3480_vm5, %v17070_v48  ;;  %v17094_v26 = vpop.permute.xlu1 %6642 }
 0xfba   : > { %v13691_v4 = vpop.eup %13690 }
 0xfbb   : > { %v17080_v22 = vmul.f32 0.1, %v13691_v4  ;;  %v6208_v4 = vadd.f32 %v16835_v49, %v16878_v44 }
 0xfbd   : > { %v6378_v29 = vsel %vm4594_vm6, %v17080_v22, 0.0 }
 0xfc6   : > { %6382 = vadd.xlane.f32.xlu1 %v6381_v25 }
 0xfca   : > { %6379 = vadd.xlane.f32.xlu1 %v6378_v29  ;;  %v6218_v29 = vadd.f32 %v16835_v49, %v16886_v54 }
 0xfcf   : > { %6650 = vrot.lane.b32.xlu0 %v6188_v45, %s14172_s3  ;;  %v6213_v45 = vadd.f32 %v16876_v18, %v16835_v49  ;;  %v11552_v18 = vld [vmem:[%s19983_s16 + $0x8] sm:$0xf] }
 0xfd0   : > { %v6347_v58 = vpop.xlane.xlu0 %6346  ;;  %12934 = vmatprep.subr.msk.mxu0 %vm2355_vm3, %v11552_v18 }
 0xfd1   : > { %v6431_v17 = vsub.f32 0.0, %v6347_v58  ;;  %12935 = vmatpush3.msk.msra.mxu0 %vm2355_vm3, %v11552_v18 }
 0xfd3   : > { %v6463_v0 = vsel %vm4594_vm6, %v16947_v28, %v6431_v17  ;;  %6656 = vrot.lane.b32.xlu0 %v6203_v43, %s14172_s3  ;;  %v6228_v17 = vadd.f32 %v16835_v49, %v16918_v41 }
 0xfd4   : > { %v6500_v31 = vmul.f32 1.442695, %v6463_v0 }
 0xfd6   : > { %13692 = vpow2.f32 %v6500_v31  ;;  %v20554_v31 = vld [vmem:[#allocation115_spill] sm:$0xff] }
 0xfd7   : > { %6654 = vrot.lane.b32.xlu0 %v6198_v6, %s14172_s3 }
 0xfd9   : > { %v6350_v5 = vpop.xlane.xlu1 %6349 }
 0xfda   : > { %v6432_v28 = vsub.f32 0.0, %v6350_v5 }
 0xfdb   : > { %6668 = vrot.lane.b32.xlu1 %v17101_v57, %s14172_s3  ;;  %6660 = vrot.lane.b32.xlu0 %v6213_v45, %s14172_s3 }
 0xfdc   : > { %v6464_v51 = vsel %vm4594_vm6, %v16951_v55, %v6432_v28  ;;  %v20552_v55 = vld [vmem:[#allocation114_spill] sm:$0xff] }
 0xfdd   : > { %v6502_v25 = vmul.f32 1.442695, %v6464_v51 }
 0xfdf   : > { %13694 = vpow2.f32 %v6502_v25  ;;  %6658 = vrot.lane.b32.xlu0 %v6208_v4, %s14172_s3  ;;  %v17138_v25 = vpop.permute.xlu0 %6644 }
 0xfe0   : > { %v13693_v56 = vpop.eup %13692  ;;  %13696 = vtanh.f32 %v6203_v43 }
 0xfe1   : > { %v6559_v58 = vmul.f32 %v13693_v56, %v20552_v55  ;;  %13698 = vtanh.f32 %v6198_v6 }
 0xfe3   : > { %6662 = vrot.lane.b32.xlu0 %v6218_v29, %s14172_s3  ;;  %v17121_v44 = vadd.f32 %v16967_v35, %v6559_v58  ;;  %v17146_v58 = vpop.permute.xlu1 %6646 }
 0xfe5   : > { %20553 = vst [vmem:[#allocation124_spill] sm:$0xff] %v17121_v44  ;;  %12893 = vmatmul.mubr.msk.f32.gmra.mrb[172].mxu1 %vm3480_vm5, %v17121_v44 }
 0xfe7   : > { %6666 = vrot.lane.b32.xlu0 %v6228_v17, %s14172_s3 }
 0xfe9   : > { %v13695_v0 = vpop.eup %13694 }
 0xfea   : > { %v6560_v5 = vmul.f32 %v13695_v0, %v20554_v31  ;;  %v13697_v35 = vpop.eup %13696  ;;  %v6243_v0 = vadd.f32 %v16920_v23, %v16835_v49 }
 0xfeb   : > { %v17134_v28 = vmul.f32 0.1, %v13697_v35  ;;  %v13699_v41 = vpop.eup %13698 }
 0xfec   : > { %v17130_v54 = vadd.f32 %v16970_v62, %v6560_v5  ;;  %v17140_v18 = vmul.f32 0.1, %v13699_v41 }
 0xfed   : > { %v6387_v51 = vsel %vm4594_vm6, %v17134_v28, 0.0 }
 0xfee   : > { %20555 = vst [vmem:[#allocation165_spill] sm:$0xff] %v17130_v54  ;;  %12895 = vmatprep.mubr.msk.f32.mxu1 %vm3480_vm5, %v17130_v54  ;;  %v6384_v62 = vsel %vm4594_vm6, %v17140_v18, 0.0 }
 0xfff   : > { %6388 = vadd.xlane.f32.xlu1 %v6387_v51 }
0x1005   : > { %v6353_v56 = vpop.xlane.xlu0 %6352 }
0x1006   : > { %v6433_v43 = vsub.f32 0.0, %v6353_v56  ;;  %6385 = vadd.xlane.f32.xlu0 %v6384_v62  ;;  %v20556_v56 = vld [vmem:[#allocation117_spill] sm:$0xff] }
0x1008   : > { %v6465_v6 = vsel %vm4594_vm6, %v16984_v16, %v6433_v43  ;;  %v6238_v43 = vadd.f32 %v16835_v49, %v16924_v42 }
0x1009   : > { %v6504_v55 = vmul.f32 1.442695, %v6465_v6  ;;  %v20558_v6 = vld [vmem:[#allocation119_spill] sm:$0xff] }
0x100b   : > { %13700 = vpow2.f32 %v6504_v55 }
0x100e   : > { %v6356_v31 = vpop.xlane.xlu1 %6355 }
0x100f   : > { %v6434_v5 = vsub.f32 0.0, %v6356_v31 }
0x1010   : > { %6672 = vrot.lane.b32.xlu1 %v6243_v0, %s14172_s3 }
0x1011   : > { %v6466_v35 = vsel %vm4594_vm6, %v16993_v34, %v6434_v5 }
0x1012   : > { %v6506_v41 = vmul.f32 1.442695, %v6466_v35 }
0x1014   : > { %13702 = vpow2.f32 %v6506_v41 }
0x1015   : > { %v13701_v51 = vpop.eup %13700  ;;  %13704 = vtanh.f32 %v6208_v4 }
0x1016   : > { %v6561_v62 = vmul.f32 %v13701_v51, %v20556_v56  ;;  %13706 = vtanh.f32 %v17031_v24  ;;  %v17178_v24 = vadd.f32 %v16926_v30, %v16835_v49  ;;  %v17194_v30 = vadd.f32 %v16932_v15, %v16835_v49 }
0x1017   : > { %13708 = vtanh.f32 %v6213_v45 }
0x1018   : > { %v17155_v16 = vadd.f32 %v16977_v63, %v6561_v62  ;;  %13710 = vtanh.f32 %v6218_v29  ;;  %v6362_v63 = vpop.xlane.xlu1 %6361 }
0x1019   : > { %13712 = vtanh.f32 %v6228_v17  ;;  %v6436_v45 = vsub.f32 0.0, %v6362_v63 }
0x101a   : > { %20557 = vst [vmem:[#allocation127_spill] sm:$0xff] %v17155_v16  ;;  %12896 = vmatmul.mubr.msk.f32.gmra.mrb[174].mxu1 %vm3480_vm5, %v17155_v16  ;;  %13714 = vtanh.f32 %v17101_v57 }
0x101b   : > { %13716 = vtanh.f32 %v6238_v43  ;;  %v6468_v51 = vsel %vm4594_vm6, %v17001_v12, %v6436_v45 }
0x101c   : > { %6670 = vrot.lane.b32.xlu0 %v6238_v43, %s14172_s3  ;;  %v6368_v4 = vpop.xlane.xlu1 %6367  ;;  %13718 = vtanh.f32 %v6243_v0  ;;  %v17196_v0 = vpop.permute.xlu0 %6648 }
0x101d   : > { %v6438_v56 = vsub.f32 0.0, %v6368_v4 }
0x101e   : > { %v13703_v23 = vpop.eup %13702 }
0x101f   : > { %v6562_v55 = vmul.f32 %v13703_v23, %v20558_v6  ;;  %v13705_v42 = vpop.eup %13704  ;;  %v6470_v15 = vsel %vm4594_vm6, %v17005_v14, %v6438_v56 }
0x1020   : > { %v17170_v31 = vmul.f32 0.1, %v13705_v42  ;;  %v13707_v5 = vpop.eup %13706  ;;  %v6374_v43 = vpop.xlane.xlu1 %6373 }
0x1021   : > { %v17164_v34 = vadd.f32 %v17018_v39, %v6562_v55  ;;  %v17174_v39 = vadd.f32 %v16835_v49, %v16928_v38  ;;  %v13709_v35 = vpop.eup %13708  ;;  %v17182_v57 = vmul.f32 0.1, %v13707_v5  ;;  %v17187_v38 = vadd.f32 %v16835_v49, %v16934_v61 }
0x1022   : > { %v6390_v29 = vsel %vm4594_vm6, %v17170_v31, 0.0  ;;  %v13711_v17 = vpop.eup %13710  ;;  %v17189_v41 = vmul.f32 0.1, %v13709_v35  ;;  %v6510_v55 = vmul.f32 1.442695, %v6468_v51  ;;  %v6440_v12 = vsub.f32 0.0, %v6374_v43 }
0x1023   : > { %20559 = vst [vmem:[#allocation129_spill] sm:$0xff] %v17164_v34  ;;  %12898 = vmatprep.mubr.msk.f32.mxu1 %vm3480_vm5, %v17164_v34  ;;  %13720 = vtanh.f32 %v17174_v39  ;;  %v13713_v62 = vpop.eup %13712  ;;  %v6399_v61 = vsel %vm4594_vm6, %v17182_v57, 0.0  ;;  %v17202_v23 = vmul.f32 0.1, %v13711_v17  ;;  %v6514_v17 = vmul.f32 1.442695, %v6470_v15 }
0x1024   : > { %13722 = vtanh.f32 %v17178_v24  ;;  %v13715_v6 = vpop.eup %13714  ;;  %v6393_v49 = vsel %vm4594_vm6, %v17189_v41, 0.0  ;;  %v17210_v42 = vmul.f32 0.1, %v13713_v62  ;;  %v6472_v14 = vsel %vm4594_vm6, %v17009_v52, %v6440_v12 }
0x1025   : > { %13724 = vtanh.f32 %v17187_v38  ;;  %v13717_v5 = vpop.eup %13716  ;;  %v6396_v35 = vsel %vm4594_vm6, %v17202_v23, 0.0  ;;  %v17214_v45 = vmul.f32 0.1, %v13715_v6  ;;  %v6518_v52 = vmul.f32 1.442695, %v6472_v14 }
0x1026   : > { %13726 = vtanh.f32 %v17194_v30  ;;  %v6402_v43 = vsel %vm4594_vm6, %v17210_v42, 0.0 }
0x1027   : > { %13728 = vpow2.f32 %v6510_v55  ;;  %v6405_v55 = vsel %vm4594_vm6, %v17214_v45, 0.0 }
0x1034   : > { %6391 = vadd.xlane.f32.xlu1 %v6390_v29  ;;  %v13719_v29 = vpop.eup %13718 }
0x1035   : > { %v17226_v15 = vmul.f32 0.1, %v13719_v29 }
0x1037   : > { %v6411_v29 = vsel %vm4594_vm6, %v17226_v15, 0.0 }
0x1038   : > { %6400 = vadd.xlane.f32.xlu1 %v6399_v61  ;;  %v17222_v61 = vmul.f32 0.1, %v13717_v5 }
0x103a   : > { %v6359_v63 = vpop.xlane.xlu0 %6358  ;;  %v6408_v5 = vsel %vm4594_vm6, %v17222_v61, 0.0 }
0x103b   : > { %v6435_v4 = vsub.f32 0.0, %v6359_v63  ;;  %6394 = vadd.xlane.f32.xlu0 %v6393_v49  ;;  %v13721_v49 = vpop.eup %13720 }
0x103c   : > { %6397 = vadd.xlane.f32.xlu1 %v6396_v35  ;;  %v13723_v63 = vpop.eup %13722  ;;  %v17232_v35 = vmul.f32 0.1, %v13721_v49 }
0x103d   : > { %v6467_v51 = vsel %vm4594_vm6, %v17040_v27, %v6435_v4 }
0x103e   : > { %v6508_v56 = vmul.f32 1.442695, %v6467_v51  ;;  %v6365_v62 = vpop.xlane.xlu0 %6364  ;;  %v13725_v51 = vpop.eup %13724  ;;  %v6414_v49 = vsel %vm4594_vm6, %v17232_v35, 0.0 }
0x103f   : > { %v6437_v6 = vsub.f32 0.0, %v6365_v62  ;;  %6403 = vadd.xlane.f32.xlu0 %v6402_v43 }
0x1040   : > { %13730 = vpow2.f32 %v6508_v56  ;;  %6406 = vadd.xlane.f32.xlu1 %v6405_v55  ;;  %v17236_v56 = vmul.f32 0.1, %v13723_v63 }
0x1041   : > { %13732 = vpow2.f32 %v6514_v17  ;;  %v6469_v27 = vsel %vm4594_vm6, %v17046_v50, %v6437_v6  ;;  %v13727_v17 = vpop.eup %13726  ;;  %v17242_v6 = vmul.f32 0.1, %v13725_v51 }
0x1042   : > { %v6512_v12 = vmul.f32 1.442695, %v6469_v27  ;;  %v6371_v4 = vpop.xlane.xlu0 %6370  ;;  %v13729_v55 = vpop.eup %13728  ;;  %v6417_v63 = vsel %vm4594_vm6, %v17236_v56, 0.0 }
0x1043   : > { %v6439_v62 = vsub.f32 0.0, %v6371_v4  ;;  %6409 = vadd.xlane.f32.xlu0 %v6408_v5  ;;  %v17246_v4 = vmul.f32 0.1, %v13727_v17  ;;  %v6420_v51 = vsel %vm4594_vm6, %v17242_v6, 0.0 }
0x1044   : > { %13734 = vpow2.f32 %v6512_v12  ;;  %6412 = vadd.xlane.f32.xlu1 %v6411_v29 }
0x1045   : > { %13736 = vpow2.f32 %v6518_v52  ;;  %v6471_v50 = vsel %vm4594_vm6, %v17058_v13, %v6439_v62  ;;  %v17248_v52 = vpop.permute.xlu1 %6652  ;;  %v20560_v62 = vld [vmem:[#allocation123_spill] sm:$0xff]  ;;  %v6423_v17 = vsel %vm4594_vm6, %v17246_v4, 0.0 }
0x1046   : > { %v6516_v14 = vmul.f32 1.442695, %v6471_v50  ;;  %v6377_v43 = vpop.xlane.xlu0 %6376  ;;  %v6564_v29 = vmul.f32 %v13729_v55, %v20560_v62 }
0x1047   : > { %v6441_v27 = vsub.f32 0.0, %v6377_v43  ;;  %6415 = vadd.xlane.f32.xlu0 %v6414_v49  ;;  %v20561_v43 = vld [vmem:[#allocation121_spill] sm:$0xff] }
0x1048   : > { %13738 = vpow2.f32 %v6516_v14  ;;  %6418 = vadd.xlane.f32.xlu1 %v6417_v63  ;;  %v20564_v63 = vld [vmem:[#allocation130_spill] sm:$0xff] }
0x1049   : > { %v6473_v13 = vsel %vm4594_vm6, %v17066_v40, %v6441_v27  ;;  %v17262_v27 = vadd.f32 %v17033_v33, %v6564_v29  ;;  %v17265_v55 = vpop.permute.xlu1 %6664  ;;  %v20568_v29 = vld [vmem:[#allocation137_spill] sm:$0xff] }
0x104a   : > { %v13731_v12 = vpop.eup %13730  ;;  %v6520_v5 = vmul.f32 1.442695, %v6473_v13 }
0x104b   : > { %v13733_v50 = vpop.eup %13732  ;;  %6421 = vadd.xlane.f32.xlu0 %v6420_v51  ;;  %v6563_v14 = vmul.f32 %v13731_v12, %v20561_v43  ;;  %20563 = vst [vmem:[#allocation135_spill] sm:$0xff] %v17262_v27  ;;  %v20565_v51 = vld [vmem:[#allocation125_spill] sm:$0xff] }
0x104c   : > { %13740 = vpow2.f32 %v6520_v5  ;;  %6424 = vadd.xlane.f32.xlu1 %v6423_v17  ;;  %v6566_v13 = vmul.f32 %v13733_v50, %v20564_v63 }
0x104d   : > { %v17259_v49 = vadd.f32 %v17016_v7, %v6563_v14  ;;  %v17275_v7 = vld [vmem:[%s19982_s15 + $0x2] ss:$0 sm:$0xff]  ;;  %v20569_v14 = vld [vmem:[#allocation132_spill] sm:$0xff] }
0x104e   : > { %v13735_v40 = vpop.eup %13734  ;;  %v17281_v5 = vadd.f32 %v17094_v26, %v6566_v13 }
0x104f   : > { %20562 = vst [vmem:[#allocation133_spill] sm:$0xff] %v17259_v49  ;;  %v13737_v16 = vpop.eup %13736  ;;  %12899 = vmatmul.mubr.msk.f32.gmra.mrb[176].mxu1 %vm3480_vm5, %v17259_v49  ;;  %v6565_v62 = vmul.f32 %v13735_v40, %v20565_v51 }
0x1050   : > { %12901 = vmatprep.mubr.msk.f32.mxu1 %vm3480_vm5, %v17262_v27  ;;  %20567 = vst [vmem:[#allocation109_spill] sm:$0xff] %v17281_v5  ;;  %v6568_v50 = vmul.f32 %v13737_v16, %v20568_v29 }
0x1051   : > { %v17278_v33 = vadd.f32 %v17084_v53, %v6565_v62 }
0x1052   : > { %v13739_v12 = vpop.eup %13738  ;;  %v17297_v62 = vadd.f32 %v17146_v58, %v6568_v50 }
0x1053   : > { %20566 = vst [vmem:[#allocation107_spill] sm:$0xff] %v17278_v33  ;;  %v6383_v17 = vpop.xlane.xlu1 %6382  ;;  %v12888_v43 = vpop.f32.mrb[168].mxu1  ;;  %12902 = vmatmul.mubr.msk.f32.gmra.mrb[178].mxu1 %vm3480_vm5, %v17278_v33  ;;  %v6567_v40 = vmul.f32 %v13739_v12, %v20569_v14 }
0x1054   : > { %v6443_v63 = vsub.f32 0.0, %v6383_v17  ;;  %v6924_v51 = vadd.f32 %v12888_v43, %v17275_v7  ;;  %v6918_v49 = vpop.f32.mrb[169].mxu1  ;;  %12904 = vmatprep.mubr.msk.f32.mxu1 %vm3480_vm5, %v17281_v5  ;;  %20571 = vst [vmem:[#allocation111_spill] sm:$0xff] %v17297_v62  ;;  %v20572_v43 = vld [vmem:[#allocation138_spill] sm:$0xff] }
0x1055   : > { %v6919_v53 = vadd.f32 %v17275_v7, %v6918_v49  ;;  %v17292_v26 = vadd.f32 %v17138_v25, %v6567_v40  ;;  %v20575_v40 = vld [vmem:[#allocation139_spill] sm:$0xff] }
0x1056   : > { %v13741_v16 = vpop.eup %13740  ;;  %v6475_v13 = vsel %vm4594_vm6, %v17076_v11, %v6443_v63  ;;  %v7078_v33 = vmax.f32 %v6924_v51, 0.0  ;;  %v6651_v51 = vpop.permute.xlu0 %6650 }
0x1057   : > { %20570 = vst [vmem:[#allocation112_spill] sm:$0xff] %v17292_v26  ;;  %v6524_v12 = vmul.f32 1.442695, %v6475_v13  ;;  %v7077_v29 = vmax.f32 %v6919_v53, 0.0  ;;  %v6380_v17 = vpop.xlane.xlu1 %6379  ;;  %12905 = vmatmul.mubr.msk.f32.gmra.mrb[180].mxu1 %vm3480_vm5, %v17292_v26  ;;  %v6569_v14 = vmul.f32 %v13741_v16, %v20572_v43 }
0x1058   : > { %v6442_v49 = vsub.f32 0.0, %v6380_v17  ;;  %12907 = vmatprep.mubr.msk.f32.mxu1 %vm3480_vm5, %v17297_v62 }
0x1059   : > { %12936 = vmatprep.mubr.msk.f32.mxu0 %vm2258_vm4, %v7077_v29  ;;  %v17306_v11 = vadd.f32 %v17196_v0, %v6569_v14  ;;  %13742 = vpow2.f32 %v6524_v12 }
0x105a   : > { %v6474_v25 = vsel %vm4594_vm6, %v17080_v22, %v6442_v49  ;;  %12937 = vmatmul.mubr.msk.f32.vlgmr.msra.gmra.mrb[184].mxu0 %vm2258_vm4, %v7078_v33  ;;  %v20574_v33 = vld [vmem:[#allocation140_spill] sm:$0xff] }
0x105b   : > { %20573 = vst [vmem:[#allocation113_spill] sm:$0xff] %v17306_v11  ;;  %v6522_v58 = vmul.f32 1.442695, %v6474_v25  ;;  %12908 = vmatmul.mubr.msk.f32.gmra.mrb[182].mxu1 %vm3480_vm5, %v17306_v11 }
0x105d   : > { %13744 = vpow2.f32 %v6522_v58  ;;  %6676 = vrot.lane.b32.xlu1 %v17178_v24, %s14172_s3 }
0x1061   : > { %6680 = vrot.lane.b32.xlu1 %v17194_v30, %s14172_s3  ;;  %6674 = vrot.lane.b32.xlu0 %v17174_v39, %s14172_s3  ;;  %v6657_v39 = vpop.permute.xlu0 %6656 }
0x1063   : > { %v13743_v0 = vpop.eup %13742 }
0x1064   : > { %v6571_v50 = vmul.f32 %v13743_v0, %v20574_v33 }
0x1065   : > { %6678 = vrot.lane.b32.xlu0 %v17187_v38, %s14172_s3  ;;  %v6655_v30 = vpop.permute.xlu0 %6654 }
0x1066   : > { %v17326_v24 = vadd.f32 %v17248_v52, %v6571_v50  ;;  %v17338_v52 = vpop.permute.xlu1 %6668 }
0x1067   : > { %v13745_v22 = vpop.eup %13744 }
0x1068   : > { %v6570_v63 = vmul.f32 %v13745_v22, %v20575_v40  ;;  %20577 = vst [vmem:[#allocation115_spill] sm:$0xff] %v17326_v24 }
0x1069   : > { %v17332_v38 = vpop.permute.xlu0 %6660 }
0x106a   : > { %v17323_v53 = vadd.f32 %v6651_v51, %v6570_v63 }
0x106c   : > { %20576 = vst [vmem:[#allocation114_spill] sm:$0xff] %v17323_v53  ;;  %12910 = vmatprep.mubr.msk.f32.mxu1 %vm3480_vm5, %v17323_v53 }
0x106d   : > { %12911 = vmatmul.mubr.msk.f32.gmra.mrb[184].mxu1 %vm3480_vm5, %v17326_v24  ;;  %v17334_v16 = vpop.permute.xlu0 %6658 }
0x1071   : > { %v17340_v14 = vpop.permute.xlu0 %6662 }
0x1075   : > { %v17344_v0 = vpop.permute.xlu0 %6666 }
0x1084   : > { %v12891_v13 = vpop.f32.mrb[170].mxu1 }
0x1085   : > { %v6934_v12 = vadd.f32 %v12891_v13, %v17275_v7  ;;  %v6928_v29 = vpop.f32.mrb[171].mxu1 }
0x1086   : > { %v6929_v17 = vadd.f32 %v17275_v7, %v6928_v29  ;;  %v20578_v29 = vld [vmem:[#allocation142_spill] sm:$0xff] }
0x1087   : > { %v7080_v49 = vmax.f32 %v6934_v12, 0.0 }
0x1088   : > { %v7079_v43 = vmax.f32 %v6929_v17, 0.0 }
0x108a   : > { %12939 = vmatprep.mubr.msk.f32.mxu0 %vm2258_vm4, %v7079_v43  ;;  %v20579_v43 = vld [vmem:[#allocation141_spill] sm:$0xff] }
0x108b   : > { %12940 = vmatmul.mubr.msk.f32.gmra.mrb[186].mxu0 %vm2258_vm4, %v7080_v49 }
0x108c   : > { %v6389_v25 = vpop.xlane.xlu1 %6388 }
0x108d   : > { %v6445_v58 = vsub.f32 0.0, %v6389_v25 }
0x108f   : > { %v6477_v22 = vsel %vm4594_vm6, %v17134_v28, %v6445_v58  ;;  %v11588_v28 = vld [vmem:[%s19985_s18 + $0x8] sm:$0xf] }
0x1090   : > { %v6528_v33 = vmul.f32 1.442695, %v6477_v22  ;;  %12984 = vmatprep.subr.msk.mxu1 %vm2355_vm3, %v11588_v28 }
0x1091   : > { %12985 = vmatpush3.msk.msra.mxu1 %vm2355_vm3, %v11588_v28 }
0x1092   : > { %13746 = vpow2.f32 %v6528_v33  ;;  %v17367_v33 = vpop.permute.xlu1 %6672 }
0x1093   : > { %v6386_v50 = vpop.xlane.xlu0 %6385 }
0x1094   : > { %v6444_v40 = vsub.f32 0.0, %v6386_v50 }
0x1096   : > { %v6476_v63 = vsel %vm4594_vm6, %v17140_v18, %v6444_v40 }
0x1097   : > { %v6526_v51 = vmul.f32 1.442695, %v6476_v63 }
0x1099   : > { %13748 = vpow2.f32 %v6526_v51  ;;  %v17371_v51 = vpop.permute.xlu0 %6670 }
0x109c   : > { %v13747_v13 = vpop.eup %13746 }
0x109d   : > { %v6573_v17 = vmul.f32 %v13747_v13, %v20578_v29 }
0x109f   : > { %v17354_v11 = vadd.f32 %v6657_v39, %v6573_v17 }
0x10a1   : > { %20581 = vst [vmem:[#allocation119_spill] sm:$0xff] %v17354_v11 }
0x10a3   : > { %v13749_v12 = vpop.eup %13748 }
0x10a4   : > { %v6572_v49 = vmul.f32 %v13749_v12, %v20579_v43 }
0x10a6   : > { %v17352_v25 = vadd.f32 %v6655_v30, %v6572_v49 }
0x10a8   : > { %20580 = vst [vmem:[#allocation117_spill] sm:$0xff] %v17352_v25  ;;  %12913 = vmatprep.mubr.msk.f32.mxu1 %vm3480_vm5, %v17352_v25 }
0x10a9   : > { %12914 = vmatmul.mubr.msk.f32.gmra.mrb[186].mxu1 %vm3480_vm5, %v17354_v11 }
0x10b8   : > { %v12894_v18 = vpop.f32.mrb[172].mxu1 }
0x10b9   : > { %v6944_v30 = vadd.f32 %v12894_v18, %v17275_v7  ;;  %v6938_v58 = vpop.f32.mrb[173].mxu1 }
0x10ba   : > { %v6939_v39 = vadd.f32 %v17275_v7, %v6938_v58 }
0x10bb   : > { %v7082_v50 = vmax.f32 %v6944_v30, 0.0 }
0x10bc   : > { %v7081_v22 = vmax.f32 %v6939_v39, 0.0 }
0x10be   : > { %12942 = vmatprep.mubr.msk.f32.mxu0 %vm2258_vm4, %v7081_v22 }
0x10bf   : > { %12943 = vmatmul.mubr.msk.f32.gmra.mrb[188].mxu0 %vm2258_vm4, %v7082_v50 }
0x10c1   : > { %v6392_v40 = vpop.xlane.xlu1 %6391 }
0x10c2   : > { %v6446_v63 = vsub.f32 0.0, %v6392_v40 }
0x10c4   : > { %v6478_v13 = vsel %vm4594_vm6, %v17170_v31, %v6446_v63 }
0x10c5   : > { %v6530_v12 = vmul.f32 1.442695, %v6478_v13  ;;  %v6401_v29 = vpop.xlane.xlu1 %6400 }
0x10c6   : > { %v6449_v17 = vsub.f32 0.0, %v6401_v29 }
0x10c7   : > { %13750 = vpow2.f32 %v6530_v12 }
0x10c8   : > { %v6481_v43 = vsel %vm4594_vm6, %v17182_v57, %v6449_v17  ;;  %v6395_v49 = vpop.xlane.xlu0 %6394 }
0x10c9   : > { %v6536_v28 = vmul.f32 1.442695, %v6481_v43  ;;  %v6447_v18 = vsub.f32 0.0, %v6395_v49  ;;  %v6398_v30 = vpop.xlane.xlu1 %6397 }
0x10ca   : > { %v6448_v58 = vsub.f32 0.0, %v6398_v30  ;;  %v20582_v30 = vld [vmem:[#allocation143_spill] sm:$0xff] }
0x10cb   : > { %v6479_v39 = vsel %vm4594_vm6, %v17189_v41, %v6447_v18  ;;  %13752 = vpow2.f32 %v6536_v28 }
0x10cc   : > { %v6532_v22 = vmul.f32 1.442695, %v6479_v39  ;;  %v6480_v50 = vsel %vm4594_vm6, %v17202_v23, %v6448_v58  ;;  %v6404_v31 = vpop.xlane.xlu0 %6403 }
0x10cd   : > { %v6534_v40 = vmul.f32 1.442695, %v6480_v50  ;;  %v6450_v63 = vsub.f32 0.0, %v6404_v31  ;;  %v6407_v13 = vpop.xlane.xlu1 %6406 }
0x10ce   : > { %13754 = vpow2.f32 %v6532_v22  ;;  %v6451_v12 = vsub.f32 0.0, %v6407_v13 }
0x10cf   : > { %13756 = vpow2.f32 %v6534_v40  ;;  %v6482_v57 = vsel %vm4594_vm6, %v17210_v42, %v6450_v63 }
0x10d0   : > { %v6538_v29 = vmul.f32 1.442695, %v6482_v57  ;;  %v6483_v17 = vsel %vm4594_vm6, %v17214_v45, %v6451_v12  ;;  %v6410_v41 = vpop.xlane.xlu0 %6409 }
0x10d1   : > { %v13751_v43 = vpop.eup %13750  ;;  %v6540_v49 = vmul.f32 1.442695, %v6483_v17  ;;  %v6452_v18 = vsub.f32 0.0, %v6410_v41  ;;  %v6413_v23 = vpop.xlane.xlu1 %6412 }
0x10d2   : > { %13758 = vpow2.f32 %v6538_v29  ;;  %v6453_v28 = vsub.f32 0.0, %v6413_v23  ;;  %v6574_v58 = vmul.f32 %v13751_v43, %v20582_v30  ;;  %v20585_v30 = vld [vmem:[#allocation145_spill] sm:$0xff] }
0x10d3   : > { %13760 = vpow2.f32 %v6540_v49  ;;  %v6484_v39 = vsel %vm4594_vm6, %v17222_v61, %v6452_v18  ;;  %v20584_v18 = vld [vmem:[#allocation144_spill] sm:$0xff] }
0x10d4   : > { %v6542_v22 = vmul.f32 1.442695, %v6484_v39  ;;  %v6485_v42 = vsel %vm4594_vm6, %v17226_v15, %v6453_v28  ;;  %v6416_v50 = vpop.xlane.xlu0 %6415  ;;  %v17391_v45 = vadd.f32 %v17334_v16, %v6574_v58 }
0x10d5   : > { %v6544_v31 = vmul.f32 1.442695, %v6485_v42  ;;  %v6454_v40 = vsub.f32 0.0, %v6416_v50  ;;  %v6419_v63 = vpop.xlane.xlu1 %6418  ;;  %v13753_v12 = vpop.eup %13752 }
0x10d6   : > { %20583 = vst [vmem:[#allocation123_spill] sm:$0xff] %v17391_v45  ;;  %13762 = vpow2.f32 %v6542_v22  ;;  %v6455_v13 = vsub.f32 0.0, %v6419_v63  ;;  %12916 = vmatprep.mubr.msk.f32.mxu1 %vm3480_vm5, %v17391_v45  ;;  %v20587_v22 = vld [vmem:[#allocation146_spill] sm:$0xff] }
0x10d7   : > { %13764 = vpow2.f32 %v6544_v31  ;;  %v6486_v61 = vsel %vm4594_vm6, %v17232_v35, %v6454_v40 }
0x10d8   : > { %v13755_v57 = vpop.eup %13754  ;;  %v6546_v29 = vmul.f32 1.442695, %v6486_v61  ;;  %v6487_v15 = vsel %vm4594_vm6, %v17236_v56, %v6455_v13  ;;  %v6422_v16 = vpop.xlane.xlu0 %6421  ;;  %v6577_v56 = vmul.f32 %v13753_v12, %v20587_v22  ;;  %v20589_v61 = vld [vmem:[#allocation147_spill] sm:$0xff] }
0x10d9   : > { %v13757_v17 = vpop.eup %13756  ;;  %v6548_v41 = vmul.f32 1.442695, %v6487_v15  ;;  %v6456_v43 = vsub.f32 0.0, %v6422_v16  ;;  %v6425_v49 = vpop.xlane.xlu1 %6424  ;;  %v6575_v23 = vmul.f32 %v13755_v57, %v20584_v18  ;;  %v20593_v15 = vld [vmem:[#allocation149_spill] sm:$0xff] }
0x10da   : > { %13766 = vpow2.f32 %v6546_v29  ;;  %v6457_v28 = vsub.f32 0.0, %v6425_v49  ;;  %v6576_v58 = vmul.f32 %v13757_v17, %v20585_v30 }
0x10db   : > { %13768 = vpow2.f32 %v6548_v41  ;;  %v6488_v35 = vsel %vm4594_vm6, %v17242_v6, %v6456_v43  ;;  %v17404_v39 = vadd.f32 %v17332_v38, %v6575_v23  ;;  %v17418_v38 = vadd.f32 %v17265_v55, %v6577_v56  ;;  %v20597_v23 = vld [vmem:[#allocation151_spill] sm:$0xff] }
0x10dc   : > { %v13759_v42 = vpop.eup %13758  ;;  %v6550_v50 = vmul.f32 1.442695, %v6488_v35  ;;  %v6489_v31 = vsel %vm4594_vm6, %v17246_v4, %v6457_v28  ;;  %v17410_v40 = vadd.f32 %v17340_v14, %v6576_v58  ;;  %v20592_v14 = vld [vmem:[#allocation148_spill] sm:$0xff]  ;;  %v6675_v49 = vpop.permute.xlu0 %6674 }
0x10dd   : > { %20586 = vst [vmem:[#allocation121_spill] sm:$0xff] %v17404_v39  ;;  %v13761_v63 = vpop.eup %13760  ;;  %v6552_v13 = vmul.f32 1.442695, %v6489_v31  ;;  %12917 = vmatmul.mubr.msk.f32.gmra.mrb[188].mxu1 %vm3480_vm5, %v17404_v39  ;;  %v6578_v6 = vmul.f32 %v13759_v42, %v20589_v61  ;;  %20590 = vst [vmem:[#allocation125_spill] sm:$0xff] %v17418_v38  ;;  %v6677_v22 = vpop.permute.xlu1 %6676  ;;  %v20601_v42 = vld [vmem:[#allocation153_spill] sm:$0xff]  ;;  %v20604_v61 = vld [vmem:[#allocation154_spill] sm:$0xff] }
0x10de   : > { %20588 = vst [vmem:[#allocation130_spill] sm:$0xff] %v17410_v40  ;;  %13770 = vpow2.f32 %v6550_v50  ;;  %12919 = vmatprep.mubr.msk.f32.mxu1 %vm3480_vm5, %v17410_v40  ;;  %v6579_v12 = vmul.f32 %v13761_v63, %v20592_v14 }
0x10df   : > { %13772 = vpow2.f32 %v6552_v13  ;;  %v17421_v4 = vadd.f32 %v17344_v0, %v6578_v6  ;;  %v20596_v0 = vld [vmem:[#allocation150_spill] sm:$0xff] }
0x10e0   : > { %v13763_v57 = vpop.eup %13762  ;;  %v17430_v17 = vadd.f32 %v17338_v52, %v6579_v12  ;;  %v20599_v52 = vld [vmem:[#allocation152_spill] sm:$0xff]  ;;  %v6679_v31 = vpop.permute.xlu0 %6678 }
0x10e1   : > { %20591 = vst [vmem:[#allocation137_spill] sm:$0xff] %v17421_v4  ;;  %v13765_v29 = vpop.eup %13764  ;;  %12920 = vmatmul.mubr.msk.f32.gmra.mrb[190].mxu1 %vm3480_vm5, %v17418_v38  ;;  %v6580_v16 = vmul.f32 %v13763_v57, %v20593_v15  ;;  %v6681_v14 = vpop.permute.xlu1 %6680 }
0x10e2   : > { %12922 = vmatprep.mubr.msk.f32.mxu1 %vm3480_vm5, %v17421_v4  ;;  %20594 = vst [vmem:[#allocation132_spill] sm:$0xff] %v17430_v17  ;;  %v6581_v41 = vmul.f32 %v13765_v29, %v20596_v0 }
0x10e3   : > { %v17433_v55 = vadd.f32 %v17371_v51, %v6580_v16 }
0x10e4   : > { %v13767_v43 = vpop.eup %13766  ;;  %v17445_v51 = vadd.f32 %v17367_v33, %v6581_v41 }
0x10e5   : > { %20595 = vst [vmem:[#allocation138_spill] sm:$0xff] %v17433_v55  ;;  %v13769_v18 = vpop.eup %13768  ;;  %v6582_v28 = vmul.f32 %v13767_v43, %v20597_v23  ;;  %12923 = vmatmul.mubr.msk.f32.gmra.mrb[192].mxu1 %vm3480_vm5, %v17430_v17 }
0x10e6   : > { %12925 = vmatprep.mubr.msk.f32.mxu1 %vm3480_vm5, %v17433_v55  ;;  %v6583_v58 = vmul.f32 %v13769_v18, %v20599_v52  ;;  %20600 = vst [vmem:[#allocation139_spill] sm:$0xff] %v17445_v51 }
0x10e7   : > { %v17441_v30 = vadd.f32 %v6675_v49, %v6582_v28 }
0x10e8   : > { %v13771_v35 = vpop.eup %13770  ;;  %v17452_v63 = vadd.f32 %v6677_v22, %v6583_v58 }
0x10e9   : > { %20598 = vst [vmem:[#allocation140_spill] sm:$0xff] %v17441_v30  ;;  %v13773_v56 = vpop.eup %13772  ;;  %v6584_v50 = vmul.f32 %v13771_v35, %v20601_v42  ;;  %12926 = vmatmul.mubr.msk.f32.gmra.mrb[194].mxu1 %vm3480_vm5, %v17445_v51 }
0x10ea   : > { %12928 = vmatprep.mubr.msk.f32.mxu1 %vm3480_vm5, %v17441_v30  ;;  %20602 = vst [vmem:[#allocation142_spill] sm:$0xff] %v17452_v63  ;;  %v6585_v6 = vmul.f32 %v13773_v56, %v20604_v61 }
0x10eb   : > { %v17454_v13 = vadd.f32 %v6679_v31, %v6584_v50 }
0x10ec   : > { %v17462_v29 = vadd.f32 %v6681_v14, %v6585_v6  ;;  %v17479_v6 = vld [vmem:[%s19984_s17 + $0x2] ss:$0 sm:$0xff] }
0x10ed   : > { %20603 = vst [vmem:[#allocation141_spill] sm:$0xff] %v17454_v13  ;;  %v12897_v33 = vpop.f32.mrb[174].mxu1  ;;  %12929 = vmatmul.mubr.msk.f32.gmra.mrb[196].mxu1 %vm3480_vm5, %v17452_v63 }
0x10ee   : > { %v6954_v12 = vadd.f32 %v12897_v33, %v17275_v7  ;;  %v6948_v57 = vpop.f32.mrb[175].mxu1  ;;  %12931 = vmatprep.mubr.msk.f32.mxu1 %vm3480_vm5, %v17454_v13  ;;  %20605 = vst [vmem:[#allocation143_spill] sm:$0xff] %v17462_v29 }
0x10ef   : > { %v6949_v15 = vadd.f32 %v17275_v7, %v6948_v57 }
0x10f0   : > { %v7084_v0 = vmax.f32 %v6954_v12, 0.0 }
0x10f1   : > { %v7083_v16 = vmax.f32 %v6949_v15, 0.0  ;;  %12932 = vmatmul.mubr.msk.f32.gmra.mrb[198].mxu1 %vm3480_vm5, %v17462_v29 }
0x10f3   : > { %12945 = vmatprep.mubr.msk.f32.mxu0 %vm2258_vm4, %v7083_v16 }
0x10f4   : > { %12946 = vmatmul.mubr.msk.f32.gmra.mrb[190].mxu0 %vm2258_vm4, %v7084_v0 }
0x1122   : > { %v12900_v41 = vpop.f32.mrb[176].mxu1 }
0x1123   : > { %v6964_v43 = vadd.f32 %v12900_v41, %v17275_v7  ;;  %v6958_v49 = vpop.f32.mrb[177].mxu1 }
0x1124   : > { %v6959_v18 = vadd.f32 %v17275_v7, %v6958_v49 }
0x1125   : > { %v7086_v52 = vmax.f32 %v6964_v43, 0.0 }
0x1126   : > { %v7085_v23 = vmax.f32 %v6959_v18, 0.0  ;;  %v12903_v28 = vpop.f32.mrb[178].mxu1 }
0x1127   : > { %v6974_v58 = vadd.f32 %v12903_v28, %v17275_v7  ;;  %v6968_v35 = vpop.f32.mrb[179].mxu1 }
0x1128   : > { %v6969_v22 = vadd.f32 %v17275_v7, %v6968_v35  ;;  %12948 = vmatprep.mubr.msk.f32.mxu0 %vm2258_vm4, %v7085_v23 }
0x1129   : > { %12949 = vmatmul.mubr.msk.f32.gmra.mrb[192].mxu0 %vm2258_vm4, %v7086_v52  ;;  %v7088_v50 = vmax.f32 %v6974_v58, 0.0 }
0x112a   : > { %v7087_v56 = vmax.f32 %v6969_v22, 0.0  ;;  %v12906_v42 = vpop.f32.mrb[180].mxu1 }
0x112b   : > { %v6984_v31 = vadd.f32 %v12906_v42, %v17275_v7  ;;  %v6978_v61 = vpop.f32.mrb[181].mxu1 }
0x112c   : > { %v6979_v33 = vadd.f32 %v17275_v7, %v6978_v61  ;;  %12951 = vmatprep.mubr.msk.f32.mxu0 %vm2258_vm4, %v7087_v56 }
0x112d   : > { %v12938_v14 = vpop.f32.mrb[184].mxu0  ;;  %12952 = vmatmul.mubr.msk.f32.gmra.mrb[194].mxu0 %vm2258_vm4, %v7088_v50  ;;  %v7090_v0 = vmax.f32 %v6984_v31, 0.0 }
0x112e   : > { %v7089_v12 = vmax.f32 %v6979_v33, 0.0  ;;  %v7290_v57 = vadd.f32 %v12938_v14, %v17479_v6  ;;  %v12909_v15 = vpop.f32.mrb[182].mxu1  ;;  %v7284_v16 = vpop.f32.mrb[185].mxu0 }
0x112f   : > { %v6994_v41 = vadd.f32 %v12909_v15, %v17275_v7  ;;  %v7285_v43 = vadd.f32 %v17479_v6, %v7284_v16  ;;  %v6988_v49 = vpop.f32.mrb[183].mxu1 }
0x1130   : > { %v6989_v18 = vadd.f32 %v17275_v7, %v6988_v49  ;;  %12954 = vmatprep.mubr.msk.f32.mxu0 %vm2258_vm4, %v7089_v12  ;;  %v7444_v28 = vmax.f32 %v7290_v57, 0.0 }
0x1131   : > { %v7443_v23 = vmax.f32 %v7285_v43, 0.0  ;;  %12955 = vmatmul.mubr.msk.f32.gmra.mrb[196].mxu0 %vm2258_vm4, %v7090_v0  ;;  %v7092_v58 = vmax.f32 %v6994_v41, 0.0 }
0x1132   : > { %v7091_v52 = vmax.f32 %v6989_v18, 0.0 }
0x1133   : > { %12986 = vmatprep.mubr.msk.f32.mxu1 %vm2258_vm4, %v7443_v23 }
0x1134   : > { %12957 = vmatprep.mubr.msk.f32.mxu0 %vm2258_vm4, %v7091_v52  ;;  %12987 = vmatmul.mubr.msk.f32.vlgmr.msra.gmra.mrb[200].mxu1 %vm2258_vm4, %v7444_v28 }
0x1135   : > { %12958 = vmatmul.mubr.msk.f32.gmra.mrb[198].mxu0 %vm2258_vm4, %v7092_v58 }
0x1140   : > { %v12912_v35 = vpop.f32.mrb[184].mxu1 }
0x1141   : > { %v7004_v22 = vadd.f32 %v12912_v35, %v17275_v7  ;;  %v6998_v56 = vpop.f32.mrb[185].mxu1 }
0x1142   : > { %v6999_v42 = vadd.f32 %v17275_v7, %v6998_v56 }
0x1143   : > { %v7094_v31 = vmax.f32 %v7004_v22, 0.0 }
0x1144   : > { %v7093_v50 = vmax.f32 %v6999_v42, 0.0 }
0x1146   : > { %12960 = vmatprep.mubr.msk.f32.mxu0 %vm2258_vm4, %v7093_v50 }
0x1147   : > { %12961 = vmatmul.mubr.msk.f32.gmra.mrb[200].mxu0 %vm2258_vm4, %v7094_v31 }
0x115e   : > { %v12941_v61 = vpop.f32.mrb[186].mxu0 }
0x115f   : > { %v7300_v33 = vadd.f32 %v12941_v61, %v17479_v6  ;;  %v7294_v14 = vpop.f32.mrb[187].mxu0 }
0x1160   : > { %v7295_v12 = vadd.f32 %v17479_v6, %v7294_v14 }
0x1161   : > { %v7446_v15 = vmax.f32 %v7300_v33, 0.0 }
0x1162   : > { %v7445_v57 = vmax.f32 %v7295_v12, 0.0 }
0x1164   : > { %12989 = vmatprep.mubr.msk.f32.mxu1 %vm2258_vm4, %v7445_v57 }
0x1165   : > { %12990 = vmatmul.mubr.msk.f32.gmra.mrb[202].mxu1 %vm2258_vm4, %v7446_v15 }
0x117c   : > { %v12915_v16 = vpop.f32.mrb[186].mxu1 }
0x117d   : > { %v7014_v0 = vadd.f32 %v12915_v16, %v17275_v7  ;;  %v7008_v41 = vpop.f32.mrb[187].mxu1 }
0x117e   : > { %v7009_v43 = vadd.f32 %v17275_v7, %v7008_v41 }
0x117f   : > { %v7096_v18 = vmax.f32 %v7014_v0, 0.0 }
0x1180   : > { %v7095_v49 = vmax.f32 %v7009_v43, 0.0 }
0x1182   : > { %12963 = vmatprep.mubr.msk.f32.mxu0 %vm2258_vm4, %v7095_v49 }
0x1183   : > { %12964 = vmatmul.mubr.msk.f32.gmra.mrb[202].mxu0 %vm2258_vm4, %v7096_v18 }
0x1192   : > { %v12944_v23 = vpop.f32.mrb[188].mxu0 }
0x1193   : > { %v7310_v28 = vadd.f32 %v12944_v23, %v17479_v6  ;;  %v7304_v52 = vpop.f32.mrb[189].mxu0 }
0x1194   : > { %v7305_v58 = vadd.f32 %v17479_v6, %v7304_v52 }
0x1195   : > { %v7448_v22 = vmax.f32 %v7310_v28, 0.0 }
0x1196   : > { %v7447_v35 = vmax.f32 %v7305_v58, 0.0 }
0x1198   : > { %12992 = vmatprep.mubr.msk.f32.mxu1 %vm2258_vm4, %v7447_v35 }
0x1199   : > { %12993 = vmatmul.mubr.msk.f32.gmra.mrb[204].mxu1 %vm2258_vm4, %v7448_v22 }
0x11b0   : > { %v12918_v56 = vpop.f32.mrb[188].mxu1 }
0x11b1   : > { %v7024_v42 = vadd.f32 %v12918_v56, %v17275_v7  ;;  %v7018_v50 = vpop.f32.mrb[189].mxu1 }
0x11b2   : > { %v7019_v31 = vadd.f32 %v17275_v7, %v7018_v50 }
0x11b3   : > { %v7098_v14 = vmax.f32 %v7024_v42, 0.0 }
0x11b4   : > { %v7097_v61 = vmax.f32 %v7019_v31, 0.0  ;;  %v12921_v33 = vpop.f32.mrb[190].mxu1 }
0x11b5   : > { %v7034_v12 = vadd.f32 %v12921_v33, %v17275_v7  ;;  %v7028_v57 = vpop.f32.mrb[191].mxu1 }
0x11b6   : > { %v7029_v15 = vadd.f32 %v17275_v7, %v7028_v57  ;;  %12966 = vmatprep.mubr.msk.f32.mxu0 %vm2258_vm4, %v7097_v61 }
0x11b7   : > { %12967 = vmatmul.mubr.msk.f32.gmra.mrb[204].mxu0 %vm2258_vm4, %v7098_v14  ;;  %v7100_v41 = vmax.f32 %v7034_v12, 0.0 }
0x11b8   : > { %v7099_v16 = vmax.f32 %v7029_v15, 0.0  ;;  %v12924_v0 = vpop.f32.mrb[192].mxu1 }
0x11b9   : > { %v7044_v43 = vadd.f32 %v12924_v0, %v17275_v7  ;;  %v7038_v49 = vpop.f32.mrb[193].mxu1 }
0x11ba   : > { %v7039_v18 = vadd.f32 %v17275_v7, %v7038_v49  ;;  %12969 = vmatprep.mubr.msk.f32.mxu0 %vm2258_vm4, %v7099_v16 }
0x11bb   : > { %12970 = vmatmul.mubr.msk.f32.gmra.mrb[206].mxu0 %vm2258_vm4, %v7100_v41  ;;  %v7102_v52 = vmax.f32 %v7044_v43, 0.0 }
0x11bc   : > { %v7101_v23 = vmax.f32 %v7039_v18, 0.0  ;;  %v12927_v28 = vpop.f32.mrb[194].mxu1 }
0x11bd   : > { %v7054_v58 = vadd.f32 %v12927_v28, %v17275_v7  ;;  %v7048_v35 = vpop.f32.mrb[195].mxu1 }
0x11be   : > { %v7049_v22 = vadd.f32 %v17275_v7, %v7048_v35  ;;  %12972 = vmatprep.mubr.msk.f32.mxu0 %vm2258_vm4, %v7101_v23 }
0x11bf   : > { %12973 = vmatmul.mubr.msk.f32.gmra.mrb[208].mxu0 %vm2258_vm4, %v7102_v52  ;;  %v7104_v50 = vmax.f32 %v7054_v58, 0.0 }
0x11c0   : > { %v7103_v56 = vmax.f32 %v7049_v22, 0.0  ;;  %v12930_v42 = vpop.f32.mrb[196].mxu1 }
0x11c1   : > { %v7064_v31 = vadd.f32 %v12930_v42, %v17275_v7  ;;  %v7058_v61 = vpop.f32.mrb[197].mxu1 }
0x11c2   : > { %v7059_v33 = vadd.f32 %v17275_v7, %v7058_v61  ;;  %12975 = vmatprep.mubr.msk.f32.mxu0 %vm2258_vm4, %v7103_v56 }
0x11c3   : > { %12976 = vmatmul.mubr.msk.f32.gmra.mrb[210].mxu0 %vm2258_vm4, %v7104_v50  ;;  %v7106_v57 = vmax.f32 %v7064_v31, 0.0 }
0x11c4   : > { %v7105_v14 = vmax.f32 %v7059_v33, 0.0  ;;  %v12933_v12 = vpop.f32.mrb[198].mxu1 }
0x11c5   : > { %v7074_v15 = vadd.f32 %v12933_v12, %v17275_v7  ;;  %v7068_v16 = vpop.f32.mrb[199].mxu1 }
0x11c6   : > { %v7069_v0 = vadd.f32 %v17275_v7, %v7068_v16  ;;  %12978 = vmatprep.mubr.msk.f32.mxu0 %vm2258_vm4, %v7105_v14 }
0x11c7   : > { %v12947_v41 = vpop.f32.mrb[190].mxu0  ;;  %12979 = vmatmul.mubr.msk.f32.gmra.mrb[212].mxu0 %vm2258_vm4, %v7106_v57  ;;  %v7108_v23 = vmax.f32 %v7074_v15, 0.0 }
0x11c8   : > { %v7107_v43 = vmax.f32 %v7069_v0, 0.0  ;;  %v7320_v49 = vadd.f32 %v12947_v41, %v17479_v6  ;;  %v7314_v18 = vpop.f32.mrb[191].mxu0  ;;  %v17548_v41 = vld [vmem:[%s19986_s19 + $0x2] ss:$0 sm:$0xff] }
0x11c9   : > { %v7315_v28 = vadd.f32 %v17479_v6, %v7314_v18 }
0x11ca   : > { %12981 = vmatprep.mubr.msk.f32.mxu0 %vm2258_vm4, %v7107_v43  ;;  %v7450_v58 = vmax.f32 %v7320_v49, 0.0 }
0x11cb   : > { %v7449_v52 = vmax.f32 %v7315_v28, 0.0  ;;  %12982 = vmatmul.mubr.msk.f32.gmra.mrb[214].mxu0 %vm2258_vm4, %v7108_v23 }
0x11cd   : > { %12995 = vmatprep.mubr.msk.f32.mxu1 %vm2258_vm4, %v7449_v52 }
0x11ce   : > { %12996 = vmatmul.mubr.msk.f32.gmra.mrb[206].mxu1 %vm2258_vm4, %v7450_v58 }
0x11fc   : > { %v12950_v7 = vpop.f32.mrb[192].mxu0 }
0x11fd   : > { %v7330_v35 = vadd.f32 %v12950_v7, %v17479_v6  ;;  %v7324_v22 = vpop.f32.mrb[193].mxu0 }
0x11fe   : > { %v7325_v56 = vadd.f32 %v17479_v6, %v7324_v22 }
0x11ff   : > { %v7452_v31 = vmax.f32 %v7330_v35, 0.0 }
0x1200   : > { %v7451_v42 = vmax.f32 %v7325_v56, 0.0  ;;  %v12953_v50 = vpop.f32.mrb[194].mxu0 }
0x1201   : > { %v7340_v61 = vadd.f32 %v12953_v50, %v17479_v6  ;;  %v7334_v33 = vpop.f32.mrb[195].mxu0 }
0x1202   : > { %v7335_v14 = vadd.f32 %v17479_v6, %v7334_v33  ;;  %12998 = vmatprep.mubr.msk.f32.mxu1 %vm2258_vm4, %v7451_v42 }
0x1203   : > { %12999 = vmatmul.mubr.msk.f32.gmra.mrb[208].mxu1 %vm2258_vm4, %v7452_v31  ;;  %v7454_v15 = vmax.f32 %v7340_v61, 0.0 }
0x1204   : > { %v7453_v12 = vmax.f32 %v7335_v14, 0.0  ;;  %v12956_v57 = vpop.f32.mrb[196].mxu0 }
0x1205   : > { %v7350_v16 = vadd.f32 %v12956_v57, %v17479_v6  ;;  %v7344_v0 = vpop.f32.mrb[197].mxu0 }
0x1206   : > { %v7345_v43 = vadd.f32 %v17479_v6, %v7344_v0  ;;  %13001 = vmatprep.mubr.msk.f32.mxu1 %vm2258_vm4, %v7453_v12 }
0x1207   : > { %v12988_v49 = vpop.f32.mrb[200].mxu1  ;;  %13002 = vmatmul.mubr.msk.f32.gmra.mrb[210].mxu1 %vm2258_vm4, %v7454_v15  ;;  %v7456_v58 = vmax.f32 %v7350_v16, 0.0 }
0x1208   : > { %v7455_v18 = vmax.f32 %v7345_v43, 0.0  ;;  %v17554_v23 = vadd.f32 %v12988_v49, %v17548_v41  ;;  %v12959_v28 = vpop.f32.mrb[198].mxu0  ;;  %v7650_v52 = vpop.f32.mrb[201].mxu1 }
0x1209   : > { %v7360_v7 = vadd.f32 %v12959_v28, %v17479_v6  ;;  %v7354_v35 = vpop.f32.mrb[199].mxu0  ;;  %v17563_v56 = vadd.f32 %v17548_v41, %v7650_v52 }
0x120a   : > { %v7355_v22 = vadd.f32 %v17479_v6, %v7354_v35  ;;  %13004 = vmatprep.mubr.msk.f32.mxu1 %vm2258_vm4, %v7455_v18  ;;  %8291 = vrot.lane.b32.xlu1 %v17554_v23, %s14171_s22 }
0x120b   : > { %13005 = vmatmul.mubr.msk.f32.gmra.mrb[212].mxu1 %vm2258_vm4, %v7456_v58  ;;  %v7458_v50 = vmax.f32 %v7360_v7, 0.0  ;;  %13774 = vtanh.f32 %v17563_v56 }
0x120c   : > { %v7457_v42 = vmax.f32 %v7355_v22, 0.0  ;;  %13776 = vtanh.f32 %v17554_v23 }
0x120e   : > { %13007 = vmatprep.mubr.msk.f32.mxu1 %vm2258_vm4, %v7457_v42  ;;  %8289 = vrot.lane.b32.xlu1 %v17563_v56, %s14171_s22 }
0x120f   : > { %13008 = vmatmul.mubr.msk.f32.gmra.mrb[214].mxu1 %vm2258_vm4, %v7458_v50 }
0x121a   : > { %v12962_v31 = vpop.f32.mrb[200].mxu0 }
0x121b   : > { %v7370_v61 = vadd.f32 %v12962_v31, %v17479_v6  ;;  %v7364_v33 = vpop.f32.mrb[201].mxu0 }
0x121c   : > { %v7365_v14 = vadd.f32 %v17479_v6, %v7364_v33 }
0x121d   : > { %v7460_v57 = vmax.f32 %v7370_v61, 0.0 }
0x121e   : > { %v7459_v12 = vmax.f32 %v7365_v14, 0.0 }
0x1220   : > { %13010 = vmatprep.mubr.msk.f32.mxu1 %vm2258_vm4, %v7459_v12 }
0x1221   : > { %13011 = vmatmul.mubr.msk.f32.gmra.mrb[216].mxu1 %vm2258_vm4, %v7460_v57 }
0x1238   : > { %v12991_v15 = vpop.f32.mrb[202].mxu1 }
0x1239   : > { %v17574_v16 = vadd.f32 %v12991_v15, %v17548_v41  ;;  %v7660_v0 = vpop.f32.mrb[203].mxu1 }
0x123a   : > { %v17577_v43 = vadd.f32 %v17548_v41, %v7660_v0 }
0x123b   : > { %8295 = vrot.lane.b32.xlu1 %v17574_v16, %s14171_s22  ;;  %13778 = vtanh.f32 %v17574_v16 }
0x123c   : > { %8293 = vrot.lane.b32.xlu0 %v17577_v43, %s14171_s22  ;;  %13780 = vtanh.f32 %v17577_v43 }
0x1256   : > { %v12965_v49 = vpop.f32.mrb[202].mxu0 }
0x1257   : > { %v7380_v18 = vadd.f32 %v12965_v49, %v17479_v6  ;;  %v7374_v28 = vpop.f32.mrb[203].mxu0 }
0x1258   : > { %v7375_v52 = vadd.f32 %v17479_v6, %v7374_v28 }
0x1259   : > { %v7462_v7 = vmax.f32 %v7380_v18, 0.0 }
0x125a   : > { %v7461_v58 = vmax.f32 %v7375_v52, 0.0 }
0x125c   : > { %13013 = vmatprep.mubr.msk.f32.mxu1 %vm2258_vm4, %v7461_v58 }
0x125d   : > { %13014 = vmatmul.mubr.msk.f32.gmra.mrb[218].mxu1 %vm2258_vm4, %v7462_v7 }
0x126c   : > { %v12994_v35 = vpop.f32.mrb[204].mxu1 }
0x126d   : > { %v17588_v22 = vadd.f32 %v12994_v35, %v17548_v41  ;;  %v7670_v42 = vpop.f32.mrb[205].mxu1 }
0x126e   : > { %v17591_v50 = vadd.f32 %v17548_v41, %v7670_v42 }
0x126f   : > { %8299 = vrot.lane.b32.xlu1 %v17588_v22, %s14171_s22 }
0x1270   : > { %8297 = vrot.lane.b32.xlu0 %v17591_v50, %s14171_s22  ;;  %13782 = vtanh.f32 %v17591_v50 }
0x1271   : > { %13784 = vtanh.f32 %v17588_v22 }
0x128a   : > { %v12968_v31 = vpop.f32.mrb[204].mxu0 }
0x128b   : > { %v7390_v61 = vadd.f32 %v12968_v31, %v17479_v6  ;;  %v7384_v33 = vpop.f32.mrb[205].mxu0 }
0x128c   : > { %v7385_v14 = vadd.f32 %v17479_v6, %v7384_v33 }
0x128d   : > { %v7464_v15 = vmax.f32 %v7390_v61, 0.0 }
0x128e   : > { %v7463_v12 = vmax.f32 %v7385_v14, 0.0  ;;  %v12971_v57 = vpop.f32.mrb[206].mxu0 }
0x128f   : > { %v7400_v0 = vadd.f32 %v12971_v57, %v17479_v6  ;;  %v7394_v49 = vpop.f32.mrb[207].mxu0 }
0x1290   : > { %v7395_v18 = vadd.f32 %v17479_v6, %v7394_v49  ;;  %13016 = vmatprep.mubr.msk.f32.mxu1 %vm2258_vm4, %v7463_v12 }
0x1291   : > { %13017 = vmatmul.mubr.msk.f32.gmra.mrb[220].mxu1 %vm2258_vm4, %v7464_v15  ;;  %v7466_v58 = vmax.f32 %v7400_v0, 0.0 }
0x1292   : > { %v7465_v28 = vmax.f32 %v7395_v18, 0.0  ;;  %v12974_v52 = vpop.f32.mrb[208].mxu0 }
0x1293   : > { %v7410_v7 = vadd.f32 %v12974_v52, %v17479_v6  ;;  %v7404_v35 = vpop.f32.mrb[209].mxu0 }
0x1294   : > { %v7405_v42 = vadd.f32 %v17479_v6, %v7404_v35  ;;  %13019 = vmatprep.mubr.msk.f32.mxu1 %vm2258_vm4, %v7465_v28 }
0x1295   : > { %13020 = vmatmul.mubr.msk.f32.gmra.mrb[222].mxu1 %vm2258_vm4, %v7466_v58  ;;  %v7468_v33 = vmax.f32 %v7410_v7, 0.0 }
0x1296   : > { %v7467_v31 = vmax.f32 %v7405_v42, 0.0  ;;  %v12977_v61 = vpop.f32.mrb[210].mxu0 }
0x1297   : > { %v7420_v14 = vadd.f32 %v12977_v61, %v17479_v6  ;;  %v7414_v12 = vpop.f32.mrb[211].mxu0 }
0x1298   : > { %v7415_v57 = vadd.f32 %v17479_v6, %v7414_v12  ;;  %13022 = vmatprep.mubr.msk.f32.mxu1 %vm2258_vm4, %v7467_v31 }
0x1299   : > { %13023 = vmatmul.mubr.msk.f32.gmra.mrb[224].mxu1 %vm2258_vm4, %v7468_v33  ;;  %v7470_v49 = vmax.f32 %v7420_v14, 0.0 }
0x129a   : > { %v7469_v15 = vmax.f32 %v7415_v57, 0.0  ;;  %v12980_v0 = vpop.f32.mrb[212].mxu0 }
0x129b   : > { %v7430_v18 = vadd.f32 %v12980_v0, %v17479_v6  ;;  %v7424_v28 = vpop.f32.mrb[213].mxu0 }
0x129c   : > { %v7425_v52 = vadd.f32 %v17479_v6, %v7424_v28  ;;  %13025 = vmatprep.mubr.msk.f32.mxu1 %vm2258_vm4, %v7469_v15 }
0x129d   : > { %13026 = vmatmul.mubr.msk.f32.gmra.mrb[226].mxu1 %vm2258_vm4, %v7470_v49  ;;  %v7472_v35 = vmax.f32 %v7430_v18, 0.0 }
0x129e   : > { %v7471_v58 = vmax.f32 %v7425_v52, 0.0  ;;  %v12983_v7 = vpop.f32.mrb[214].mxu0 }
0x129f   : > { %v7440_v42 = vadd.f32 %v12983_v7, %v17479_v6  ;;  %v7434_v31 = vpop.f32.mrb[215].mxu0 }
0x12a0   : > { %v7435_v61 = vadd.f32 %v17479_v6, %v7434_v31  ;;  %13028 = vmatprep.mubr.msk.f32.mxu1 %vm2258_vm4, %v7471_v58  ;;  %v13775_v6 = vpop.eup %13774 }
0x12a1   : > { %v12997_v33 = vpop.f32.mrb[206].mxu1  ;;  %13029 = vmatmul.mubr.msk.f32.gmra.mrb[228].mxu1 %vm2258_vm4, %v7472_v35  ;;  %v7474_v15 = vmax.f32 %v7440_v42, 0.0  ;;  %v17630_v49 = vmul.f32 0.1, %v13775_v6  ;;  %v13777_v18 = vpop.eup %13776 }
0x12a2   : > { %v7473_v14 = vmax.f32 %v7435_v61, 0.0  ;;  %v17620_v12 = vadd.f32 %v12997_v33, %v17548_v41  ;;  %v7680_v57 = vpop.f32.mrb[207].mxu1  ;;  %v17634_v52 = vmul.f32 0.1, %v13777_v18  ;;  %v13779_v6 = vpop.eup %13778 }
0x12a3   : > { %v7681_v0 = vadd.f32 %v17548_v41, %v7680_v57  ;;  %v7873_v28 = vsel %vm4594_vm6, %v17630_v49, 0.0 }
0x12a4   : > { %8303 = vrot.lane.b32.xlu1 %v17620_v12, %s14171_s22  ;;  %13031 = vmatprep.mubr.msk.f32.mxu1 %vm2258_vm4, %v7473_v14  ;;  %v7876_v58 = vsel %vm4594_vm6, %v17634_v52, 0.0 }
0x12a5   : > { %8301 = vrot.lane.b32.xlu0 %v7681_v0, %s14171_s22  ;;  %13032 = vmatmul.mubr.msk.f32.gmra.mrb[230].mxu1 %vm2258_vm4, %v7474_v15  ;;  %13786 = vtanh.f32 %v7681_v0 }
0x12a6   : > { %13788 = vtanh.f32 %v17620_v12 }
0x12c4   : > { %7874 = vadd.xlane.f32.xlu0 %v7873_v28  ;;  %v17655_v28 = vmul.f32 0.1, %v13779_v6 }
0x12c8   : > { %7877 = vadd.xlane.f32.xlu1 %v7876_v58  ;;  %v13781_v58 = vpop.eup %13780 }
0x12c9   : > { %v13783_v26 = vpop.eup %13782 }
0x12ca   : > { %v17665_v43 = vmul.f32 0.1, %v13783_v26  ;;  %v13785_v26 = vpop.eup %13784 }
0x12cc   : > { %v7885_v50 = vsel %vm4594_vm6, %v17665_v43, 0.0 }
0x12d6   : > { %v13000_v7 = vpop.f32.mrb[208].mxu1 }
0x12d7   : > { %v17639_v35 = vadd.f32 %v13000_v7, %v17548_v41  ;;  %v7690_v56 = vpop.f32.mrb[209].mxu1 }
0x12d8   : > { %v7691_v23 = vadd.f32 %v17548_v41, %v7690_v56  ;;  %v7882_v56 = vsel %vm4594_vm6, %v17655_v28, 0.0 }
0x12d9   : > { %8307 = vrot.lane.b32.xlu1 %v17639_v35, %s14171_s22 }
0x12da   : > { %v13003_v42 = vpop.f32.mrb[210].mxu1  ;;  %8305 = vrot.lane.b32.xlu0 %v7691_v23, %s14171_s22  ;;  %13790 = vtanh.f32 %v7691_v23 }
0x12db   : > { %v17646_v31 = vadd.f32 %v13003_v42, %v17548_v41  ;;  %v7700_v61 = vpop.f32.mrb[211].mxu1  ;;  %v17661_v42 = vmul.f32 0.1, %v13781_v58  ;;  %v17677_v58 = vmul.f32 0.1, %v13785_v26 }
0x12dc   : > { %v7701_v5 = vadd.f32 %v17548_v41, %v7700_v61 }
0x12dd   : > { %8311 = vrot.lane.b32.xlu1 %v17646_v31, %s14171_s22  ;;  %v7879_v16 = vsel %vm4594_vm6, %v17661_v42, 0.0 }
0x12de   : > { %v13006_v33 = vpop.f32.mrb[212].mxu1  ;;  %13792 = vtanh.f32 %v7701_v5 }
0x12df   : > { %v7710_v14 = vpop.f32.mrb[213].mxu1  ;;  %v17670_v6 = vadd.f32 %v13006_v33, %v17548_v41  ;;  %v7888_v33 = vsel %vm4594_vm6, %v17677_v58, 0.0 }
0x12e0   : > { %v7711_v0 = vadd.f32 %v17548_v41, %v7710_v14 }
0x12e2   : > { %v13009_v57 = vpop.f32.mrb[214].mxu1  ;;  %13794 = vtanh.f32 %v7711_v0 }
0x12e3   : > { %v7720_v15 = vpop.f32.mrb[215].mxu1  ;;  %v7726_v22 = vadd.f32 %v13009_v57, %v17548_v41 }
0x12f4   : > { %v17653_v18 = vpop.f32.mrb[216].mxu1 }
0x12f5   : > { %v17657_v7 = vpop.f32.mrb[217].mxu1  ;;  %v7736_v8 = vadd.f32 %v17653_v18, %v17548_v41 }
0x12f9   : > { %7883 = vadd.xlane.f32.xlu0 %v7882_v56  ;;  %v13787_v56 = vpop.eup %13786 }
0x12fa   : > { %v13789_v26 = vpop.eup %13788 }
0x12fb   : > { %v13791_v34 = vpop.eup %13790 }
0x12fc   : > { %v17699_v29 = vmul.f32 0.1, %v13791_v34  ;;  %v13793_v63 = vpop.eup %13792 }
0x12fd   : > { %7880 = vadd.xlane.f32.xlu0 %v7879_v16 }
0x12fe   : > { %v7897_v23 = vsel %vm4594_vm6, %v17699_v29, 0.0 }
0x1301   : > { %7886 = vadd.xlane.f32.xlu1 %v7885_v50  ;;  %v17683_v50 = vmul.f32 0.1, %v13787_v56  ;;  %v7721_v56 = vadd.f32 %v17548_v41, %v7720_v15  ;;  %v17705_v15 = vmul.f32 0.1, %v13793_v63 }
0x1303   : > { %v7891_v61 = vsel %vm4594_vm6, %v17683_v50, 0.0  ;;  %13796 = vtanh.f32 %v7721_v56  ;;  %v7903_v51 = vsel %vm4594_vm6, %v17705_v15, 0.0 }
0x1304   : > { %13798 = vtanh.f32 %v17639_v35 }
0x1305   : > { %13800 = vtanh.f32 %v17646_v31 }
0x1306   : > { %13802 = vtanh.f32 %v17670_v6 }
0x1307   : > { %13804 = vtanh.f32 %v7726_v22 }
0x1312   : > { %8315 = vrot.lane.b32.xlu1 %v17670_v6, %s14171_s22 }
0x1313   : > { %8309 = vrot.lane.b32.xlu0 %v7701_v5, %s14171_s22 }
0x1330   : > { %v13015_v16 = vpop.f32.mrb[218].mxu1 }
0x1331   : > { %v17679_v27 = vpop.f32.mrb[219].mxu1 }
0x1332   : > { %7889 = vadd.xlane.f32.xlu0 %v7888_v33  ;;  %v17693_v33 = vmul.f32 0.1, %v13789_v26 }
0x1334   : > { %v7894_v14 = vsel %vm4594_vm6, %v17693_v33, 0.0 }
0x1336   : > { %7892 = vadd.xlane.f32.xlu1 %v7891_v61 }
0x1347   : > { %8319 = vrot.lane.b32.xlu1 %v7726_v22, %s14171_s22  ;;  %v7731_v22 = vadd.f32 %v17548_v41, %v17657_v7  ;;  %v7741_v7 = vadd.f32 %v17548_v41, %v17679_v27 }
0x1348   : > { %8313 = vrot.lane.b32.xlu0 %v7711_v0, %s14171_s22  ;;  %v13795_v0 = vpop.eup %13794 }
0x1349   : > { %v17711_v34 = vmul.f32 0.1, %v13795_v0  ;;  %v13797_v48 = vpop.eup %13796  ;;  %13806 = vtanh.f32 %v7731_v22 }
0x134a   : > { %v17719_v37 = vmul.f32 0.1, %v13797_v48  ;;  %v7746_v48 = vadd.f32 %v13015_v16, %v17548_v41  ;;  %13808 = vtanh.f32 %v7736_v8 }
0x134b   : > { %v7909_v63 = vsel %vm4594_vm6, %v17711_v34, 0.0  ;;  %13810 = vtanh.f32 %v7741_v7 }
0x134c   : > { %v7915_v0 = vsel %vm4594_vm6, %v17719_v37, 0.0  ;;  %13812 = vtanh.f32 %v7746_v48 }
0x1364   : > { %v13018_v61 = vpop.f32.mrb[220].mxu1 }
0x1365   : > { %v17695_v57 = vpop.f32.mrb[221].mxu1 }
0x1367   : > { %7895 = vadd.xlane.f32.xlu0 %v7894_v14 }
0x1368   : > { %v13021_v12 = vpop.f32.mrb[222].mxu1 }
0x1369   : > { %v17701_v5 = vpop.f32.mrb[223].mxu1  ;;  %v17746_v18 = vadd.f32 %v13021_v12, %v17548_v41 }
0x136b   : > { %7898 = vadd.xlane.f32.xlu1 %v7897_v23 }
0x136c   : > { %v13024_v26 = vpop.f32.mrb[224].mxu1 }
0x136d   : > { %v17707_v54 = vpop.f32.mrb[225].mxu1 }
0x136f   : > { %7904 = vadd.xlane.f32.xlu1 %v7903_v51 }
0x1370   : > { %v17713_v14 = vpop.f32.mrb[226].mxu1 }
0x1371   : > { %v17715_v17 = vpop.f32.mrb[227].mxu1 }
0x1372   : > { %v7781_v40 = vadd.f32 %v17548_v41, %v17715_v17 }
0x1373   : > { %7910 = vadd.xlane.f32.xlu1 %v7909_v63  ;;  %v17740_v63 = vadd.f32 %v13018_v61, %v17548_v41 }
0x1374   : > { %v17721_v23 = vpop.f32.mrb[228].mxu1 }
0x1375   : > { %v17723_v44 = vpop.f32.mrb[229].mxu1  ;;  %v17822_v39 = vadd.f32 %v17721_v23, %v17548_v41 }
0x1376   : > { %v7791_v17 = vadd.f32 %v17548_v41, %v17723_v44 }
0x1377   : > { %7916 = vadd.xlane.f32.xlu1 %v7915_v0 }
0x1378   : > { %v17727_v13 = vpop.f32.mrb[230].mxu1 }
0x1379   : > { %v17729_v51 = vpop.f32.mrb[231].mxu1 }
0x137a   : > { %v17844_v62 = vadd.f32 %v17548_v41, %v17729_v51 }
0x137d   : > { %8317 = vrot.lane.b32.xlu0 %v7721_v56, %s14171_s22  ;;  %v13799_v56 = vpop.eup %13798 }
0x137e   : > { %v17750_v35 = vmul.f32 0.1, %v13799_v56  ;;  %v13801_v16 = vpop.eup %13800 }
0x137f   : > { %v17754_v61 = vmul.f32 0.1, %v13801_v16  ;;  %v13803_v0 = vpop.eup %13802 }
0x1380   : > { %v7900_v31 = vsel %vm4594_vm6, %v17750_v35, 0.0  ;;  %v17758_v12 = vmul.f32 0.1, %v13803_v0  ;;  %v13805_v38 = vpop.eup %13804 }
0x1381   : > { %v7906_v6 = vsel %vm4594_vm6, %v17754_v61, 0.0  ;;  %v17764_v30 = vmul.f32 0.1, %v13805_v38  ;;  %v7751_v38 = vadd.f32 %v17548_v41, %v17695_v57 }
0x1382   : > { %v7912_v56 = vsel %vm4594_vm6, %v17758_v12, 0.0 }
0x1383   : > { %v7918_v16 = vsel %vm4594_vm6, %v17764_v30, 0.0  ;;  %13814 = vtanh.f32 %v7751_v38 }
0x1384   : > { %13816 = vtanh.f32 %v17740_v63 }
0x1388   : > { %8323 = vrot.lane.b32.xlu1 %v7736_v8, %s14171_s22  ;;  %v7771_v8 = vadd.f32 %v17548_v41, %v17707_v54 }
0x138c   : > { %8327 = vrot.lane.b32.xlu1 %v7746_v48, %s14171_s22 }
0x1390   : > { %8331 = vrot.lane.b32.xlu1 %v17740_v63, %s14171_s22 }
0x1394   : > { %8335 = vrot.lane.b32.xlu1 %v17746_v18, %s14171_s22 }
0x139c   : > { %7901 = vadd.xlane.f32.xlu0 %v7900_v31  ;;  %v13807_v31 = vpop.eup %13806 }
0x139d   : > { %v17768_v55 = vmul.f32 0.1, %v13807_v31  ;;  %v13809_v27 = vpop.eup %13808 }
0x139f   : > { %v7921_v0 = vsel %vm4594_vm6, %v17768_v55, 0.0 }
0x13a0   : > { %7907 = vadd.xlane.f32.xlu0 %v7906_v6  ;;  %v17780_v6 = vadd.f32 %v13024_v26, %v17548_v41  ;;  %v17797_v26 = vadd.f32 %v17713_v14, %v17548_v41 }
0x13a4   : > { %7913 = vadd.xlane.f32.xlu0 %v7912_v56  ;;  %v7761_v56 = vadd.f32 %v17548_v41, %v17701_v5 }
0x13a6   : > { %13818 = vtanh.f32 %v7761_v56 }
0x13a7   : > { %13820 = vtanh.f32 %v7771_v8 }
0x13a8   : > { %7919 = vadd.xlane.f32.xlu0 %v7918_v16  ;;  %v13811_v16 = vpop.eup %13810  ;;  %13822 = vtanh.f32 %v7781_v40 }
0x13a9   : > { %v17791_v31 = vmul.f32 0.1, %v13811_v16  ;;  %13824 = vtanh.f32 %v7791_v17 }
0x13aa   : > { %13826 = vtanh.f32 %v17844_v62 }
0x13ab   : > { %v7927_v5 = vsel %vm4594_vm6, %v17791_v31, 0.0 }
0x13b8   : > { %7922 = vadd.xlane.f32.xlu1 %v7921_v0  ;;  %v13813_v0 = vpop.eup %13812 }
0x13b9   : > { %v13815_v16 = vpop.eup %13814 }
0x13ba   : > { %v13817_v25 = vpop.eup %13816 }
0x13bb   : > { %v17840_v11 = vmul.f32 0.1, %v13817_v25  ;;  %v13819_v24 = vpop.eup %13818 }
0x13be   : > { %8321 = vrot.lane.b32.xlu0 %v7731_v22, %s14171_s22  ;;  %v17787_v22 = vmul.f32 0.1, %v13809_v27  ;;  %v17806_v27 = vmul.f32 0.1, %v13813_v0 }
0x13c0   : > { %v7924_v57 = vsel %vm4594_vm6, %v17787_v22, 0.0  ;;  %v7930_v14 = vsel %vm4594_vm6, %v17806_v27, 0.0 }
0x13c2   : > { %8325 = vrot.lane.b32.xlu0 %v7741_v7, %s14171_s22  ;;  %v17804_v7 = vpop.permute.xlu0 %8293 }
0x13c6   : > { %8329 = vrot.lane.b32.xlu0 %v7751_v38, %s14171_s22 }
0x13c9   : > { %8339 = vrot.lane.b32.xlu1 %v17780_v6, %s14171_s22 }
0x13ca   : > { %8333 = vrot.lane.b32.xlu0 %v7761_v56, %s14171_s22  ;;  %v7936_v56 = vsel %vm4594_vm6, %v17840_v11, 0.0 }
0x13e9   : > { %7925 = vadd.xlane.f32.xlu0 %v7924_v57  ;;  %v17808_v57 = vpop.permute.xlu0 %8297 }
0x13ed   : > { %7928 = vadd.xlane.f32.xlu1 %v7927_v5  ;;  %v17812_v5 = vmul.f32 0.1, %v13815_v16  ;;  %v17814_v54 = vpop.permute.xlu0 %8301 }
0x13ef   : > { %v7933_v48 = vsel %vm4594_vm6, %v17812_v5, 0.0 }
0x13f1   : > { %v7875_v38 = vpop.xlane.xlu0 %7874 }
0x13f5   : > { %v17818_v4 = vpop.permute.xlu0 %8305 }
0x13f6   : > { %20606 = vst [vmem:[#allocation144_spill] sm:$0xff] %v17818_v4 }
0x13f9   : > { %v7884_v0 = vpop.xlane.xlu0 %7883 }
0x13fd   : > { %v17826_v16 = vpop.xlane.xlu0 %7880 }
0x13fe   : > { %8343 = vrot.lane.b32.xlu1 %v17797_v26, %s14171_s22 }
0x13ff   : > { %8337 = vrot.lane.b32.xlu0 %v7771_v8, %s14171_s22  ;;  %v17848_v8 = vmul.f32 0.1, %v13819_v24 }
0x1401   : > { %v7939_v44 = vsel %vm4594_vm6, %v17848_v8, 0.0 }
0x141e   : > { %7931 = vadd.xlane.f32.xlu0 %v7930_v14  ;;  %v17831_v14 = vpop.permute.xlu0 %8309 }
0x141f   : > { %20607 = vst [vmem:[#allocation145_spill] sm:$0xff] %v17831_v14 }
0x1422   : > { %7934 = vadd.xlane.f32.xlu1 %v7933_v48  ;;  %v7890_v48 = vpop.xlane.xlu0 %7889 }
0x1426   : > { %v17834_v45 = vpop.permute.xlu0 %8313 }
0x1427   : > { %20608 = vst [vmem:[#allocation146_spill] sm:$0xff] %v17834_v45 }
0x142a   : > { %v7896_v23 = vpop.xlane.xlu0 %7895 }
0x142e   : > { %v17838_v53 = vpop.permute.xlu0 %8317 }
0x142f   : > { %20609 = vst [vmem:[#allocation147_spill] sm:$0xff] %v17838_v53 }
0x1432   : > { %v7902_v63 = vpop.xlane.xlu0 %7901 }
0x1433   : > { %8347 = vrot.lane.b32.xlu1 %v17822_v39, %s14171_s22 }
0x1434   : > { %8341 = vrot.lane.b32.xlu0 %v7781_v40, %s14171_s22  ;;  %v13821_v40 = vpop.eup %13820 }
0x1435   : > { %v17853_v25 = vmul.f32 0.1, %v13821_v40  ;;  %v13823_v47 = vpop.eup %13822  ;;  %v7969_v40 = vsub.f32 0.0, %v7875_v38  ;;  %v7974_v38 = vsub.f32 0.0, %v7890_v48 }
0x1436   : > { %v7908_v53 = vpop.xlane.xlu0 %7907  ;;  %v17857_v46 = vmul.f32 0.1, %v13823_v47  ;;  %v13825_v2 = vpop.eup %13824 }
0x1437   : > { %v7945_v51 = vsel %vm4594_vm6, %v17853_v25, 0.0  ;;  %v17861_v45 = vmul.f32 0.1, %v13825_v2  ;;  %v13827_v59 = vpop.eup %13826  ;;  %v8001_v47 = vsel %vm4594_vm6, %v17630_v49, %v7969_v40  ;;  %v17871_v2 = vpop.permute.xlu1 %8291  ;;  %v8006_v49 = vsel %vm4594_vm6, %v17677_v58, %v7974_v38 }
0x1438   : > { %v8033_v36 = vmul.f32 1.442695, %v8001_v47  ;;  %v8043_v40 = vmul.f32 1.442695, %v8006_v49 }
0x1439   : > { %v7957_v3 = vsel %vm4594_vm6, %v17861_v45, 0.0 }
0x143a   : > { %v7914_v24 = vpop.xlane.xlu0 %7913  ;;  %13828 = vpow2.f32 %v8033_v36 }
0x143b   : > { %v17878_v4 = vpop.permute.xlu1 %8289 }
0x143e   : > { %v7920_v14 = vpop.xlane.xlu0 %7919 }
0x143f   : > { %v17884_v47 = vpop.permute.xlu1 %8295 }
0x1443   : > { %v17890_v48 = vpop.permute.xlu1 %8299 }
0x1447   : > { %v17896_v38 = vpop.permute.xlu1 %8303 }
0x1453   : > { %7937 = vadd.xlane.f32.xlu0 %v7936_v56  ;;  %v7951_v56 = vsel %vm4594_vm6, %v17857_v46, 0.0 }
0x1457   : > { %7940 = vadd.xlane.f32.xlu1 %v7939_v44  ;;  %v17865_v44 = vmul.f32 0.1, %v13827_v59 }
0x1459   : > { %v7963_v20 = vsel %vm4594_vm6, %v17865_v44, 0.0 }
0x145b   : > { %7946 = vadd.xlane.f32.xlu1 %v7945_v51  ;;  %v7972_v51 = vsub.f32 0.0, %v7884_v0  ;;  %v7976_v0 = vsub.f32 0.0, %v7896_v23  ;;  %v7980_v23 = vsub.f32 0.0, %v7908_v53 }
0x145d   : > { %v8004_v59 = vsel %vm4594_vm6, %v17655_v28, %v7972_v51  ;;  %v13829_v51 = vpop.eup %13828 }
0x145f   : > { %7952 = vadd.xlane.f32.xlu1 %v7951_v56  ;;  %v17873_v56 = vpop.permute.xlu0 %8321 }
0x1460   : > { %20610 = vst [vmem:[#allocation148_spill] sm:$0xff] %v17873_v56  ;;  %v7978_v56 = vsub.f32 0.0, %v7902_v63  ;;  %v7982_v63 = vsub.f32 0.0, %v7914_v24 }
0x1462   : > { %v8010_v58 = vsel %vm4594_vm6, %v17750_v35, %v7978_v56  ;;  %v17903_v35 = vpop.xlane.xlu1 %7877  ;;  %v8014_v53 = vsel %vm4594_vm6, %v17758_v12, %v7982_v63  ;;  %v7984_v56 = vsub.f32 0.0, %v7920_v14 }
0x1463   : > { %7958 = vadd.xlane.f32.xlu1 %v7957_v3  ;;  %v8039_v3 = vmul.f32 1.442695, %v8004_v59  ;;  %v8051_v59 = vmul.f32 1.442695, %v8010_v58 }
0x1464   : > { %v8016_v24 = vsel %vm4594_vm6, %v17764_v30, %v7984_v56 }
0x1465   : > { %13830 = vpow2.f32 %v8039_v3  ;;  %v8063_v12 = vmul.f32 1.442695, %v8016_v24 }
0x1466   : > { %13832 = vpow2.f32 %v8043_v40 }
0x1467   : > { %7964 = vadd.xlane.f32.xlu1 %v7963_v20  ;;  %v17882_v20 = vpop.permute.xlu0 %8325  ;;  %13834 = vtanh.f32 %v17746_v18 }
0x1469   : > { %8345 = vrot.lane.b32.xlu0 %v7791_v17, %s14171_s22  ;;  %v8008_v17 = vsel %vm4594_vm6, %v17693_v33, %v7976_v0  ;;  %v8012_v33 = vsel %vm4594_vm6, %v17754_v61, %v7980_v23  ;;  %v8059_v61 = vmul.f32 1.442695, %v8014_v53 }
0x146a   : > { %v8047_v28 = vmul.f32 1.442695, %v8008_v17  ;;  %v8055_v18 = vmul.f32 1.442695, %v8012_v33 }
0x146b   : > { %v17888_v36 = vpop.permute.xlu0 %8329 }
0x146c   : > { %13836 = vpow2.f32 %v8047_v28 }
0x146d   : > { %13838 = vpow2.f32 %v8051_v59 }
0x146e   : > { %13840 = vpow2.f32 %v8055_v18 }
0x146f   : > { %v13831_v3 = vpop.eup %13830  ;;  %v17900_v49 = vpop.permute.xlu0 %8333  ;;  %13842 = vpow2.f32 %v8059_v61 }
0x1470   : > { %20611 = vst [vmem:[#allocation149_spill] sm:$0xff] %v17900_v49  ;;  %v13833_v0 = vpop.eup %13832  ;;  %13844 = vpow2.f32 %v8063_v12 }
0x1471   : > { %v13835_v17 = vpop.eup %13834 }
0x1472   : > { %v17910_v23 = vmul.f32 0.1, %v13835_v17  ;;  %v7806_v17 = vadd.f32 %v17727_v13, %v17548_v41 }
0x1474   : > { %v7942_v33 = vsel %vm4594_vm6, %v17910_v23, 0.0 }
0x1476   : > { %v7926_v40 = vpop.xlane.xlu0 %7925  ;;  %v13837_v58 = vpop.eup %13836 }
0x1477   : > { %v7986_v28 = vsub.f32 0.0, %v7926_v40  ;;  %v13839_v59 = vpop.eup %13838 }
0x1478   : > { %8129 = vrot.lane.b32.xlu1 %v13829_v51, %s14170_s0  ;;  %v17912_v51 = vpop.permute.xlu1 %8307 }
0x1479   : > { %v8018_v14 = vsel %vm4594_vm6, %v17787_v22, %v7986_v28 }
0x147a   : > { %v8067_v30 = vmul.f32 1.442695, %v8018_v14  ;;  %v17935_v28 = vpop.permute.xlu0 %8337 }
0x147b   : > { %20612 = vst [vmem:[#allocation150_spill] sm:$0xff] %v17935_v28 }
0x147c   : > { %8135 = vrot.lane.b32.xlu1 %v13831_v3, %s14170_s0  ;;  %v17920_v63 = vpop.permute.xlu1 %8311  ;;  %v13841_v3 = vpop.eup %13840  ;;  %13846 = vpow2.f32 %v8067_v30 }
0x147d   : > { %v13843_v53 = vpop.eup %13842  ;;  %13848 = vtanh.f32 %v17780_v6 }
0x147e   : > { %v13845_v22 = vpop.eup %13844 }
0x1480   : > { %8139 = vrot.lane.b32.xlu1 %v13833_v0, %s14170_s0  ;;  %v7887_v18 = vpop.xlane.xlu1 %7886 }
0x1484   : > { %8143 = vrot.lane.b32.xlu1 %v13837_v58, %s14170_s0  ;;  %v17924_v56 = vpop.permute.xlu1 %8315 }
0x1486   : > { %v13847_v0 = vpop.eup %13846 }
0x1488   : > { %7943 = vadd.xlane.f32.xlu0 %v7942_v33  ;;  %8147 = vrot.lane.b32.xlu1 %v13839_v59, %s14170_s0  ;;  %v7893_v40 = vpop.xlane.xlu1 %7892 }
0x148c   : > { %8151 = vrot.lane.b32.xlu1 %v13841_v3, %s14170_s0  ;;  %v17930_v61 = vpop.permute.xlu1 %8319 }
0x1490   : > { %8155 = vrot.lane.b32.xlu1 %v13843_v53, %s14170_s0  ;;  %v7899_v24 = vpop.xlane.xlu1 %7898 }
0x1494   : > { %8159 = vrot.lane.b32.xlu1 %v13845_v22, %s14170_s0  ;;  %v17937_v58 = vpop.xlane.xlu1 %7904 }
0x1498   : > { %8163 = vrot.lane.b32.xlu1 %v13847_v0, %s14170_s0  ;;  %v17939_v59 = vpop.xlane.xlu1 %7910 }
0x149c   : > { %v17945_v41 = vpop.xlane.xlu1 %7916 }
0x149e   : > { %8351 = vrot.lane.b32.xlu0 %v7806_v17, %s14171_s22 }
0x14a0   : > { %v17948_v30 = vpop.permute.xlu1 %8323 }
0x14a1   : > { %20613 = vst [vmem:[#allocation151_spill] sm:$0xff] %v17948_v30 }
0x14a2   : > { %8349 = vrot.lane.b32.xlu0 %v17844_v62, %s14171_s22  ;;  %v13849_v62 = vpop.eup %13848 }
0x14a3   : > { %v17951_v53 = vmul.f32 0.1, %v13849_v62 }
0x14a4   : > { %v17953_v22 = vpop.permute.xlu1 %8327 }
0x14a5   : > { %20614 = vst [vmem:[#allocation152_spill] sm:$0xff] %v17953_v22  ;;  %v7948_v6 = vsel %vm4594_vm6, %v17951_v53, 0.0  ;;  %v7973_v22 = vsub.f32 0.0, %v7887_v18 }
0x14a7   : > { %v8005_v28 = vsel %vm4594_vm6, %v17665_v43, %v7973_v22  ;;  %v7979_v43 = vsub.f32 0.0, %v17937_v58  ;;  %v7983_v58 = vsub.f32 0.0, %v17945_v41 }
0x14a8   : > { %v8041_v30 = vmul.f32 1.442695, %v8005_v28 }
0x14ab   : > { %v7932_v12 = vpop.xlane.xlu0 %7931 }
0x14ac   : > { %v7988_v14 = vsub.f32 0.0, %v7932_v12 }
0x14ae   : > { %v8020_v33 = vsel %vm4594_vm6, %v17806_v27, %v7988_v14  ;;  %v17963_v14 = vpop.permute.xlu1 %8331 }
0x14af   : > { %v8071_v13 = vmul.f32 1.442695, %v8020_v33  ;;  %20615 = vst [vmem:[#allocation153_spill] sm:$0xff] %v17963_v14  ;;  %v17983_v49 = vpop.permute.xlu0 %8341 }
0x14b1   : > { %13850 = vpow2.f32 %v8071_v13 }
0x14b2   : > { %13852 = vtanh.f32 %v17797_v26  ;;  %v17969_v62 = vpop.permute.xlu1 %8335 }
0x14b3   : > { %13854 = vtanh.f32 %v17822_v39  ;;  %20616 = vst [vmem:[#allocation154_spill] sm:$0xff] %v17969_v62 }
0x14b4   : > { %13856 = vtanh.f32 %v7806_v17 }
0x14bb   : > { %v13851_v3 = vpop.eup %13850 }
0x14bc   : > { %8167 = vrot.lane.b32.xlu1 %v13851_v3, %s14170_s0  ;;  %v13853_v27 = vpop.eup %13852 }
0x14bd   : > { %v17957_v26 = vmul.f32 0.1, %v13853_v27  ;;  %v13855_v0 = vpop.eup %13854  ;;  %v7970_v27 = vsub.f32 0.0, %v17903_v35  ;;  %v7975_v35 = vsub.f32 0.0, %v7893_v40 }
0x14be   : > { %v17961_v12 = vmul.f32 0.1, %v13855_v0  ;;  %v13857_v17 = vpop.eup %13856 }
0x14bf   : > { %v7954_v39 = vsel %vm4594_vm6, %v17957_v26, 0.0  ;;  %v17967_v13 = vmul.f32 0.1, %v13857_v17  ;;  %v8002_v0 = vsel %vm4594_vm6, %v17634_v52, %v7970_v27  ;;  %v8007_v52 = vsel %vm4594_vm6, %v17683_v50, %v7975_v35 }
0x14c0   : > { %v7960_v33 = vsel %vm4594_vm6, %v17961_v12, 0.0  ;;  %v8035_v14 = vmul.f32 1.442695, %v8002_v0  ;;  %v7981_v0 = vsub.f32 0.0, %v17939_v59  ;;  %v8015_v59 = vsel %vm4594_vm6, %v17719_v37, %v7983_v58 }
0x14c1   : > { %7949 = vadd.xlane.f32.xlu0 %v7948_v6  ;;  %v7966_v3 = vsel %vm4594_vm6, %v17967_v13, 0.0  ;;  %v7923_v6 = vpop.xlane.xlu1 %7922 }
0x14c2   : > { %13858 = vpow2.f32 %v8035_v14 }
0x14c5   : > { %7955 = vadd.xlane.f32.xlu0 %v7954_v39  ;;  %v7971_v39 = vsub.f32 0.0, %v17826_v16  ;;  %v7977_v16 = vsub.f32 0.0, %v7899_v24 }
0x14c7   : > { %v8003_v17 = vsel %vm4594_vm6, %v17661_v42, %v7971_v39  ;;  %v8045_v42 = vmul.f32 1.442695, %v8007_v52  ;;  %v8009_v14 = vsel %vm4594_vm6, %v17699_v29, %v7977_v16  ;;  %v7985_v52 = vsub.f32 0.0, %v7923_v6 }
0x14c8   : > { %v8037_v62 = vmul.f32 1.442695, %v8003_v17  ;;  %v8049_v50 = vmul.f32 1.442695, %v8009_v14 }
0x14c9   : > { %7961 = vadd.xlane.f32.xlu0 %v7960_v33  ;;  %v17979_v33 = vpop.permute.xlu1 %8339  ;;  %v8017_v41 = vsel %vm4594_vm6, %v17768_v55, %v7985_v52 }
0x14ca   : > { %13860 = vpow2.f32 %v8037_v62  ;;  %v8011_v62 = vsel %vm4594_vm6, %v17705_v15, %v7979_v43 }
0x14cb   : > { %13862 = vpow2.f32 %v8041_v30  ;;  %v8053_v29 = vmul.f32 1.442695, %v8011_v62 }
0x14cc   : > { %v13859_v22 = vpop.eup %13858  ;;  %13864 = vpow2.f32 %v8045_v42 }
0x14cd   : > { %7967 = vadd.xlane.f32.xlu0 %v7966_v3  ;;  %v7929_v3 = vpop.xlane.xlu1 %7928 }
0x14ce   : > { %v7987_v14 = vsub.f32 0.0, %v7929_v3 }
0x14d0   : > { %v8019_v6 = vsel %vm4594_vm6, %v17791_v31, %v7987_v14 }
0x14d1   : > { %v17987_v18 = vpop.permute.xlu1 %8343 }
0x14d4   : > { %v13861_v39 = vpop.eup %13860 }
0x14d5   : > { %v7935_v24 = vpop.xlane.xlu1 %7934  ;;  %v13863_v17 = vpop.eup %13862 }
0x14d6   : > { %v13865_v16 = vpop.eup %13864 }
0x14d9   : > { %v18002_v35 = vpop.permute.xlu1 %8347 }
0x14e0   : > { %v7938_v27 = vpop.xlane.xlu0 %7937 }
0x14e1   : > { %v7990_v40 = vsub.f32 0.0, %v7938_v27 }
0x14e3   : > { %v8022_v28 = vsel %vm4594_vm6, %v17840_v11, %v7990_v40  ;;  %8131 = vrot.lane.b32.xlu0 %v13859_v22, %s14170_s0  ;;  %v8013_v11 = vsel %vm4594_vm6, %v17711_v34, %v7981_v0  ;;  %v8061_v34 = vmul.f32 1.442695, %v8015_v59  ;;  %v8065_v40 = vmul.f32 1.442695, %v8017_v41 }
0x14e4   : > { %v8075_v30 = vmul.f32 1.442695, %v8022_v28  ;;  %v8057_v15 = vmul.f32 1.442695, %v8013_v11  ;;  %v7941_v42 = vpop.xlane.xlu1 %7940  ;;  %v7989_v22 = vsub.f32 0.0, %v7935_v24 }
0x14e5   : > { %v7991_v3 = vsub.f32 0.0, %v7941_v42 }
0x14e6   : > { %13866 = vpow2.f32 %v8075_v30  ;;  %v8021_v55 = vsel %vm4594_vm6, %v17812_v5, %v7989_v22 }
0x14e7   : > { %8133 = vrot.lane.b32.xlu0 %v13861_v39, %s14170_s0  ;;  %13868 = vpow2.f32 %v8049_v50  ;;  %v8069_v50 = vmul.f32 1.442695, %v8019_v6  ;;  %v8073_v0 = vmul.f32 1.442695, %v8021_v55  ;;  %v8023_v39 = vsel %vm4594_vm6, %v17848_v8, %v7991_v3  ;;  %v11624_v3 = vld [vmem:[%s19981_s14 + $0x18] sm:$0xff] }
0x14e8   : > { %13870 = vpow2.f32 %v8053_v29  ;;  %v7947_v37 = vpop.xlane.xlu1 %7946  ;;  %v8077_v29 = vmul.f32 1.442695, %v8023_v39  ;;  %13034 = vmatprep.subr.mxu0 %v11624_v3 }
0x14e9   : > { %13872 = vpow2.f32 %v8057_v15  ;;  %v7993_v31 = vsub.f32 0.0, %v7947_v37  ;;  %13035 = vmatpush3.msra.mxu0 %v11624_v3 }
0x14ea   : > { %13874 = vpow2.f32 %v8061_v34 }
0x14eb   : > { %8137 = vrot.lane.b32.xlu0 %v13863_v17, %s14170_s0  ;;  %13876 = vpow2.f32 %v8065_v40  ;;  %v8025_v5 = vsel %vm4594_vm6, %v17853_v25, %v7993_v31  ;;  %v18033_v40 = vpop.permute.xlu0 %8345 }
0x14ec   : > { %v7953_v62 = vpop.xlane.xlu1 %7952  ;;  %13878 = vpow2.f32 %v8069_v50  ;;  %v8081_v15 = vmul.f32 1.442695, %v8025_v5 }
0x14ed   : > { %13880 = vpow2.f32 %v8073_v0  ;;  %v7995_v58 = vsub.f32 0.0, %v7953_v62 }
0x14ee   : > { %13882 = vpow2.f32 %v8077_v29 }
0x14ef   : > { %8141 = vrot.lane.b32.xlu0 %v13865_v16, %s14170_s0  ;;  %v8027_v59 = vsel %vm4594_vm6, %v17857_v46, %v7995_v58  ;;  %13884 = vpow2.f32 %v8081_v15 }
0x14f0   : > { %v13867_v27 = vpop.eup %13866  ;;  %v7959_v11 = vpop.xlane.xlu1 %7958  ;;  %v8085_v42 = vmul.f32 1.442695, %v8027_v59 }
0x14f1   : > { %8171 = vrot.lane.b32.xlu1 %v13867_v27, %s14170_s0  ;;  %v13869_v43 = vpop.eup %13868  ;;  %v7997_v8 = vsub.f32 0.0, %v7959_v11 }
0x14f2   : > { %v13871_v28 = vpop.eup %13870  ;;  %13886 = vpow2.f32 %v8085_v42 }
0x14f3   : > { %8145 = vrot.lane.b32.xlu0 %v13869_v43, %s14170_s0  ;;  %v13873_v30 = vpop.eup %13872  ;;  %v8029_v27 = vsel %vm4594_vm6, %v17861_v45, %v7997_v8 }
0x14f4   : > { %v13875_v24 = vpop.eup %13874  ;;  %v7965_v16 = vpop.xlane.xlu1 %7964  ;;  %v8089_v41 = vmul.f32 1.442695, %v8029_v27 }
0x14f5   : > { %v13877_v17 = vpop.eup %13876  ;;  %v7999_v25 = vsub.f32 0.0, %v7965_v16 }
0x14f6   : > { %v13879_v52 = vpop.eup %13878  ;;  %13888 = vpow2.f32 %v8089_v41 }
0x14f7   : > { %8149 = vrot.lane.b32.xlu0 %v13871_v28, %s14170_s0  ;;  %v13881_v34 = vpop.eup %13880  ;;  %v8031_v14 = vsel %vm4594_vm6, %v17865_v44, %v7999_v25 }
0x14f8   : > { %v13883_v46 = vpop.eup %13882  ;;  %v8093_v43 = vmul.f32 1.442695, %v8031_v14  ;;  %v8130_v8 = vpop.permute.xlu1 %8129 }
0x14f9   : > { %v13885_v37 = vpop.eup %13884 }
0x14fa   : > { %13890 = vpow2.f32 %v8093_v43 }
0x14fb   : > { %8153 = vrot.lane.b32.xlu0 %v13873_v30, %s14170_s0 }
0x14fc   : > { %v13887_v6 = vpop.eup %13886 }
0x14ff   : > { %8157 = vrot.lane.b32.xlu0 %v13875_v24, %s14170_s0 }
0x1500   : > { %v13889_v50 = vpop.eup %13888 }
0x1503   : > { %8161 = vrot.lane.b32.xlu0 %v13877_v17, %s14170_s0 }
0x1504   : > { %v13891_v55 = vpop.eup %13890 }
0x1507   : > { %8165 = vrot.lane.b32.xlu0 %v13879_v52, %s14170_s0 }
0x150b   : > { %8169 = vrot.lane.b32.xlu0 %v13881_v34, %s14170_s0 }
0x150f   : > { %8173 = vrot.lane.b32.xlu0 %v13883_v46, %s14170_s0 }
0x1513   : > { %8177 = vrot.lane.b32.xlu0 %v13885_v37, %s14170_s0 }
0x1515   : > { %v7944_v45 = vpop.xlane.xlu0 %7943 }
0x1516   : > { %v7992_v22 = vsub.f32 0.0, %v7944_v45 }
0x1517   : > { %8181 = vrot.lane.b32.xlu0 %v13887_v6, %s14170_s0  ;;  %v8225_v6 = vmul.f32 %v8130_v8, %v16476_v10 }
0x1518   : > { %v8024_v28 = vsel %vm4594_vm6, %v17910_v23, %v7992_v22 }
0x1519   : > { %v8079_v44 = vmul.f32 1.442695, %v8024_v28  ;;  %v18045_v62 = vpop.permute.xlu0 %8351 }
0x151b   : > { %13892 = vpow2.f32 %v8079_v44  ;;  %8185 = vrot.lane.b32.xlu0 %v13889_v50, %s14170_s0  ;;  %v18076_v44 = vadd.f32 %v17878_v4, %v8225_v6  ;;  %v20617_v4 = vld [vmem:[#allocation144_spill] sm:$0xff] }
0x151d   : > { %v18047_v23 = vpop.permute.xlu0 %8349 }
0x151f   : > { %8189 = vrot.lane.b32.xlu0 %v13891_v55, %s14170_s0 }
0x1525   : > { %v13893_v30 = vpop.eup %13892 }
0x1526   : > { %8175 = vrot.lane.b32.xlu1 %v13893_v30, %s14170_s0 }
0x154e   : > { %v7950_v0 = vpop.xlane.xlu0 %7949 }
0x154f   : > { %v7994_v39 = vsub.f32 0.0, %v7950_v0  ;;  %v20618_v0 = vld [vmem:[#allocation159_spill] sm:$0xff] }
0x1551   : > { %v8026_v31 = vsel %vm4594_vm6, %v17951_v53, %v7994_v39 }
0x1552   : > { %v8083_v24 = vmul.f32 1.442695, %v8026_v31  ;;  %v7956_v29 = vpop.xlane.xlu0 %7955 }
0x1553   : > { %v7996_v11 = vsub.f32 0.0, %v7956_v29 }
0x1554   : > { %13894 = vpow2.f32 %v8083_v24 }
0x1555   : > { %v8028_v5 = vsel %vm4594_vm6, %v17957_v26, %v7996_v11  ;;  %v8136_v26 = vpop.permute.xlu1 %8135  ;;  %v20621_v11 = vld [vmem:[#allocation102_spill] sm:$0xff] }
0x1556   : > { %v8087_v58 = vmul.f32 1.442695, %v8028_v5  ;;  %v7962_v17 = vpop.xlane.xlu0 %7961 }
0x1557   : > { %v7998_v15 = vsub.f32 0.0, %v7962_v17 }
0x1558   : > { %13896 = vpow2.f32 %v8087_v58 }
0x1559   : > { %v8030_v59 = vsel %vm4594_vm6, %v17961_v12, %v7998_v15  ;;  %v8140_v37 = vpop.permute.xlu1 %8139 }
0x155a   : > { %v8091_v52 = vmul.f32 1.442695, %v8030_v59  ;;  %v7968_v16 = vpop.xlane.xlu0 %7967  ;;  %v20623_v59 = vld [vmem:[#allocation146_spill] sm:$0xff] }
0x155b   : > { %v8000_v42 = vsub.f32 0.0, %v7968_v16  ;;  %v20624_v16 = vld [vmem:[#allocation98_spill] sm:$0xff] }
0x155c   : > { %13898 = vpow2.f32 %v8091_v52 }
0x155d   : > { %v8032_v53 = vsel %vm4594_vm6, %v17967_v13, %v8000_v42 }
0x155e   : > { %v13895_v27 = vpop.eup %13894  ;;  %v8095_v25 = vmul.f32 1.442695, %v8032_v53  ;;  %v8132_v34 = vpop.permute.xlu0 %8131 }
0x155f   : > { %8179 = vrot.lane.b32.xlu1 %v13895_v27, %s14170_s0  ;;  %v8226_v50 = vmul.f32 %v8132_v34, %v16489_v21  ;;  %v20625_v27 = vld [vmem:[#allocation156_spill] sm:$0xff] }
0x1560   : > { %13900 = vpow2.f32 %v8095_v25  ;;  %v20626_v25 = vld [vmem:[#allocation147_spill] sm:$0xff] }
0x1561   : > { %v18089_v3 = vadd.f32 %v17871_v2, %v8226_v50  ;;  %v20620_v2 = vld [vmem:[#allocation145_spill] sm:$0xff]  ;;  %v20631_v50 = vld [vmem:[#allocation106_spill] sm:$0xff] }
0x1562   : > { %v13897_v41 = vpop.eup %13896  ;;  %v8134_v14 = vpop.permute.xlu0 %8133 }
0x1563   : > { %v8227_v46 = vmul.f32 %v8134_v14, %v16461_v60  ;;  %8183 = vrot.lane.b32.xlu1 %v13897_v41, %s14170_s0  ;;  %v20627_v14 = vld [vmem:[#allocation104_spill] sm:$0xff] }
0x1565   : > { %v18061_v12 = vadd.f32 %v17804_v7, %v8227_v46 }
0x1566   : > { %v13899_v43 = vpop.eup %13898  ;;  %v8138_v45 = vpop.permute.xlu0 %8137 }
0x1567   : > { %v8229_v13 = vmul.f32 %v8138_v45, %v16469_v1  ;;  %8187 = vrot.lane.b32.xlu1 %v13899_v43, %s14170_s0  ;;  %8463 = vrot.lane.b32.xlu0 %v18061_v12, %s14169_s26  ;;  %v8144_v1 = vpop.permute.xlu1 %8143  ;;  %v20629_v45 = vld [vmem:[#allocation148_spill] sm:$0xff] }
0x1569   : > { %v18069_v22 = vadd.f32 %v17808_v57, %v8229_v13 }
0x156a   : > { %v13901_v60 = vpop.eup %13900  ;;  %v8142_v28 = vpop.permute.xlu0 %8141 }
0x156b   : > { %v8231_v7 = vmul.f32 %v8142_v28, %v16480_v19  ;;  %8191 = vrot.lane.b32.xlu1 %v13901_v60, %s14170_s0  ;;  %8467 = vrot.lane.b32.xlu0 %v18069_v22, %s14169_s26  ;;  %v8228_v19 = vmul.f32 %v8136_v26, %v16500_v32  ;;  %v8148_v21 = vpop.permute.xlu1 %8147  ;;  %v20619_v32 = vld [vmem:[#allocation155_spill] sm:$0xff]  ;;  %v20630_v60 = vld [vmem:[#allocation157_spill] sm:$0xff] }
0x156c   : > { %v8230_v31 = vmul.f32 %v8140_v37, %v20619_v32 }
0x156d   : > { %v18080_v10 = vadd.f32 %v17814_v54, %v8231_v7 }
0x156e   : > { %v8146_v57 = vpop.permute.xlu0 %8145  ;;  %v18112_v17 = vadd.f32 %v17890_v48, %v8230_v31  ;;  %v8234_v48 = vmul.f32 %v8148_v21, %v20625_v27  ;;  %v20634_v31 = vld [vmem:[#allocation110_spill] sm:$0xff] }
0x156f   : > { %v8233_v55 = vmul.f32 %v8146_v57, %v16492_v9  ;;  %8471 = vrot.lane.b32.xlu0 %v18080_v10, %s14169_s26  ;;  %8459 = vrot.lane.b32.xlu1 %v18076_v44, %s14169_s26  ;;  %v18100_v9 = vadd.f32 %v17884_v47, %v8228_v19  ;;  %v8152_v58 = vpop.permute.xlu1 %8151  ;;  %v20622_v47 = vld [vmem:[#allocation160_spill] sm:$0xff] }
0x1570   : > { %v8232_v15 = vmul.f32 %v8144_v1, %v20622_v47  ;;  %v18136_v43 = vadd.f32 %v17912_v51, %v8234_v48  ;;  %v20632_v19 = vld [vmem:[#allocation100_spill] sm:$0xff] }
0x1571   : > { %v18092_v30 = vadd.f32 %v20617_v4, %v8233_v55 }
0x1572   : > { %v8150_v54 = vpop.permute.xlu0 %8149  ;;  %v18124_v53 = vadd.f32 %v17896_v38, %v8232_v15  ;;  %v20628_v38 = vld [vmem:[#allocation99_spill] sm:$0xff]  ;;  %v20637_v15 = vld [vmem:[#allocation118_spill] sm:$0xff] }
0x1573   : > { %v8235_v39 = vmul.f32 %v8150_v54, %v20618_v0  ;;  %8475 = vrot.lane.b32.xlu0 %v18092_v30, %s14169_s26  ;;  %8461 = vrot.lane.b32.xlu1 %v18089_v3, %s14169_s26  ;;  %v8156_v26 = vpop.permute.xlu1 %8155  ;;  %v8236_v37 = vmul.f32 %v8152_v58, %v20628_v38  ;;  %v20633_v54 = vld [vmem:[#allocation158_spill] sm:$0xff]  ;;  %v20643_v38 = vld [vmem:[#allocation105_spill] sm:$0xff] }
0x1574   : > { %v8238_v57 = vmul.f32 %v8156_v26, %v20631_v50  ;;  %v20641_v26 = vld [vmem:[#allocation122_spill] sm:$0xff]  ;;  %v20645_v50 = vld [vmem:[#allocation153_spill] sm:$0xff] }
0x1575   : > { %v18104_v24 = vadd.f32 %v20620_v2, %v8235_v39  ;;  %v18145_v1 = vadd.f32 %v17920_v63, %v8236_v37 }
0x1576   : > { %v8154_v29 = vpop.permute.xlu0 %8153  ;;  %v18154_v21 = vadd.f32 %v17924_v56, %v8238_v57  ;;  %v20636_v56 = vld [vmem:[#allocation149_spill] sm:$0xff] }
0x1577   : > { %v8237_v5 = vmul.f32 %v8154_v29, %v20621_v11  ;;  %8479 = vrot.lane.b32.xlu0 %v18104_v24, %s14169_s26  ;;  %8465 = vrot.lane.b32.xlu1 %v18100_v9, %s14169_s26  ;;  %v8160_v7 = vpop.permute.xlu1 %8159  ;;  %v20635_v29 = vld [vmem:[#allocation101_spill] sm:$0xff] }
0x1578   : > { %v8240_v0 = vmul.f32 %v8160_v7, %v20633_v54 }
0x1579   : > { %v18116_v8 = vadd.f32 %v20623_v59, %v8237_v5  ;;  %v20638_v59 = vld [vmem:[#allocation151_spill] sm:$0xff] }
0x157a   : > { %v8158_v52 = vpop.permute.xlu0 %8157 }
0x157b   : > { %v8239_v42 = vmul.f32 %v8158_v52, %v20624_v16  ;;  %8483 = vrot.lane.b32.xlu0 %v18116_v8, %s14169_s26  ;;  %8469 = vrot.lane.b32.xlu1 %v18112_v17, %s14169_s26  ;;  %v8164_v39 = vpop.permute.xlu1 %8163  ;;  %v20639_v16 = vld [vmem:[#allocation103_spill] sm:$0xff] }
0x157c   : > { %v8242_v11 = vmul.f32 %v8164_v39, %v20635_v29 }
0x157d   : > { %v18128_v34 = vadd.f32 %v20626_v25, %v8239_v42 }
0x157e   : > { %v8162_v41 = vpop.permute.xlu0 %8161  ;;  %v18172_v52 = vadd.f32 %v20638_v59, %v8242_v11 }
0x157f   : > { %v8241_v46 = vmul.f32 %v8162_v41, %v20627_v14  ;;  %8487 = vrot.lane.b32.xlu0 %v18128_v34, %s14169_s26  ;;  %8473 = vrot.lane.b32.xlu1 %v18124_v53, %s14169_s26  ;;  %v8168_v58 = vpop.permute.xlu1 %8167  ;;  %v20642_v14 = vld [vmem:[#allocation152_spill] sm:$0xff] }
0x1580   : > { %v8244_v42 = vmul.f32 %v8168_v58, %v20639_v16  ;;  %v20656_v16 = vld [vmem:[#allocation57_spill] sm:$0xff] }
0x1581   : > { %v8401_v13 = vadd.f32 %v20629_v45, %v8241_v46 }
0x1582   : > { %v8166_v6 = vpop.permute.xlu0 %8165  ;;  %v18181_v46 = vadd.f32 %v20642_v14, %v8244_v42 }
0x1583   : > { %v8243_v28 = vmul.f32 %v8166_v6, %v20630_v60  ;;  %8491 = vrot.lane.b32.xlu0 %v8401_v13, %s14169_s26  ;;  %8477 = vrot.lane.b32.xlu1 %v18136_v43, %s14169_s26  ;;  %v8172_v48 = vpop.permute.xlu1 %8171  ;;  %v20644_v60 = vld [vmem:[#allocation126_spill] sm:$0xff] }
0x1584   : > { %v8246_v37 = vmul.f32 %v8172_v48, %v20643_v38  ;;  %v20658_v48 = vld [vmem:[#allocation37_spill] sm:$0xff] }
0x1585   : > { %v8403_v51 = vadd.f32 %v17882_v20, %v8243_v28  ;;  %v18163_v20 = vadd.f32 %v17930_v61, %v8240_v0  ;;  %v20640_v61 = vld [vmem:[#allocation150_spill] sm:$0xff]  ;;  %v20647_v0 = vld [vmem:[#allocation108_spill] sm:$0xff]  ;;  %v20660_v38 = vld [vmem:[#allocation65_spill] sm:$0xff] }
0x1586   : > { %v8170_v55 = vpop.permute.xlu0 %8169  ;;  %v18190_v57 = vadd.f32 %v20645_v50, %v8246_v37 }
0x1587   : > { %v8245_v4 = vmul.f32 %v8170_v55, %v20632_v19  ;;  %8495 = vrot.lane.b32.xlu0 %v8403_v51, %s14169_s26  ;;  %8481 = vrot.lane.b32.xlu1 %v18145_v1, %s14169_s26  ;;  %v20646_v19 = vld [vmem:[#allocation128_spill] sm:$0xff] }
0x1589   : > { %v8405_v63 = vadd.f32 %v17888_v36, %v8245_v4 }
0x158a   : > { %v8174_v32 = vpop.permute.xlu0 %8173 }
0x158b   : > { %v8247_v2 = vmul.f32 %v8174_v32, %v20634_v31  ;;  %8499 = vrot.lane.b32.xlu0 %v8405_v63, %s14169_s26  ;;  %8485 = vrot.lane.b32.xlu1 %v18154_v21, %s14169_s26 }
0x158d   : > { %v8407_v5 = vadd.f32 %v20636_v56, %v8247_v2  ;;  %v20651_v2 = vld [vmem:[#allocation161_spill] sm:$0xff]  ;;  %v20652_v56 = vld [vmem:[#allocation131_spill] sm:$0xff] }
0x158e   : > { %v8178_v47 = vpop.permute.xlu0 %8177 }
0x158f   : > { %v8249_v36 = vmul.f32 %v8178_v47, %v20637_v15  ;;  %8503 = vrot.lane.b32.xlu0 %v8407_v5, %s14169_s26  ;;  %8489 = vrot.lane.b32.xlu1 %v18163_v20, %s14169_s26 }
0x1591   : > { %v8409_v27 = vadd.f32 %v20640_v61, %v8249_v36  ;;  %v20655_v36 = vld [vmem:[#allocation54_spill] sm:$0xff]  ;;  %v20657_v61 = vld [vmem:[#allocation35_spill] sm:$0xff] }
0x1592   : > { %v8182_v25 = vpop.permute.xlu0 %8181 }
0x1593   : > { %v8251_v41 = vmul.f32 %v8182_v25, %v20641_v26  ;;  %8507 = vrot.lane.b32.xlu0 %v8409_v27, %s14169_s26  ;;  %8493 = vrot.lane.b32.xlu1 %v18172_v52, %s14169_s26 }
0x1595   : > { %v8411_v45 = vadd.f32 %v17983_v49, %v8251_v41  ;;  %v20648_v49 = vld [vmem:[#allocation154_spill] sm:$0xff] }
0x1596   : > { %v8186_v6 = vpop.permute.xlu0 %8185  ;;  %v20659_v41 = vld [vmem:[#allocation62_spill] sm:$0xff] }
0x1597   : > { %v8253_v28 = vmul.f32 %v8186_v6, %v20644_v60  ;;  %8511 = vrot.lane.b32.xlu0 %v8411_v45, %s14169_s26  ;;  %8497 = vrot.lane.b32.xlu1 %v18181_v46, %s14169_s26  ;;  %v20661_v6 = vld [vmem:[#allocation3_spill] sm:$0xff] }
0x1598   : > { %v8176_v7 = vpop.permute.xlu1 %8175 }
0x1599   : > { %v8413_v55 = vadd.f32 %v18033_v40, %v8253_v28  ;;  %v8248_v4 = vmul.f32 %v8176_v7, %v20646_v19  ;;  %v20662_v7 = vld [vmem:[#allocation5_spill] sm:$0xff] }
0x159a   : > { %v8190_v54 = vpop.permute.xlu0 %8189 }
0x159b   : > { %v8255_v39 = vmul.f32 %v8190_v54, %v20647_v0  ;;  %8515 = vrot.lane.b32.xlu0 %v8413_v55, %s14169_s26  ;;  %8501 = vrot.lane.b32.xlu1 %v18190_v57, %s14169_s26  ;;  %v8408_v32 = vadd.f32 %v20648_v49, %v8248_v4  ;;  %v20664_v4 = vld [vmem:[#allocation9_spill] sm:$0xff]  ;;  %v20665_v0 = vld [vmem:[#allocation11_spill] sm:$0xff] }
0x159c   : > { %v20666_v49 = vld [vmem:[#allocation13_spill] sm:$0xff] }
0x159d   : > { %v18200_v31 = vadd.f32 %v18047_v23, %v8255_v39  ;;  %v20649_v23 = vld [vmem:[#allocation162_spill] sm:$0xff] }
0x159f   : > { %8519 = vrot.lane.b32.xlu0 %v18200_v31, %s14169_s26  ;;  %8505 = vrot.lane.b32.xlu1 %v8408_v32, %s14169_s26 }
0x15a3   : > { %10056 = vrot.lane.b32.xlu0 %v8401_v13, %s14170_s0 }
0x15a7   : > { %10060 = vrot.lane.b32.xlu0 %v8403_v51, %s14170_s0 }
0x15ab   : > { %10064 = vrot.lane.b32.xlu0 %v8405_v63, %s14170_s0  ;;  %v20650_v63 = vld [vmem:[#allocation116_spill] sm:$0xff] }
0x15af   : > { %10068 = vrot.lane.b32.xlu0 %v8407_v5, %s14170_s0 }
0x15b3   : > { %10072 = vrot.lane.b32.xlu0 %v8409_v27, %s14170_s0 }
0x15b7   : > { %10076 = vrot.lane.b32.xlu0 %v8411_v45, %s14170_s0  ;;  %v11659_v45 = vld [vmem:[%s19983_s16 + $0xc] sm:$0xf] }
0x15b8   : > { %13084 = vmatprep.subr.msk.mxu1 %vm2355_vm3, %v11659_v45 }
0x15b9   : > { %13085 = vmatpush3.msk.msra.mxu1 %vm2355_vm3, %v11659_v45  ;;  %v20708_v45 = vld [vmem:[#allocation82_spill] sm:$0xff] }
0x15bb   : > { %10080 = vrot.lane.b32.xlu0 %v8413_v55, %s14170_s0  ;;  %v20663_v55 = vld [vmem:[#allocation7_spill] sm:$0xff] }
0x15bf   : > { %10024 = vrot.lane.b32.xlu0 %v18076_v44, %s14170_s0 }
0x15c3   : > { %10028 = vrot.lane.b32.xlu0 %v18061_v12, %s14170_s0 }
0x15c7   : > { %10032 = vrot.lane.b32.xlu0 %v18069_v22, %s14170_s0 }
0x15cb   : > { %10036 = vrot.lane.b32.xlu0 %v18080_v10, %s14170_s0 }
0x15cf   : > { %10040 = vrot.lane.b32.xlu0 %v18092_v30, %s14170_s0 }
0x15d1   : > { %v8180_v40 = vpop.permute.xlu1 %8179 }
0x15d2   : > { %v8250_v13 = vmul.f32 %v8180_v40, %v20649_v23  ;;  %v20671_v40 = vld [vmem:[#allocation50_spill] sm:$0xff]  ;;  %v20673_v23 = vld [vmem:[#allocation53_spill] sm:$0xff] }
0x15d3   : > { %10044 = vrot.lane.b32.xlu0 %v18104_v24, %s14170_s0 }
0x15d4   : > { %v8410_v44 = vadd.f32 %v17979_v33, %v8250_v13  ;;  %v20675_v13 = vld [vmem:[#allocation56_spill] sm:$0xff] }
0x15d5   : > { %v8184_v51 = vpop.permute.xlu1 %8183 }
0x15d6   : > { %v8252_v12 = vmul.f32 %v8184_v51, %v20650_v63  ;;  %8509 = vrot.lane.b32.xlu1 %v8410_v44, %s14169_s26  ;;  %v20678_v51 = vld [vmem:[#allocation28_spill] sm:$0xff] }
0x15d7   : > { %10048 = vrot.lane.b32.xlu0 %v18116_v8, %s14170_s0  ;;  %v20679_v63 = vld [vmem:[#allocation60_spill] sm:$0xff] }
0x15d8   : > { %v8412_v22 = vadd.f32 %v17987_v18, %v8252_v12  ;;  %v20653_v18 = vld [vmem:[#allocation49_spill] sm:$0xff]  ;;  %v20680_v12 = vld [vmem:[#allocation30_spill] sm:$0xff] }
0x15d9   : > { %v8464_v10 = vpop.permute.xlu0 %8463  ;;  %v8188_v30 = vpop.permute.xlu1 %8187 }
0x15da   : > { %v8254_v29 = vmul.f32 %v8188_v30, %v20651_v2  ;;  %8513 = vrot.lane.b32.xlu1 %v8412_v22, %s14169_s26  ;;  %v20683_v30 = vld [vmem:[#allocation63_spill] sm:$0xff]  ;;  %v20684_v2 = vld [vmem:[#allocation69_spill] sm:$0xff] }
0x15db   : > { %10052 = vrot.lane.b32.xlu0 %v18128_v34, %s14170_s0 }
0x15dc   : > { %v8414_v33 = vadd.f32 %v18002_v35, %v8254_v29  ;;  %v20654_v35 = vld [vmem:[#allocation52_spill] sm:$0xff] }
0x15dd   : > { %v8468_v24 = vpop.permute.xlu0 %8467  ;;  %v8192_v11 = vpop.permute.xlu1 %8191  ;;  %v20685_v29 = vld [vmem:[#allocation64_spill] sm:$0xff] }
0x15de   : > { %v8256_v5 = vmul.f32 %v8192_v11, %v20652_v56  ;;  %8517 = vrot.lane.b32.xlu1 %v8414_v33, %s14169_s26  ;;  %v20687_v11 = vld [vmem:[#allocation2_spill] sm:$0xff]  ;;  %v20688_v56 = vld [vmem:[#allocation77_spill] sm:$0xff] }
0x15df   : > { %10568 = vrot.lane.b32.xlu0 %v20653_v18, %s14173_s2  ;;  %v20689_v18 = vld [vmem:[#allocation4_spill] sm:$0xff] }
0x15e0   : > { %v8416_v8 = vadd.f32 %v18045_v62, %v8256_v5 }
0x15e1   : > { %v8472_v58 = vpop.permute.xlu0 %8471  ;;  %v8460_v47 = vpop.permute.xlu1 %8459 }
0x15e2   : > { %8521 = vrot.lane.b32.xlu1 %v8416_v8, %s14169_s26  ;;  %13036 = vmatprep.mubr.msk.f32.mxu0 %vm3480_vm5, %v8460_v47 }
0x15e3   : > { %10572 = vrot.lane.b32.xlu0 %v20654_v35, %s14173_s2  ;;  %v20691_v35 = vld [vmem:[#allocation6_spill] sm:$0xff] }
0x15e5   : > { %v8476_v34 = vpop.permute.xlu0 %8475  ;;  %v8462_v15 = vpop.permute.xlu1 %8461 }
0x15e6   : > { %10058 = vrot.lane.b32.xlu1 %v18172_v52, %s14170_s0  ;;  %13037 = vmatmul.mubr.msk.f32.vlgmr.msra.gmra.mrb[216].mxu0 %vm3480_vm5, %v8462_v15 }
0x15e7   : > { %10576 = vrot.lane.b32.xlu0 %v20655_v36, %s14173_s2  ;;  %13039 = vmatprep.mubr.msk.f32.mxu0 %vm3480_vm5, %v8464_v10  ;;  %v20682_v10 = vld [vmem:[#allocation33_spill] sm:$0xff]  ;;  %v20692_v36 = vld [vmem:[#allocation8_spill] sm:$0xff] }
0x15e9   : > { %v8480_v62 = vpop.permute.xlu0 %8479  ;;  %v8466_v59 = vpop.permute.xlu1 %8465 }
0x15ea   : > { %10062 = vrot.lane.b32.xlu1 %v18181_v46, %s14170_s0  ;;  %13040 = vmatmul.mubr.msk.f32.gmra.mrb[218].mxu0 %vm3480_vm5, %v8466_v59  ;;  %v20693_v59 = vld [vmem:[#allocation10_spill] sm:$0xff] }
0x15eb   : > { %10580 = vrot.lane.b32.xlu0 %v20656_v16, %s14173_s2  ;;  %13042 = vmatprep.mubr.msk.f32.mxu0 %vm3480_vm5, %v8468_v24  ;;  %v20694_v16 = vld [vmem:[#allocation12_spill] sm:$0xff] }
0x15ed   : > { %v8470_v52 = vpop.permute.xlu1 %8469  ;;  %v8484_v42 = vpop.permute.xlu0 %8483 }
0x15ee   : > { %10066 = vrot.lane.b32.xlu1 %v18190_v57, %s14170_s0  ;;  %13043 = vmatmul.mubr.msk.f32.gmra.mrb[220].mxu0 %vm3480_vm5, %v8470_v52  ;;  %v20696_v52 = vld [vmem:[#allocation17_spill] sm:$0xff] }
0x15ef   : > { %10584 = vrot.lane.b32.xlu0 %v20657_v61, %s14173_s2  ;;  %13045 = vmatprep.mubr.msk.f32.mxu0 %vm3480_vm5, %v8472_v58  ;;  %v20690_v58 = vld [vmem:[#allocation81_spill] sm:$0xff]  ;;  %v20698_v61 = vld [vmem:[#allocation19_spill] sm:$0xff] }
0x15f1   : > { %v8474_v27 = vpop.permute.xlu1 %8473  ;;  %v8488_v25 = vpop.permute.xlu0 %8487 }
0x15f2   : > { %10070 = vrot.lane.b32.xlu1 %v8408_v32, %s14170_s0  ;;  %13046 = vmatmul.mubr.msk.f32.gmra.mrb[222].mxu0 %vm3480_vm5, %v8474_v27  ;;  %v20668_v32 = vld [vmem:[#allocation31_spill] sm:$0xff]  ;;  %v20699_v27 = vld [vmem:[#allocation21_spill] sm:$0xff] }
0x15f3   : > { %10588 = vrot.lane.b32.xlu0 %v20658_v48, %s14173_s2  ;;  %13048 = vmatprep.mubr.msk.f32.mxu0 %vm3480_vm5, %v8476_v34  ;;  %v20700_v48 = vld [vmem:[#allocation23_spill] sm:$0xff] }
0x15f5   : > { %v8478_v26 = vpop.permute.xlu1 %8477  ;;  %v8492_v46 = vpop.permute.xlu0 %8491 }
0x15f6   : > { %10074 = vrot.lane.b32.xlu1 %v8410_v44, %s14170_s0  ;;  %13049 = vmatmul.mubr.msk.f32.gmra.mrb[224].mxu0 %vm3480_vm5, %v8478_v26  ;;  %v20677_v44 = vld [vmem:[#allocation59_spill] sm:$0xff] }
0x15f7   : > { %10592 = vrot.lane.b32.xlu0 %v20659_v41, %s14173_s2  ;;  %13051 = vmatprep.mubr.msk.f32.mxu0 %vm3480_vm5, %v8480_v62  ;;  %v20702_v26 = vld [vmem:[#allocation27_spill] sm:$0xff]  ;;  %v20703_v41 = vld [vmem:[#allocation29_spill] sm:$0xff] }
0x15f9   : > { %v8482_v14 = vpop.permute.xlu1 %8481  ;;  %v8496_v60 = vpop.permute.xlu0 %8495 }
0x15fa   : > { %10078 = vrot.lane.b32.xlu1 %v8412_v22, %s14170_s0  ;;  %13052 = vmatmul.mubr.msk.f32.gmra.mrb[226].mxu0 %vm3480_vm5, %v8482_v14  ;;  %v20681_v22 = vld [vmem:[#allocation61_spill] sm:$0xff]  ;;  %v20704_v14 = vld [vmem:[#allocation32_spill] sm:$0xff] }
0x15fb   : > { %10596 = vrot.lane.b32.xlu0 %v20660_v38, %s14173_s2  ;;  %13054 = vmatprep.mubr.msk.f32.mxu0 %vm3480_vm5, %v8484_v42  ;;  %v20697_v42 = vld [vmem:[#allocation16_spill] sm:$0xff]  ;;  %v20706_v38 = vld [vmem:[#allocation74_spill] sm:$0xff] }
0x15fd   : > { %v8486_v37 = vpop.permute.xlu1 %8485  ;;  %v8500_v57 = vpop.permute.xlu0 %8499 }
0x15fe   : > { %10082 = vrot.lane.b32.xlu1 %v8414_v33, %s14170_s0  ;;  %13055 = vmatmul.mubr.msk.f32.gmra.mrb[228].mxu0 %vm3480_vm5, %v8486_v37  ;;  %v20686_v33 = vld [vmem:[#allocation73_spill] sm:$0xff]  ;;  %v20707_v37 = vld [vmem:[#allocation78_spill] sm:$0xff] }
0x15ff   : > { %10632 = vrot.lane.b32.xlu0 %v20661_v6, %s14174_s4  ;;  %13057 = vmatprep.mubr.msk.f32.mxu0 %vm3480_vm5, %v8488_v25  ;;  %v20701_v25 = vld [vmem:[#allocation25_spill] sm:$0xff]  ;;  %v11695_v6 = vld [vmem:[%s19985_s18 + $0xc] sm:$0xf] }
0x1600   : > { %13134 = vmatprep.subr.msk.mxu0 %vm2355_vm3, %v11695_v6 }
0x1601   : > { %v8490_v28 = vpop.permute.xlu1 %8489  ;;  %v8504_v54 = vpop.permute.xlu0 %8503  ;;  %13135 = vmatpush3.msk.msra.mxu0 %vm2355_vm3, %v11695_v6 }
0x1602   : > { %10086 = vrot.lane.b32.xlu1 %v8416_v8, %s14170_s0  ;;  %13058 = vmatmul.mubr.msk.f32.gmra.mrb[230].mxu0 %vm3480_vm5, %v8490_v28 }
0x1603   : > { %10636 = vrot.lane.b32.xlu0 %v20662_v7, %s14174_s4  ;;  %13060 = vmatprep.mubr.msk.f32.mxu0 %vm3480_vm5, %v8492_v46  ;;  %v20705_v46 = vld [vmem:[#allocation70_spill] sm:$0xff] }
0x1605   : > { %v8494_v50 = vpop.permute.xlu1 %8493  ;;  %v8508_v39 = vpop.permute.xlu0 %8507 }
0x1606   : > { %10026 = vrot.lane.b32.xlu1 %v18089_v3, %s14170_s0  ;;  %13061 = vmatmul.mubr.msk.f32.gmra.mrb[232].mxu0 %vm3480_vm5, %v8494_v50 }
0x1607   : > { %10640 = vrot.lane.b32.xlu0 %v20663_v55, %s14174_s4  ;;  %13063 = vmatprep.mubr.msk.f32.mxu0 %vm3480_vm5, %v8496_v60  ;;  %v18426_v60 = vld [vmem:[%s19982_s15 + $0x3] ss:$0 sm:$0xff] }
0x1609   : > { %v8498_v19 = vpop.permute.xlu1 %8497  ;;  %v8512_v24 = vpop.permute.xlu0 %8511 }
0x160a   : > { %10030 = vrot.lane.b32.xlu1 %v18100_v9, %s14170_s0  ;;  %13064 = vmatmul.mubr.msk.f32.gmra.mrb[234].mxu0 %vm3480_vm5, %v8498_v19 }
0x160b   : > { %10644 = vrot.lane.b32.xlu0 %v20664_v4, %s14174_s4  ;;  %13066 = vmatprep.mubr.msk.f32.mxu0 %vm3480_vm5, %v8500_v57 }
0x160d   : > { %v8502_v3 = vpop.permute.xlu1 %8501  ;;  %v8516_v8 = vpop.permute.xlu0 %8515 }
0x160e   : > { %10034 = vrot.lane.b32.xlu1 %v18112_v17, %s14170_s0  ;;  %13067 = vmatmul.mubr.msk.f32.gmra.mrb[236].mxu0 %vm3480_vm5, %v8502_v3  ;;  %v20667_v17 = vld [vmem:[#allocation14_spill] sm:$0xff] }
0x160f   : > { %10648 = vrot.lane.b32.xlu0 %v20665_v0, %s14174_s4  ;;  %13069 = vmatprep.mubr.msk.f32.mxu0 %vm3480_vm5, %v8504_v54 }
0x1611   : > { %v8506_v9 = vpop.permute.xlu1 %8505  ;;  %v8520_v15 = vpop.permute.xlu0 %8519 }
0x1612   : > { %10038 = vrot.lane.b32.xlu1 %v18124_v53, %s14170_s0  ;;  %13070 = vmatmul.mubr.msk.f32.gmra.mrb[238].mxu0 %vm3480_vm5, %v8506_v9  ;;  %v20669_v53 = vld [vmem:[#allocation18_spill] sm:$0xff] }
0x1613   : > { %10652 = vrot.lane.b32.xlu0 %v20666_v49, %s14174_s4  ;;  %13072 = vmatprep.mubr.msk.f32.mxu0 %vm3480_vm5, %v8508_v39 }
0x1616   : > { %10042 = vrot.lane.b32.xlu1 %v18136_v43, %s14170_s0  ;;  %v20670_v43 = vld [vmem:[#allocation20_spill] sm:$0xff] }
0x1617   : > { %10656 = vrot.lane.b32.xlu0 %v20667_v17, %s14174_s4 }
0x161a   : > { %10046 = vrot.lane.b32.xlu1 %v18145_v1, %s14170_s0  ;;  %v20672_v1 = vld [vmem:[#allocation22_spill] sm:$0xff] }
0x161b   : > { %10660 = vrot.lane.b32.xlu0 %v20668_v32, %s14174_s4 }
0x161e   : > { %10050 = vrot.lane.b32.xlu1 %v18154_v21, %s14170_s0  ;;  %v20674_v21 = vld [vmem:[#allocation24_spill] sm:$0xff] }
0x161f   : > { %10696 = vrot.lane.b32.xlu0 %v20669_v53, %s14175_s21 }
0x1622   : > { %10054 = vrot.lane.b32.xlu1 %v18163_v20, %s14170_s0  ;;  %v20676_v20 = vld [vmem:[#allocation26_spill] sm:$0xff] }
0x1623   : > { %10700 = vrot.lane.b32.xlu0 %v20670_v43, %s14175_s21 }
0x1626   : > { %10570 = vrot.lane.b32.xlu1 %v20671_v40, %s14173_s2 }
0x1627   : > { %10704 = vrot.lane.b32.xlu0 %v20672_v1, %s14175_s21 }
0x162a   : > { %10574 = vrot.lane.b32.xlu1 %v20673_v23, %s14173_s2 }
0x162b   : > { %10708 = vrot.lane.b32.xlu0 %v20674_v21, %s14175_s21 }
0x162e   : > { %10578 = vrot.lane.b32.xlu1 %v20675_v13, %s14173_s2 }
0x162f   : > { %10712 = vrot.lane.b32.xlu0 %v20676_v20, %s14175_s21 }
0x1632   : > { %10582 = vrot.lane.b32.xlu1 %v20677_v44, %s14173_s2 }
0x1633   : > { %10716 = vrot.lane.b32.xlu0 %v20678_v51, %s14175_s21 }
0x1636   : > { %10586 = vrot.lane.b32.xlu1 %v20679_v63, %s14173_s2 }
0x1637   : > { %10720 = vrot.lane.b32.xlu0 %v20680_v12, %s14175_s21 }
0x163a   : > { %10590 = vrot.lane.b32.xlu1 %v20681_v22, %s14173_s2 }
0x163b   : > { %10724 = vrot.lane.b32.xlu0 %v20682_v10, %s14175_s21 }
0x163e   : > { %10594 = vrot.lane.b32.xlu1 %v20683_v30, %s14173_s2 }
0x163f   : > { %10744 = vrot.lane.b32.xlu0 %v20684_v2, %s14176_s30 }
0x1642   : > { %10598 = vrot.lane.b32.xlu1 %v20685_v29, %s14173_s2 }
0x1643   : > { %10748 = vrot.lane.b32.xlu0 %v20686_v33, %s14176_s30 }
0x1646   : > { %10634 = vrot.lane.b32.xlu1 %v20687_v11, %s14174_s4 }
0x1647   : > { %10752 = vrot.lane.b32.xlu0 %v20688_v56, %s14176_s30 }
0x1648   : > { %v8510_v5 = vpop.permute.xlu1 %8509 }
0x1649   : > { %13073 = vmatmul.mubr.msk.f32.gmra.mrb[240].mxu0 %vm3480_vm5, %v8510_v5 }
0x164a   : > { %10638 = vrot.lane.b32.xlu1 %v20689_v18, %s14174_s4  ;;  %13075 = vmatprep.mubr.msk.f32.mxu0 %vm3480_vm5, %v8512_v24 }
0x164b   : > { %10756 = vrot.lane.b32.xlu0 %v20690_v58, %s14176_s30 }
0x164c   : > { %v8514_v47 = vpop.permute.xlu1 %8513 }
0x164d   : > { %13076 = vmatmul.mubr.msk.f32.gmra.mrb[242].mxu0 %vm3480_vm5, %v8514_v47 }
0x164e   : > { %10642 = vrot.lane.b32.xlu1 %v20691_v35, %s14174_s4  ;;  %13078 = vmatprep.mubr.msk.f32.mxu0 %vm3480_vm5, %v8516_v8 }
0x164f   : > { %10084 = vrot.lane.b32.xlu0 %v18200_v31, %s14170_s0  ;;  %v20695_v31 = vld [vmem:[#allocation15_spill] sm:$0xff] }
0x1650   : > { %v8518_v34 = vpop.permute.xlu1 %8517 }
0x1651   : > { %13079 = vmatmul.mubr.msk.f32.gmra.mrb[244].mxu0 %vm3480_vm5, %v8518_v34 }
0x1652   : > { %10646 = vrot.lane.b32.xlu1 %v20692_v36, %s14174_s4  ;;  %13081 = vmatprep.mubr.msk.f32.mxu0 %vm3480_vm5, %v8520_v15 }
0x1654   : > { %v8522_v62 = vpop.permute.xlu1 %8521 }
0x1655   : > { %13082 = vmatmul.mubr.msk.f32.gmra.mrb[246].mxu0 %vm3480_vm5, %v8522_v62 }
0x1656   : > { %10650 = vrot.lane.b32.xlu1 %v20693_v59, %s14174_s4 }
0x165a   : > { %10654 = vrot.lane.b32.xlu1 %v20694_v16, %s14174_s4 }
0x165e   : > { %10658 = vrot.lane.b32.xlu1 %v20695_v31, %s14174_s4 }
0x1662   : > { %10662 = vrot.lane.b32.xlu1 %v20696_v52, %s14174_s4 }
0x1666   : > { %10698 = vrot.lane.b32.xlu1 %v20697_v42, %s14175_s21 }
0x166a   : > { %10702 = vrot.lane.b32.xlu1 %v20698_v61, %s14175_s21 }
0x166e   : > { %10706 = vrot.lane.b32.xlu1 %v20699_v27, %s14175_s21 }
0x1672   : > { %10710 = vrot.lane.b32.xlu1 %v20700_v48, %s14175_s21 }
0x1676   : > { %10714 = vrot.lane.b32.xlu1 %v20701_v25, %s14175_s21 }
0x167a   : > { %10718 = vrot.lane.b32.xlu1 %v20702_v26, %s14175_s21 }
0x167e   : > { %10722 = vrot.lane.b32.xlu1 %v20703_v41, %s14175_s21 }
0x1682   : > { %10726 = vrot.lane.b32.xlu1 %v20704_v14, %s14175_s21  ;;  %s14178_s21 = smov 16  }
0x1686   : > { %10746 = vrot.lane.b32.xlu1 %v20705_v46, %s14176_s30 }
0x168a   : > { %10750 = vrot.lane.b32.xlu1 %v20706_v38, %s14176_s30 }
0x168e   : > { %10754 = vrot.lane.b32.xlu1 %v20707_v37, %s14176_s30 }
0x1692   : > { %10758 = vrot.lane.b32.xlu1 %v20708_v45, %s14176_s30 }
0x16b9   : > { %v13038_v28 = vpop.f32.mrb[216].mxu0 }
0x16ba   : > { %v8659_v7 = vadd.f32 %v13038_v28, %v18426_v60  ;;  %v8653_v50 = vpop.f32.mrb[217].mxu0 }
0x16bb   : > { %v8654_v57 = vadd.f32 %v18426_v60, %v8653_v50 }
0x16bc   : > { %v8813_v4 = vmax.f32 %v8659_v7, 0.0 }
0x16bd   : > { %v8812_v55 = vmax.f32 %v8654_v57, 0.0  ;;  %v13041_v19 = vpop.f32.mrb[218].mxu0 }
0x16be   : > { %v8669_v54 = vadd.f32 %v13041_v19, %v18426_v60  ;;  %v8663_v3 = vpop.f32.mrb[219].mxu0 }
0x16bf   : > { %v8664_v0 = vadd.f32 %v18426_v60, %v8663_v3  ;;  %13086 = vmatprep.mubr.msk.f32.mxu1 %vm2258_vm4, %v8812_v55 }
0x16c0   : > { %13087 = vmatmul.mubr.msk.f32.vlgmr.msra.gmra.mrb[232].mxu1 %vm2258_vm4, %v8813_v4  ;;  %v8815_v49 = vmax.f32 %v8669_v54, 0.0 }
0x16c1   : > { %v8814_v9 = vmax.f32 %v8664_v0, 0.0  ;;  %v13044_v39 = vpop.f32.mrb[220].mxu0 }
0x16c2   : > { %v8679_v17 = vadd.f32 %v13044_v39, %v18426_v60  ;;  %v8673_v32 = vpop.f32.mrb[221].mxu0 }
0x16c3   : > { %v8674_v53 = vadd.f32 %v18426_v60, %v8673_v32  ;;  %13089 = vmatprep.mubr.msk.f32.mxu1 %vm2258_vm4, %v8814_v9 }
0x16c4   : > { %13090 = vmatmul.mubr.msk.f32.gmra.mrb[234].mxu1 %vm2258_vm4, %v8815_v49  ;;  %v8817_v1 = vmax.f32 %v8679_v17, 0.0 }
0x16c5   : > { %v8816_v43 = vmax.f32 %v8674_v53, 0.0  ;;  %v13047_v40 = vpop.f32.mrb[222].mxu0 }
0x16c6   : > { %v8689_v23 = vadd.f32 %v13047_v40, %v18426_v60  ;;  %v8683_v21 = vpop.f32.mrb[223].mxu0 }
0x16c7   : > { %v8684_v13 = vadd.f32 %v18426_v60, %v8683_v21  ;;  %13092 = vmatprep.mubr.msk.f32.mxu1 %vm2258_vm4, %v8816_v43 }
0x16c8   : > { %13093 = vmatmul.mubr.msk.f32.gmra.mrb[236].mxu1 %vm2258_vm4, %v8817_v1  ;;  %v8819_v51 = vmax.f32 %v8689_v23, 0.0 }
0x16c9   : > { %v8818_v20 = vmax.f32 %v8684_v13, 0.0  ;;  %v13050_v44 = vpop.f32.mrb[224].mxu0 }
0x16ca   : > { %v8699_v63 = vadd.f32 %v13050_v44, %v18426_v60  ;;  %v8693_v12 = vpop.f32.mrb[225].mxu0 }
0x16cb   : > { %v8694_v22 = vadd.f32 %v18426_v60, %v8693_v12  ;;  %13095 = vmatprep.mubr.msk.f32.mxu1 %vm2258_vm4, %v8818_v20 }
0x16cc   : > { %13096 = vmatmul.mubr.msk.f32.gmra.mrb[238].mxu1 %vm2258_vm4, %v8819_v51  ;;  %v8821_v2 = vmax.f32 %v8699_v63, 0.0 }
0x16cd   : > { %v8820_v10 = vmax.f32 %v8694_v22, 0.0  ;;  %v13053_v30 = vpop.f32.mrb[226].mxu0 }
0x16ce   : > { %v8709_v29 = vadd.f32 %v13053_v30, %v18426_v60  ;;  %v8703_v33 = vpop.f32.mrb[227].mxu0 }
0x16cf   : > { %v8704_v24 = vadd.f32 %v18426_v60, %v8703_v33  ;;  %13098 = vmatprep.mubr.msk.f32.mxu1 %vm2258_vm4, %v8820_v10 }
0x16d0   : > { %13099 = vmatmul.mubr.msk.f32.gmra.mrb[240].mxu1 %vm2258_vm4, %v8821_v2  ;;  %v8823_v5 = vmax.f32 %v8709_v29, 0.0 }
0x16d1   : > { %v8822_v11 = vmax.f32 %v8704_v24, 0.0  ;;  %v13056_v56 = vpop.f32.mrb[228].mxu0  ;;  %v18495_v24 = vld [vmem:[%s19984_s17 + $0x3] ss:$0 sm:$0xff] }
0x16d2   : > { %v8719_v18 = vadd.f32 %v13056_v56, %v18426_v60  ;;  %v8713_v8 = vpop.f32.mrb[229].mxu0 }
0x16d3   : > { %v8714_v58 = vadd.f32 %v18426_v60, %v8713_v8  ;;  %13101 = vmatprep.mubr.msk.f32.mxu1 %vm2258_vm4, %v8822_v11 }
0x16d4   : > { %13102 = vmatmul.mubr.msk.f32.gmra.mrb[242].mxu1 %vm2258_vm4, %v8823_v5  ;;  %v8825_v34 = vmax.f32 %v8719_v18, 0.0 }
0x16d5   : > { %v8824_v47 = vmax.f32 %v8714_v58, 0.0  ;;  %v13059_v35 = vpop.f32.mrb[230].mxu0 }
0x16d6   : > { %v8729_v15 = vadd.f32 %v13059_v35, %v18426_v60  ;;  %v8723_v36 = vpop.f32.mrb[231].mxu0 }
0x16d7   : > { %v8724_v62 = vadd.f32 %v18426_v60, %v8723_v36  ;;  %13104 = vmatprep.mubr.msk.f32.mxu1 %vm2258_vm4, %v8824_v47 }
0x16d8   : > { %13105 = vmatmul.mubr.msk.f32.gmra.mrb[244].mxu1 %vm2258_vm4, %v8825_v34  ;;  %v8827_v31 = vmax.f32 %v8729_v15, 0.0 }
0x16d9   : > { %v8826_v59 = vmax.f32 %v8724_v62, 0.0  ;;  %v13062_v16 = vpop.f32.mrb[232].mxu0 }
0x16da   : > { %v8739_v52 = vadd.f32 %v13062_v16, %v18426_v60  ;;  %v8733_v42 = vpop.f32.mrb[233].mxu0 }
0x16db   : > { %v8734_v61 = vadd.f32 %v18426_v60, %v8733_v42  ;;  %13107 = vmatprep.mubr.msk.f32.mxu1 %vm2258_vm4, %v8826_v59 }
0x16dc   : > { %13108 = vmatmul.mubr.msk.f32.gmra.mrb[246].mxu1 %vm2258_vm4, %v8827_v31  ;;  %v8829_v25 = vmax.f32 %v8739_v52, 0.0 }
0x16dd   : > { %v8828_v27 = vmax.f32 %v8734_v61, 0.0  ;;  %v13065_v48 = vpop.f32.mrb[234].mxu0 }
0x16de   : > { %v8749_v26 = vadd.f32 %v13065_v48, %v18426_v60  ;;  %v8743_v41 = vpop.f32.mrb[235].mxu0 }
0x16df   : > { %v8744_v14 = vadd.f32 %v18426_v60, %v8743_v41  ;;  %13110 = vmatprep.mubr.msk.f32.mxu1 %vm2258_vm4, %v8828_v27 }
0x16e0   : > { %13111 = vmatmul.mubr.msk.f32.gmra.mrb[248].mxu1 %vm2258_vm4, %v8829_v25  ;;  %v8831_v37 = vmax.f32 %v8749_v26, 0.0 }
0x16e1   : > { %v8830_v46 = vmax.f32 %v8744_v14, 0.0  ;;  %v13068_v38 = vpop.f32.mrb[236].mxu0 }
0x16e2   : > { %v8759_v45 = vadd.f32 %v13068_v38, %v18426_v60  ;;  %v8753_v6 = vpop.f32.mrb[237].mxu0 }
0x16e3   : > { %v8754_v28 = vadd.f32 %v18426_v60, %v8753_v6  ;;  %13113 = vmatprep.mubr.msk.f32.mxu1 %vm2258_vm4, %v8830_v46 }
0x16e4   : > { %13114 = vmatmul.mubr.msk.f32.gmra.mrb[250].mxu1 %vm2258_vm4, %v8831_v37  ;;  %v8833_v57 = vmax.f32 %v8759_v45, 0.0 }
0x16e5   : > { %v8832_v7 = vmax.f32 %v8754_v28, 0.0  ;;  %v13071_v50 = vpop.f32.mrb[238].mxu0 }
0x16e6   : > { %v8769_v55 = vadd.f32 %v13071_v50, %v18426_v60  ;;  %v8763_v19 = vpop.f32.mrb[239].mxu0 }
0x16e7   : > { %v8764_v4 = vadd.f32 %v18426_v60, %v8763_v19  ;;  %13116 = vmatprep.mubr.msk.f32.mxu1 %vm2258_vm4, %v8832_v7 }
0x16e8   : > { %13117 = vmatmul.mubr.msk.f32.gmra.mrb[252].mxu1 %vm2258_vm4, %v8833_v57  ;;  %v8835_v3 = vmax.f32 %v8769_v55, 0.0 }
0x16e9   : > { %v8834_v54 = vmax.f32 %v8764_v4, 0.0 }
0x16eb   : > { %13119 = vmatprep.mubr.msk.f32.mxu1 %vm2258_vm4, %v8834_v54 }
0x16ec   : > { %13120 = vmatmul.mubr.msk.f32.gmra.mrb[254].mxu1 %vm2258_vm4, %v8835_v3 }
0x171c   : > { %v13074_v0 = vpop.f32.mrb[240].mxu0 }
0x171d   : > { %v8779_v9 = vadd.f32 %v13074_v0, %v18426_v60  ;;  %v8773_v39 = vpop.f32.mrb[241].mxu0 }
0x171e   : > { %v8774_v49 = vadd.f32 %v18426_v60, %v8773_v39 }
0x171f   : > { %v8837_v53 = vmax.f32 %v8779_v9, 0.0 }
0x1720   : > { %v8836_v17 = vmax.f32 %v8774_v49, 0.0  ;;  %v13077_v32 = vpop.f32.mrb[242].mxu0 }
0x1721   : > { %v8789_v43 = vadd.f32 %v13077_v32, %v18426_v60  ;;  %v8783_v40 = vpop.f32.mrb[243].mxu0 }
0x1722   : > { %v8784_v1 = vadd.f32 %v18426_v60, %v8783_v40  ;;  %13122 = vmatprep.mubr.msk.f32.mxu1 %vm2258_vm4, %v8836_v17 }
0x1723   : > { %13123 = vmatmul.mubr.msk.f32.gmra.mrb[0].mxu1 %vm2258_vm4, %v8837_v53  ;;  %v8839_v13 = vmax.f32 %v8789_v43, 0.0 }
0x1724   : > { %v8838_v23 = vmax.f32 %v8784_v1, 0.0  ;;  %v13080_v21 = vpop.f32.mrb[244].mxu0 }
0x1725   : > { %v8799_v20 = vadd.f32 %v13080_v21, %v18426_v60  ;;  %v8793_v44 = vpop.f32.mrb[245].mxu0 }
0x1726   : > { %v8794_v51 = vadd.f32 %v18426_v60, %v8793_v44  ;;  %13125 = vmatprep.mubr.msk.f32.mxu1 %vm2258_vm4, %v8838_v23 }
0x1727   : > { %13126 = vmatmul.mubr.msk.f32.gmra.mrb[2].mxu1 %vm2258_vm4, %v8839_v13  ;;  %v8841_v22 = vmax.f32 %v8799_v20, 0.0 }
0x1728   : > { %v8840_v63 = vmax.f32 %v8794_v51, 0.0  ;;  %v13083_v12 = vpop.f32.mrb[246].mxu0 }
0x1729   : > { %v8809_v10 = vadd.f32 %v13083_v12, %v18426_v60  ;;  %v8803_v30 = vpop.f32.mrb[247].mxu0 }
0x172a   : > { %v8804_v2 = vadd.f32 %v18426_v60, %v8803_v30  ;;  %13128 = vmatprep.mubr.msk.f32.mxu1 %vm2258_vm4, %v8840_v63 }
0x172b   : > { %13129 = vmatmul.mubr.msk.f32.gmra.mrb[4].mxu1 %vm2258_vm4, %v8841_v22  ;;  %v8843_v33 = vmax.f32 %v8809_v10, 0.0 }
0x172c   : > { %v8842_v29 = vmax.f32 %v8804_v2, 0.0 }
0x172e   : > { %13131 = vmatprep.mubr.msk.f32.mxu1 %vm2258_vm4, %v8842_v29 }
0x172f   : > { %13132 = vmatmul.mubr.msk.f32.gmra.mrb[6].mxu1 %vm2258_vm4, %v8843_v33 }
0x1793   : > { %v13088_v11 = vpop.f32.mrb[232].mxu1 }
0x1794   : > { %v9025_v56 = vadd.f32 %v13088_v11, %v18495_v24  ;;  %v9019_v5 = vpop.f32.mrb[233].mxu1 }
0x1795   : > { %v9020_v60 = vadd.f32 %v18495_v24, %v9019_v5 }
0x1796   : > { %v9179_v58 = vmax.f32 %v9025_v56, 0.0 }
0x1797   : > { %v9178_v18 = vmax.f32 %v9020_v60, 0.0  ;;  %v13091_v8 = vpop.f32.mrb[234].mxu1 }
0x1798   : > { %v9035_v47 = vadd.f32 %v13091_v8, %v18495_v24  ;;  %v9029_v35 = vpop.f32.mrb[235].mxu1 }
0x1799   : > { %v9030_v34 = vadd.f32 %v18495_v24, %v9029_v35  ;;  %13136 = vmatprep.mubr.msk.f32.mxu0 %vm2258_vm4, %v9178_v18 }
0x179a   : > { %13137 = vmatmul.mubr.msk.f32.vlgmr.msra.gmra.mrb[248].mxu0 %vm2258_vm4, %v9179_v58  ;;  %v9181_v62 = vmax.f32 %v9035_v47, 0.0 }
0x179b   : > { %v9180_v15 = vmax.f32 %v9030_v34, 0.0  ;;  %v13094_v36 = vpop.f32.mrb[236].mxu1 }
0x179c   : > { %v9045_v59 = vadd.f32 %v13094_v36, %v18495_v24  ;;  %v9039_v16 = vpop.f32.mrb[237].mxu1 }
0x179d   : > { %v9040_v31 = vadd.f32 %v18495_v24, %v9039_v16  ;;  %13139 = vmatprep.mubr.msk.f32.mxu0 %vm2258_vm4, %v9180_v15 }
0x179e   : > { %13140 = vmatmul.mubr.msk.f32.gmra.mrb[250].mxu0 %vm2258_vm4, %v9181_v62  ;;  %v9183_v61 = vmax.f32 %v9045_v59, 0.0 }
0x179f   : > { %v9182_v52 = vmax.f32 %v9040_v31, 0.0  ;;  %v13097_v42 = vpop.f32.mrb[238].mxu1 }
0x17a0   : > { %v9055_v27 = vadd.f32 %v13097_v42, %v18495_v24  ;;  %v9049_v48 = vpop.f32.mrb[239].mxu1 }
0x17a1   : > { %v9050_v25 = vadd.f32 %v18495_v24, %v9049_v48  ;;  %13142 = vmatprep.mubr.msk.f32.mxu0 %vm2258_vm4, %v9182_v52 }
0x17a2   : > { %13143 = vmatmul.mubr.msk.f32.gmra.mrb[252].mxu0 %vm2258_vm4, %v9183_v61  ;;  %v9185_v14 = vmax.f32 %v9055_v27, 0.0 }
0x17a3   : > { %v9184_v26 = vmax.f32 %v9050_v25, 0.0  ;;  %v13100_v41 = vpop.f32.mrb[240].mxu1 }
0x17a4   : > { %v9065_v46 = vadd.f32 %v13100_v41, %v18495_v24  ;;  %v9059_v38 = vpop.f32.mrb[241].mxu1 }
0x17a5   : > { %v9060_v37 = vadd.f32 %v18495_v24, %v9059_v38  ;;  %13145 = vmatprep.mubr.msk.f32.mxu0 %vm2258_vm4, %v9184_v26 }
0x17a6   : > { %13146 = vmatmul.mubr.msk.f32.gmra.mrb[254].mxu0 %vm2258_vm4, %v9185_v14  ;;  %v9187_v28 = vmax.f32 %v9065_v46, 0.0 }
0x17a7   : > { %v9186_v45 = vmax.f32 %v9060_v37, 0.0  ;;  %v13103_v6 = vpop.f32.mrb[242].mxu1 }
0x17a8   : > { %v9075_v7 = vadd.f32 %v13103_v6, %v18495_v24  ;;  %v9069_v50 = vpop.f32.mrb[243].mxu1 }
0x17a9   : > { %v9070_v57 = vadd.f32 %v18495_v24, %v9069_v50  ;;  %13148 = vmatprep.mubr.msk.f32.mxu0 %vm2258_vm4, %v9186_v45 }
0x17aa   : > { %13149 = vmatmul.mubr.msk.f32.gmra.mrb[0].mxu0 %vm2258_vm4, %v9187_v28  ;;  %v9189_v4 = vmax.f32 %v9075_v7, 0.0 }
0x17ab   : > { %v9188_v55 = vmax.f32 %v9070_v57, 0.0  ;;  %v13106_v19 = vpop.f32.mrb[244].mxu1  ;;  %v18564_v57 = vld [vmem:[%s19986_s19 + $0x3] ss:$0 sm:$0xff] }
0x17ac   : > { %v9085_v54 = vadd.f32 %v13106_v19, %v18495_v24  ;;  %v9079_v3 = vpop.f32.mrb[245].mxu1 }
0x17ad   : > { %v9080_v0 = vadd.f32 %v18495_v24, %v9079_v3  ;;  %13151 = vmatprep.mubr.msk.f32.mxu0 %vm2258_vm4, %v9188_v55 }
0x17ae   : > { %13152 = vmatmul.mubr.msk.f32.gmra.mrb[2].mxu0 %vm2258_vm4, %v9189_v4  ;;  %v9191_v49 = vmax.f32 %v9085_v54, 0.0 }
0x17af   : > { %v9190_v9 = vmax.f32 %v9080_v0, 0.0  ;;  %v13109_v39 = vpop.f32.mrb[246].mxu1 }
0x17b0   : > { %v9095_v17 = vadd.f32 %v13109_v39, %v18495_v24  ;;  %v9089_v32 = vpop.f32.mrb[247].mxu1 }
0x17b1   : > { %v9090_v53 = vadd.f32 %v18495_v24, %v9089_v32  ;;  %13154 = vmatprep.mubr.msk.f32.mxu0 %vm2258_vm4, %v9190_v9 }
0x17b2   : > { %13155 = vmatmul.mubr.msk.f32.gmra.mrb[4].mxu0 %vm2258_vm4, %v9191_v49  ;;  %v9193_v1 = vmax.f32 %v9095_v17, 0.0 }
0x17b3   : > { %v9192_v43 = vmax.f32 %v9090_v53, 0.0  ;;  %v13112_v40 = vpop.f32.mrb[248].mxu1 }
0x17b4   : > { %v9105_v23 = vadd.f32 %v13112_v40, %v18495_v24  ;;  %v9099_v21 = vpop.f32.mrb[249].mxu1 }
0x17b5   : > { %v9100_v13 = vadd.f32 %v18495_v24, %v9099_v21  ;;  %13157 = vmatprep.mubr.msk.f32.mxu0 %vm2258_vm4, %v9192_v43 }
0x17b6   : > { %13158 = vmatmul.mubr.msk.f32.gmra.mrb[6].mxu0 %vm2258_vm4, %v9193_v1  ;;  %v9195_v51 = vmax.f32 %v9105_v23, 0.0 }
0x17b7   : > { %v9194_v20 = vmax.f32 %v9100_v13, 0.0  ;;  %v13115_v44 = vpop.f32.mrb[250].mxu1 }
0x17b8   : > { %v9115_v63 = vadd.f32 %v13115_v44, %v18495_v24  ;;  %v9109_v12 = vpop.f32.mrb[251].mxu1 }
0x17b9   : > { %v9110_v22 = vadd.f32 %v18495_v24, %v9109_v12  ;;  %13160 = vmatprep.mubr.msk.f32.mxu0 %vm2258_vm4, %v9194_v20 }
0x17ba   : > { %13161 = vmatmul.mubr.msk.f32.gmra.mrb[8].mxu0 %vm2258_vm4, %v9195_v51  ;;  %v9197_v2 = vmax.f32 %v9115_v63, 0.0 }
0x17bb   : > { %v9196_v10 = vmax.f32 %v9110_v22, 0.0  ;;  %v13118_v30 = vpop.f32.mrb[252].mxu1 }
0x17bc   : > { %v9125_v29 = vadd.f32 %v13118_v30, %v18495_v24  ;;  %v9119_v33 = vpop.f32.mrb[253].mxu1  ;;  %v18605_v30 = vpop.permute.xlu1 %10058 }
0x17bd   : > { %v9120_v11 = vadd.f32 %v18495_v24, %v9119_v33  ;;  %13163 = vmatprep.mubr.msk.f32.mxu0 %vm2258_vm4, %v9196_v10 }
0x17be   : > { %13164 = vmatmul.mubr.msk.f32.gmra.mrb[10].mxu0 %vm2258_vm4, %v9197_v2  ;;  %v9199_v60 = vmax.f32 %v9125_v29, 0.0 }
0x17bf   : > { %v9198_v56 = vmax.f32 %v9120_v11, 0.0  ;;  %v13121_v5 = vpop.f32.mrb[254].mxu1 }
0x17c0   : > { %v9135_v18 = vadd.f32 %v13121_v5, %v18495_v24  ;;  %v9129_v8 = vpop.f32.mrb[255].mxu1  ;;  %v18611_v11 = vpop.permute.xlu1 %10062 }
0x17c1   : > { %v9130_v58 = vadd.f32 %v18495_v24, %v9129_v8  ;;  %13166 = vmatprep.mubr.msk.f32.mxu0 %vm2258_vm4, %v9198_v56 }
0x17c2   : > { %13167 = vmatmul.mubr.msk.f32.gmra.mrb[12].mxu0 %vm2258_vm4, %v9199_v60  ;;  %v9201_v35 = vmax.f32 %v9135_v18, 0.0 }
0x17c3   : > { %v9200_v47 = vmax.f32 %v9130_v58, 0.0 }
0x17c4   : > { %v18623_v58 = vpop.permute.xlu1 %10066 }
0x17c5   : > { %13169 = vmatprep.mubr.msk.f32.mxu0 %vm2258_vm4, %v9200_v47 }
0x17c6   : > { %13170 = vmatmul.mubr.msk.f32.gmra.mrb[14].mxu0 %vm2258_vm4, %v9201_v35 }
0x17f6   : > { %v13124_v34 = vpop.f32.mrb[0].mxu1 }
0x17f7   : > { %v9145_v15 = vadd.f32 %v13124_v34, %v18495_v24  ;;  %v9139_v36 = vpop.f32.mrb[1].mxu1 }
0x17f8   : > { %v9140_v62 = vadd.f32 %v18495_v24, %v9139_v36 }
0x17f9   : > { %v9203_v31 = vmax.f32 %v9145_v15, 0.0  ;;  %v18629_v15 = vpop.permute.xlu1 %10070 }
0x17fa   : > { %v9202_v59 = vmax.f32 %v9140_v62, 0.0  ;;  %v13127_v16 = vpop.f32.mrb[2].mxu1 }
0x17fb   : > { %v9155_v52 = vadd.f32 %v13127_v16, %v18495_v24  ;;  %v9149_v42 = vpop.f32.mrb[3].mxu1 }
0x17fc   : > { %v9150_v61 = vadd.f32 %v18495_v24, %v9149_v42  ;;  %13172 = vmatprep.mubr.msk.f32.mxu0 %vm2258_vm4, %v9202_v59  ;;  %v18647_v42 = vpop.permute.xlu0 %10056 }
0x17fd   : > { %13173 = vmatmul.mubr.msk.f32.gmra.mrb[16].mxu0 %vm2258_vm4, %v9203_v31  ;;  %v9205_v25 = vmax.f32 %v9155_v52, 0.0  ;;  %v18633_v62 = vpop.permute.xlu1 %10074 }
0x17fe   : > { %v9204_v27 = vmax.f32 %v9150_v61, 0.0  ;;  %v13130_v48 = vpop.f32.mrb[4].mxu1  ;;  %20709 = vst [vmem:[#allocation144_spill] sm:$0xff] %v18633_v62 }
0x17ff   : > { %v9165_v26 = vadd.f32 %v13130_v48, %v18495_v24  ;;  %v9159_v41 = vpop.f32.mrb[5].mxu1 }
0x1800   : > { %v9160_v14 = vadd.f32 %v18495_v24, %v9159_v41  ;;  %13175 = vmatprep.mubr.msk.f32.mxu0 %vm2258_vm4, %v9204_v27  ;;  %v18658_v48 = vpop.permute.xlu0 %10060 }
0x1801   : > { %13176 = vmatmul.mubr.msk.f32.gmra.mrb[18].mxu0 %vm2258_vm4, %v9205_v25  ;;  %v9207_v37 = vmax.f32 %v9165_v26, 0.0  ;;  %v18635_v59 = vpop.permute.xlu1 %10078 }
0x1802   : > { %v9206_v46 = vmax.f32 %v9160_v14, 0.0  ;;  %v13133_v38 = vpop.f32.mrb[6].mxu1  ;;  %20710 = vst [vmem:[#allocation159_spill] sm:$0xff] %v18635_v59 }
0x1803   : > { %v9175_v45 = vadd.f32 %v13133_v38, %v18495_v24  ;;  %v9169_v6 = vpop.f32.mrb[7].mxu1 }
0x1804   : > { %v9170_v28 = vadd.f32 %v18495_v24, %v9169_v6  ;;  %13178 = vmatprep.mubr.msk.f32.mxu0 %vm2258_vm4, %v9206_v46  ;;  %v18662_v26 = vpop.permute.xlu0 %10064 }
0x1805   : > { %13179 = vmatmul.mubr.msk.f32.gmra.mrb[20].mxu0 %vm2258_vm4, %v9207_v37  ;;  %v9209_v50 = vmax.f32 %v9175_v45, 0.0  ;;  %v18642_v31 = vpop.permute.xlu1 %10082 }
0x1806   : > { %v9208_v7 = vmax.f32 %v9170_v28, 0.0  ;;  %20711 = vst [vmem:[#allocation155_spill] sm:$0xff] %v18642_v31 }
0x1808   : > { %13181 = vmatprep.mubr.msk.f32.mxu0 %vm2258_vm4, %v9208_v7  ;;  %v18666_v14 = vpop.permute.xlu0 %10068 }
0x1809   : > { %13182 = vmatmul.mubr.msk.f32.gmra.mrb[22].mxu0 %vm2258_vm4, %v9209_v50  ;;  %v18654_v27 = vpop.permute.xlu1 %10086 }
0x180a   : > { %20712 = vst [vmem:[#allocation145_spill] sm:$0xff] %v18654_v27 }
0x180c   : > { %v18672_v6 = vpop.permute.xlu0 %10072 }
0x180d   : > { %v18660_v25 = vpop.permute.xlu1 %10026 }
0x1811   : > { %v18664_v41 = vpop.permute.xlu1 %10030 }
0x1815   : > { %v18668_v38 = vpop.permute.xlu1 %10034 }
0x1816   : > { %20713 = vst [vmem:[#allocation102_spill] sm:$0xff] %v18668_v38 }
0x186d   : > { %v13138_v55 = vpop.f32.mrb[248].mxu0 }
0x186e   : > { %v9391_v19 = vadd.f32 %v13138_v55, %v18564_v57  ;;  %v9385_v4 = vpop.f32.mrb[249].mxu0  ;;  %v18680_v55 = vpop.permute.xlu1 %10038 }
0x186f   : > { %v9386_v24 = vadd.f32 %v18564_v57, %v9385_v4  ;;  %20714 = vst [vmem:[#allocation160_spill] sm:$0xff] %v18680_v55  ;;  %v18684_v4 = vpop.permute.xlu0 %10076 }
0x1870   : > { %9898 = vrot.lane.b32.xlu0 %v9391_v19, %s14172_s3 }
0x1871   : > { %v13141_v54 = vpop.f32.mrb[250].mxu0  ;;  %9896 = vrot.lane.b32.xlu1 %v9386_v24, %s14172_s3  ;;  %13902 = vtanh.f32 %v9386_v24 }
0x1872   : > { %v9401_v3 = vadd.f32 %v13141_v54, %v18564_v57  ;;  %v9395_v0 = vpop.f32.mrb[251].mxu0  ;;  %13904 = vtanh.f32 %v9391_v19 }
0x1873   : > { %v9396_v49 = vadd.f32 %v18564_v57, %v9395_v0 }
0x1874   : > { %13906 = vtanh.f32 %v9401_v3 }
0x1875   : > { %v13144_v9 = vpop.f32.mrb[252].mxu0  ;;  %9902 = vrot.lane.b32.xlu1 %v9401_v3, %s14172_s3  ;;  %13908 = vtanh.f32 %v9396_v49 }
0x1876   : > { %v9405_v39 = vpop.f32.mrb[253].mxu0  ;;  %v18577_v43 = vadd.f32 %v13144_v9, %v18564_v57  ;;  %v18692_v9 = vpop.permute.xlu1 %10042 }
0x1877   : > { %v9406_v17 = vadd.f32 %v18564_v57, %v9405_v39  ;;  %20715 = vst [vmem:[#allocation146_spill] sm:$0xff] %v18692_v9 }
0x1879   : > { %v13147_v32 = vpop.f32.mrb[254].mxu0  ;;  %9904 = vrot.lane.b32.xlu0 %v9406_v17, %s14172_s3  ;;  %9900 = vrot.lane.b32.xlu1 %v9396_v49, %s14172_s3  ;;  %13910 = vtanh.f32 %v9406_v17  ;;  %v18696_v49 = vpop.permute.xlu0 %10080 }
0x187a   : > { %v9415_v53 = vpop.f32.mrb[255].mxu0  ;;  %v18587_v21 = vadd.f32 %v13147_v32, %v18564_v57  ;;  %13912 = vtanh.f32 %v18577_v43 }
0x187b   : > { %v18580_v40 = vadd.f32 %v18564_v57, %v9415_v53  ;;  %v13903_v33 = vpop.eup %13902 }
0x187c   : > { %v18617_v60 = vmul.f32 0.1, %v13903_v33  ;;  %v13905_v35 = vpop.eup %13904 }
0x187d   : > { %v13150_v1 = vpop.f32.mrb[0].mxu0  ;;  %9908 = vrot.lane.b32.xlu0 %v18580_v40, %s14172_s3  ;;  %9906 = vrot.lane.b32.xlu1 %v18577_v43, %s14172_s3  ;;  %v18627_v34 = vmul.f32 0.1, %v13905_v35  ;;  %v18710_v33 = vpop.permute.xlu0 %10024  ;;  %13914 = vtanh.f32 %v18580_v40 }
0x187e   : > { %v9425_v23 = vpop.f32.mrb[1].mxu0  ;;  %v9608_v47 = vsel %vm4594_vm6, %v18617_v60, 0.0  ;;  %v18645_v52 = vadd.f32 %v13150_v1, %v18564_v57  ;;  %v13907_v46 = vpop.eup %13906  ;;  %20717 = vst [vmem:[#allocation156_spill] sm:$0xff] %v18710_v33  ;;  %13916 = vtanh.f32 %v18587_v21 }
0x187f   : > { %v9611_v36 = vsel %vm4594_vm6, %v18627_v34, 0.0  ;;  %v18638_v16 = vadd.f32 %v18564_v57, %v9425_v23  ;;  %v18670_v37 = vmul.f32 0.1, %v13907_v46  ;;  %v13909_v45 = vpop.eup %13908  ;;  %v18704_v1 = vpop.permute.xlu1 %10046 }
0x1880   : > { %v18678_v50 = vmul.f32 0.1, %v13909_v45  ;;  %20716 = vst [vmem:[#allocation98_spill] sm:$0xff] %v18704_v1 }
0x1881   : > { %v13153_v13 = vpop.f32.mrb[2].mxu0  ;;  %9910 = vrot.lane.b32.xlu1 %v18587_v21, %s14172_s3  ;;  %v9617_v7 = vsel %vm4594_vm6, %v18670_v37, 0.0  ;;  %v18714_v35 = vpop.permute.xlu0 %10028  ;;  %13918 = vtanh.f32 %v18638_v16 }
0x1882   : > { %v18591_v20 = vpop.f32.mrb[3].mxu0  ;;  %v18652_v61 = vadd.f32 %v13153_v13, %v18564_v57  ;;  %v9614_v54 = vsel %vm4594_vm6, %v18678_v50, 0.0  ;;  %20719 = vst [vmem:[#allocation104_spill] sm:$0xff] %v18714_v35 }
0x1883   : > { %v13911_v0 = vpop.eup %13910  ;;  %v9436_v46 = vadd.f32 %v18564_v57, %v18591_v20 }
0x1884   : > { %v18700_v32 = vmul.f32 0.1, %v13911_v0 }
0x1885   : > { %v18593_v44 = vpop.f32.mrb[4].mxu0  ;;  %v18720_v45 = vpop.permute.xlu0 %10032  ;;  %13920 = vtanh.f32 %v9436_v46 }
0x1886   : > { %v18595_v51 = vpop.f32.mrb[5].mxu0  ;;  %v9620_v13 = vsel %vm4594_vm6, %v18700_v32, 0.0  ;;  %20721 = vst [vmem:[#allocation148_spill] sm:$0xff] %v18720_v45 }
0x1889   : > { %v18597_v63 = vpop.f32.mrb[6].mxu0  ;;  %v18731_v0 = vpop.permute.xlu0 %10036 }
0x188a   : > { %v18599_v12 = vpop.f32.mrb[7].mxu0  ;;  %20723 = vst [vmem:[#allocation106_spill] sm:$0xff] %v18731_v0 }
0x188b   : > { %v9456_v21 = vadd.f32 %v18564_v57, %v18599_v12 }
0x188d   : > { %v18601_v22 = vpop.f32.mrb[8].mxu0 }
0x188e   : > { %v18603_v10 = vpop.f32.mrb[9].mxu0 }
0x1891   : > { %v18607_v2 = vpop.f32.mrb[10].mxu0 }
0x1892   : > { %v18609_v29 = vpop.f32.mrb[11].mxu0 }
0x1895   : > { %v18613_v56 = vpop.f32.mrb[12].mxu0 }
0x1896   : > { %v18615_v5 = vpop.f32.mrb[13].mxu0 }
0x1899   : > { %v18619_v18 = vpop.f32.mrb[14].mxu0 }
0x189a   : > { %v18621_v8 = vpop.f32.mrb[15].mxu0 }
0x189c   : > { %9609 = vadd.xlane.f32.xlu0 %v9608_v47  ;;  %v18712_v47 = vpop.permute.xlu1 %10050 }
0x189d   : > { %20718 = vst [vmem:[#allocation147_spill] sm:$0xff] %v18712_v47 }
0x18a5   : > { %9612 = vadd.xlane.f32.xlu1 %v9611_v36  ;;  %v18716_v36 = vpop.permute.xlu1 %10054 }
0x18a6   : > { %20720 = vst [vmem:[#allocation99_spill] sm:$0xff] %v18716_v36  ;;  %v18735_v36 = vpop.permute.xlu0 %10040 }
0x18a7   : > { %20725 = vst [vmem:[#allocation158_spill] sm:$0xff] %v18735_v36 }
0x18aa   : > { %v18740_v47 = vpop.permute.xlu0 %10044 }
0x18ab   : > { %20727 = vst [vmem:[#allocation101_spill] sm:$0xff] %v18740_v47 }
0x18ae   : > { %v18745_v9 = vpop.permute.xlu0 %10048 }
0x18af   : > { %20729 = vst [vmem:[#allocation118_spill] sm:$0xff] %v18745_v9 }
0x18b2   : > { %9912 = vrot.lane.b32.xlu0 %v18638_v16, %s14172_s3 }
0x18b6   : > { %9914 = vrot.lane.b32.xlu1 %v18645_v52, %s14172_s3 }
0x18ba   : > { %9918 = vrot.lane.b32.xlu1 %v18652_v61, %s14172_s3 }
0x18d0   : > { %v18674_v28 = vpop.f32.mrb[16].mxu0 }
0x18d1   : > { %v18682_v19 = vpop.f32.mrb[17].mxu0  ;;  %9618 = vadd.xlane.f32.xlu0 %v9617_v7  ;;  %v18725_v7 = vadd.f32 %v18593_v44, %v18564_v57  ;;  %v13913_v44 = vpop.eup %13912 }
0x18d2   : > { %v18747_v55 = vmul.f32 0.1, %v13913_v44 }
0x18d4   : > { %v18686_v24 = vpop.f32.mrb[18].mxu0  ;;  %v9623_v43 = vsel %vm4594_vm6, %v18747_v55, 0.0 }
0x18d5   : > { %v18690_v3 = vpop.f32.mrb[19].mxu0  ;;  %9615 = vadd.xlane.f32.xlu0 %v9614_v54  ;;  %v18727_v54 = vpop.permute.xlu1 %10570 }
0x18d6   : > { %20722 = vst [vmem:[#allocation157_spill] sm:$0xff] %v18727_v54 }
0x18d8   : > { %v18694_v39 = vpop.f32.mrb[20].mxu0 }
0x18d9   : > { %v18698_v17 = vpop.f32.mrb[21].mxu0 }
0x18dc   : > { %v18702_v53 = vpop.f32.mrb[22].mxu0 }
0x18dd   : > { %v18706_v23 = vpop.f32.mrb[23].mxu0 }
0x18de   : > { %9621 = vadd.xlane.f32.xlu1 %v9620_v13  ;;  %v18733_v13 = vpop.permute.xlu1 %10574 }
0x18df   : > { %20724 = vst [vmem:[#allocation100_spill] sm:$0xff] %v18733_v13  ;;  %v18751_v13 = vpop.permute.xlu0 %10052 }
0x18e0   : > { %20731 = vst [vmem:[#allocation103_spill] sm:$0xff] %v18751_v13 }
0x18e2   : > { %v18738_v20 = vpop.permute.xlu1 %10578 }
0x18e3   : > { %20726 = vst [vmem:[#allocation110_spill] sm:$0xff] %v18738_v20  ;;  %v13915_v20 = vpop.eup %13914 }
0x18e4   : > { %v18757_v47 = vmul.f32 0.1, %v13915_v20 }
0x18e6   : > { %v18742_v1 = vpop.permute.xlu1 %10582  ;;  %20733 = vst [vmem:[#allocation122_spill] sm:$0xff] %v18757_v47  ;;  %v9626_v40 = vsel %vm4594_vm6, %v18757_v47, 0.0 }
0x18e7   : > { %20728 = vst [vmem:[#allocation149_spill] sm:$0xff] %v18742_v1  ;;  %v18759_v1 = vpop.permute.xlu0 %10568 }
0x18e8   : > { %20734 = vst [vmem:[#allocation152_spill] sm:$0xff] %v18759_v1  ;;  %v18780_v1 = vadd.f32 %v18597_v63, %v18564_v57  ;;  %v13917_v63 = vpop.eup %13916 }
0x18e9   : > { %v13919_v16 = vpop.eup %13918 }
0x18ea   : > { %v18749_v54 = vpop.permute.xlu1 %10586 }
0x18eb   : > { %9916 = vrot.lane.b32.xlu0 %v9436_v46, %s14172_s3  ;;  %20730 = vst [vmem:[#allocation151_spill] sm:$0xff] %v18749_v54  ;;  %v18765_v54 = vpop.permute.xlu0 %10572  ;;  %v13921_v46 = vpop.eup %13920 }
0x18ec   : > { %20736 = vst [vmem:[#allocation126_spill] sm:$0xff] %v18765_v54 }
0x18ee   : > { %v18755_v36 = vpop.permute.xlu1 %10590 }
0x18ef   : > { %9922 = vrot.lane.b32.xlu1 %v18725_v7, %s14172_s3  ;;  %20732 = vst [vmem:[#allocation150_spill] sm:$0xff] %v18755_v36  ;;  %v18769_v9 = vpop.permute.xlu0 %10576 }
0x18f0   : > { %20738 = vst [vmem:[#allocation128_spill] sm:$0xff] %v18769_v9 }
0x18f2   : > { %v18763_v44 = vpop.permute.xlu1 %10594 }
0x18f3   : > { %20735 = vst [vmem:[#allocation105_spill] sm:$0xff] %v18763_v44  ;;  %v18776_v20 = vpop.permute.xlu0 %10580 }
0x18f4   : > { %20740 = vst [vmem:[#allocation154_spill] sm:$0xff] %v18776_v20 }
0x18f6   : > { %v18767_v13 = vpop.permute.xlu1 %10598 }
0x18f7   : > { %20737 = vst [vmem:[#allocation153_spill] sm:$0xff] %v18767_v13  ;;  %v18786_v13 = vpop.permute.xlu0 %10584 }
0x18f8   : > { %20742 = vst [vmem:[#allocation116_spill] sm:$0xff] %v18786_v13 }
0x18fa   : > { %v18773_v36 = vpop.permute.xlu1 %10634 }
0x18fb   : > { %20739 = vst [vmem:[#allocation108_spill] sm:$0xff] %v18773_v36 }
0x190a   : > { %9624 = vadd.xlane.f32.xlu0 %v9623_v43  ;;  %v9446_v43 = vadd.f32 %v18564_v57, %v18595_v51  ;;  %v18790_v51 = vpop.permute.xlu0 %10588 }
0x190b   : > { %20744 = vst [vmem:[#allocation131_spill] sm:$0xff] %v18790_v51 }
0x190c   : > { %13922 = vtanh.f32 %v9446_v43 }
0x190d   : > { %13924 = vtanh.f32 %v9456_v21 }
0x190e   : > { %v18795_v20 = vpop.permute.xlu0 %10592  ;;  %13926 = vtanh.f32 %v18645_v52 }
0x190f   : > { %20746 = vst [vmem:[#allocation52_spill] sm:$0xff] %v18795_v20  ;;  %13928 = vtanh.f32 %v18652_v61  ;;  %v18885_v61 = vadd.f32 %v18613_v56, %v18564_v57 }
0x1910   : > { %13930 = vtanh.f32 %v18725_v7 }
0x1911   : > { %13932 = vtanh.f32 %v18780_v1 }
0x1912   : > { %v18800_v36 = vpop.permute.xlu0 %10596 }
0x1913   : > { %9627 = vadd.xlane.f32.xlu1 %v9626_v40  ;;  %v18784_v40 = vpop.permute.xlu1 %10638  ;;  %20748 = vst [vmem:[#allocation57_spill] sm:$0xff] %v18800_v36  ;;  %v18814_v36 = vmul.f32 0.1, %v13919_v16 }
0x1914   : > { %20741 = vst [vmem:[#allocation162_spill] sm:$0xff] %v18784_v40  ;;  %v18802_v40 = vmul.f32 0.1, %v13917_v63 }
0x1915   : > { %20753 = vst [vmem:[#allocation3_spill] sm:$0xff] %v18814_v36 }
0x1916   : > { %20749 = vst [vmem:[#allocation35_spill] sm:$0xff] %v18802_v40  ;;  %v18810_v20 = vpop.permute.xlu0 %10632  ;;  %v13923_v12 = vpop.eup %13922 }
0x1917   : > { %v18788_v44 = vpop.permute.xlu1 %10642  ;;  %20751 = vst [vmem:[#allocation62_spill] sm:$0xff] %v18810_v20  ;;  %v13925_v16 = vpop.eup %13924 }
0x1918   : > { %20743 = vst [vmem:[#allocation161_spill] sm:$0xff] %v18788_v44  ;;  %v13927_v52 = vpop.eup %13926 }
0x1919   : > { %v13929_v7 = vpop.eup %13928 }
0x191a   : > { %v18816_v63 = vpop.permute.xlu0 %10636 }
0x191b   : > { %v18793_v9 = vpop.permute.xlu1 %10646  ;;  %20754 = vst [vmem:[#allocation5_spill] sm:$0xff] %v18816_v63 }
0x191c   : > { %20745 = vst [vmem:[#allocation49_spill] sm:$0xff] %v18793_v9  ;;  %v9629_v9 = vsel %vm4594_vm6, %v18802_v40, 0.0 }
0x191e   : > { %v18824_v20 = vpop.permute.xlu0 %10640 }
0x191f   : > { %v18798_v54 = vpop.permute.xlu1 %10650  ;;  %20757 = vst [vmem:[#allocation11_spill] sm:$0xff] %v18824_v20 }
0x1920   : > { %9920 = vrot.lane.b32.xlu0 %v9446_v43, %s14172_s3  ;;  %20747 = vst [vmem:[#allocation54_spill] sm:$0xff] %v18798_v54  ;;  %v9632_v43 = vsel %vm4594_vm6, %v18814_v36, 0.0 }
0x1923   : > { %v18804_v13 = vpop.permute.xlu1 %10654 }
0x1924   : > { %9926 = vrot.lane.b32.xlu1 %v18780_v1, %s14172_s3  ;;  %20750 = vst [vmem:[#allocation37_spill] sm:$0xff] %v18804_v13  ;;  %v18820_v13 = vmul.f32 0.1, %v13921_v46  ;;  %v18834_v46 = vmul.f32 0.1, %v13925_v16  ;;  %v18856_v16 = vadd.f32 %v18564_v57, %v18603_v10  ;;  %v18874_v10 = vadd.f32 %v18564_v57, %v18609_v29 }
0x1926   : > { %20755 = vst [vmem:[#allocation7_spill] sm:$0xff] %v18820_v13 }
0x1927   : > { %v18812_v54 = vpop.permute.xlu1 %10658 }
0x1928   : > { %20752 = vst [vmem:[#allocation65_spill] sm:$0xff] %v18812_v54  ;;  %v18828_v54 = vmul.f32 0.1, %v13923_v12 }
0x192a   : > { %20758 = vst [vmem:[#allocation13_spill] sm:$0xff] %v18828_v54  ;;  %v9644_v63 = vsel %vm4594_vm6, %v18828_v54, 0.0 }
0x192b   : > { %v18822_v51 = vpop.permute.xlu1 %10662 }
0x192c   : > { %20756 = vst [vmem:[#allocation9_spill] sm:$0xff] %v18822_v51  ;;  %v9650_v51 = vsel %vm4594_vm6, %v18834_v46, 0.0 }
0x192f   : > { %v18830_v44 = vpop.permute.xlu1 %10698 }
0x1930   : > { %20759 = vst [vmem:[#allocation14_spill] sm:$0xff] %v18830_v44 }
0x1933   : > { %v18840_v20 = vpop.permute.xlu1 %10702 }
0x1934   : > { %20761 = vst [vmem:[#allocation18_spill] sm:$0xff] %v18840_v20 }
0x193f   : > { %9630 = vadd.xlane.f32.xlu0 %v9629_v9  ;;  %v9638_v9 = vsel %vm4594_vm6, %v18820_v13, 0.0 }
0x1948   : > { %9633 = vadd.xlane.f32.xlu1 %v9632_v43  ;;  %v18836_v43 = vpop.permute.xlu0 %10644 }
0x1949   : > { %20760 = vst [vmem:[#allocation31_spill] sm:$0xff] %v18836_v43 }
0x194c   : > { %9639 = vadd.xlane.f32.xlu1 %v9638_v9  ;;  %v18843_v12 = vpop.permute.xlu0 %10648  ;;  %v18845_v9 = vpop.permute.xlu1 %10706 }
0x194d   : > { %20762 = vst [vmem:[#allocation20_spill] sm:$0xff] %v18843_v12  ;;  %20763 = vst [vmem:[#allocation50_spill] sm:$0xff] %v18845_v9 }
0x1950   : > { %9645 = vadd.xlane.f32.xlu1 %v9644_v63  ;;  %v18847_v44 = vpop.permute.xlu0 %10652  ;;  %v18849_v27 = vpop.permute.xlu1 %10710 }
0x1951   : > { %20764 = vst [vmem:[#allocation22_spill] sm:$0xff] %v18847_v44  ;;  %20765 = vst [vmem:[#allocation53_spill] sm:$0xff] %v18849_v27  ;;  %v13931_v44 = vpop.eup %13930 }
0x1952   : > { %v13933_v12 = vpop.eup %13932 }
0x1954   : > { %9651 = vadd.xlane.f32.xlu1 %v9650_v51  ;;  %v18852_v63 = vpop.permute.xlu0 %10656  ;;  %v18861_v51 = vpop.permute.xlu1 %10714 }
0x1955   : > { %9924 = vrot.lane.b32.xlu0 %v9456_v21, %s14172_s3  ;;  %20766 = vst [vmem:[#allocation24_spill] sm:$0xff] %v18852_v63  ;;  %20767 = vst [vmem:[#allocation56_spill] sm:$0xff] %v18861_v51  ;;  %v18865_v21 = vadd.f32 %v18607_v2, %v18564_v57  ;;  %v18887_v51 = vmul.f32 0.1, %v13927_v52 }
0x1957   : > { %20771 = vst [vmem:[#allocation60_spill] sm:$0xff] %v18887_v51  ;;  %v9635_v1 = vsel %vm4594_vm6, %v18887_v51, 0.0 }
0x1958   : > { %v18867_v27 = vpop.permute.xlu0 %10660  ;;  %v18876_v63 = vpop.permute.xlu1 %10718 }
0x1959   : > { %20768 = vst [vmem:[#allocation26_spill] sm:$0xff] %v18867_v27  ;;  %20769 = vst [vmem:[#allocation59_spill] sm:$0xff] %v18876_v63  ;;  %v18895_v63 = vadd.f32 %v18619_v18, %v18564_v57  ;;  %v18899_v27 = vmul.f32 0.1, %v13929_v7 }
0x195b   : > { %20773 = vst [vmem:[#allocation61_spill] sm:$0xff] %v18899_v27  ;;  %v9641_v52 = vsel %vm4594_vm6, %v18899_v27, 0.0 }
0x195c   : > { %v18881_v2 = vpop.permute.xlu0 %10696  ;;  %v18891_v29 = vpop.permute.xlu1 %10722 }
0x195d   : > { %20770 = vst [vmem:[#allocation28_spill] sm:$0xff] %v18881_v2  ;;  %20772 = vst [vmem:[#allocation30_spill] sm:$0xff] %v18891_v29  ;;  %v18907_v29 = vmul.f32 0.1, %v13931_v44 }
0x195f   : > { %20775 = vst [vmem:[#allocation63_spill] sm:$0xff] %v18907_v29  ;;  %v9647_v7 = vsel %vm4594_vm6, %v18907_v29, 0.0 }
0x1960   : > { %v18901_v56 = vpop.permute.xlu0 %10700  ;;  %v18909_v18 = vpop.permute.xlu1 %10726 }
0x1961   : > { %20774 = vst [vmem:[#allocation33_spill] sm:$0xff] %v18901_v56  ;;  %20776 = vst [vmem:[#allocation69_spill] sm:$0xff] %v18909_v18 }
0x1964   : > { %v18911_v43 = vpop.permute.xlu0 %10704  ;;  %v18917_v56 = vpop.permute.xlu1 %10746 }
0x1965   : > { %9928 = vrot.lane.b32.xlu1 %v18856_v16, %s14172_s3  ;;  %20777 = vst [vmem:[#allocation64_spill] sm:$0xff] %v18911_v43  ;;  %20779 = vst [vmem:[#allocation2_spill] sm:$0xff] %v18917_v56 }
0x1968   : > { %v18921_v44 = vpop.permute.xlu0 %10708  ;;  %v18925_v18 = vpop.permute.xlu1 %10750 }
0x1969   : > { %9934 = vrot.lane.b32.xlu1 %v18865_v21, %s14172_s3  ;;  %20780 = vst [vmem:[#allocation77_spill] sm:$0xff] %v18921_v44  ;;  %20781 = vst [vmem:[#allocation4_spill] sm:$0xff] %v18925_v18 }
0x196c   : > { %v18927_v43 = vpop.permute.xlu0 %10712  ;;  %v18929_v29 = vpop.permute.xlu1 %10754 }
0x196d   : > { %9932 = vrot.lane.b32.xlu1 %v18874_v10, %s14172_s3  ;;  %20782 = vst [vmem:[#allocation81_spill] sm:$0xff] %v18927_v43  ;;  %20783 = vst [vmem:[#allocation6_spill] sm:$0xff] %v18929_v29 }
0x1970   : > { %v18933_v27 = vpop.permute.xlu1 %10758 }
0x1971   : > { %9938 = vrot.lane.b32.xlu1 %v18885_v61, %s14172_s3  ;;  %20785 = vst [vmem:[#allocation10_spill] sm:$0xff] %v18933_v27 }
0x1974   : > { %9636 = vadd.xlane.f32.xlu0 %v9635_v1  ;;  %v18915_v1 = vmul.f32 0.1, %v13933_v12  ;;  %v18931_v12 = vpop.permute.xlu0 %10716  ;;  %v18939_v44 = vpop.permute.xlu1 %9896 }
0x1975   : > { %9942 = vrot.lane.b32.xlu1 %v18895_v63, %s14172_s3  ;;  %20784 = vst [vmem:[#allocation8_spill] sm:$0xff] %v18931_v12  ;;  %20787 = vst [vmem:[#allocation15_spill] sm:$0xff] %v18939_v44 }
0x1976   : > { %20778 = vst [vmem:[#allocation73_spill] sm:$0xff] %v18915_v1  ;;  %v9653_v2 = vsel %vm4594_vm6, %v18915_v1, 0.0 }
0x1978   : > { %9642 = vadd.xlane.f32.xlu0 %v9641_v52  ;;  %v9471_v52 = vadd.f32 %v18601_v22, %v18564_v57  ;;  %v18935_v51 = vpop.permute.xlu0 %10720  ;;  %v9486_v22 = vadd.f32 %v18564_v57, %v18615_v5  ;;  %v18949_v27 = vpop.permute.xlu1 %9902 }
0x1979   : > { %20786 = vst [vmem:[#allocation12_spill] sm:$0xff] %v18935_v51 }
0x197a   : > { %13934 = vtanh.f32 %v9471_v52 }
0x197b   : > { %13936 = vtanh.f32 %v18856_v16 }
0x197c   : > { %9648 = vadd.xlane.f32.xlu0 %v9647_v7  ;;  %v18946_v1 = vpop.permute.xlu0 %10724  ;;  %v18959_v5 = vpop.permute.xlu1 %9900  ;;  %13938 = vtanh.f32 %v9486_v22 }
0x197d   : > { %20788 = vst [vmem:[#allocation17_spill] sm:$0xff] %v18946_v1  ;;  %20790 = vst [vmem:[#allocation19_spill] sm:$0xff] %v18959_v5  ;;  %v18976_v1 = vadd.f32 %v18686_v24, %v18564_v57  ;;  %13940 = vtanh.f32 %v18865_v21 }
0x197e   : > { %13942 = vtanh.f32 %v18874_v10  ;;  %v20809_v10 = vld [vmem:[#allocation111_spill] sm:$0xff] }
0x1980   : > { %9654 = vadd.xlane.f32.xlu0 %v9653_v2  ;;  %v18963_v12 = vpop.permute.xlu1 %9906 }
0x1981   : > { %20792 = vst [vmem:[#allocation23_spill] sm:$0xff] %v18963_v12 }
0x1984   : > { %v13935_v7 = vpop.eup %13934 }
0x1985   : > { %v18937_v2 = vmul.f32 0.1, %v13935_v7  ;;  %v18953_v7 = vadd.f32 %v18564_v57, %v18621_v8  ;;  %v13937_v29 = vpop.eup %13936 }
0x1987   : > { %v9659_v43 = vsel %vm4594_vm6, %v18937_v2, 0.0 }
0x1996   : > { %9930 = vrot.lane.b32.xlu0 %v9471_v52, %s14172_s3  ;;  %v18957_v52 = vpop.permute.xlu0 %10744 }
0x1997   : > { %20789 = vst [vmem:[#allocation16_spill] sm:$0xff] %v18957_v52  ;;  %v18978_v52 = vpop.permute.xlu1 %9910 }
0x1998   : > { %20794 = vst [vmem:[#allocation27_spill] sm:$0xff] %v18978_v52 }
0x1999   : > { %9660 = vadd.xlane.f32.xlu1 %v9659_v43  ;;  %v18967_v43 = vadd.f32 %v18674_v28, %v18564_v57 }
0x199a   : > { %9936 = vrot.lane.b32.xlu0 %v9486_v22, %s14172_s3  ;;  %v18961_v51 = vpop.permute.xlu0 %10748 }
0x199b   : > { %20791 = vst [vmem:[#allocation21_spill] sm:$0xff] %v18961_v51  ;;  %v18984_v28 = vpop.xlane.xlu1 %9612 }
0x199e   : > { %9940 = vrot.lane.b32.xlu0 %v18953_v7, %s14172_s3  ;;  %v18971_v8 = vpop.permute.xlu0 %10752 }
0x199f   : > { %20793 = vst [vmem:[#allocation25_spill] sm:$0xff] %v18971_v8  ;;  %v18988_v18 = vpop.permute.xlu1 %9914  ;;  %v18990_v8 = vmul.f32 0.1, %v13937_v29  ;;  %v13939_v29 = vpop.eup %13938 }
0x19a0   : > { %20796 = vst [vmem:[#allocation32_spill] sm:$0xff] %v18988_v18  ;;  %v19010_v31 = vmul.f32 0.1, %v13939_v29  ;;  %v13941_v21 = vpop.eup %13940 }
0x19a1   : > { %v9656_v24 = vsel %vm4594_vm6, %v18990_v8, 0.0 }
0x19a2   : > { %v18982_v51 = vpop.permute.xlu0 %10756  ;;  %v9668_v22 = vsel %vm4594_vm6, %v19010_v31, 0.0 }
0x19a3   : > { %20795 = vst [vmem:[#allocation29_spill] sm:$0xff] %v18982_v51  ;;  %v18996_v52 = vpop.permute.xlu1 %9918 }
0x19a4   : > { %20797 = vst [vmem:[#allocation70_spill] sm:$0xff] %v18996_v52 }
0x19a6   : > { %v18986_v9 = vpop.permute.xlu0 %10084 }
0x19a7   : > { %v19000_v51 = vpop.xlane.xlu1 %9621 }
0x19aa   : > { %9946 = vrot.lane.b32.xlu1 %v18967_v43, %s14172_s3  ;;  %v18992_v16 = vpop.permute.xlu0 %9898 }
0x19ab   : > { %v19004_v0 = vpop.permute.xlu1 %9922 }
0x19ac   : > { %20800 = vst [vmem:[#allocation82_spill] sm:$0xff] %v19004_v0 }
0x19ae   : > { %9950 = vrot.lane.b32.xlu1 %v18976_v1, %s14172_s3  ;;  %v18998_v20 = vpop.permute.xlu0 %9904 }
0x19af   : > { %20798 = vst [vmem:[#allocation74_spill] sm:$0xff] %v18998_v20  ;;  %v19008_v45 = vpop.xlane.xlu1 %9627 }
0x19b2   : > { %v19002_v56 = vpop.permute.xlu0 %9908 }
0x19b3   : > { %20799 = vst [vmem:[#allocation78_spill] sm:$0xff] %v19002_v56  ;;  %v19016_v52 = vpop.permute.xlu1 %9926 }
0x19b4   : > { %20802 = vst [vmem:[#allocation167_spill] sm:$0xff] %v19016_v52 }
0x19b6   : > { %v19006_v18 = vpop.xlane.xlu0 %9609 }
0x19ba   : > { %v19012_v40 = vpop.permute.xlu0 %9912 }
0x19bb   : > { %20801 = vst [vmem:[#allocation166_spill] sm:$0xff] %v19012_v40 }
0x19bd   : > { %9657 = vadd.xlane.f32.xlu0 %v9656_v24  ;;  %v9506_v24 = vadd.f32 %v18564_v57, %v18682_v19  ;;  %v19036_v19 = vadd.f32 %v18694_v39, %v18564_v57  ;;  %v19049_v39 = vmul.f32 0.1, %v13941_v21 }
0x19be   : > { %v19020_v56 = vpop.xlane.xlu0 %9618 }
0x19bf   : > { %v9665_v5 = vsel %vm4594_vm6, %v19049_v39, 0.0 }
0x19c2   : > { %v19025_v20 = vpop.xlane.xlu0 %9615 }
0x19c6   : > { %v19031_v59 = vpop.permute.xlu0 %9916 }
0x19c7   : > { %20806 = vst [vmem:[#allocation171_spill] sm:$0xff] %v19031_v59 }
0x19ca   : > { %v19038_v54 = vpop.xlane.xlu0 %9624 }
0x19ce   : > { %v19045_v59 = vpop.permute.xlu0 %9920 }
0x19cf   : > { %20807 = vst [vmem:[#allocation172_spill] sm:$0xff] %v19045_v59 }
0x19d2   : > { %9669 = vadd.xlane.f32.xlu1 %v9668_v22 }
0x19d3   : > { %9944 = vrot.lane.b32.xlu0 %v9506_v24, %s14172_s3 }
0x19d5   : > { %v19023_v0 = vpop.xlane.xlu1 %9633 }
0x19d6   : > { %20803 = vst [vmem:[#allocation168_spill] sm:$0xff] %v19023_v0 }
0x19d9   : > { %v19027_v29 = vpop.xlane.xlu1 %9639 }
0x19da   : > { %20804 = vst [vmem:[#allocation169_spill] sm:$0xff] %v19027_v29 }
0x19dd   : > { %v19029_v40 = vpop.xlane.xlu1 %9645 }
0x19de   : > { %20805 = vst [vmem:[#allocation170_spill] sm:$0xff] %v19029_v40  ;;  %v19047_v40 = vpop.xlane.xlu0 %9630 }
0x19df   : > { %20808 = vst [vmem:[#allocation173_spill] sm:$0xff] %v19047_v40 }
0x19e1   : > { %v9652_v22 = vpop.xlane.xlu1 %9651 }
0x19e2   : > { %v9718_v52 = vsub.f32 0.0, %v9652_v22  ;;  %v13943_v22 = vpop.eup %13942 }
0x19e3   : > { %9954 = vrot.lane.b32.xlu1 %v19036_v19, %s14172_s3  ;;  %v19053_v29 = vmul.f32 0.1, %v13943_v22 }
0x19e4   : > { %v9750_v35 = vsel %vm4594_vm6, %v18834_v46, %v9718_v52  ;;  %v9925_v46 = vpop.permute.xlu0 %9924 }
0x19e5   : > { %v9796_v62 = vmul.f32 1.442695, %v9750_v35 }
0x19e7   : > { %13944 = vpow2.f32 %v9796_v62  ;;  %v9662_v62 = vsel %vm4594_vm6, %v19053_v29, 0.0 }
0x19e8   : > { %13946 = vtanh.f32 %v18953_v7 }
0x19e9   : > { %13948 = vtanh.f32 %v18885_v61 }
0x19ea   : > { %13950 = vtanh.f32 %v9506_v24 }
0x19f1   : > { %v13945_v13 = vpop.eup %13944 }
0x19f2   : > { %9666 = vadd.xlane.f32.xlu0 %v9665_v5  ;;  %v9846_v33 = vmul.f32 %v13945_v13, %v20809_v10  ;;  %v13947_v52 = vpop.eup %13946  ;;  %v9516_v5 = vadd.f32 %v18564_v57, %v18690_v3  ;;  %v9526_v3 = vadd.f32 %v18564_v57, %v18698_v17 }
0x19f3   : > { %v19061_v21 = vmul.f32 0.1, %v13947_v52  ;;  %v13949_v13 = vpop.eup %13948 }
0x19f4   : > { %v19056_v35 = vadd.f32 %v9925_v46, %v9846_v33  ;;  %v19070_v33 = vadd.f32 %v18702_v53, %v18564_v57  ;;  %v19075_v7 = vmul.f32 0.1, %v13949_v13  ;;  %13952 = vtanh.f32 %v9516_v5  ;;  %v13951_v53 = vpop.eup %13950 }
0x19f5   : > { %v9674_v59 = vsel %vm4594_vm6, %v19061_v21, 0.0  ;;  %13954 = vtanh.f32 %v9526_v3  ;;  %v19081_v22 = vmul.f32 0.1, %v13951_v53  ;;  %v20813_v53 = vld [vmem:[#allocation86_spill] sm:$0xff] }
0x19f6   : > { %20810 = vst [vmem:[#allocation111_spill] sm:$0xff] %v19056_v35  ;;  %9663 = vadd.xlane.f32.xlu0 %v9662_v62  ;;  %13956 = vtanh.f32 %v18895_v63  ;;  %v9536_v63 = vadd.f32 %v18564_v57, %v18706_v23 }
0x19f7   : > { %v9680_v61 = vsel %vm4594_vm6, %v19081_v22, 0.0 }
0x19f8   : > { %13958 = vtanh.f32 %v9536_v63 }
0x19fe   : > { %v13953_v10 = vpop.eup %13952 }
0x19ff   : > { %v19085_v46 = vmul.f32 0.1, %v13953_v10  ;;  %v13955_v62 = vpop.eup %13954 }
0x1a00   : > { %v19089_v52 = vmul.f32 0.1, %v13955_v62  ;;  %v13957_v10 = vpop.eup %13956 }
0x1a01   : > { %v9686_v24 = vsel %vm4594_vm6, %v19085_v46, 0.0 }
0x1a02   : > { %v9692_v17 = vsel %vm4594_vm6, %v19089_v52, 0.0  ;;  %v13959_v40 = vpop.eup %13958 }
0x1a03   : > { %v19123_v44 = vmul.f32 0.1, %v13959_v40 }
0x1a05   : > { %v9698_v23 = vsel %vm4594_vm6, %v19123_v44, 0.0 }
0x1a07   : > { %9675 = vadd.xlane.f32.xlu1 %v9674_v59  ;;  %v9671_v59 = vsel %vm4594_vm6, %v19075_v7, 0.0 }
0x1a0c   : > { %9948 = vrot.lane.b32.xlu0 %v9516_v5, %s14172_s3  ;;  %v19094_v5 = vpop.xlane.xlu0 %9636 }
0x1a0d   : > { %20811 = vst [vmem:[#allocation174_spill] sm:$0xff] %v19094_v5 }
0x1a10   : > { %v19097_v13 = vpop.xlane.xlu0 %9642 }
0x1a11   : > { %20812 = vst [vmem:[#allocation175_spill] sm:$0xff] %v19097_v13 }
0x1a18   : > { %9958 = vrot.lane.b32.xlu1 %v19070_v33, %s14172_s3 }
0x1a2b   : > { %9672 = vadd.xlane.f32.xlu0 %v9671_v59  ;;  %v19099_v59 = vpop.permute.xlu1 %9928 }
0x1a2f   : > { %v9935_v62 = vpop.permute.xlu1 %9934 }
0x1a33   : > { %v19111_v5 = vpop.permute.xlu1 %9932 }
0x1a37   : > { %v19115_v35 = vpop.permute.xlu1 %9938 }
0x1a3c   : > { %9681 = vadd.xlane.f32.xlu1 %v9680_v61  ;;  %v19103_v61 = vpop.xlane.xlu0 %9648 }
0x1a3d   : > { %20814 = vst [vmem:[#allocation86_spill] sm:$0xff] %v19103_v61  ;;  %v19119_v61 = vpop.permute.xlu1 %9942 }
0x1a40   : > { %9687 = vadd.xlane.f32.xlu1 %v9686_v24  ;;  %v19107_v24 = vpop.xlane.xlu0 %9654 }
0x1a41   : > { %9952 = vrot.lane.b32.xlu0 %v9526_v3, %s14172_s3  ;;  %v19105_v3 = vmul.f32 0.1, %v13957_v10  ;;  %20815 = vst [vmem:[#allocation176_spill] sm:$0xff] %v19107_v24  ;;  %v9661_v10 = vpop.xlane.xlu1 %9660 }
0x1a42   : > { %v9721_v36 = vsub.f32 0.0, %v9661_v10 }
0x1a44   : > { %9693 = vadd.xlane.f32.xlu1 %v9692_v17  ;;  %v9677_v17 = vsel %vm4594_vm6, %v19105_v3, 0.0  ;;  %v9931_v13 = vpop.permute.xlu0 %9930  ;;  %v9753_v57 = vsel %vm4594_vm6, %v18937_v2, %v9721_v36  ;;  %v20816_v2 = vld [vmem:[#allocation90_spill] sm:$0xff] }
0x1a55   : > { %10762 = vrot.lane.b32.xlu1 %v20813_v53, %s14176_s30  ;;  %v19117_v53 = vpop.permute.xlu0 %9936 }
0x1a59   : > { %v19121_v24 = vpop.permute.xlu0 %9940 }
0x1a5d   : > { %v19125_v38 = vpop.xlane.xlu0 %9657 }
0x1a60   : > { %9678 = vadd.xlane.f32.xlu0 %v9677_v17  ;;  %v9802_v17 = vmul.f32 1.442695, %v9753_v57 }
0x1a61   : > { %v19132_v0 = vpop.permute.xlu0 %9944 }
0x1a62   : > { %13960 = vpow2.f32 %v9802_v17 }
0x1a63   : > { %13962 = vtanh.f32 %v18967_v43  ;;  %v20819_v43 = vld [vmem:[#allocation119_spill] sm:$0xff] }
0x1a6c   : > { %v13961_v36 = vpop.eup %13960 }
0x1a76   : > { %9956 = vrot.lane.b32.xlu0 %v9536_v63, %s14172_s3  ;;  %v20817_v63 = vld [vmem:[#allocation115_spill] sm:$0xff]  ;;  %s14177_s3 = smov 56  }
0x1a77   : > { %v9849_v57 = vmul.f32 %v13961_v36, %v20817_v63 }
0x1a79   : > { %9699 = vadd.xlane.f32.xlu1 %v9698_v23  ;;  %v13963_v23 = vpop.eup %13962 }
0x1a7f   : > { %v9667_v12 = vpop.xlane.xlu0 %9666 }
0x1a80   : > { %v9723_v47 = vsub.f32 0.0, %v9667_v12  ;;  %v20818_v12 = vld [vmem:[#allocation66_spill] sm:$0xff] }
0x1a82   : > { %v9755_v40 = vsel %vm4594_vm6, %v19049_v39, %v9723_v47  ;;  %v10009_v47 = vadd.f32 %v9931_v13, %v9849_v57  ;;  %v20821_v13 = vld [vmem:[#allocation68_spill] sm:$0xff] }
0x1a83   : > { %v9806_v10 = vmul.f32 1.442695, %v9755_v40  ;;  %v19146_v40 = vmul.f32 0.1, %v13963_v23 }
0x1a85   : > { %13964 = vpow2.f32 %v9806_v10  ;;  %v20820_v10 = vld [vmem:[#allocation97_spill] sm:$0xff] }
0x1a86   : > { %13966 = vtanh.f32 %v18976_v1 }
0x1a87   : > { %13968 = vtanh.f32 %v19036_v19  ;;  %v19152_v19 = vsel %vm3480_vm5, %v10009_v47, %v18605_v30  ;;  %v19165_v30 = vpop.permute.xlu1 %9946  ;;  %v20823_v47 = vld [vmem:[#allocation72_spill] sm:$0xff] }
0x1a88   : > { %13970 = vtanh.f32 %v19070_v33  ;;  %v10201_v57 = vand.u32 2147483647, %v19152_v19  ;;  %20822 = vst [vmem:[#allocation90_spill] sm:$0xff] %v19165_v30 }
0x1a8a   : > { %10766 = vrot.lane.b32.xlu1 %v20816_v2, %s14176_s30  ;;  %v9683_v2 = vsel %vm4594_vm6, %v19146_v40, 0.0 }
0x1a8e   : > { %10770 = vrot.lane.b32.xlu1 %v20818_v12, %s14176_s30 }
0x1a8f   : > { %v13965_v17 = vpop.eup %13964 }
0x1a90   : > { %v9851_v39 = vmul.f32 %v13965_v17, %v20819_v43  ;;  %v13967_v1 = vpop.eup %13966  ;;  %v10233_v43 = vsub.f32 0.0, %v10201_v57 }
0x1a91   : > { %v19156_v63 = vmul.f32 0.1, %v13967_v1  ;;  %v13969_v33 = vpop.eup %13968 }
0x1a92   : > { %10774 = vrot.lane.b32.xlu1 %v20820_v10, %s14176_s30  ;;  %v10011_v36 = vadd.f32 %v9935_v62, %v9851_v39  ;;  %v19169_v12 = vmul.f32 0.1, %v13969_v33  ;;  %v13971_v17 = vpop.eup %13970  ;;  %v19178_v10 = vpop.permute.xlu1 %9950 }
0x1a93   : > { %v9689_v62 = vsel %vm4594_vm6, %v19156_v63, 0.0  ;;  %20824 = vst [vmem:[#allocation115_spill] sm:$0xff] %v19178_v10  ;;  %v20827_v10 = vld [vmem:[#allocation84_spill] sm:$0xff] }
0x1a94   : > { %v19163_v23 = vsel %vm3480_vm5, %v10011_v36, %v18611_v11  ;;  %v9695_v1 = vsel %vm4594_vm6, %v19169_v12, 0.0  ;;  %v19176_v11 = vmul.f32 0.1, %v13971_v17  ;;  %v20825_v36 = vld [vmem:[#allocation76_spill] sm:$0xff]  ;;  %v9720_v17 = vsub.f32 0.0, %v19125_v38 }
0x1a95   : > { %9684 = vadd.xlane.f32.xlu0 %v9683_v2  ;;  %v10203_v39 = vand.u32 2147483647, %v19163_v23  ;;  %v10282_v2 = vmul.f32 1.442695, %v10233_v43 }
0x1a96   : > { %10810 = vrot.lane.b32.xlu1 %v20821_v13, %s14177_s3  ;;  %v9701_v13 = vsel %vm4594_vm6, %v19176_v11, 0.0  ;;  %v9670_v57 = vpop.xlane.xlu1 %9669  ;;  %v9752_v43 = vsel %vm4594_vm6, %v18990_v8, %v9720_v17 }
0x1a97   : > { %v10235_v33 = vsub.f32 0.0, %v10203_v39  ;;  %13972 = vpow2.f32 %v10282_v2  ;;  %v20829_v2 = vld [vmem:[#allocation88_spill] sm:$0xff] }
0x1a99   : > { %9690 = vadd.xlane.f32.xlu0 %v9689_v62  ;;  %v20826_v62 = vld [vmem:[#allocation80_spill] sm:$0xff] }
0x1a9a   : > { %10814 = vrot.lane.b32.xlu1 %v20823_v47, %s14177_s3  ;;  %v10286_v47 = vmul.f32 1.442695, %v10235_v33  ;;  %v19191_v39 = vpop.permute.xlu1 %9954  ;;  %v9724_v33 = vsub.f32 0.0, %v9670_v57 }
0x1a9b   : > { %20828 = vst [vmem:[#allocation66_spill] sm:$0xff] %v19191_v39 }
0x1a9c   : > { %13974 = vpow2.f32 %v10286_v47  ;;  %v9756_v8 = vsel %vm4594_vm6, %v19010_v31, %v9724_v33  ;;  %v20833_v31 = vld [vmem:[#allocation85_spill] sm:$0xff] }
0x1a9d   : > { %9696 = vadd.xlane.f32.xlu0 %v9695_v1  ;;  %v9664_v1 = vpop.xlane.xlu0 %9663  ;;  %v9808_v39 = vmul.f32 1.442695, %v9756_v8 }
0x1a9e   : > { %10818 = vrot.lane.b32.xlu1 %v20825_v36, %s14177_s3  ;;  %v9722_v30 = vsub.f32 0.0, %v9664_v1  ;;  %v9800_v36 = vmul.f32 1.442695, %v9752_v43 }
0x1aa0   : > { %13976 = vpow2.f32 %v9800_v36 }
0x1aa1   : > { %9702 = vadd.xlane.f32.xlu0 %v9701_v13  ;;  %v9754_v13 = vsel %vm4594_vm6, %v19053_v29, %v9722_v30  ;;  %v13973_v38 = vpop.eup %13972  ;;  %v20831_v29 = vld [vmem:[#allocation95_spill] sm:$0xff]  ;;  %v19205_v36 = vpop.permute.xlu0 %9948 }
0x1aa2   : > { %10822 = vrot.lane.b32.xlu1 %v20826_v62, %s14177_s3  ;;  %v9676_v62 = vpop.xlane.xlu1 %9675  ;;  %v9804_v1 = vmul.f32 1.442695, %v9754_v13  ;;  %v10329_v17 = vadd.f32 1.0, %v13973_v38 }
0x1aa3   : > { %v9726_v47 = vsub.f32 0.0, %v9676_v62 }
0x1aa4   : > { %13978 = vpow2.f32 %v9804_v1  ;;  %v20834_v1 = vld [vmem:[#allocation36_spill] sm:$0xff] }
0x1aa5   : > { %v9758_v30 = vsel %vm4594_vm6, %v19061_v21, %v9726_v47  ;;  %13980 = vlog2.f32 %v10329_v17  ;;  %v20836_v47 = vld [vmem:[#allocation89_spill] sm:$0xff] }
0x1aa6   : > { %10826 = vrot.lane.b32.xlu1 %v20827_v10, %s14177_s3  ;;  %v20830_v10 = vld [vmem:[#allocation92_spill] sm:$0xff]  ;;  %v13975_v43 = vpop.eup %13974  ;;  %13982 = vpow2.f32 %v9808_v39  ;;  %v9812_v13 = vmul.f32 1.442695, %v9758_v30 }
0x1aa7   : > { %v10331_v57 = vadd.f32 1.0, %v13975_v43 }
0x1aa9   : > { %13984 = vlog2.f32 %v10331_v57  ;;  %v20838_v57 = vld [vmem:[#allocation38_spill] sm:$0xff] }
0x1aaa   : > { %10830 = vrot.lane.b32.xlu1 %v20829_v2, %s14177_s3  ;;  %v20832_v2 = vld [vmem:[#allocation34_spill] sm:$0xff]  ;;  %v13977_v33 = vpop.eup %13976  ;;  %13986 = vpow2.f32 %v9812_v13  ;;  %v20839_v13 = vld [vmem:[#allocation93_spill] sm:$0xff] }
0x1aae   : > { %10834 = vrot.lane.b32.xlu1 %v20830_v10, %s14177_s3  ;;  %v13979_v21 = vpop.eup %13978  ;;  %v20835_v10 = vld [vmem:[#allocation114_spill] sm:$0xff] }
0x1aaf   : > { %v9848_v8 = vmul.f32 %v13977_v33, %v20835_v10  ;;  %v13981_v43 = vpop.eup %13980 }
0x1ab0   : > { %v10379_v33 = vmul.f32 0.6931472, %v13981_v43  ;;  %v19235_v43 = vpop.permute.xlu1 %9958 }
0x1ab2   : > { %10838 = vrot.lane.b32.xlu1 %v20831_v29, %s14177_s3  ;;  %v20837_v29 = vld [vmem:[#allocation117_spill] sm:$0xff] }
0x1ab3   : > { %v9850_v30 = vmul.f32 %v13979_v21, %v20837_v29  ;;  %v20841_v21 = vld [vmem:[#allocation96_spill] sm:$0xff]  ;;  %v20843_v29 = vld [vmem:[#allocation41_spill] sm:$0xff] }
0x1ab6   : > { %10874 = vrot.lane.b32.xlu1 %v20832_v2, %s14177_s3  ;;  %v10008_v2 = vadd.f32 %v19099_v59, %v9848_v8 }
0x1ab7   : > { %10760 = vrot.lane.b32.xlu0 %v20833_v31, %s14176_s30  ;;  %v13983_v31 = vpop.eup %13982 }
0x1ab8   : > { %v9673_v38 = vpop.xlane.xlu0 %9672  ;;  %v19232_v10 = vsel %vm3480_vm5, %v10008_v2, %v18647_v42  ;;  %v20844_v42 = vld [vmem:[#allocation130_spill] sm:$0xff] }
0x1ab9   : > { %v9725_v62 = vsub.f32 0.0, %v9673_v38  ;;  %v13985_v38 = vpop.eup %13984 }
0x1aba   : > { %10878 = vrot.lane.b32.xlu1 %v20834_v1, %s14177_s3  ;;  %v10010_v1 = vadd.f32 %v19111_v5, %v9850_v30  ;;  %v10200_v5 = vand.u32 2147483647, %v19232_v10 }
0x1abb   : > { %v9757_v39 = vsel %vm4594_vm6, %v19075_v7, %v9725_v62  ;;  %10764 = vrot.lane.b32.xlu0 %v20836_v47, %s14176_s30  ;;  %v20840_v7 = vld [vmem:[#allocation40_spill] sm:$0xff]  ;;  %v10169_v62 = vmax.f32 %v19152_v19, 0.0  ;;  %v20842_v47 = vld [vmem:[#allocation123_spill] sm:$0xff]  ;;  %v10171_v19 = vmax.f32 %v19163_v23, 0.0 }
0x1abc   : > { %v9810_v17 = vmul.f32 1.442695, %v9757_v39  ;;  %v13987_v39 = vpop.eup %13986  ;;  %v9852_v59 = vmul.f32 %v13983_v31, %v20842_v47  ;;  %v19243_v30 = vsel %vm3480_vm5, %v10010_v1, %v18658_v48  ;;  %v10232_v48 = vsub.f32 0.0, %v10200_v5  ;;  %v20848_v1 = vld [vmem:[#allocation71_spill] sm:$0xff] }
0x1abd   : > { %v10425_v8 = vadd.f32 %v10379_v33, %v10169_v62  ;;  %v10202_v23 = vand.u32 2147483647, %v19243_v30 }
0x1abe   : > { %13988 = vpow2.f32 %v9810_v17  ;;  %10882 = vrot.lane.b32.xlu1 %v20838_v57, %s14177_s3  ;;  %v10383_v17 = vmul.f32 0.6931472, %v13985_v38  ;;  %v9854_v57 = vmul.f32 %v13987_v39, %v20844_v42  ;;  %v10012_v38 = vadd.f32 %v19117_v53, %v9852_v59 }
0x1abf   : > { %10768 = vrot.lane.b32.xlu0 %v20839_v13, %s14176_s30  ;;  %v20845_v13 = vld [vmem:[#allocation67_spill] sm:$0xff]  ;;  %v10457_v31 = vmax.f32 %v10425_v8, 1e-07 }
0x1ac0   : > { %v10427_v33 = vadd.f32 %v10383_v17, %v10171_v19  ;;  %v10014_v8 = vadd.f32 %v19121_v24, %v9854_v57  ;;  %v19261_v19 = vsel %vm3480_vm5, %v10012_v38, %v18662_v26  ;;  %v20849_v24 = vld [vmem:[#allocation75_spill] sm:$0xff] }
0x1ac1   : > { %v10489_v59 = vmin.f32 %v10457_v31, 10000000.0  ;;  %v10204_v26 = vand.u32 2147483647, %v19261_v19 }
0x1ac2   : > { %10886 = vrot.lane.b32.xlu1 %v20840_v7, %s14177_s3  ;;  %v20846_v7 = vld [vmem:[#allocation121_spill] sm:$0xff]  ;;  %v10459_v17 = vmax.f32 %v10427_v33, 1e-07  ;;  %v19274_v57 = vsel %vm3480_vm5, %v10014_v8, %v18666_v14  ;;  %v20851_v8 = vld [vmem:[#allocation83_spill] sm:$0xff] }
0x1ac3   : > { %10772 = vrot.lane.b32.xlu0 %v20841_v21, %s14176_s30  ;;  %v10236_v14 = vsub.f32 0.0, %v10204_v26 }
0x1ac4   : > { %v10491_v31 = vmin.f32 %v10459_v17, 10000000.0  ;;  %v20852_v17 = vld [vmem:[#allocation137_spill] sm:$0xff] }
0x1ac6   : > { %10890 = vrot.lane.b32.xlu1 %v20843_v29, %s14177_s3  ;;  %v20847_v29 = vld [vmem:[#allocation42_spill] sm:$0xff] }
0x1ac7   : > { %10808 = vrot.lane.b32.xlu0 %v20845_v13, %s14177_s3 }
0x1ac8   : > { %v13989_v2 = vpop.eup %13988 }
0x1ac9   : > { %v9853_v62 = vmul.f32 %v13989_v2, %v20846_v7  ;;  %v9682_v21 = vpop.xlane.xlu1 %9681  ;;  %v10234_v2 = vsub.f32 0.0, %v10202_v23 }
0x1aca   : > { %v9728_v47 = vsub.f32 0.0, %v9682_v21  ;;  %10894 = vrot.lane.b32.xlu1 %v20847_v29, %s14177_s3  ;;  %v10206_v29 = vand.u32 2147483647, %v19274_v57 }
0x1acb   : > { %10812 = vrot.lane.b32.xlu0 %v20848_v1, %s14177_s3  ;;  %v10013_v39 = vadd.f32 %v19115_v35, %v9853_v62  ;;  %v10284_v21 = vmul.f32 1.442695, %v10234_v2  ;;  %v20853_v2 = vld [vmem:[#allocation87_spill] sm:$0xff] }
0x1acc   : > { %v9760_v53 = vsel %vm4594_vm6, %v19081_v22, %v9728_v47  ;;  %v10280_v22 = vmul.f32 1.442695, %v10232_v48  ;;  %v20850_v48 = vld [vmem:[#allocation79_spill] sm:$0xff] }
0x1acd   : > { %v9816_v42 = vmul.f32 1.442695, %v9760_v53  ;;  %v9688_v13 = vpop.xlane.xlu1 %9687  ;;  %v19265_v5 = vsel %vm3480_vm5, %v10013_v39, %v18623_v58  ;;  %v10238_v39 = vsub.f32 0.0, %v10206_v29  ;;  %v10288_v53 = vmul.f32 1.442695, %v10236_v14  ;;  %v20856_v29 = vld [vmem:[#allocation140_spill] sm:$0xff] }
0x1ace   : > { %v9730_v7 = vsub.f32 0.0, %v9688_v13  ;;  %10522 = vrot.lane.b32.xlu1 %v10489_v59, %s14178_s21  ;;  %v10205_v35 = vand.u32 2147483647, %v19265_v5 }
0x1acf   : > { %13990 = vpow2.f32 %v9816_v42  ;;  %10816 = vrot.lane.b32.xlu0 %v20849_v24, %s14177_s3  ;;  %v10292_v13 = vmul.f32 1.442695, %v10238_v39  ;;  %v20854_v24 = vld [vmem:[#allocation138_spill] sm:$0xff] }
0x1ad0   : > { %v9762_v58 = vsel %vm4594_vm6, %v19085_v46, %v9730_v7  ;;  %v10237_v33 = vsub.f32 0.0, %v10205_v35  ;;  %13992 = vpow2.f32 %v10280_v22 }
0x1ad1   : > { %v9820_v38 = vmul.f32 1.442695, %v9762_v58  ;;  %v9694_v62 = vpop.xlane.xlu1 %9693 }
0x1ad2   : > { %v9732_v23 = vsub.f32 0.0, %v9694_v62  ;;  %10526 = vrot.lane.b32.xlu1 %v10491_v31, %s14178_s21  ;;  %v10290_v47 = vmul.f32 1.442695, %v10237_v33  ;;  %v20855_v31 = vld [vmem:[#allocation91_spill] sm:$0xff] }
0x1ad3   : > { %13994 = vpow2.f32 %v9820_v38  ;;  %10820 = vrot.lane.b32.xlu0 %v20850_v48, %s14177_s3 }
0x1ad4   : > { %v9764_v46 = vsel %vm4594_vm6, %v19089_v52, %v9732_v23  ;;  %13996 = vpow2.f32 %v10290_v47 }
0x1ad5   : > { %v9824_v1 = vmul.f32 1.442695, %v9764_v46  ;;  %13998 = vpow2.f32 %v10284_v21  ;;  %v20857_v46 = vld [vmem:[#allocation94_spill] sm:$0xff] }
0x1ad7   : > { %14000 = vpow2.f32 %v9824_v1  ;;  %10824 = vrot.lane.b32.xlu0 %v20851_v8, %s14177_s3 }
0x1ad8   : > { %14002 = vpow2.f32 %v10288_v53 }
0x1ad9   : > { %v13991_v59 = vpop.eup %13990  ;;  %14004 = vpow2.f32 %v10292_v13 }
0x1ada   : > { %v9856_v42 = vmul.f32 %v13991_v59, %v20852_v17  ;;  %v13993_v7 = vpop.eup %13992 }
0x1adb   : > { %10828 = vrot.lane.b32.xlu0 %v20853_v2, %s14177_s3  ;;  %v10328_v21 = vadd.f32 1.0, %v13993_v7 }
0x1adc   : > { %v10016_v52 = vadd.f32 %v19132_v0, %v9856_v42 }
0x1add   : > { %v13995_v35 = vpop.eup %13994 }
0x1ade   : > { %v13997_v22 = vpop.eup %13996  ;;  %v9858_v26 = vmul.f32 %v13995_v35, %v20854_v24  ;;  %v19293_v58 = vsel %vm3480_vm5, %v10016_v52, %v18672_v6  ;;  %v9953_v6 = vpop.permute.xlu0 %9952 }
0x1adf   : > { %10832 = vrot.lane.b32.xlu0 %v20855_v31, %s14177_s3  ;;  %v10333_v33 = vadd.f32 1.0, %v13997_v22  ;;  %v10208_v38 = vand.u32 2147483647, %v19293_v58  ;;  %v13999_v62 = vpop.eup %13998  ;;  %v20859_v22 = vld [vmem:[#allocation43_spill] sm:$0xff] }
0x1ae0   : > { %v10018_v23 = vadd.f32 %v19205_v36, %v9858_v26  ;;  %v10330_v8 = vadd.f32 1.0, %v13999_v62 }
0x1ae1   : > { %v14001_v0 = vpop.eup %14000  ;;  %14006 = vlog2.f32 %v10333_v33  ;;  %v10240_v47 = vsub.f32 0.0, %v10208_v38 }
0x1ae2   : > { %v9860_v48 = vmul.f32 %v14001_v0, %v20856_v29  ;;  %v19302_v14 = vsel %vm3480_vm5, %v10018_v23, %v18684_v4  ;;  %14008 = vlog2.f32 %v10328_v21  ;;  %v14003_v36 = vpop.eup %14002  ;;  %v20858_v4 = vld [vmem:[#allocation39_spill] sm:$0xff]  ;;  %v20860_v0 = vld [vmem:[#allocation45_spill] sm:$0xff] }
0x1ae3   : > { %10836 = vrot.lane.b32.xlu0 %v20857_v46, %s14177_s3  ;;  %v10296_v1 = vmul.f32 1.442695, %v10240_v47  ;;  %v10210_v39 = vand.u32 2147483647, %v19302_v14  ;;  %v14005_v2 = vpop.eup %14004  ;;  %v10332_v7 = vadd.f32 1.0, %v14003_v36  ;;  %v9705_v47 = vsub.f32 0.0, %v18984_v28 }
0x1ae4   : > { %v10020_v53 = vadd.f32 %v9953_v6, %v9860_v48  ;;  %v10334_v24 = vadd.f32 1.0, %v14005_v2  ;;  %v10168_v36 = vmax.f32 %v19232_v10, 0.0 }
0x1ae5   : > { %14010 = vpow2.f32 %v10296_v1  ;;  %v10242_v59 = vsub.f32 0.0, %v10210_v39  ;;  %v9737_v28 = vsel %vm4594_vm6, %v18627_v34, %v9705_v47  ;;  %v20864_v47 = vld [vmem:[#allocation125_spill] sm:$0xff] }
0x1ae6   : > { %v19309_v17 = vsel %vm3480_vm5, %v10020_v53, %v18696_v49  ;;  %14012 = vlog2.f32 %v10330_v8  ;;  %v10173_v49 = vmax.f32 %v19265_v5, 0.0  ;;  %v20861_v53 = vld [vmem:[#allocation47_spill] sm:$0xff]  ;;  %v9770_v2 = vmul.f32 1.442695, %v9737_v28 }
0x1ae7   : > { %10872 = vrot.lane.b32.xlu0 %v20858_v4, %s14177_s3  ;;  %v10300_v42 = vmul.f32 1.442695, %v10242_v59  ;;  %v10212_v13 = vand.u32 2147483647, %v19309_v17 }
0x1ae9   : > { %14014 = vpow2.f32 %v10300_v42  ;;  %v10244_v52 = vsub.f32 0.0, %v10212_v13 }
0x1aea   : > { %14016 = vlog2.f32 %v10332_v7  ;;  %v9707_v7 = vsub.f32 0.0, %v19020_v56  ;;  %v10172_v56 = vmax.f32 %v19261_v19, 0.0 }
0x1aeb   : > { %v14007_v35 = vpop.eup %14006  ;;  %10876 = vrot.lane.b32.xlu0 %v20859_v22, %s14177_s3  ;;  %v10304_v26 = vmul.f32 1.442695, %v10244_v52  ;;  %v20862_v52 = vld [vmem:[#allocation48_spill] sm:$0xff] }
0x1aec   : > { %v10387_v31 = vmul.f32 0.6931472, %v14007_v35  ;;  %v14009_v38 = vpop.eup %14008  ;;  %v10170_v35 = vmax.f32 %v19243_v30, 0.0 }
0x1aed   : > { %v9679_v33 = vpop.xlane.xlu0 %9678  ;;  %14018 = vpow2.f32 %v10304_v26  ;;  %v10377_v46 = vmul.f32 0.6931472, %v14009_v38 }
0x1aee   : > { %v9727_v62 = vsub.f32 0.0, %v9679_v33  ;;  %v10429_v21 = vadd.f32 %v10387_v31, %v10173_v49  ;;  %14020 = vlog2.f32 %v10334_v24  ;;  %v9739_v49 = vsel %vm4594_vm6, %v18670_v37, %v9707_v7  ;;  %v20863_v31 = vld [vmem:[#allocation51_spill] sm:$0xff] }
0x1aef   : > { %v14011_v23 = vpop.eup %14010  ;;  %10880 = vrot.lane.b32.xlu0 %v20860_v0, %s14177_s3  ;;  %v10424_v59 = vadd.f32 %v10377_v46, %v10168_v36  ;;  %v9774_v0 = vmul.f32 1.442695, %v9739_v49 }
0x1af0   : > { %v9759_v29 = vsel %vm4594_vm6, %v19105_v3, %v9727_v62  ;;  %v10461_v48 = vmax.f32 %v10429_v21, 1e-07  ;;  %v10336_v6 = vadd.f32 1.0, %v14011_v23  ;;  %v14013_v1 = vpop.eup %14012 }
0x1af1   : > { %v9814_v5 = vmul.f32 1.442695, %v9759_v29  ;;  %v10381_v4 = vmul.f32 0.6931472, %v14013_v1  ;;  %v10456_v24 = vmax.f32 %v10424_v59, 1e-07 }
0x1af2   : > { %v10493_v39 = vmin.f32 %v10461_v48, 10000000.0  ;;  %14022 = vlog2.f32 %v10336_v6  ;;  %v10174_v48 = vmax.f32 %v19274_v57, 0.0 }
0x1af3   : > { %v14015_v8 = vpop.eup %14014  ;;  %14024 = vpow2.f32 %v9814_v5  ;;  %10884 = vrot.lane.b32.xlu0 %v20861_v53, %s14177_s3  ;;  %v10426_v34 = vadd.f32 %v10381_v4, %v10170_v35  ;;  %v10488_v30 = vmin.f32 %v10456_v24, 10000000.0  ;;  %v20865_v35 = vld [vmem:[#allocation120_spill] sm:$0xff] }
0x1af4   : > { %10530 = vrot.lane.b32.xlu1 %v10493_v39, %s14178_s21  ;;  %v10338_v3 = vadd.f32 1.0, %v14015_v8  ;;  %v14017_v42 = vpop.eup %14016  ;;  %v19341_v39 = vpop.permute.xlu1 %10762  ;;  %v10176_v8 = vmax.f32 %v19293_v58, 0.0  ;;  %v10178_v58 = vmax.f32 %v19302_v14, 0.0  ;;  %v9709_v14 = vsub.f32 0.0, %v19038_v54 }
0x1af5   : > { %v10385_v26 = vmul.f32 0.6931472, %v14017_v42  ;;  %v10458_v21 = vmax.f32 %v10426_v34, 1e-07 }
0x1af6   : > { %14026 = vlog2.f32 %v10338_v3 }
0x1af7   : > { %v14019_v13 = vpop.eup %14018  ;;  %10888 = vrot.lane.b32.xlu0 %v20862_v52, %s14177_s3  ;;  %14028 = vpow2.f32 %v9770_v2  ;;  %v10428_v23 = vadd.f32 %v10385_v26, %v10172_v56  ;;  %v10490_v46 = vmin.f32 %v10458_v21, 10000000.0  ;;  %v20866_v21 = vld [vmem:[#allocation164_spill] sm:$0xff] }
0x1af8   : > { %v10340_v10 = vadd.f32 1.0, %v14019_v13  ;;  %v14021_v22 = vpop.eup %14020 }
0x1af9   : > { %v10389_v38 = vmul.f32 0.6931472, %v14021_v22  ;;  %v10460_v19 = vmax.f32 %v10428_v23, 1e-07 }
0x1afa   : > { %14030 = vlog2.f32 %v10340_v10 }
0x1afb   : > { %10892 = vrot.lane.b32.xlu0 %v20863_v31, %s14177_s3  ;;  %v10430_v37 = vadd.f32 %v10389_v38, %v10174_v48  ;;  %14032 = vpow2.f32 %v9774_v0  ;;  %v10180_v31 = vmax.f32 %v19309_v17, 0.0  ;;  %v9704_v0 = vsub.f32 0.0, %v19006_v18 }
0x1afc   : > { %v14023_v33 = vpop.eup %14022  ;;  %v9741_v17 = vsel %vm4594_vm6, %v18747_v55, %v9709_v14  ;;  %v20868_v14 = vld [vmem:[#allocation122_spill] sm:$0xff] }
0x1afd   : > { %v14025_v62 = vpop.eup %14024  ;;  %v10393_v6 = vmul.f32 0.6931472, %v14023_v33  ;;  %v10462_v36 = vmax.f32 %v10430_v37, 1e-07  ;;  %v9778_v37 = vmul.f32 1.442695, %v9741_v17  ;;  %v9736_v18 = vsel %vm4594_vm6, %v18617_v60, %v9704_v0 }
0x1afe   : > { %v9855_v29 = vmul.f32 %v14025_v62, %v20864_v47 }
0x1aff   : > { %10520 = vrot.lane.b32.xlu0 %v10488_v30, %s14178_s21  ;;  %v10432_v28 = vadd.f32 %v10393_v6, %v10176_v8  ;;  %v20867_v8 = vld [vmem:[#allocation141_spill] sm:$0xff] }
0x1b00   : > { %v10015_v5 = vadd.f32 %v19119_v61, %v9855_v29  ;;  %v14027_v1 = vpop.eup %14026  ;;  %v10492_v61 = vmin.f32 %v10460_v19, 10000000.0 }
0x1b01   : > { %v14029_v3 = vpop.eup %14028  ;;  %v10397_v59 = vmul.f32 0.6931472, %v14027_v1  ;;  %v10464_v52 = vmax.f32 %v10432_v28, 1e-07  ;;  %v9706_v28 = vsub.f32 0.0, %v19025_v20 }
0x1b02   : > { %v19346_v53 = vsel %vm3480_vm5, %v10015_v5, %v18629_v15  ;;  %v10494_v15 = vmin.f32 %v10462_v36, 10000000.0  ;;  %v9833_v10 = vmul.f32 %v14029_v3, %v20865_v35  ;;  %v9957_v36 = vpop.permute.xlu0 %9956  ;;  %v9710_v35 = vsub.f32 0.0, %v19008_v45 }
0x1b03   : > { %10524 = vrot.lane.b32.xlu0 %v10490_v46, %s14178_s21  ;;  %v10207_v57 = vand.u32 2147483647, %v19346_v53  ;;  %v10434_v24 = vadd.f32 %v10397_v59, %v10178_v58  ;;  %v10496_v33 = vmin.f32 %v10464_v52, 10000000.0 }
0x1b04   : > { %v14031_v42 = vpop.eup %14030  ;;  %v9993_v30 = vadd.f32 %v18992_v16, %v9833_v10  ;;  %v9742_v45 = vsel %vm4594_vm6, %v20868_v14, %v9710_v35 }
0x1b05   : > { %v10239_v4 = vsub.f32 0.0, %v10207_v57  ;;  %v10401_v34 = vmul.f32 0.6931472, %v14031_v42  ;;  %v14033_v56 = vpop.eup %14032  ;;  %v10466_v38 = vmax.f32 %v10434_v24, 1e-07 }
0x1b06   : > { %v9700_v13 = vpop.xlane.xlu1 %9699  ;;  %v9835_v23 = vmul.f32 %v14033_v56, %v20866_v21  ;;  %v19370_v54 = vsel %vm3480_vm5, %v9993_v30, %v18660_v25  ;;  %v9768_v25 = vmul.f32 1.442695, %v9736_v18  ;;  %v9780_v17 = vmul.f32 1.442695, %v9742_v45 }
0x1b07   : > { %v9734_v2 = vsub.f32 0.0, %v9700_v13  ;;  %10528 = vrot.lane.b32.xlu0 %v10492_v61, %s14178_s21  ;;  %v10294_v7 = vmul.f32 1.442695, %v10239_v4  ;;  %v10436_v62 = vadd.f32 %v10401_v34, %v10180_v31  ;;  %v10498_v47 = vmin.f32 %v10466_v38, 10000000.0 }
0x1b08   : > { %v9995_v6 = vadd.f32 %v18949_v27, %v9835_v23  ;;  %v10185_v55 = vand.u32 2147483647, %v19370_v54 }
0x1b09   : > { %v9766_v22 = vsel %vm4594_vm6, %v19123_v44, %v9734_v2  ;;  %14034 = vpow2.f32 %v10294_v7  ;;  %v10468_v29 = vmax.f32 %v10436_v62, 1e-07  ;;  %v9708_v2 = vsub.f32 0.0, %v19000_v51 }
0x1b0a   : > { %v9828_v26 = vmul.f32 1.442695, %v9766_v22  ;;  %v19355_v49 = vpop.permute.xlu1 %10766  ;;  %v19385_v27 = vsel %vm3480_vm5, %v9995_v6, %v18664_v41  ;;  %v10217_v60 = vsub.f32 0.0, %v10185_v55  ;;  %v9738_v41 = vsel %vm4594_vm6, %v18678_v50, %v9706_v28  ;;  %v20871_v6 = vld [vmem:[#allocation163_spill] sm:$0xff]  ;;  %v20872_v55 = vld [vmem:[#allocation168_spill] sm:$0xff] }
0x1b0b   : > { %10532 = vrot.lane.b32.xlu0 %v10494_v15, %s14178_s21  ;;  %v10500_v46 = vmin.f32 %v10468_v29, 10000000.0  ;;  %v10187_v59 = vand.u32 2147483647, %v19385_v27  ;;  %v9772_v52 = vmul.f32 1.442695, %v9738_v41  ;;  %v9740_v34 = vsel %vm4594_vm6, %v18700_v32, %v9708_v2 }
0x1b0c   : > { %14036 = vpow2.f32 %v9828_v26  ;;  %v10250_v13 = vmul.f32 1.442695, %v10217_v60  ;;  %v10175_v22 = vmax.f32 %v19346_v53, 0.0  ;;  %v9776_v30 = vmul.f32 1.442695, %v9740_v34  ;;  %v20873_v60 = vld [vmem:[#allocation102_spill] sm:$0xff] }
0x1b0d   : > { %v10219_v7 = vsub.f32 0.0, %v10187_v59  ;;  %v20875_v2 = vld [vmem:[#allocation3_spill] sm:$0xff] }
0x1b0e   : > { %v19361_v44 = vpop.permute.xlu1 %10770 }
0x1b0f   : > { %10536 = vrot.lane.b32.xlu0 %v10496_v33, %s14178_s21  ;;  %v10254_v51 = vmul.f32 1.442695, %v10219_v7  ;;  %v20869_v33 = vld [vmem:[#allocation124_spill] sm:$0xff] }
0x1b12   : > { %v19372_v48 = vpop.permute.xlu1 %10774 }
0x1b13   : > { %v14035_v16 = vpop.eup %14034  ;;  %10540 = vrot.lane.b32.xlu0 %v10498_v47, %s14178_s21 }
0x1b14   : > { %v10335_v5 = vadd.f32 1.0, %v14035_v16  ;;  %v20870_v16 = vld [vmem:[#allocation23_spill] sm:$0xff] }
0x1b16   : > { %v14037_v19 = vpop.eup %14036  ;;  %v19379_v1 = vpop.permute.xlu1 %10810  ;;  %14038 = vlog2.f32 %v10335_v5 }
0x1b17   : > { %14040 = vpow2.f32 %v9778_v37  ;;  %v9862_v57 = vmul.f32 %v14037_v19, %v20867_v8  ;;  %10544 = vrot.lane.b32.xlu0 %v10500_v46, %s14178_s21  ;;  %v9712_v46 = vsub.f32 0.0, %v20872_v55 }
0x1b18   : > { %14042 = vpow2.f32 %v9768_v25 }
0x1b19   : > { %v10022_v3 = vadd.f32 %v9957_v36, %v9862_v57  ;;  %14044 = vpow2.f32 %v10250_v13 }
0x1b1a   : > { %v19388_v61 = vpop.permute.xlu1 %10814 }
0x1b1b   : > { %v19393_v4 = vsel %vm3480_vm5, %v10022_v3, %v18986_v9  ;;  %v20874_v3 = vld [vmem:[#allocation15_spill] sm:$0xff] }
0x1b1c   : > { %v10214_v42 = vand.u32 2147483647, %v19393_v4 }
0x1b1e   : > { %v19399_v58 = vpop.permute.xlu1 %10818  ;;  %v10246_v20 = vsub.f32 0.0, %v10214_v42 }
0x1b20   : > { %v14039_v15 = vpop.eup %14038  ;;  %v10308_v10 = vmul.f32 1.442695, %v10246_v20  ;;  %v9744_v20 = vsel %vm4594_vm6, %v20875_v2, %v9712_v46 }
0x1b21   : > { %v14041_v9 = vpop.eup %14040  ;;  %v10391_v24 = vmul.f32 0.6931472, %v14039_v15 }
0x1b22   : > { %v9685_v50 = vpop.xlane.xlu0 %9684  ;;  %v19405_v26 = vpop.permute.xlu1 %10822  ;;  %14046 = vpow2.f32 %v10308_v10  ;;  %v9837_v38 = vmul.f32 %v14041_v9, %v20869_v33 }
0x1b23   : > { %v9729_v31 = vsub.f32 0.0, %v9685_v50  ;;  %v10431_v56 = vadd.f32 %v10391_v24, %v10175_v22  ;;  %14048 = vpow2.f32 %v9772_v52  ;;  %v14043_v62 = vpop.eup %14042  ;;  %v20876_v22 = vld [vmem:[#allocation156_spill] sm:$0xff]  ;;  %v20877_v50 = vld [vmem:[#allocation134_spill] sm:$0xff] }
0x1b24   : > { %14050 = vpow2.f32 %v10254_v51  ;;  %v9997_v37 = vadd.f32 %v20870_v16, %v9837_v38  ;;  %v9832_v18 = vmul.f32 %v14043_v62, %v20871_v6  ;;  %v20882_v6 = vld [vmem:[#allocation7_spill] sm:$0xff] }
0x1b25   : > { %v9761_v53 = vsel %vm4594_vm6, %v19146_v40, %v9729_v31  ;;  %v10463_v21 = vmax.f32 %v10431_v56, 1e-07  ;;  %v14045_v40 = vpop.eup %14044  ;;  %v20878_v56 = vld [vmem:[#allocation169_spill] sm:$0xff] }
0x1b26   : > { %v9818_v32 = vmul.f32 1.442695, %v9761_v53  ;;  %v9691_v23 = vpop.xlane.xlu0 %9690  ;;  %v19412_v0 = vpop.permute.xlu1 %10826  ;;  %v19424_v28 = vsel %vm3480_vm5, %v9997_v37, %v20873_v60  ;;  %v9992_v59 = vadd.f32 %v20874_v3, %v9832_v18  ;;  %v10313_v13 = vadd.f32 1.0, %v14045_v40  ;;  %v20886_v60 = vld [vmem:[#allocation144_spill] sm:$0xff] }
0x1b27   : > { %v9731_v47 = vsub.f32 0.0, %v9691_v23  ;;  %v10495_v29 = vmin.f32 %v10463_v21, 10000000.0  ;;  %v10189_v10 = vand.u32 2147483647, %v19424_v28  ;;  %v9714_v14 = vsub.f32 0.0, %v20878_v56 }
0x1b28   : > { %14052 = vpow2.f32 %v9818_v32  ;;  %v19436_v24 = vsel %vm3480_vm5, %v9992_v59, %v20876_v22  ;;  %v20890_v22 = vld [vmem:[#allocation104_spill] sm:$0xff]  ;;  %v10182_v56 = vmax.f32 %v19393_v4, 0.0 }
0x1b29   : > { %14054 = vpow2.f32 %v9776_v30  ;;  %v9763_v5 = vsel %vm4594_vm6, %v19156_v63, %v9731_v47  ;;  %10534 = vrot.lane.b32.xlu1 %v10495_v29, %s14178_s21  ;;  %v20879_v30 = vld [vmem:[#allocation132_spill] sm:$0xff]  ;;  %v10221_v32 = vsub.f32 0.0, %v10189_v10  ;;  %v10184_v23 = vand.u32 2147483647, %v19436_v24  ;;  %v20881_v29 = vld [vmem:[#allocation19_spill] sm:$0xff] }
0x1b2a   : > { %v9822_v19 = vmul.f32 1.442695, %v9763_v5  ;;  %v9697_v25 = vpop.xlane.xlu0 %9696  ;;  %v19420_v8 = vpop.permute.xlu1 %10830  ;;  %14056 = vpow2.f32 %v9780_v17  ;;  %v20880_v17 = vld [vmem:[#allocation90_spill] sm:$0xff]  ;;  %v9746_v18 = vsel %vm4594_vm6, %v20882_v6, %v9714_v14  ;;  %v20889_v10 = vld [vmem:[#allocation115_spill] sm:$0xff] }
0x1b2b   : > { %v9733_v57 = vsub.f32 0.0, %v9697_v25  ;;  %v20883_v5 = vld [vmem:[#allocation170_spill] sm:$0xff]  ;;  %v10258_v59 = vmul.f32 1.442695, %v10221_v32  ;;  %v20896_v6 = vld [vmem:[#allocation35_spill] sm:$0xff] }
0x1b2c   : > { %v14047_v36 = vpop.eup %14046  ;;  %14058 = vpow2.f32 %v9822_v19  ;;  %v9716_v40 = vsub.f32 0.0, %v20883_v5  ;;  %v20884_v19 = vld [vmem:[#allocation136_spill] sm:$0xff]  ;;  %v20897_v5 = vld [vmem:[#allocation66_spill] sm:$0xff] }
0x1b2d   : > { %v9765_v63 = vsel %vm4594_vm6, %v19169_v12, %v9733_v57  ;;  %v10342_v42 = vadd.f32 1.0, %v14047_v36  ;;  %v14049_v41 = vpop.eup %14048  ;;  %v9784_v12 = vmul.f32 1.442695, %v9744_v20  ;;  %v20885_v57 = vld [vmem:[#allocation139_spill] sm:$0xff] }
0x1b2e   : > { %v9826_v7 = vmul.f32 1.442695, %v9765_v63  ;;  %v9703_v15 = vpop.xlane.xlu0 %9702  ;;  %v19431_v52 = vpop.permute.xlu1 %10834  ;;  %v9834_v51 = vmul.f32 %v14049_v41, %v20877_v50  ;;  %v10153_v63 = vmax.f32 %v19370_v54, 0.0  ;;  %v20887_v41 = vld [vmem:[#allocation165_spill] sm:$0xff] }
0x1b2f   : > { %v9735_v35 = vsub.f32 0.0, %v9703_v15  ;;  %14060 = vlog2.f32 %v10342_v42  ;;  %v14051_v9 = vpop.eup %14050  ;;  %v20891_v50 = vld [vmem:[#allocation13_spill] sm:$0xff] }
0x1b30   : > { %14062 = vpow2.f32 %v9826_v7  ;;  %v10315_v21 = vadd.f32 1.0, %v14051_v9  ;;  %v9994_v16 = vadd.f32 %v20881_v29, %v9834_v51  ;;  %v20888_v7 = vld [vmem:[#allocation173_spill] sm:$0xff]  ;;  %v9748_v51 = vsel %vm4594_vm6, %v20891_v50, %v9716_v40 }
0x1b31   : > { %v9767_v34 = vsel %vm4594_vm6, %v19176_v11, %v9735_v35  ;;  %14064 = vlog2.f32 %v10313_v13  ;;  %v10216_v13 = vsub.f32 0.0, %v10184_v23  ;;  %v9711_v15 = vsub.f32 0.0, %v20888_v7  ;;  %v20894_v23 = vld [vmem:[#allocation74_spill] sm:$0xff] }
0x1b32   : > { %v14053_v31 = vpop.eup %14052  ;;  %v9830_v45 = vmul.f32 1.442695, %v9767_v34  ;;  %v19442_v33 = vpop.permute.xlu0 %10760  ;;  %v9788_v35 = vmul.f32 1.442695, %v9746_v18  ;;  %v9792_v18 = vmul.f32 1.442695, %v9748_v51 }
0x1b33   : > { %v19444_v38 = vpop.permute.xlu1 %10838  ;;  %v14055_v62 = vpop.eup %14054  ;;  %v9857_v53 = vmul.f32 %v14053_v31, %v20879_v30  ;;  %v20892_v30 = vld [vmem:[#allocation142_spill] sm:$0xff]  ;;  %v9743_v4 = vsel %vm4594_vm6, %v20896_v6, %v9711_v15 }
0x1b34   : > { %14066 = vpow2.f32 %v9830_v45  ;;  %v14057_v11 = vpop.eup %14056  ;;  %v9836_v25 = vmul.f32 %v14055_v62, %v20884_v19 }
0x1b35   : > { %14068 = vpow2.f32 %v9784_v12  ;;  %v10017_v47 = vadd.f32 %v20880_v17, %v9857_v53  ;;  %v9838_v2 = vmul.f32 %v14057_v11, %v20887_v41  ;;  %v19470_v12 = vsel %vm3480_vm5, %v9994_v16, %v20890_v22  ;;  %v20895_v16 = vld [vmem:[#allocation78_spill] sm:$0xff]  ;;  %v20898_v41 = vld [vmem:[#allocation143_spill] sm:$0xff] }
0x1b36   : > { %v14059_v37 = vpop.eup %14058  ;;  %v19453_v55 = vpop.permute.xlu0 %10764  ;;  %14070 = vlog2.f32 %v10315_v21  ;;  %v20893_v21 = vld [vmem:[#allocation159_spill] sm:$0xff]  ;;  %v9996_v11 = vadd.f32 %v20894_v23, %v9836_v25  ;;  %v10186_v15 = vand.u32 2147483647, %v19470_v12 }
0x1b37   : > { %v19455_v46 = vpop.permute.xlu1 %10874  ;;  %v9859_v36 = vmul.f32 %v14059_v37, %v20885_v57  ;;  %v19461_v3 = vsel %vm3480_vm5, %v10017_v47, %v20886_v60  ;;  %14072 = vpow2.f32 %v10258_v59  ;;  %v9998_v37 = vadd.f32 %v20895_v16, %v9838_v2  ;;  %v20899_v2 = vld [vmem:[#allocation155_spill] sm:$0xff] }
0x1b38   : > { %v10209_v42 = vand.u32 2147483647, %v19461_v3  ;;  %14074 = vpow2.f32 %v9788_v35  ;;  %v20900_v35 = vld [vmem:[#allocation148_spill] sm:$0xff] }
0x1b39   : > { %v14061_v20 = vpop.eup %14060  ;;  %v10019_v9 = vadd.f32 %v20889_v10, %v9859_v36  ;;  %v19502_v10 = vsel %vm3480_vm5, %v9996_v11, %v20900_v35 }
0x1b3a   : > { %v14063_v34 = vpop.eup %14062  ;;  %v19474_v54 = vpop.permute.xlu0 %10768  ;;  %v10405_v14 = vmul.f32 0.6931472, %v14061_v20  ;;  %v10241_v45 = vsub.f32 0.0, %v10209_v42 }
0x1b3b   : > { %v19476_v31 = vpop.permute.xlu1 %10878  ;;  %v14065_v62 = vpop.eup %14064  ;;  %v9861_v53 = vmul.f32 %v14063_v34, %v20892_v30  ;;  %v19482_v32 = vsel %vm3480_vm5, %v10019_v9, %v20893_v21  ;;  %v9782_v9 = vmul.f32 1.442695, %v9743_v4  ;;  %v20902_v21 = vld [vmem:[#allocation129_spill] sm:$0xff] }
0x1b3c   : > { %v10438_v17 = vadd.f32 %v10405_v14, %v10182_v56  ;;  %v10298_v47 = vmul.f32 1.442695, %v10241_v45  ;;  %v10211_v29 = vand.u32 2147483647, %v19482_v32  ;;  %v10347_v25 = vmul.f32 0.6931472, %v14065_v62 }
0x1b3d   : > { %v10021_v40 = vadd.f32 %v20897_v5, %v9861_v53  ;;  %v20901_v14 = vld [vmem:[#allocation106_spill] sm:$0xff]  ;;  %v10188_v53 = vand.u32 2147483647, %v19502_v10  ;;  %v10218_v5 = vsub.f32 0.0, %v10186_v15 }
0x1b3e   : > { %v14067_v19 = vpop.eup %14066  ;;  %v19490_v57 = vpop.permute.xlu0 %10772  ;;  %v10470_v60 = vmax.f32 %v10438_v17, 1e-07  ;;  %14076 = vpow2.f32 %v10298_v47  ;;  %v10243_v59 = vsub.f32 0.0, %v10211_v29  ;;  %v19508_v45 = vsel %vm3480_vm5, %v9998_v37, %v20901_v14  ;;  %v20903_v47 = vld [vmem:[#allocation145_spill] sm:$0xff] }
0x1b3f   : > { %v19492_v36 = vpop.permute.xlu1 %10882  ;;  %v14069_v42 = vpop.eup %14068  ;;  %v9863_v20 = vmul.f32 %v14067_v19, %v20898_v41  ;;  %v19497_v7 = vsel %vm3480_vm5, %v10021_v40, %v20899_v2  ;;  %14078 = vpow2.f32 %v9792_v18  ;;  %v10409_v11 = vadd.f32 %v10347_v25, %v10153_v63  ;;  %v20904_v19 = vld [vmem:[#allocation55_spill] sm:$0xff] }
0x1b40   : > { %v10502_v22 = vmin.f32 %v10470_v60, 10000000.0  ;;  %v10302_v34 = vmul.f32 1.442695, %v10243_v59  ;;  %v14071_v50 = vpop.eup %14070  ;;  %v10213_v51 = vand.u32 2147483647, %v19497_v7  ;;  %v9840_v23 = vmul.f32 %v14069_v42, %v20902_v21 }
0x1b41   : > { %v10023_v56 = vadd.f32 %v19235_v43, %v9863_v20  ;;  %v10351_v29 = vmul.f32 0.6931472, %v14071_v50  ;;  %v10190_v37 = vand.u32 2147483647, %v19508_v45  ;;  %v14073_v6 = vpop.eup %14072  ;;  %v10248_v18 = vmul.f32 1.442695, %v10216_v13 }
0x1b42   : > { %v19510_v62 = vpop.permute.xlu0 %10808  ;;  %10548 = vrot.lane.b32.xlu0 %v10502_v22, %s14178_s21  ;;  %14080 = vpow2.f32 %v10302_v34  ;;  %v10245_v17 = vsub.f32 0.0, %v10213_v51  ;;  %v10155_v60 = vmax.f32 %v19385_v27, 0.0  ;;  %v10220_v59 = vsub.f32 0.0, %v10188_v53  ;;  %v20905_v42 = vld [vmem:[#allocation166_spill] sm:$0xff]  ;;  %v14075_v20 = vpop.eup %14074 }
0x1b43   : > { %v19513_v30 = vpop.permute.xlu1 %10886  ;;  %v19519_v43 = vsel %vm3480_vm5, %v10023_v56, %v20903_v47  ;;  %14082 = vpow2.f32 %v9782_v9  ;;  %v10000_v41 = vadd.f32 %v20905_v42, %v9840_v23  ;;  %v10441_v2 = vmax.f32 %v10409_v11, 1e-07  ;;  %v20906_v56 = vld [vmem:[#allocation58_spill] sm:$0xff]  ;;  %v20908_v23 = vld [vmem:[#allocation135_spill] sm:$0xff]  ;;  %v20910_v42 = vld [vmem:[#allocation109_spill] sm:$0xff] }
0x1b44   : > { %v10215_v16 = vand.u32 2147483647, %v19519_v43  ;;  %v10306_v4 = vmul.f32 1.442695, %v10245_v17  ;;  %v10411_v9 = vadd.f32 %v10351_v29, %v10155_v60  ;;  %v10317_v13 = vadd.f32 1.0, %v14073_v6  ;;  %v20907_v53 = vld [vmem:[#allocation158_spill] sm:$0xff] }
0x1b45   : > { %v10222_v22 = vsub.f32 0.0, %v10190_v37  ;;  %v10252_v50 = vmul.f32 1.442695, %v10218_v5  ;;  %v10256_v14 = vmul.f32 1.442695, %v10220_v59  ;;  %v19539_v21 = vsel %vm3480_vm5, %v10000_v41, %v20907_v53  ;;  %v20909_v60 = vld [vmem:[#allocation171_spill] sm:$0xff] }
0x1b46   : > { %v19523_v40 = vpop.permute.xlu0 %10812  ;;  %10896 = vrot.lane.b32.xlu0 %v20904_v19, %s14177_s3  ;;  %v10247_v25 = vsub.f32 0.0, %v10215_v16  ;;  %14084 = vpow2.f32 %v10306_v4  ;;  %v9842_v11 = vmul.f32 %v14075_v20, %v20908_v23  ;;  %v10473_v29 = vmin.f32 %v10441_v2, 10000000.0  ;;  %v20911_v20 = vld [vmem:[#allocation157_spill] sm:$0xff] }
0x1b47   : > { %v19527_v63 = vpop.permute.xlu1 %10890  ;;  %14086 = vpow2.f32 %v10248_v18  ;;  %v10443_v16 = vmax.f32 %v10411_v9, 1e-07  ;;  %v10260_v37 = vmul.f32 1.442695, %v10222_v22  ;;  %v10192_v4 = vand.u32 2147483647, %v19539_v21 }
0x1b48   : > { %v14077_v35 = vpop.eup %14076  ;;  %v10310_v15 = vmul.f32 1.442695, %v10247_v25  ;;  %v10002_v25 = vadd.f32 %v20909_v60, %v9842_v11  ;;  %v20914_v11 = vld [vmem:[#allocation101_spill] sm:$0xff]  ;;  %v20917_v60 = vld [vmem:[#allocation100_spill] sm:$0xff] }
0x1b49   : > { %v10337_v34 = vadd.f32 1.0, %v14077_v35  ;;  %v14079_v17 = vpop.eup %14078  ;;  %v10475_v35 = vmin.f32 %v10443_v16, 10000000.0  ;;  %v10224_v22 = vsub.f32 0.0, %v10192_v4 }
0x1b4a   : > { %v19531_v51 = vpop.permute.xlu0 %10816  ;;  %10900 = vrot.lane.b32.xlu0 %v20906_v56, %s14177_s3  ;;  %14088 = vpow2.f32 %v10310_v15  ;;  %v9844_v41 = vmul.f32 %v14079_v17, %v20910_v42  ;;  %v19559_v17 = vsel %vm3480_vm5, %v10002_v25, %v20914_v11  ;;  %v20918_v42 = vld [vmem:[#allocation2_spill] sm:$0xff] }
0x1b4b   : > { %v19535_v27 = vpop.permute.xlu1 %10894  ;;  %14090 = vlog2.f32 %v10337_v34  ;;  %v20913_v34 = vld [vmem:[#allocation127_spill] sm:$0xff] }
0x1b4c   : > { %v14081_v47 = vpop.eup %14080  ;;  %14092 = vlog2.f32 %v10317_v13  ;;  %v20912_v13 = vld [vmem:[#allocation108_spill] sm:$0xff] }
0x1b4d   : > { %v10339_v6 = vadd.f32 1.0, %v14081_v47  ;;  %14094 = vpow2.f32 %v10252_v50  ;;  %v14083_v18 = vpop.eup %14082 }
0x1b4e   : > { %v19543_v5 = vpop.permute.xlu0 %10820  ;;  %14096 = vpow2.f32 %v10256_v14  ;;  %v9839_v50 = vmul.f32 %v14083_v18, %v20913_v34 }
0x1b4f   : > { %v10523_v19 = vpop.permute.xlu1 %10522  ;;  %14098 = vlog2.f32 %v10339_v6  ;;  %v20916_v6 = vld [vmem:[#allocation172_spill] sm:$0xff] }
0x1b50   : > { %v10921_v59 = vsel %vm673_vm0, %v10473_v29, %v10523_v19  ;;  %14100 = vpow2.f32 %v10260_v37  ;;  %v14085_v9 = vpop.eup %14084  ;;  %v20915_v29 = vld [vmem:[#allocation14_spill] sm:$0xff]  ;;  %v10004_v4 = vadd.f32 %v20916_v6, %v9844_v41 }
0x1b51   : > { %v10938_v2 = vsel %vm10936_vm7, %v10921_v59, %v20911_v20  ;;  %v10341_v23 = vadd.f32 1.0, %v14085_v9  ;;  %v14087_v47 = vpop.eup %14086 }
0x1b52   : > { %v10955_v15 = vsel %vm10953_vm8, %v10938_v2, %v20912_v13  ;;  %v19555_v14 = vpop.permute.xlu0 %10824  ;;  %v20919_v2 = vld [vmem:[#allocation162_spill] sm:$0xff] }
0x1b53   : > { %v10972_v56 = vsel %vm10970_vm9, %v10955_v15, %v20912_v13  ;;  %v10527_v53 = vpop.permute.xlu1 %10526  ;;  %14102 = vlog2.f32 %v10341_v23 }
0x1b54   : > { %v10989_v16 = vsel %vm10987_vm10, %v10972_v56, %v20915_v29  ;;  %v10923_v37 = vsel %vm673_vm0, %v10475_v35, %v10527_v53  ;;  %v14089_v18 = vpop.eup %14088  ;;  %v10177_v56 = vmax.f32 %v19461_v3, 0.0 }
0x1b55   : > { %v11006_v19 = vsel %vm11004_vm11, %v10989_v16, %v20915_v29  ;;  %v10940_v59 = vsel %vm10936_vm7, %v10923_v37, %v20917_v60  ;;  %v14091_v25 = vpop.eup %14090  ;;  %v10343_v35 = vadd.f32 1.0, %v14089_v18  ;;  %v20920_v29 = vld [vmem:[#allocation18_spill] sm:$0xff]  ;;  %v10194_v37 = vand.u32 2147483647, %v19559_v17 }
0x1b56   : > { %v11023_v20 = vsel %vm11021_vm12, %v11006_v19, %v20918_v42  ;;  %v10957_v9 = vsel %vm10953_vm8, %v10940_v59, %v20919_v2  ;;  %v14093_v13 = vpop.eup %14092  ;;  %v19584_v34 = vpop.permute.xlu0 %10828  ;;  %v10395_v53 = vmul.f32 0.6931472, %v14091_v25  ;;  %v20921_v60 = vld [vmem:[#allocation118_spill] sm:$0xff] }
0x1b57   : > { %v11040_v41 = vsel %vm11038_vm13, %v11023_v20, %v19379_v1  ;;  %v10974_v15 = vsel %vm10970_vm9, %v10957_v9, %v20919_v2  ;;  %v14095_v23 = vpop.eup %14094  ;;  %14104 = vlog2.f32 %v10343_v35  ;;  %v19597_v3 = vsel %vm3480_vm5, %v10004_v4, %v20921_v60  ;;  %v20923_v2 = vld [vmem:[#allocation27_spill] sm:$0xff] }
0x1b58   : > { %v11057_v11 = vsel %vm11055_vm14, %v11040_v41, %v19455_v46  ;;  %v10991_v16 = vsel %vm10987_vm10, %v10974_v15, %v20920_v29  ;;  %v14097_v1 = vpop.eup %14096  ;;  %v10433_v19 = vadd.f32 %v10395_v53, %v10177_v56  ;;  %v20922_v46 = vld [vmem:[#allocation4_spill] sm:$0xff]  ;;  %v10355_v42 = vmul.f32 0.6931472, %v14093_v13 }
0x1b59   : > { %v11074_v6 = vsel %vm11072_vm15, %v11057_v11, 0.0  ;;  %v11008_v18 = vsel %vm11004_vm11, %v10991_v16, %v20920_v29  ;;  %v14099_v59 = vpop.eup %14098  ;;  %v10264_v20 = vmul.f32 1.442695, %v10224_v22  ;;  %v9999_v9 = vadd.f32 %v20923_v2, %v9839_v50 }
0x1b5a   : > { %11090 = vst [vmem:[%s19578_s23 + $0x8] sm:$0xff] %v11074_v6  ;;  %v11025_v25 = vsel %vm11021_vm12, %v11008_v18, %v20922_v46  ;;  %v14101_v35 = vpop.eup %14100  ;;  %v19605_v15 = vpop.permute.xlu0 %10832  ;;  %v10465_v56 = vmax.f32 %v10433_v19, 1e-07  ;;  %v10179_v4 = vmax.f32 %v19482_v32, 0.0  ;;  %v10399_v53 = vmul.f32 0.6931472, %v14099_v59 }
0x1b5b   : > { %v11042_v41 = vsel %vm11038_vm13, %v11025_v25, %v19388_v61  ;;  %v10157_v29 = vmax.f32 %v19424_v28, 0.0  ;;  %v10226_v13 = vsub.f32 0.0, %v10194_v37  ;;  %v10196_v22 = vand.u32 2147483647, %v19597_v3  ;;  %v20924_v28 = vld [vmem:[#allocation160_spill] sm:$0xff] }
0x1b5c   : > { %v11059_v11 = vsel %vm11055_vm14, %v11042_v41, %v19476_v31  ;;  %v10497_v16 = vmin.f32 %v10465_v56, 10000000.0  ;;  %v10435_v6 = vadd.f32 %v10399_v53, %v10179_v4  ;;  %v10312_v18 = vadd.f32 1.0, %v14087_v47 }
0x1b5d   : > { %v11076_v50 = vsel %vm11072_vm15, %v11059_v11, 0.0  ;;  %v10413_v61 = vadd.f32 %v10355_v42, %v10157_v29  ;;  %v10314_v60 = vadd.f32 1.0, %v14095_v23  ;;  %v14103_v19 = vpop.eup %14102  ;;  %v10316_v31 = vadd.f32 1.0, %v14097_v1 }
0x1b5e   : > { %11092 = vst [vmem:[%s19578_s23 + $0x18] sm:$0xff] %v11076_v50  ;;  %v19614_v46 = vpop.permute.xlu0 %10836  ;;  %10538 = vrot.lane.b32.xlu1 %v10497_v16, %s14178_s21  ;;  %v10467_v32 = vmax.f32 %v10435_v6, 1e-07  ;;  %14106 = vpow2.f32 %v10264_v20  ;;  %v19619_v37 = vsel %vm3480_vm5, %v9999_v9, %v20924_v28  ;;  %v10181_v59 = vmax.f32 %v19497_v7, 0.0 }
0x1b5f   : > { %v10403_v25 = vmul.f32 0.6931472, %v14103_v19  ;;  %v10268_v2 = vmul.f32 1.442695, %v10226_v13  ;;  %v10228_v47 = vsub.f32 0.0, %v10196_v22  ;;  %14108 = vlog2.f32 %v10312_v18 }
0x1b60   : > { %v10499_v41 = vmin.f32 %v10467_v32, 10000000.0  ;;  %v10318_v23 = vadd.f32 1.0, %v14101_v35  ;;  %v10445_v4 = vmax.f32 %v10413_v61, 1e-07  ;;  %14110 = vlog2.f32 %v10314_v60  ;;  %v20925_v61 = vld [vmem:[#allocation110_spill] sm:$0xff] }
0x1b61   : > { %v14105_v42 = vpop.eup %14104  ;;  %v10437_v56 = vadd.f32 %v10403_v25, %v10181_v59  ;;  %v10183_v1 = vmax.f32 %v19519_v43, 0.0  ;;  %14112 = vlog2.f32 %v10316_v31  ;;  %v10191_v7 = vand.u32 2147483647, %v19619_v37  ;;  %v20926_v32 = vld [vmem:[#allocation161_spill] sm:$0xff] }
0x1b62   : > { %v19622_v53 = vpop.permute.xlu0 %10872  ;;  %10542 = vrot.lane.b32.xlu1 %v10499_v41, %s14178_s21  ;;  %v10407_v20 = vmul.f32 0.6931472, %v14105_v42  ;;  %14114 = vpow2.f32 %v10268_v2  ;;  %v10272_v11 = vmul.f32 1.442695, %v10228_v47  ;;  %v10477_v13 = vmin.f32 %v10445_v4, 10000000.0 }
0x1b63   : > { %v10469_v9 = vmax.f32 %v10437_v56, 1e-07  ;;  %14116 = vlog2.f32 %v10318_v23  ;;  %v10223_v6 = vsub.f32 0.0, %v10191_v7  ;;  %v20927_v41 = vld [vmem:[#allocation50_spill] sm:$0xff] }
0x1b64   : > { %v10439_v29 = vadd.f32 %v10407_v20, %v10183_v1  ;;  %14118 = vpow2.f32 %v10272_v11  ;;  %v20928_v20 = vld [vmem:[#allocation6_spill] sm:$0xff] }
0x1b65   : > { %v10501_v35 = vmin.f32 %v10469_v9, 10000000.0  ;;  %v10262_v2 = vmul.f32 1.442695, %v10223_v6 }
0x1b66   : > { %v19627_v22 = vpop.permute.xlu0 %10876  ;;  %v10531_v50 = vpop.permute.xlu1 %10530  ;;  %v10471_v16 = vmax.f32 %v10439_v29, 1e-07 }
0x1b67   : > { %10546 = vrot.lane.b32.xlu1 %v10501_v35, %s14178_s21  ;;  %v10925_v43 = vsel %vm673_vm0, %v10477_v13, %v10531_v50  ;;  %14120 = vpow2.f32 %v10262_v2  ;;  %v20929_v50 = vld [vmem:[#allocation44_spill] sm:$0xff] }
0x1b68   : > { %v14107_v18 = vpop.eup %14106  ;;  %v10942_v60 = vsel %vm10936_vm7, %v10925_v43, %v20925_v61  ;;  %v10503_v19 = vmin.f32 %v10471_v16, 10000000.0  ;;  %v10152_v16 = vmax.f32 %v19436_v24, 0.0 }
0x1b69   : > { %v10959_v31 = vsel %vm10953_vm8, %v10942_v60, %v20926_v32  ;;  %v14109_v28 = vpop.eup %14108  ;;  %v10320_v42 = vadd.f32 1.0, %v14107_v18 }
0x1b6a   : > { %v10976_v59 = vsel %vm10970_vm9, %v10959_v31, %v20926_v32  ;;  %v19637_v25 = vpop.permute.xlu0 %10880  ;;  %v14111_v47 = vpop.eup %14110  ;;  %v10345_v9 = vmul.f32 0.6931472, %v14109_v28  ;;  %v20930_v28 = vld [vmem:[#allocation46_spill] sm:$0xff] }
0x1b6b   : > { %v10993_v23 = vsel %vm10987_vm10, %v10976_v59, %v20927_v41  ;;  %10550 = vrot.lane.b32.xlu1 %v10503_v19, %s14178_s21  ;;  %v14113_v56 = vpop.eup %14112  ;;  %v10349_v6 = vmul.f32 0.6931472, %v14111_v47  ;;  %14122 = vlog2.f32 %v10320_v42  ;;  %v10154_v19 = vmax.f32 %v19470_v12, 0.0  ;;  %v20931_v42 = vld [vmem:[#allocation103_spill] sm:$0xff] }
0x1b6c   : > { %v11010_v4 = vsel %vm11004_vm11, %v10993_v23, %v20927_v41  ;;  %v14115_v1 = vpop.eup %14114  ;;  %v10353_v18 = vmul.f32 0.6931472, %v14113_v56  ;;  %v10158_v59 = vmax.f32 %v19508_v45, 0.0  ;;  %v20932_v56 = vld [vmem:[#allocation111_spill] sm:$0xff] }
0x1b6d   : > { %v11027_v7 = vsel %vm11021_vm12, %v11010_v4, %v20928_v20  ;;  %v14117_v11 = vpop.eup %14116  ;;  %v10322_v61 = vadd.f32 1.0, %v14115_v1  ;;  %v10410_v24 = vadd.f32 %v10349_v6, %v10154_v19  ;;  %v19667_v12 = vsel %vm3480_vm5, %v20932_v56, %v20931_v42  ;;  %v20933_v4 = vld [vmem:[#allocation174_spill] sm:$0xff]  ;;  %v20935_v6 = vld [vmem:[#allocation60_spill] sm:$0xff] }
0x1b6e   : > { %v11044_v29 = vsel %vm11038_vm13, %v11027_v7, %v19399_v58  ;;  %v19648_v35 = vpop.permute.xlu0 %10884  ;;  %v14119_v60 = vpop.eup %14118  ;;  %v10408_v58 = vadd.f32 %v10345_v9, %v10152_v16  ;;  %v10357_v32 = vmul.f32 0.6931472, %v14117_v11  ;;  %v9713_v1 = vsub.f32 0.0, %v20933_v4 }
0x1b6f   : > { %v11061_v13 = vsel %vm11055_vm14, %v11044_v29, %v19492_v36  ;;  %10898 = vrot.lane.b32.xlu1 %v20929_v50, %s14177_s3  ;;  %v10156_v36 = vmax.f32 %v19502_v10, 0.0  ;;  %14124 = vlog2.f32 %v10322_v61  ;;  %v10324_v47 = vadd.f32 1.0, %v14119_v60  ;;  %v20934_v10 = vld [vmem:[#allocation175_spill] sm:$0xff]  ;;  %v20936_v61 = vld [vmem:[#allocation61_spill] sm:$0xff] }
0x1b70   : > { %v11078_v43 = vsel %vm11072_vm15, %v11061_v13, 0.0  ;;  %v10440_v41 = vmax.f32 %v10408_v58, 1e-07  ;;  %v10414_v23 = vadd.f32 %v10357_v32, %v10158_v59  ;;  %v9715_v7 = vsub.f32 0.0, %v20934_v10  ;;  %v20939_v10 = vld [vmem:[#allocation86_spill] sm:$0xff] }
0x1b71   : > { %11094 = vst [vmem:[%s19578_s23 + $0x28] sm:$0xff] %v11078_v43  ;;  %v10412_v2 = vadd.f32 %v10353_v18, %v10156_v36  ;;  %v10442_v9 = vmax.f32 %v10410_v24, 1e-07  ;;  %v14121_v11 = vpop.eup %14120  ;;  %14126 = vlog2.f32 %v10324_v47  ;;  %v10198_v45 = vand.u32 2147483647, %v19667_v12  ;;  %v20937_v36 = vld [vmem:[#allocation152_spill] sm:$0xff] }
0x1b72   : > { %v19658_v31 = vpop.permute.xlu0 %10888  ;;  %v10472_v50 = vmin.f32 %v10440_v41, 10000000.0  ;;  %v10446_v16 = vmax.f32 %v10414_v23, 1e-07  ;;  %v9745_v43 = vsel %vm4594_vm6, %v20935_v6, %v9713_v1  ;;  %v9747_v60 = vsel %vm4594_vm6, %v20936_v61, %v9715_v7  ;;  %v20938_v41 = vld [vmem:[#allocation62_spill] sm:$0xff] }
0x1b73   : > { %10902 = vrot.lane.b32.xlu1 %v20930_v28, %s14177_s3  ;;  %v10444_v29 = vmax.f32 %v10412_v2, 1e-07  ;;  %v10474_v19 = vmin.f32 %v10442_v9, 10000000.0  ;;  %v10319_v32 = vadd.f32 1.0, %v14121_v11  ;;  %v10230_v2 = vsub.f32 0.0, %v10198_v45 }
0x1b74   : > { %v9786_v47 = vmul.f32 1.442695, %v9745_v43  ;;  %v10478_v42 = vmin.f32 %v10446_v16, 10000000.0  ;;  %v10160_v56 = vmax.f32 %v19539_v21, 0.0  ;;  %v9717_v7 = vsub.f32 0.0, %v20939_v10 }
0x1b75   : > { %v14123_v13 = vpop.eup %14122  ;;  %v10476_v24 = vmin.f32 %v10444_v29, 10000000.0  ;;  %v9790_v1 = vmul.f32 1.442695, %v9747_v60  ;;  %v20940_v29 = vld [vmem:[#allocation28_spill] sm:$0xff]  ;;  %v10164_v6 = vmax.f32 %v19597_v3, 0.0  ;;  %14128 = vlog2.f32 %v10319_v32 }
0x1b76   : > { %v19670_v20 = vpop.permute.xlu0 %10892  ;;  %v10361_v59 = vmul.f32 0.6931472, %v14123_v13  ;;  %v20941_v16 = vld [vmem:[#allocation126_spill] sm:$0xff]  ;;  %v10276_v61 = vmul.f32 1.442695, %v10230_v2  ;;  %14130 = vpow2.f32 %v9786_v47  ;;  %v20942_v60 = vld [vmem:[#allocation16_spill] sm:$0xff] }
0x1b77   : > { %14132 = vpow2.f32 %v9790_v1  ;;  %v20944_v3 = vld [vmem:[#allocation63_spill] sm:$0xff]  ;;  %v20945_v47 = vld [vmem:[#allocation176_spill] sm:$0xff]  ;;  %v20946_v10 = vld [vmem:[#allocation33_spill] sm:$0xff] }
0x1b78   : > { %v9749_v32 = vsel %vm4594_vm6, %v20944_v3, %v9717_v7  ;;  %14134 = vpow2.f32 %v10276_v61 }
0x1b79   : > { %v14125_v4 = vpop.eup %14124 }
0x1b7a   : > { %v10521_v18 = vpop.permute.xlu0 %10520 }
0x1b7b   : > { %v10920_v58 = vsel %vm673_vm0, %v10472_v50, %v10521_v18  ;;  %v10162_v50 = vmax.f32 %v19559_v17, 0.0  ;;  %v10416_v18 = vadd.f32 %v10361_v59, %v10160_v56 }
0x1b7c   : > { %v10937_v28 = vsel %vm10936_vm7, %v10920_v58, %v20937_v36  ;;  %v20943_v58 = vld [vmem:[#allocation5_spill] sm:$0xff] }
0x1b7d   : > { %v10954_v23 = vsel %vm10953_vm8, %v10937_v28, %v20938_v41  ;;  %v14127_v28 = vpop.eup %14126 }
0x1b7e   : > { %v10971_v9 = vsel %vm10970_vm9, %v10954_v23, %v20938_v41  ;;  %v10525_v11 = vpop.permute.xlu0 %10524  ;;  %v9719_v23 = vsub.f32 0.0, %v20945_v47  ;;  %v20953_v47 = vld [vmem:[#allocation25_spill] sm:$0xff] }
0x1b7f   : > { %v10988_v45 = vsel %vm10987_vm10, %v10971_v9, %v20940_v29  ;;  %v10922_v13 = vsel %vm673_vm0, %v10474_v19, %v10525_v11  ;;  %v10365_v19 = vmul.f32 0.6931472, %v14125_v4 }
0x1b80   : > { %v11005_v21 = vsel %vm11004_vm11, %v10988_v45, %v20940_v29  ;;  %v10939_v43 = vsel %vm10936_vm7, %v10922_v13, %v20941_v16  ;;  %v10448_v29 = vmax.f32 %v10416_v18, 1e-07  ;;  %v20948_v45 = vld [vmem:[#allocation21_spill] sm:$0xff] }
0x1b81   : > { %v11022_v17 = vsel %vm11021_vm12, %v11005_v21, %v20942_v60  ;;  %v10956_v36 = vsel %vm10953_vm8, %v10939_v43, %v20943_v58  ;;  %v20949_v21 = vld [vmem:[#allocation11_spill] sm:$0xff]  ;;  %v10418_v16 = vadd.f32 %v10365_v19, %v10162_v50  ;;  %v10369_v43 = vmul.f32 0.6931472, %v14127_v28  ;;  %v20950_v18 = vld [vmem:[#allocation73_spill] sm:$0xff] }
0x1b82   : > { %v11039_v41 = vsel %vm11038_vm13, %v11022_v17, %v19510_v62  ;;  %v10973_v59 = vsel %vm10970_vm9, %v10956_v36, %v20943_v58  ;;  %v10529_v2 = vpop.permute.xlu0 %10528  ;;  %v20947_v62 = vld [vmem:[#allocation128_spill] sm:$0xff]  ;;  %v9751_v36 = vsel %vm4594_vm6, %v20950_v18, %v9719_v23  ;;  %v10480_v61 = vmin.f32 %v10448_v29, 10000000.0  ;;  %v20955_v29 = vld [vmem:[#allocation77_spill] sm:$0xff] }
0x1b83   : > { %v11056_v56 = vsel %vm11055_vm14, %v11039_v41, %v19622_v53  ;;  %v10990_v4 = vsel %vm10987_vm10, %v10973_v59, %v20946_v10  ;;  %v10924_v1 = vsel %vm673_vm0, %v10476_v24, %v10529_v2  ;;  %v9794_v24 = vmul.f32 1.442695, %v9749_v32  ;;  %v20951_v41 = vld [vmem:[#allocation64_spill] sm:$0xff]  ;;  %v20952_v32 = vld [vmem:[#allocation154_spill] sm:$0xff]  ;;  %v14129_v2 = vpop.eup %14128 }
0x1b84   : > { %v11073_v9 = vsel %vm11072_vm15, %v11056_v56, 0.0  ;;  %v11007_v7 = vsel %vm11004_vm11, %v10990_v4, %v20946_v10  ;;  %v10941_v11 = vsel %vm10936_vm7, %v10924_v1, %v20947_v62  ;;  %v10450_v10 = vmax.f32 %v10418_v16, 1e-07  ;;  %v14131_v62 = vpop.eup %14130 }
0x1b85   : > { %11089 = vst [vmem:[%s19578_s23] sm:$0xff] %v11073_v9  ;;  %v11024_v13 = vsel %vm11021_vm12, %v11007_v7, %v20948_v45  ;;  %v10958_v53 = vsel %vm10953_vm8, %v10941_v11, %v20949_v21  ;;  %14136 = vpow2.f32 %v9794_v24  ;;  %v9798_v4 = vmul.f32 1.442695, %v9751_v36  ;;  %v20957_v24 = vld [vmem:[#allocation29_spill] sm:$0xff] }
0x1b86   : > { %v11041_v60 = vsel %vm11038_vm13, %v11024_v13, %v19523_v40  ;;  %v10975_v17 = vsel %vm10970_vm9, %v10958_v53, %v20949_v21  ;;  %v10533_v58 = vpop.permute.xlu0 %10532  ;;  %v14133_v21 = vpop.eup %14132 }
0x1b87   : > { %v11058_v3 = vsel %vm11055_vm14, %v11041_v60, %v19627_v22  ;;  %v10992_v50 = vsel %vm10987_vm10, %v10975_v17, %v20951_v41  ;;  %v10926_v19 = vsel %vm673_vm0, %v10478_v42, %v10533_v58  ;;  %v20954_v22 = vld [vmem:[#allocation31_spill] sm:$0xff]  ;;  %v10420_v42 = vadd.f32 %v10369_v43, %v10164_v6 }
0x1b88   : > { %v11075_v28 = vsel %vm11072_vm15, %v11058_v3, 0.0  ;;  %v11009_v40 = vsel %vm11004_vm11, %v10992_v50, %v20951_v41  ;;  %v10943_v59 = vsel %vm10936_vm7, %v10926_v19, %v20952_v32  ;;  %v10359_v43 = vmul.f32 0.6931472, %v14129_v2  ;;  %v20959_v50 = vld [vmem:[#allocation133_spill] sm:$0xff]  ;;  %v14135_v2 = vpop.eup %14134 }
0x1b89   : > { %11091 = vst [vmem:[%s19578_s23 + $0x10] sm:$0xff] %v11075_v28  ;;  %v11026_v23 = vsel %vm11021_vm12, %v11009_v40, %v20953_v47  ;;  %v10960_v56 = vsel %vm10953_vm8, %v10943_v59, %v20954_v22  ;;  %v10482_v58 = vmin.f32 %v10450_v10, 10000000.0  ;;  %v10452_v18 = vmax.f32 %v10420_v42, 1e-07  ;;  %v20960_v40 = vld [vmem:[#allocation81_spill] sm:$0xff] }
0x1b8a   : > { %v11043_v1 = vsel %vm11038_vm13, %v11026_v23, %v19531_v51  ;;  %v10977_v9 = vsel %vm10970_vm9, %v10960_v56, %v20954_v22  ;;  %v10537_v7 = vpop.permute.xlu0 %10536  ;;  %v20956_v51 = vld [vmem:[#allocation116_spill] sm:$0xff]  ;;  %14138 = vpow2.f32 %v9798_v4  ;;  %v9841_v19 = vmul.f32 %v14131_v62, %v20959_v50  ;;  %v20961_v23 = vld [vmem:[#allocation131_spill] sm:$0xff]  ;;  %v20962_v56 = vld [vmem:[#allocation22_spill] sm:$0xff] }
0x1b8b   : > { %v11060_v11 = vsel %vm11055_vm14, %v11043_v1, %v19637_v25  ;;  %v10994_v45 = vsel %vm10987_vm10, %v10977_v9, %v20955_v29  ;;  %v10928_v13 = vsel %vm673_vm0, %v10480_v61, %v10537_v7  ;;  %v20958_v25 = vld [vmem:[#allocation20_spill] sm:$0xff]  ;;  %v10159_v61 = vmax.f32 %v19619_v37, 0.0 }
0x1b8c   : > { %v11077_v6 = vsel %vm11072_vm15, %v11060_v11, 0.0  ;;  %v11011_v53 = vsel %vm11004_vm11, %v10994_v45, %v20955_v29  ;;  %v10945_v16 = vsel %vm10936_vm7, %v10928_v13, %v20956_v51  ;;  %v10484_v42 = vmin.f32 %v10452_v18, 10000000.0  ;;  %v20963_v7 = vld [vmem:[#allocation32_spill] sm:$0xff]  ;;  %v20964_v11 = vld [vmem:[#allocation107_spill] sm:$0xff]  ;;  %v20968_v18 = vld [vmem:[#allocation146_spill] sm:$0xff] }
0x1b8d   : > { %11093 = vst [vmem:[%s19578_s23 + $0x20] sm:$0xff] %v11077_v6  ;;  %v11028_v60 = vsel %vm11021_vm12, %v11011_v53, %v20957_v24  ;;  %v10962_v17 = vsel %vm10953_vm8, %v10945_v16, %v20958_v25  ;;  %v10415_v4 = vadd.f32 %v10359_v43, %v10159_v61  ;;  %v10001_v62 = vadd.f32 %v20963_v7, %v9841_v19  ;;  %v20965_v45 = vld [vmem:[#allocation8_spill] sm:$0xff]  ;;  %v20976_v7 = vld [vmem:[#allocation49_spill] sm:$0xff] }
0x1b8e   : > { %v11045_v36 = vsel %vm11038_vm13, %v11028_v60, %v19543_v5  ;;  %v10979_v3 = vsel %vm10970_vm9, %v10962_v17, %v20958_v25  ;;  %v10541_v41 = vpop.permute.xlu0 %10540  ;;  %v9843_v29 = vmul.f32 %v14133_v21, %v20964_v11  ;;  %v20966_v16 = vld [vmem:[#allocation52_spill] sm:$0xff]  ;;  %v10326_v25 = vadd.f32 1.0, %v14135_v2  ;;  %v20977_v11 = vld [vmem:[#allocation147_spill] sm:$0xff] }
0x1b8f   : > { %v11062_v28 = vsel %vm11055_vm14, %v11045_v36, %v19648_v35  ;;  %v10996_v32 = vsel %vm10987_vm10, %v10979_v3, %v20960_v40  ;;  %v10930_v59 = vsel %vm673_vm0, %v10482_v58, %v10541_v41  ;;  %v14137_v53 = vpop.eup %14136  ;;  %v10447_v60 = vmax.f32 %v10415_v4, 1e-07  ;;  %v20969_v3 = vld [vmem:[#allocation70_spill] sm:$0xff]  ;;  %v20970_v50 = vld [vmem:[#allocation12_spill] sm:$0xff] }
0x1b90   : > { %v11079_v47 = vsel %vm11072_vm15, %v11062_v28, 0.0  ;;  %v11013_v5 = vsel %vm11004_vm11, %v10996_v32, %v20960_v40  ;;  %v10947_v22 = vsel %vm10936_vm7, %v10930_v59, %v20961_v23  ;;  %v19810_v36 = vsel %vm3480_vm5, %v10001_v62, %v20968_v18  ;;  %v20971_v28 = vld [vmem:[#allocation112_spill] sm:$0xff] }
0x1b91   : > { %11095 = vst [vmem:[%s19578_s23 + $0x30] sm:$0xff] %v11079_v47  ;;  %v11030_v35 = vsel %vm11021_vm12, %v11013_v5, %v19442_v33  ;;  %v10964_v10 = vsel %vm10953_vm8, %v10947_v22, %v20962_v56  ;;  %v10003_v41 = vadd.f32 %v20969_v3, %v9843_v29  ;;  %v9845_v40 = vmul.f32 %v14137_v53, %v20971_v28  ;;  %v20972_v5 = vld [vmem:[#allocation98_spill] sm:$0xff] }
0x1b92   : > { %v11047_v37 = vsel %vm11038_vm13, %v11030_v35, %v19555_v14  ;;  %v10981_v1 = vsel %vm10970_vm9, %v10964_v10, %v20962_v56  ;;  %v10545_v9 = vpop.permute.xlu0 %10544  ;;  %v10193_v2 = vand.u32 2147483647, %v19810_v36  ;;  %v10479_v47 = vmin.f32 %v10447_v60, 10000000.0  ;;  %v20973_v35 = vld [vmem:[#allocation82_spill] sm:$0xff]  ;;  %v20974_v10 = vld [vmem:[#allocation113_spill] sm:$0xff] }
0x1b93   : > { %v11064_v33 = vsel %vm11055_vm14, %v11047_v37, %v19658_v31  ;;  %v10998_v13 = vsel %vm10987_vm10, %v10981_v1, %v20965_v45  ;;  %v10932_v6 = vsel %vm673_vm0, %v10484_v42, %v10545_v9  ;;  %v20967_v31 = vld [vmem:[#allocation24_spill] sm:$0xff]  ;;  %14140 = vlog2.f32 %v10326_v25  ;;  %v20975_v37 = vld [vmem:[#allocation149_spill] sm:$0xff] }
0x1b94   : > { %v11081_v51 = vsel %vm11072_vm15, %v11064_v33, 0.0  ;;  %v11015_v14 = vsel %vm11004_vm11, %v10998_v13, %v20965_v45  ;;  %v10949_v43 = vsel %vm10936_vm7, %v10932_v6, %v20966_v16  ;;  %v14139_v32 = vpop.eup %14138  ;;  %v19829_v23 = vsel %vm3480_vm5, %v10003_v41, %v20972_v5  ;;  %v20978_v33 = vld [vmem:[#allocation167_spill] sm:$0xff]  ;;  %v20979_v13 = vld [vmem:[#allocation53_spill] sm:$0xff]  ;;  %v20980_v16 = vld [vmem:[#allocation10_spill] sm:$0xff] }
0x1b95   : > { %11097 = vst [vmem:[%s19578_s23 + $0x40] sm:$0xff] %v11081_v51  ;;  %v11032_v21 = vsel %vm11021_vm12, %v11015_v14, %v19453_v55  ;;  %v10966_v24 = vsel %vm10953_vm8, %v10949_v43, %v20967_v31  ;;  %v10005_v56 = vadd.f32 %v20973_v35, %v9845_v40  ;;  %v9847_v42 = vmul.f32 %v14139_v32, %v20974_v10  ;;  %v20982_v5 = vld [vmem:[#allocation57_spill] sm:$0xff]  ;;  %v20983_v35 = vld [vmem:[#allocation26_spill] sm:$0xff] }
0x1b96   : > { %v11049_v17 = vsel %vm11038_vm13, %v11032_v21, %v19584_v34  ;;  %v10983_v58 = vsel %vm10970_vm9, %v10966_v24, %v20967_v31  ;;  %v10225_v1 = vsub.f32 0.0, %v10193_v2  ;;  %v10195_v9 = vand.u32 2147483647, %v19829_v23  ;;  %v20981_v24 = vld [vmem:[#allocation99_spill] sm:$0xff] }
0x1b97   : > { %v11066_v55 = vsel %vm11055_vm14, %v11049_v17, %v19670_v20  ;;  %v11000_v19 = vsel %vm10987_vm10, %v10983_v58, %v20970_v50  ;;  %v19843_v29 = vsel %vm3480_vm5, %v10005_v56, %v20977_v11  ;;  %v10007_v45 = vadd.f32 %v20978_v33, %v9847_v42 }
0x1b98   : > { %v11083_v34 = vsel %vm11072_vm15, %v11066_v55, 0.0  ;;  %v11017_v59 = vsel %vm11004_vm11, %v11000_v19, %v20970_v50  ;;  %v10266_v51 = vmul.f32 1.442695, %v10225_v1  ;;  %v10227_v14 = vsub.f32 0.0, %v10195_v9 }
0x1b99   : > { %11099 = vst [vmem:[%s19578_s23 + $0x50] sm:$0xff] %v11083_v34  ;;  %v11034_v61 = vsel %vm11021_vm12, %v11017_v59, %v19474_v54  ;;  %v10197_v21 = vand.u32 2147483647, %v19843_v29  ;;  %v19857_v60 = vsel %vm3480_vm5, %v10007_v45, %v20981_v24  ;;  %v10166_v50 = vmax.f32 %v19667_v12, 0.0 }
0x1b9a   : > { %v11051_v20 = vsel %vm11038_vm13, %v11034_v61, %v19605_v15  ;;  %14142 = vpow2.f32 %v10266_v51  ;;  %v10270_v18 = vmul.f32 1.442695, %v10227_v14  ;;  %v10199_v41 = vand.u32 2147483647, %v19857_v60 }
0x1b9b   : > { %v10535_v22 = vpop.permute.xlu1 %10534  ;;  %v10229_v3 = vsub.f32 0.0, %v10197_v21 }
0x1b9c   : > { %v10927_v4 = vsel %vm673_vm0, %v10479_v47, %v10535_v22  ;;  %14144 = vpow2.f32 %v10270_v18  ;;  %v10231_v19 = vsub.f32 0.0, %v10199_v41 }
0x1b9d   : > { %v10944_v54 = vsel %vm10936_vm7, %v10927_v4, %v20975_v37  ;;  %v14141_v25 = vpop.eup %14140 }
0x1b9e   : > { %v10961_v15 = vsel %vm10953_vm8, %v10944_v54, %v20976_v7  ;;  %v10373_v55 = vmul.f32 0.6931472, %v14141_v25  ;;  %v10278_v40 = vmul.f32 1.442695, %v10231_v19  ;;  %v20984_v54 = vld [vmem:[#allocation17_spill] sm:$0xff]  ;;  %v20985_v19 = vld [vmem:[#allocation151_spill] sm:$0xff] }
0x1b9f   : > { %v10978_v62 = vsel %vm10970_vm9, %v10961_v15, %v20976_v7 }
0x1ba0   : > { %v10995_v6 = vsel %vm10987_vm10, %v10978_v62, %v20979_v13  ;;  %v10422_v28 = vadd.f32 %v10373_v55, %v10166_v50 }
0x1ba1   : > { %v11012_v53 = vsel %vm11004_vm11, %v10995_v6, %v20979_v13 }
0x1ba2   : > { %v11029_v43 = vsel %vm11021_vm12, %v11012_v53, %v20980_v16  ;;  %v10454_v34 = vmax.f32 %v10422_v28, 1e-07  ;;  %v10161_v16 = vmax.f32 %v19810_v36, 0.0  ;;  %v10167_v28 = vmax.f32 %v19857_v60, 0.0  ;;  %v20988_v60 = vld [vmem:[#allocation150_spill] sm:$0xff] }
0x1ba3   : > { %v11046_v31 = vsel %vm11038_vm13, %v11029_v43, %v19405_v26  ;;  %v10274_v26 = vmul.f32 1.442695, %v10229_v3 }
0x1ba4   : > { %v11063_v17 = vsel %vm11055_vm14, %v11046_v31, %v19513_v30  ;;  %v14143_v32 = vpop.eup %14142  ;;  %v10486_v61 = vmin.f32 %v10454_v34, 10000000.0  ;;  %v10163_v31 = vmax.f32 %v19829_v23, 0.0 }
0x1ba5   : > { %v11080_v58 = vsel %vm11072_vm15, %v11063_v17, 0.0  ;;  %14146 = vpow2.f32 %v10274_v26  ;;  %v10321_v30 = vadd.f32 1.0, %v14143_v32 }
0x1ba6   : > { %11096 = vst [vmem:[%s19578_s23 + $0x38] sm:$0xff] %v11080_v58  ;;  %14148 = vpow2.f32 %v10278_v40  ;;  %v14145_v59 = vpop.eup %14144  ;;  %v10165_v58 = vmax.f32 %v19843_v29, 0.0  ;;  %v20986_v40 = vld [vmem:[#allocation54_spill] sm:$0xff] }
0x1ba7   : > { %14150 = vlog2.f32 %v10321_v30  ;;  %v10323_v12 = vadd.f32 1.0, %v14145_v59 }
0x1ba9   : > { %14152 = vlog2.f32 %v10323_v12 }
0x1baf   : > { %v14147_v10 = vpop.eup %14146 }
0x1bb0   : > { %v10325_v62 = vadd.f32 1.0, %v14147_v10  ;;  %v14149_v11 = vpop.eup %14148 }
0x1bb1   : > { %v10327_v6 = vadd.f32 1.0, %v14149_v11  ;;  %v14151_v53 = vpop.eup %14150  ;;  %v20991_v11 = vld [vmem:[#allocation105_spill] sm:$0xff] }
0x1bb2   : > { %14154 = vlog2.f32 %v10325_v62  ;;  %v10363_v51 = vmul.f32 0.6931472, %v14151_v53 }
0x1bb3   : > { %14156 = vlog2.f32 %v10327_v6  ;;  %v14153_v14 = vpop.eup %14152 }
0x1bb4   : > { %v10549_v2 = vpop.permute.xlu0 %10548  ;;  %v10367_v43 = vmul.f32 0.6931472, %v14153_v14 }
0x1bb5   : > { %v10934_v47 = vsel %vm673_vm0, %v10486_v61, %v10549_v2  ;;  %v20987_v61 = vld [vmem:[#allocation56_spill] sm:$0xff] }
0x1bb6   : > { %v10951_v22 = vsel %vm10936_vm7, %v10934_v47, %v20982_v5  ;;  %v10419_v24 = vadd.f32 %v10367_v43, %v10163_v31 }
0x1bb7   : > { %v10968_v56 = vsel %vm10953_vm8, %v10951_v22, %v20983_v35 }
0x1bb8   : > { %v10985_v42 = vsel %vm10970_vm9, %v10968_v56, %v20983_v35  ;;  %v10897_v4 = vpop.permute.xlu0 %10896  ;;  %v10451_v3 = vmax.f32 %v10419_v24, 1e-07  ;;  %v20989_v35 = vld [vmem:[#allocation37_spill] sm:$0xff] }
0x1bb9   : > { %v11068_v37 = vsel %vm11055_vm14, %v11051_v20, %v10897_v4  ;;  %v11002_v1 = vsel %vm10987_vm10, %v10985_v42, %v20984_v54 }
0x1bba   : > { %v11085_v9 = vsel %vm11072_vm15, %v11068_v37, 0.0  ;;  %v11019_v7 = vsel %vm11004_vm11, %v11002_v1, %v20984_v54  ;;  %v10483_v32 = vmin.f32 %v10451_v3, 10000000.0  ;;  %v20990_v1 = vld [vmem:[#allocation59_spill] sm:$0xff] }
0x1bbb   : > { %11101 = vst [vmem:[%s19578_s23 + $0x60] sm:$0xff] %v11085_v9  ;;  %v11036_v15 = vsel %vm11021_vm12, %v11019_v7, %v19490_v57  ;;  %v10417_v57 = vadd.f32 %v10363_v51, %v10161_v16  ;;  %v20993_v16 = vld [vmem:[#allocation30_spill] sm:$0xff] }
0x1bbc   : > { %v11053_v33 = vsel %vm11038_vm13, %v11036_v15, %v19614_v46  ;;  %v10901_v45 = vpop.permute.xlu0 %10900  ;;  %v14155_v21 = vpop.eup %14154 }
0x1bbd   : > { %v11070_v20 = vsel %vm11055_vm14, %v11053_v33, %v10901_v45  ;;  %v10449_v46 = vmax.f32 %v10417_v57, 1e-07  ;;  %v10371_v25 = vmul.f32 0.6931472, %v14155_v21  ;;  %v14157_v17 = vpop.eup %14156  ;;  %v20992_v45 = vld [vmem:[#allocation65_spill] sm:$0xff] }
0x1bbe   : > { %v11087_v13 = vsel %vm11072_vm15, %v11070_v20, 0.0  ;;  %v10375_v50 = vmul.f32 0.6931472, %v14157_v17 }
0x1bbf   : > { %11103 = vst [vmem:[%s19578_s23 + $0x70] sm:$0xff] %v11087_v13  ;;  %v10481_v18 = vmin.f32 %v10449_v46, 10000000.0  ;;  %v10421_v55 = vadd.f32 %v10371_v25, %v10165_v58 }
0x1bc0   : > { %v10423_v59 = vadd.f32 %v10375_v50, %v10167_v28 }
0x1bc1   : > { %v10453_v30 = vmax.f32 %v10421_v55, 1e-07 }
0x1bc2   : > { %v10455_v37 = vmax.f32 %v10423_v59, 1e-07 }
0x1bc3   : > { %v10485_v4 = vmin.f32 %v10453_v30, 10000000.0 }
0x1bc4   : > { %v10487_v13 = vmin.f32 %v10455_v37, 10000000.0 }
0x1bd0   : > { %v10539_v41 = vpop.permute.xlu1 %10538 }
0x1bd1   : > { %v10929_v26 = vsel %vm673_vm0, %v10481_v18, %v10539_v41  ;;  %v20996_v18 = vld [vmem:[#allocation69_spill] sm:$0xff] }
0x1bd2   : > { %v10946_v36 = vsel %vm10936_vm7, %v10929_v26, %v20985_v19 }
0x1bd3   : > { %v10963_v23 = vsel %vm10953_vm8, %v10946_v36, %v20986_v40 }
0x1bd4   : > { %v10980_v34 = vsel %vm10970_vm9, %v10963_v23, %v20986_v40  ;;  %v10543_v29 = vpop.permute.xlu1 %10542 }
0x1bd5   : > { %v10997_v2 = vsel %vm10987_vm10, %v10980_v34, %v20987_v61  ;;  %v10931_v47 = vsel %vm673_vm0, %v10483_v32, %v10543_v29 }
0x1bd6   : > { %v11014_v5 = vsel %vm11004_vm11, %v10997_v2, %v20987_v61  ;;  %v10948_v22 = vsel %vm10936_vm7, %v10931_v47, %v20988_v60 }
0x1bd7   : > { %v11031_v12 = vsel %vm11021_vm12, %v11014_v5, %v19341_v39  ;;  %v10965_v56 = vsel %vm10953_vm8, %v10948_v22, %v20989_v35 }
0x1bd8   : > { %v11048_v10 = vsel %vm11038_vm13, %v11031_v12, %v19412_v0  ;;  %v10982_v42 = vsel %vm10970_vm9, %v10965_v56, %v20989_v35 }
0x1bd9   : > { %v11065_v54 = vsel %vm11055_vm14, %v11048_v10, %v19527_v63  ;;  %v10999_v9 = vsel %vm10987_vm10, %v10982_v42, %v20990_v1  ;;  %v10547_v7 = vpop.permute.xlu1 %10546 }
0x1bda   : > { %v11082_v39 = vsel %vm11072_vm15, %v11065_v54, 0.0  ;;  %v11016_v15 = vsel %vm11004_vm11, %v10999_v9, %v20990_v1  ;;  %v10933_v0 = vsel %vm673_vm0, %v10485_v4, %v10547_v7 }
0x1bdb   : > { %11098 = vst [vmem:[%s19578_s23 + $0x48] sm:$0xff] %v11082_v39  ;;  %v11033_v62 = vsel %vm11021_vm12, %v11016_v15, %v19355_v49  ;;  %v10950_v33 = vsel %vm10936_vm7, %v10933_v0, %v20991_v11 }
0x1bdc   : > { %v11050_v63 = vsel %vm11038_vm13, %v11033_v62, %v19420_v8  ;;  %v10967_v20 = vsel %vm10953_vm8, %v10950_v33, %v20992_v45  ;;  %v20994_v8 = vld [vmem:[#allocation153_spill] sm:$0xff] }
0x1bdd   : > { %v11067_v6 = vsel %vm11055_vm14, %v11050_v63, %v19535_v27  ;;  %v10984_v53 = vsel %vm10970_vm9, %v10967_v20, %v20992_v45  ;;  %v10551_v51 = vpop.permute.xlu1 %10550  ;;  %v20995_v27 = vld [vmem:[#allocation9_spill] sm:$0xff] }
0x1bde   : > { %v11084_v49 = vsel %vm11072_vm15, %v11067_v6, 0.0  ;;  %v10935_v14 = vsel %vm673_vm0, %v10487_v13, %v10551_v51  ;;  %v11001_v57 = vsel %vm10987_vm10, %v10984_v53, %v20993_v16 }
0x1bdf   : > { %11100 = vst [vmem:[%s19578_s23 + $0x58] sm:$0xff] %v11084_v49  ;;  %v10952_v43 = vsel %vm10936_vm7, %v10935_v14, %v20994_v8  ;;  %v11018_v21 = vsel %vm11004_vm11, %v11001_v57, %v20993_v16 }
0x1be0   : > { %v10969_v31 = vsel %vm10953_vm8, %v10952_v43, %v20995_v27  ;;  %v11035_v46 = vsel %vm11021_vm12, %v11018_v21, %v19361_v44 }
0x1be1   : > { %v10986_v24 = vsel %vm10970_vm9, %v10969_v31, %v20995_v27  ;;  %v11052_v25 = vsel %vm11038_vm13, %v11035_v46, %v19431_v52  ;;  %v10899_v17 = vpop.permute.xlu1 %10898 }
0x1be2   : > { %v11069_v58 = vsel %vm11055_vm14, %v11052_v25, %v10899_v17  ;;  %v11003_v3 = vsel %vm10987_vm10, %v10986_v24, %v20996_v18 }
0x1be3   : > { %v11086_v41 = vsel %vm11072_vm15, %v11069_v58, 0.0  ;;  %v11020_v55 = vsel %vm11004_vm11, %v11003_v3, %v20996_v18 }
0x1be4   : > { %11102 = vst [vmem:[%s19578_s23 + $0x68] sm:$0xff] %v11086_v41  ;;  %v11037_v44 = vsel %vm11021_vm12, %v11020_v55, %v19372_v48 }
0x1be5   : > { %v11054_v50 = vsel %vm11038_vm13, %v11037_v44, %v19444_v38  ;;  %v10903_v26 = vpop.permute.xlu1 %10902 }
0x1be6   : > { %v11071_v52 = vsel %vm11055_vm14, %v11054_v50, %v10903_v26 }
0x1be7   : > { %v11088_v19 = vsel %vm11072_vm15, %v11071_v52, 0.0 }
0x1be8   : > { %11104 = vst [vmem:[%s19578_s23 + $0x78] sm:$0xff] %v11088_v19 }
0x1be9 PF: > { %s30_s1 = sadd.s32 1, %s14164_s1  }
0x1bea   : > { %p27_p4 = scmp.ge.s32.totalorder %s30_s1, 4  }
0x1bec   :  { %29 = sbr.rel (!%p27_p4) target bundleno = 6 (0x6), region = 148 }

</bundles_post_ra>
